<compile_context>
chip_gen: v7x
topology: tpu7x:2x2x1
jax: 0.10.0
libtpu: 0.0.40
codegen_flags: <defaults>
</compile_context>

<pallas_src>
import functools

import jax
import jax.numpy as jnp
import numpy as np
from jax.experimental import pallas as pl
from jax.experimental.pallas import tpu as pltpu


# ----------------------------------------------------------------------------
# Small helpers
# ----------------------------------------------------------------------------
def _round_up(x, m):
    return ((x + m - 1) // m) * m


def _pick_tm(M, Kp, Np, out_bytes):
    """Row-tile size: as large as possible within a conservative VMEM budget
    (fits v7x's 32 MiB scoped default / 64 MiB physical as well as v5e/v6e),
    while aiming for >= 2 grid steps so both v7x TensorCores get work."""
    budget = 20 * 1024 * 1024
    fixed = 2 * Kp * Np * 2 + Np * 4                 # weight (dbl-buffered) + bias
    per_row = 2 * Kp * 2 + 2 * Np * out_bytes        # A tile + out tile, dbl-buffered
    cap = max(8, ((budget - fixed) // per_row) // 8 * 8)
    if M <= 8:
        return _round_up(max(M, 1), 8)
    tm = min(1024, _round_up((M + 1) // 2, 8), cap)
    return max(8, tm)


# ----------------------------------------------------------------------------
# Pallas kernels
# ----------------------------------------------------------------------------
def _mm_bias_act_kernel(a_ref, w_ref, b_ref, o_ref, *, act):
    """One row-tile of: out = act(A @ W + b).  A/W are bf16, accumulate f32."""
    acc = jnp.dot(a_ref[...], w_ref[...], preferred_element_type=jnp.float32)
    acc = acc + b_ref[...]                                  # (tm, N) + (1, N)
    if act == "relu":
        acc = jnp.maximum(acc, 0.0)
    elif act == "sigmoid":
        # exp on EUP + approximate reciprocal (EUP) keeps the divide off the VALU
        acc = pl.reciprocal(1.0 + jnp.exp(-acc), approx=True)
    o_ref[...] = acc.astype(o_ref.dtype)


def _bottleneck_kernel(h4_ref, eps_ref, we5_ref, be5_ref, we6_ref, be6_ref,
                       wd1_ref, bd1_ref, wd2_ref, bd2_ref,
                       z_ref, rho_ref, logs_ref, o_ref, *, z_dim):
    """Fused: e5 conv (== linear 1024->256)+relu -> enc head -> (mu, rho, logs)
    -> reparameterize -> d1 linear+relu -> d2 (1x1 transposed conv == linear)
    + relu.  All M=batch matmuls in one call (launch-latency bound)."""
    # e5: 4x4 valid conv on the 4x4 map == linear over flattened (kh, kw, ci)
    h = jnp.dot(h4_ref[...], we5_ref[...],
                preferred_element_type=jnp.float32) + be5_ref[...]
    h = jnp.maximum(h, 0.0)

    # encoder head: enc = h @ We6 + be6   (columns: [mu(0:z), rho(z), logs(z+1)])
    enc = jnp.dot(h.astype(jnp.bfloat16), we6_ref[...],
                  preferred_element_type=jnp.float32) + be6_ref[...]
    mu = enc[:, :z_dim]
    rho = jnp.tanh(enc[:, z_dim:z_dim + 1])
    logs = enc[:, z_dim + 1:z_dim + 2]

    # reparameterize: z = mu + cumsum(eps, axis=1) * exp(0.5*logs)
    # cumulative sum via an upper-triangular matmul (z_dim x z_dim, tiny).
    row = jax.lax.broadcasted_iota(jnp.int32, (z_dim, z_dim), 0)
    col = jax.lax.broadcasted_iota(jnp.int32, (z_dim, z_dim), 1)
    tri = (row <= col).astype(jnp.float32)
    csum = jnp.dot(eps_ref[...], tri, preferred_element_type=jnp.float32)
    z = mu + csum * jnp.exp(0.5 * logs)

    z_ref[...] = z
    rho_ref[...] = rho
    logs_ref[...] = logs

    # decoder head: relu(z @ Wd1 + bd1) then relu(. @ Wd2 + bd2)
    h1 = jnp.dot(z.astype(jnp.bfloat16), wd1_ref[...],
                 preferred_element_type=jnp.float32) + bd1_ref[...]
    h1 = jnp.maximum(h1, 0.0)
    h2 = jnp.dot(h1.astype(jnp.bfloat16), wd2_ref[...],
                 preferred_element_type=jnp.float32) + bd2_ref[...]
    h2 = jnp.maximum(h2, 0.0)
    o_ref[...] = h2.astype(o_ref.dtype)


# ----------------------------------------------------------------------------
# Pallas call wrappers
# ----------------------------------------------------------------------------
def _matmul_bias_act(a, w_pad, b_pad, *, act, out_dtype, n_valid=None):
    """act(a @ w_pad + b_pad) with a:(M,K) (K <= Kp), w_pad:(Kp,Np) bf16,
    b_pad:(1,Np) f32.  Tiled over rows, lane-dense (Np multiple of 128)."""
    M, K = a.shape
    Kp, Np = w_pad.shape
    a = a.astype(jnp.bfloat16)
    if Kp != K:
        a = jnp.pad(a, ((0, 0), (0, Kp - K)))
    tm = _pick_tm(M, Kp, Np, jnp.dtype(out_dtype).itemsize)
    m_pad = _round_up(M, tm)
    if m_pad != M:
        a = jnp.pad(a, ((0, m_pad - M), (0, 0)))

    out = pl.pallas_call(
        functools.partial(_mm_bias_act_kernel, act=act),
        out_shape=jax.ShapeDtypeStruct((m_pad, Np), out_dtype),
        grid=(m_pad // tm,),
        in_specs=[
            pl.BlockSpec((tm, Kp), lambda i: (i, 0)),   # row tile of A
            pl.BlockSpec((Kp, Np), lambda i: (0, 0)),   # full (padded) weight
            pl.BlockSpec((1, Np), lambda i: (0, 0)),    # bias row
        ],
        out_specs=pl.BlockSpec((tm, Np), lambda i: (i, 0)),
        compiler_params=pltpu.CompilerParams(dimension_semantics=("parallel",)),
    )(a, w_pad, b_pad)

    out = out[:M]
    if n_valid is not None and n_valid != Np:
        out = out[:, :n_valid]
    return out


def _im2col_nhwc(x, ksize, stride, pad):
    """x: (B, H, W, C) -> (B*OH*OW, ksize*ksize*C); column order (kh, kw, c)."""
    B, H, W, C = x.shape
    if pad:
        x = jnp.pad(x, ((0, 0), (pad, pad), (pad, pad), (0, 0)))
    Hp, Wp = H + 2 * pad, W + 2 * pad
    OH = (Hp - ksize) // stride + 1
    OW = (Wp - ksize) // stride + 1
    cols = []
    for kh in range(ksize):
        for kw in range(ksize):
            cols.append(x[:, kh:kh + stride * OH:stride,
                          kw:kw + stride * OW:stride, :])
    p = jnp.concatenate(cols, axis=-1)            # (B, OH, OW, k*k*C)
    return p.reshape(B * OH * OW, ksize * ksize * C), OH, OW


def conv2d_nhwc(x, w_pad, b_pad, ksize, stride, pad, n_out, act,
                out_dtype=jnp.bfloat16):
    """x: (B,H,W,Cin) NHWC -> (B,OH,OW,n_out) via im2col + fused matmul."""
    B = x.shape[0]
    patches, OH, OW = _im2col_nhwc(x, ksize, stride, pad)
    out = _matmul_bias_act(patches, w_pad, b_pad, act=act,
                           out_dtype=out_dtype, n_valid=n_out)
    return out.reshape(B, OH, OW, n_out)


def conv_transpose2d_s2_nhwc(x, w_pad, b_pad, n_out, act,
                             out_dtype=jnp.bfloat16):
    """ConvTranspose2d(k=4, stride=2, pad=1) via 2x2 output-phase decomposition:
    one 3x3/stride-1 im2col + one matmul with phase-packed weights, then
    interleave the 4 phases -> (B, 2H, 2W, n_out)."""
    B, H, W, _ = x.shape
    cout_pad = w_pad.shape[1] // 4
    patches, _, _ = _im2col_nhwc(x, 3, 1, 1)
    out = _matmul_bias_act(patches, w_pad, b_pad, act=act, out_dtype=out_dtype)
    out = out.reshape(B, H, W, 2, 2, cout_pad)              # (.., r, c, co)
    out = out.transpose(0, 1, 3, 2, 4, 5).reshape(B, 2 * H, 2 * W, cout_pad)
    return out[..., :n_out]


def _bottleneck(h4, eps, prep, z_dim):
    """h4: (B, 1024) flattened NHWC output of e4 (row order (kh, kw, ci))."""
    we5, be5 = prep["e5"]
    we6, be6 = prep["e6"]
    wd1, bd1 = prep["d1"]
    wd2, bd2 = prep["d2"]
    B = h4.shape[0]
    return pl.pallas_call(
        functools.partial(_bottleneck_kernel, z_dim=z_dim),
        out_shape=(jax.ShapeDtypeStruct((B, z_dim), jnp.float32),
                   jax.ShapeDtypeStruct((B, 1), jnp.float32),
                   jax.ShapeDtypeStruct((B, 1), jnp.float32),
                   jax.ShapeDtypeStruct((B, wd2.shape[1]), jnp.bfloat16)),
    )(h4.astype(jnp.bfloat16), eps.astype(jnp.float32),
      we5, be5, we6, be6, wd1, bd1, wd2, bd2)


# ----------------------------------------------------------------------------
# Parameter init (PyTorch layout) and one-time prep into matmul-ready form
# ----------------------------------------------------------------------------
def _init_conv(key, cout, cin, k):
    fan_in = cin * k * k
    bound = 1.0 / np.sqrt(fan_in)
    kw, kb = jax.random.split(key)
    return (jax.random.uniform(kw, (cout, cin, k, k), jnp.float32, -bound, bound),
            jax.random.uniform(kb, (cout,), jnp.float32, -bound, bound))


def _init_convt(key, cin, cout, k):
    fan_in = cout * k * k
    bound = 1.0 / np.sqrt(fan_in)
    kw, kb = jax.random.split(key)
    return (jax.random.uniform(kw, (cin, cout, k, k), jnp.float32, -bound, bound),
            jax.random.uniform(kb, (cout,), jnp.float32, -bound, bound))


def _init_linear(key, nout, nin):
    bound = 1.0 / np.sqrt(nin)
    kw, kb = jax.random.split(key)
    return (jax.random.uniform(kw, (nout, nin), jnp.float32, -bound, bound),
            jax.random.uniform(kb, (nout,), jnp.float32, -bound, bound))


def init_params(key, input_channels, z_dim):
    ks = jax.random.split(key, 12)
    p = {}
    p["e1"] = _init_conv(ks[0], 32, input_channels, 4)
    p["e2"] = _init_conv(ks[1], 32, 32, 4)
    p["e3"] = _init_conv(ks[2], 64, 32, 4)
    p["e4"] = _init_conv(ks[3], 64, 64, 4)
    p["e5"] = _init_conv(ks[4], 256, 64, 4)
    p["e6"] = _init_linear(ks[5], z_dim + 2, 256)
    p["d1"] = _init_linear(ks[6], 256, z_dim)
    p["d2"] = _init_convt(ks[7], 256, 64, 4)
    p["d3"] = _init_convt(ks[8], 64, 64, 4)
    p["d4"] = _init_convt(ks[9], 64, 32, 4)
    p["d5"] = _init_convt(ks[10], 32, 32, 4)
    p["d6"] = _init_convt(ks[11], 32, input_channels, 4)
    return p


def _prep_matmul(Wm, b):
    """Pad (K,N) weight matrix / N bias to lane-dense (multiples of 128), bf16/f32."""
    K, N = Wm.shape
    Kp, Np = _round_up(K, 128), _round_up(N, 128)
    w = jnp.pad(Wm.astype(jnp.bfloat16), ((0, Kp - K), (0, Np - N)))
    bias = jnp.pad(b.astype(jnp.float32), (0, Np - N)).reshape(1, Np)
    return w, bias


def _convt_s2_weight(W, cout_pad):
    """(Cin, Cout, 4, 4) ConvTranspose2d(stride=2, pad=1) weight -> phase-packed
    (9*Cin, 4*cout_pad) matrix for a 3x3/stride-1 im2col of the 1-padded input.
    Rows ordered (dy, dx, ci); columns ordered (r, c, co)."""
    cin, cout = W.shape[0], W.shape[1]
    taps = {0: ((0, 3), (1, 1)),   # output phase r=0: (dy, kh) pairs
            1: ((1, 2), (2, 0))}   # output phase r=1
    G = jnp.zeros((3, 3, cin, 2, 2, cout_pad), W.dtype)
    for r in (0, 1):
        for c in (0, 1):
            for dy, kh in taps[r]:
                for dx, kw in taps[c]:
                    G = G.at[dy, dx, :, r, c, :cout].set(W[:, :, kh, kw])
    return G.reshape(9 * cin, 4 * cout_pad)


def prepare_params(params):
    """One-time (outside jit) conversion of PyTorch-layout params into padded
    bf16 matmul weights + f32 bias rows."""
    P = {}
    # encoder convs: (Cout, Cin, K, K) -> (K*K*Cin, Cout), rows ordered (kh,kw,ci)
    for name in ("e1", "e2", "e3", "e4", "e5"):
        W, b = params[name]
        Cout, Cin, K, _ = W.shape
        Wm = W.transpose(2, 3, 1, 0).reshape(K * K * Cin, Cout)
        P[name] = _prep_matmul(Wm, b)
    # encoder head linear 256 -> z_dim + 2
    W, b = params["e6"]
    P["e6"] = _prep_matmul(W.T, b)
    # decoder head linear z_dim -> 256 (used inside the fused bottleneck kernel)
    W, b = params["d1"]
    P["d1"] = (W.T.astype(jnp.bfloat16), b.astype(jnp.float32).reshape(1, -1))
    # d2: ConvTranspose2d(256, 64, 4) on a 1x1 input == linear 256 -> 4*4*64,
    # columns ordered (kh, kw, co) so the output reshapes straight to NHWC.
    W, b = params["d2"]
    Cin, Cout, K, _ = W.shape
    Wm = W.transpose(0, 2, 3, 1).reshape(Cin, K * K * Cout)
    P["d2"] = (Wm.astype(jnp.bfloat16),
               jnp.tile(b, K * K).astype(jnp.float32).reshape(1, -1))
    # stride-2 transposed convs: phase-packed weights; pad Cout per phase to a
    # multiple of 32 so the 4*Cout output stays a multiple of 128 (lane-dense).
    for name in ("d3", "d4", "d5", "d6"):
        W, b = params[name]
        Cout = W.shape[1]
        cout_pad = _round_up(Cout, 32)
        G = _convt_s2_weight(W, cout_pad)
        bias = jnp.tile(jnp.pad(b, (0, cout_pad - Cout)), 4)
        P[name] = _prep_matmul(G, bias)
    return P


# ----------------------------------------------------------------------------
# Forward pass
# ----------------------------------------------------------------------------
# e5 (4x4 valid conv down to 1x1) is fused into the bottleneck kernel.
_ENCODER_CONVS = (("e1", 4, 2, 1, 32),
                  ("e2", 4, 2, 1, 32),
                  ("e3", 4, 2, 1, 64),
                  ("e4", 4, 2, 1, 64))
_DECODER_CONVTS = (("d3", 64), ("d4", 32), ("d5", 32))


def rho_betavae_forward(prep, x, eps, *, z_dim, input_channels):
    B = x.shape[0]
    # NCHW -> NHWC once, activations in bf16 end-to-end.
    h = jnp.transpose(x, (0, 2, 3, 1)).astype(jnp.bfloat16)
    for name, k, s, p, cout in _ENCODER_CONVS:
        h = conv2d_nhwc(h, *prep[name], k, s, p, cout, act="relu")
    # e4 output is (B, 4, 4, 64); e5's 4x4 valid-conv im2col is just a flatten
    # (row order (kh, kw, ci) matches the e5 weight row order).
    h4 = h.reshape(B, -1)                                     # (B, 1024)

    # fused: e5 linear+relu -> enc head -> tanh/rho -> reparameterize -> d1 -> d2
    z, rho, logs, d = _bottleneck(h4, eps, prep, z_dim)
    d = d.reshape(B, 4, 4, -1)                                # (B, 4, 4, 64) NHWC

    for name, cout in _DECODER_CONVTS:
        d = conv_transpose2d_s2_nhwc(d, *prep[name], cout, act="relu")
    xh = conv_transpose2d_s2_nhwc(d, *prep["d6"], input_channels,
                                  act="sigmoid", out_dtype=jnp.float32)
    x_hat = jnp.transpose(xh, (0, 3, 1, 2))                   # back to NCHW
    return x_hat, z, rho, logs


# ----------------------------------------------------------------------------
# Main
# ----------------------------------------------------------------------------
if __name__ == "__main__":
    INPUT_CHANNELS = 3
    Z_DIM = 8
    BATCH = 2
    # The architecture (4 stride-2 convs + one 4x4 valid conv down to 1x1)
    # requires 64x64 input.
    H = W = 64

    key = jax.random.PRNGKey(0)
    k_params, k_x, k_eps = jax.random.split(key, 3)

    params = init_params(k_params, INPUT_CHANNELS, Z_DIM)
    prep = prepare_params(params)          # one-time, outside jit

    x = jax.random.uniform(k_x, (BATCH, INPUT_CHANNELS, H, W), jnp.float32)
    # torch.randn_like draws inside reparameterize -> passed explicitly as eps.
    eps = jax.random.normal(k_eps, (BATCH, Z_DIM), jnp.float32)

    fwd = jax.jit(functools.partial(rho_betavae_forward,
                                    z_dim=Z_DIM, input_channels=INPUT_CHANNELS))
    x_hat, z, rho, logs = fwd(prep, x, eps)
    jax.block_until_ready((x_hat, z, rho, logs))

    assert x_hat.shape == (BATCH, INPUT_CHANNELS, H, W)
    assert z.shape == (BATCH, Z_DIM)
    assert rho.shape == (BATCH, 1)
    assert logs.shape == (BATCH, 1)
    assert bool(jnp.all(jnp.isfinite(x_hat)))
    print("KERNEL_OK")
</pallas_src>

<mosaic_0001>
module attributes {stable_mosaic.version = 11 : i64} {
  func.func @_mm_bias_act_kernel(%arg0: i32, %arg1: memref<1024x128xbf16, #tpu.memory_space<vmem>>, %arg2: memref<128x128xbf16, #tpu.memory_space<vmem>>, %arg3: memref<1x128xf32, #tpu.memory_space<vmem>>, %arg4: memref<1024x128xbf16, #tpu.memory_space<vmem>>) attributes {dimension_semantics = [#tpu.dimension_semantics<parallel>], iteration_bounds = array<i64: 2>, scalar_prefetch = 0 : i64, scratch_operands = 0 : i64, tpu.core_type = #tpu.core_type<tc>, window_params = [{transform_indices = @transform_0, window_bounds = array<i64: 1024, 128>}, {pipeline_mode = #tpu.pipeline_mode<synchronous>, transform_indices = @transform_1, window_bounds = array<i64: 128, 128>}, {pipeline_mode = #tpu.pipeline_mode<synchronous>, transform_indices = @transform_2, window_bounds = array<i64: 1, 128>}, {transform_indices = @transform_3, window_bounds = array<i64: 1024, 128>}]} {
    %c0 = arith.constant 0 : index
    %c0_0 = arith.constant 0 : index
    %0 = vector.load %arg1[%c0, %c0_0] : memref<1024x128xbf16, #tpu.memory_space<vmem>>, vector<1024x128xbf16>
    %c0_1 = arith.constant 0 : index
    %c0_2 = arith.constant 0 : index
    %1 = vector.load %arg2[%c0_1, %c0_2] : memref<128x128xbf16, #tpu.memory_space<vmem>>, vector<128x128xbf16>
    %cst = arith.constant dense<0.000000e+00> : vector<1024x128xf32>
    %2 = tpu.matmul %0, %1, %cst {dimension_numbers = #tpu.dot_dimension_numbers<[1], [0], [0], [1], [0, 0, 1, 1], [], []>} : vector<1024x128xbf16>, vector<128x128xbf16>, vector<1024x128xf32> -> vector<1024x128xf32>
    %c0_3 = arith.constant 0 : index
    %c0_4 = arith.constant 0 : index
    %3 = vector.load %arg3[%c0_3, %c0_4] : memref<1x128xf32, #tpu.memory_space<vmem>>, vector<1x128xf32>
    %4 = vector.broadcast %3 : vector<1x128xf32> to vector<1024x128xf32>
    %5 = arith.addf %2, %4 : vector<1024x128xf32>
    %cst_5 = arith.constant 0.000000e+00 : f32
    %6 = vector.broadcast %cst_5 : f32 to vector<1024x128xf32>
    %7 = arith.maximumf %5, %6 : vector<1024x128xf32>
    %8 = arith.truncf %7 : vector<1024x128xf32> to vector<1024x128xbf16>
    %c0_6 = arith.constant 0 : index
    %c0_7 = arith.constant 0 : index
    %9 = vector.load %arg4[%c0_6, %c0_7] : memref<1024x128xbf16, #tpu.memory_space<vmem>>, vector<1024x128xbf16>
    tpu.vector_store %arg4[%c0_6, %c0_7], %8 {strides = array<i32>} : memref<1024x128xbf16, #tpu.memory_space<vmem>>, vector<1024x128xbf16>,
    return
  }
  func.func @transform_0(%arg0: i32) -> (i32, i32) {
    %c0_i32 = arith.constant 0 : i32
    %c0_i32_0 = arith.constant 0 : i32
    return %arg0, %c0_i32 : i32, i32
  }
  func.func @transform_1(%arg0: i32) -> (i32, i32) {
    %c0_i32 = arith.constant 0 : i32
    %c0_i32_0 = arith.constant 0 : i32
    %c0_i32_1 = arith.constant 0 : i32
    return %c0_i32, %c0_i32_0 : i32, i32
  }
  func.func @transform_2(%arg0: i32) -> (i32, i32) {
    %c0_i32 = arith.constant 0 : i32
    %c0_i32_0 = arith.constant 0 : i32
    %c0_i32_1 = arith.constant 0 : i32
    return %c0_i32, %c0_i32_0 : i32, i32
  }
  func.func @transform_3(%arg0: i32) -> (i32, i32) {
    %c0_i32 = arith.constant 0 : i32
    %c0_i32_0 = arith.constant 0 : i32
    return %arg0, %c0_i32 : i32, i32
  }
}

module attributes {stable_mosaic.version = 11 : i64} {
  func.func @_mm_bias_act_kernel(%arg0: i32, %arg1: memref<256x512xbf16, #tpu.memory_space<vmem>>, %arg2: memref<512x128xbf16, #tpu.memory_space<vmem>>, %arg3: memref<1x128xf32, #tpu.memory_space<vmem>>, %arg4: memref<256x128xbf16, #tpu.memory_space<vmem>>) attributes {dimension_semantics = [#tpu.dimension_semantics<parallel>], iteration_bounds = array<i64: 2>, scalar_prefetch = 0 : i64, scratch_operands = 0 : i64, tpu.core_type = #tpu.core_type<tc>, window_params = [{transform_indices = @transform_0, window_bounds = array<i64: 256, 512>}, {pipeline_mode = #tpu.pipeline_mode<synchronous>, transform_indices = @transform_1, window_bounds = array<i64: 512, 128>}, {pipeline_mode = #tpu.pipeline_mode<synchronous>, transform_indices = @transform_2, window_bounds = array<i64: 1, 128>}, {transform_indices = @transform_3, window_bounds = array<i64: 256, 128>}]} {
    %c0 = arith.constant 0 : index
    %c0_0 = arith.constant 0 : index
    %0 = vector.load %arg1[%c0, %c0_0] : memref<256x512xbf16, #tpu.memory_space<vmem>>, vector<256x512xbf16>
    %c0_1 = arith.constant 0 : index
    %c0_2 = arith.constant 0 : index
    %1 = vector.load %arg2[%c0_1, %c0_2] : memref<512x128xbf16, #tpu.memory_space<vmem>>, vector<512x128xbf16>
    %cst = arith.constant dense<0.000000e+00> : vector<256x128xf32>
    %2 = tpu.matmul %0, %1, %cst {dimension_numbers = #tpu.dot_dimension_numbers<[1], [0], [0], [1], [0, 0, 1, 1], [], []>} : vector<256x512xbf16>, vector<512x128xbf16>, vector<256x128xf32> -> vector<256x128xf32>
    %c0_3 = arith.constant 0 : index
    %c0_4 = arith.constant 0 : index
    %3 = vector.load %arg3[%c0_3, %c0_4] : memref<1x128xf32, #tpu.memory_space<vmem>>, vector<1x128xf32>
    %4 = vector.broadcast %3 : vector<1x128xf32> to vector<256x128xf32>
    %5 = arith.addf %2, %4 : vector<256x128xf32>
    %cst_5 = arith.constant 0.000000e+00 : f32
    %6 = vector.broadcast %cst_5 : f32 to vector<256x128xf32>
    %7 = arith.maximumf %5, %6 : vector<256x128xf32>
    %8 = arith.truncf %7 : vector<256x128xf32> to vector<256x128xbf16>
    %c0_6 = arith.constant 0 : index
    %c0_7 = arith.constant 0 : index
    %9 = vector.load %arg4[%c0_6, %c0_7] : memref<256x128xbf16, #tpu.memory_space<vmem>>, vector<256x128xbf16>
    tpu.vector_store %arg4[%c0_6, %c0_7], %8 {strides = array<i32>} : memref<256x128xbf16, #tpu.memory_space<vmem>>, vector<256x128xbf16>,
    return
  }
  func.func @transform_0(%arg0: i32) -> (i32, i32) {
    %c0_i32 = arith.constant 0 : i32
    %c0_i32_0 = arith.constant 0 : i32
    return %arg0, %c0_i32 : i32, i32
  }
  func.func @transform_1(%arg0: i32) -> (i32, i32) {
    %c0_i32 = arith.constant 0 : i32
    %c0_i32_0 = arith.constant 0 : i32
    %c0_i32_1 = arith.constant 0 : i32
    return %c0_i32, %c0_i32_0 : i32, i32
  }
  func.func @transform_2(%arg0: i32) -> (i32, i32) {
    %c0_i32 = arith.constant 0 : i32
    %c0_i32_0 = arith.constant 0 : i32
    %c0_i32_1 = arith.constant 0 : i32
    return %c0_i32, %c0_i32_0 : i32, i32
  }
  func.func @transform_3(%arg0: i32) -> (i32, i32) {
    %c0_i32 = arith.constant 0 : i32
    %c0_i32_0 = arith.constant 0 : i32
    return %arg0, %c0_i32 : i32, i32
  }
}

module attributes {stable_mosaic.version = 11 : i64} {
  func.func @_mm_bias_act_kernel(%arg0: i32, %arg1: memref<64x512xbf16, #tpu.memory_space<vmem>>, %arg2: memref<512x128xbf16, #tpu.memory_space<vmem>>, %arg3: memref<1x128xf32, #tpu.memory_space<vmem>>, %arg4: memref<64x128xbf16, #tpu.memory_space<vmem>>) attributes {dimension_semantics = [#tpu.dimension_semantics<parallel>], iteration_bounds = array<i64: 2>, scalar_prefetch = 0 : i64, scratch_operands = 0 : i64, tpu.core_type = #tpu.core_type<tc>, window_params = [{transform_indices = @transform_0, window_bounds = array<i64: 64, 512>}, {pipeline_mode = #tpu.pipeline_mode<synchronous>, transform_indices = @transform_1, window_bounds = array<i64: 512, 128>}, {pipeline_mode = #tpu.pipeline_mode<synchronous>, transform_indices = @transform_2, window_bounds = array<i64: 1, 128>}, {transform_indices = @transform_3, window_bounds = array<i64: 64, 128>}]} {
    %c0 = arith.constant 0 : index
    %c0_0 = arith.constant 0 : index
    %0 = vector.load %arg1[%c0, %c0_0] : memref<64x512xbf16, #tpu.memory_space<vmem>>, vector<64x512xbf16>
    %c0_1 = arith.constant 0 : index
    %c0_2 = arith.constant 0 : index
    %1 = vector.load %arg2[%c0_1, %c0_2] : memref<512x128xbf16, #tpu.memory_space<vmem>>, vector<512x128xbf16>
    %cst = arith.constant dense<0.000000e+00> : vector<64x128xf32>
    %2 = tpu.matmul %0, %1, %cst {dimension_numbers = #tpu.dot_dimension_numbers<[1], [0], [0], [1], [0, 0, 1, 1], [], []>} : vector<64x512xbf16>, vector<512x128xbf16>, vector<64x128xf32> -> vector<64x128xf32>
    %c0_3 = arith.constant 0 : index
    %c0_4 = arith.constant 0 : index
    %3 = vector.load %arg3[%c0_3, %c0_4] : memref<1x128xf32, #tpu.memory_space<vmem>>, vector<1x128xf32>
    %4 = vector.broadcast %3 : vector<1x128xf32> to vector<64x128xf32>
    %5 = arith.addf %2, %4 : vector<64x128xf32>
    %cst_5 = arith.constant 0.000000e+00 : f32
    %6 = vector.broadcast %cst_5 : f32 to vector<64x128xf32>
    %7 = arith.maximumf %5, %6 : vector<64x128xf32>
    %8 = arith.truncf %7 : vector<64x128xf32> to vector<64x128xbf16>
    %c0_6 = arith.constant 0 : index
    %c0_7 = arith.constant 0 : index
    %9 = vector.load %arg4[%c0_6, %c0_7] : memref<64x128xbf16, #tpu.memory_space<vmem>>, vector<64x128xbf16>
    tpu.vector_store %arg4[%c0_6, %c0_7], %8 {strides = array<i32>} : memref<64x128xbf16, #tpu.memory_space<vmem>>, vector<64x128xbf16>,
    return
  }
  func.func @transform_0(%arg0: i32) -> (i32, i32) {
    %c0_i32 = arith.constant 0 : i32
    %c0_i32_0 = arith.constant 0 : i32
    return %arg0, %c0_i32 : i32, i32
  }
  func.func @transform_1(%arg0: i32) -> (i32, i32) {
    %c0_i32 = arith.constant 0 : i32
    %c0_i32_0 = arith.constant 0 : i32
    %c0_i32_1 = arith.constant 0 : i32
    return %c0_i32, %c0_i32_0 : i32, i32
  }
  func.func @transform_2(%arg0: i32) -> (i32, i32) {
    %c0_i32 = arith.constant 0 : i32
    %c0_i32_0 = arith.constant 0 : i32
    %c0_i32_1 = arith.constant 0 : i32
    return %c0_i32, %c0_i32_0 : i32, i32
  }
  func.func @transform_3(%arg0: i32) -> (i32, i32) {
    %c0_i32 = arith.constant 0 : i32
    %c0_i32_0 = arith.constant 0 : i32
    return %arg0, %c0_i32 : i32, i32
  }
}

module attributes {stable_mosaic.version = 11 : i64} {
  func.func @_mm_bias_act_kernel(%arg0: i32, %arg1: memref<16x1024xbf16, #tpu.memory_space<vmem>>, %arg2: memref<1024x128xbf16, #tpu.memory_space<vmem>>, %arg3: memref<1x128xf32, #tpu.memory_space<vmem>>, %arg4: memref<16x128xbf16, #tpu.memory_space<vmem>>) attributes {dimension_semantics = [#tpu.dimension_semantics<parallel>], iteration_bounds = array<i64: 2>, scalar_prefetch = 0 : i64, scratch_operands = 0 : i64, tpu.core_type = #tpu.core_type<tc>, window_params = [{transform_indices = @transform_0, window_bounds = array<i64: 16, 1024>}, {pipeline_mode = #tpu.pipeline_mode<synchronous>, transform_indices = @transform_1, window_bounds = array<i64: 1024, 128>}, {pipeline_mode = #tpu.pipeline_mode<synchronous>, transform_indices = @transform_2, window_bounds = array<i64: 1, 128>}, {transform_indices = @transform_3, window_bounds = array<i64: 16, 128>}]} {
    %c0 = arith.constant 0 : index
    %c0_0 = arith.constant 0 : index
    %0 = vector.load %arg1[%c0, %c0_0] : memref<16x1024xbf16, #tpu.memory_space<vmem>>, vector<16x1024xbf16>
    %c0_1 = arith.constant 0 : index
    %c0_2 = arith.constant 0 : index
    %1 = vector.load %arg2[%c0_1, %c0_2] : memref<1024x128xbf16, #tpu.memory_space<vmem>>, vector<1024x128xbf16>
    %cst = arith.constant dense<0.000000e+00> : vector<16x128xf32>
    %2 = tpu.matmul %0, %1, %cst {dimension_numbers = #tpu.dot_dimension_numbers<[1], [0], [0], [1], [0, 0, 1, 1], [], []>} : vector<16x1024xbf16>, vector<1024x128xbf16>, vector<16x128xf32> -> vector<16x128xf32>
    %c0_3 = arith.constant 0 : index
    %c0_4 = arith.constant 0 : index
    %3 = vector.load %arg3[%c0_3, %c0_4] : memref<1x128xf32, #tpu.memory_space<vmem>>, vector<1x128xf32>
    %4 = vector.broadcast %3 : vector<1x128xf32> to vector<16x128xf32>
    %5 = arith.addf %2, %4 : vector<16x128xf32>
    %cst_5 = arith.constant 0.000000e+00 : f32
    %6 = vector.broadcast %cst_5 : f32 to vector<16x128xf32>
    %7 = arith.maximumf %5, %6 : vector<16x128xf32>
    %8 = arith.truncf %7 : vector<16x128xf32> to vector<16x128xbf16>
    %c0_6 = arith.constant 0 : index
    %c0_7 = arith.constant 0 : index
    %9 = vector.load %arg4[%c0_6, %c0_7] : memref<16x128xbf16, #tpu.memory_space<vmem>>, vector<16x128xbf16>
    tpu.vector_store %arg4[%c0_6, %c0_7], %8 {strides = array<i32>} : memref<16x128xbf16, #tpu.memory_space<vmem>>, vector<16x128xbf16>,
    return
  }
  func.func @transform_0(%arg0: i32) -> (i32, i32) {
    %c0_i32 = arith.constant 0 : i32
    %c0_i32_0 = arith.constant 0 : i32
    return %arg0, %c0_i32 : i32, i32
  }
  func.func @transform_1(%arg0: i32) -> (i32, i32) {
    %c0_i32 = arith.constant 0 : i32
    %c0_i32_0 = arith.constant 0 : i32
    %c0_i32_1 = arith.constant 0 : i32
    return %c0_i32, %c0_i32_0 : i32, i32
  }
  func.func @transform_2(%arg0: i32) -> (i32, i32) {
    %c0_i32 = arith.constant 0 : i32
    %c0_i32_0 = arith.constant 0 : i32
    %c0_i32_1 = arith.constant 0 : i32
    return %c0_i32, %c0_i32_0 : i32, i32
  }
  func.func @transform_3(%arg0: i32) -> (i32, i32) {
    %c0_i32 = arith.constant 0 : i32
    %c0_i32_0 = arith.constant 0 : i32
    return %arg0, %c0_i32 : i32, i32
  }
}

module attributes {stable_mosaic.version = 11 : i64} {
  func.func @_bottleneck_kernel(%arg0: memref<2x1024xbf16, #tpu.memory_space<vmem>>, %arg1: memref<2x8xf32, #tpu.memory_space<vmem>>, %arg2: memref<1024x256xbf16, #tpu.memory_space<vmem>>, %arg3: memref<1x256xf32, #tpu.memory_space<vmem>>, %arg4: memref<256x128xbf16, #tpu.memory_space<vmem>>, %arg5: memref<1x128xf32, #tpu.memory_space<vmem>>, %arg6: memref<8x256xbf16, #tpu.memory_space<vmem>>, %arg7: memref<1x256xf32, #tpu.memory_space<vmem>>, %arg8: memref<256x1024xbf16, #tpu.memory_space<vmem>>, %arg9: memref<1x1024xf32, #tpu.memory_space<vmem>>, %arg10: memref<2x8xf32, #tpu.memory_space<vmem>>, %arg11: memref<2x1xf32, #tpu.memory_space<vmem>>, %arg12: memref<2x1xf32, #tpu.memory_space<vmem>>, %arg13: memref<2x1024xbf16, #tpu.memory_space<vmem>>) attributes {dimension_semantics = [], scalar_prefetch = 0 : i64, scratch_operands = 0 : i64, tpu.core_type = #tpu.core_type<tc>} {
    %c0 = arith.constant 0 : index
    %c0_0 = arith.constant 0 : index
    %0 = vector.load %arg0[%c0, %c0_0] : memref<2x1024xbf16, #tpu.memory_space<vmem>>, vector<2x1024xbf16>
    %c0_1 = arith.constant 0 : index
    %c0_2 = arith.constant 0 : index
    %1 = vector.load %arg2[%c0_1, %c0_2] : memref<1024x256xbf16, #tpu.memory_space<vmem>>, vector<1024x256xbf16>
    %cst = arith.constant dense<0.000000e+00> : vector<2x256xf32>
    %2 = tpu.matmul %0, %1, %cst {dimension_numbers = #tpu.dot_dimension_numbers<[1], [0], [0], [1], [0, 0, 1, 1], [], []>} : vector<2x1024xbf16>, vector<1024x256xbf16>, vector<2x256xf32> -> vector<2x256xf32>
    %c0_3 = arith.constant 0 : index
    %c0_4 = arith.constant 0 : index
    %3 = vector.load %arg3[%c0_3, %c0_4] : memref<1x256xf32, #tpu.memory_space<vmem>>, vector<1x256xf32>
    %4 = vector.broadcast %3 : vector<1x256xf32> to vector<2x256xf32>
    %5 = arith.addf %2, %4 : vector<2x256xf32>
    %cst_5 = arith.constant 0.000000e+00 : f32
    %6 = vector.broadcast %cst_5 : f32 to vector<2x256xf32>
    %7 = arith.maximumf %5, %6 : vector<2x256xf32>
    %8 = arith.truncf %7 : vector<2x256xf32> to vector<2x256xbf16>
    %c0_6 = arith.constant 0 : index
    %c0_7 = arith.constant 0 : index
    %9 = vector.load %arg4[%c0_6, %c0_7] : memref<256x128xbf16, #tpu.memory_space<vmem>>, vector<256x128xbf16>
    %cst_8 = arith.constant dense<0.000000e+00> : vector<2x128xf32>
    %10 = tpu.matmul %8, %9, %cst_8 {dimension_numbers = #tpu.dot_dimension_numbers<[1], [0], [0], [1], [0, 0, 1, 1], [], []>} : vector<2x256xbf16>, vector<256x128xbf16>, vector<2x128xf32> -> vector<2x128xf32>
    %c0_9 = arith.constant 0 : index
    %c0_10 = arith.constant 0 : index
    %11 = vector.load %arg5[%c0_9, %c0_10] : memref<1x128xf32, #tpu.memory_space<vmem>>, vector<1x128xf32>
    %12 = vector.broadcast %11 : vector<1x128xf32> to vector<2x128xf32>
    %13 = arith.addf %10, %12 : vector<2x128xf32>
    %14 = vector.extract_strided_slice %13 {offsets = [0, 0], sizes = [2, 8], strides = [1, 1]} : vector<2x128xf32> to vector<2x8xf32>
    %15 = vector.extract_strided_slice %13 {offsets = [0, 8], sizes = [2, 1], strides = [1, 1]} : vector<2x128xf32> to vector<2x1xf32>
    %16 = math.tanh %15 : vector<2x1xf32>
    %17 = vector.extract_strided_slice %13 {offsets = [0, 9], sizes = [2, 1], strides = [1, 1]} : vector<2x128xf32> to vector<2x1xf32>
    %18 = tpu.iota {dimensions = array<i32: 0>} : vector<8x8xi32>
    %19 = tpu.iota {dimensions = array<i32: 1>} : vector<8x8xi32>
    %20 = arith.cmpi sle, %18, %19 : vector<8x8xi32>
    %21 = arith.extui %20 : vector<8x8xi1> to vector<8x8xi32>
    %22 = arith.sitofp %21 : vector<8x8xi32> to vector<8x8xf32>
    %c0_11 = arith.constant 0 : index
    %c0_12 = arith.constant 0 : index
    %23 = vector.load %arg1[%c0_11, %c0_12] : memref<2x8xf32, #tpu.memory_space<vmem>>, vector<2x8xf32>
    %cst_13 = arith.constant dense<0.000000e+00> : vector<2x8xf32>
    %24 = tpu.matmul %23, %22, %cst_13 {dimension_numbers = #tpu.dot_dimension_numbers<[1], [0], [0], [1], [0, 0, 1, 1], [], []>} : vector<2x8xf32>, vector<8x8xf32>, vector<2x8xf32> -> vector<2x8xf32>
    %cst_14 = arith.constant 5.000000e-01 : f32
    %25 = vector.broadcast %cst_14 : f32 to vector<2x1xf32>
    %26 = arith.mulf %25, %17 : vector<2x1xf32>
    %27 = math.exp %26 : vector<2x1xf32>
    %28 = vector.broadcast %27 : vector<2x1xf32> to vector<2x8xf32>
    %29 = arith.mulf %24, %28 : vector<2x8xf32>
    %30 = arith.addf %14, %29 : vector<2x8xf32>
    %c0_15 = arith.constant 0 : index
    %c0_16 = arith.constant 0 : index
    %31 = vector.load %arg10[%c0_15, %c0_16] : memref<2x8xf32, #tpu.memory_space<vmem>>, vector<2x8xf32>
    tpu.vector_store %arg10[%c0_15, %c0_16], %30 {strides = array<i32>} : memref<2x8xf32, #tpu.memory_space<vmem>>, vector<2x8xf32>,
    %c0_17 = arith.constant 0 : index
    %c0_18 = arith.constant 0 : index
    %32 = vector.load %arg11[%c0_17, %c0_18] : memref<2x1xf32, #tpu.memory_space<vmem>>, vector<2x1xf32>
    tpu.vector_store %arg11[%c0_17, %c0_18], %16 {strides = array<i32>} : memref<2x1xf32, #tpu.memory_space<vmem>>, vector<2x1xf32>,
    %c0_19 = arith.constant 0 : index
    %c0_20 = arith.constant 0 : index
    %33 = vector.load %arg12[%c0_19, %c0_20] : memref<2x1xf32, #tpu.memory_space<vmem>>, vector<2x1xf32>
    tpu.vector_store %arg12[%c0_19, %c0_20], %17 {strides = array<i32>} : memref<2x1xf32, #tpu.memory_space<vmem>>, vector<2x1xf32>,
    %34 = arith.truncf %30 : vector<2x8xf32> to vector<2x8xbf16>
    %c0_21 = arith.constant 0 : index
    %c0_22 = arith.constant 0 : index
    %35 = vector.load %arg6[%c0_21, %c0_22] : memref<8x256xbf16, #tpu.memory_space<vmem>>, vector<8x256xbf16>
    %cst_23 = arith.constant dense<0.000000e+00> : vector<2x256xf32>
    %36 = tpu.matmul %34, %35, %cst_23 {dimension_numbers = #tpu.dot_dimension_numbers<[1], [0], [0], [1], [0, 0, 1, 1], [], []>} : vector<2x8xbf16>, vector<8x256xbf16>, vector<2x256xf32> -> vector<2x256xf32>
    %c0_24 = arith.constant 0 : index
    %c0_25 = arith.constant 0 : index
    %37 = vector.load %arg7[%c0_24, %c0_25] : memref<1x256xf32, #tpu.memory_space<vmem>>, vector<1x256xf32>
    %38 = vector.broadcast %37 : vector<1x256xf32> to vector<2x256xf32>
    %39 = arith.addf %36, %38 : vector<2x256xf32>
    %cst_26 = arith.constant 0.000000e+00 : f32
    %40 = vector.broadcast %cst_26 : f32 to vector<2x256xf32>
    %41 = arith.maximumf %39, %40 : vector<2x256xf32>
    %42 = arith.truncf %41 : vector<2x256xf32> to vector<2x256xbf16>
    %c0_27 = arith.constant 0 : index
    %c0_28 = arith.constant 0 : index
    %43 = vector.load %arg8[%c0_27, %c0_28] : memref<256x1024xbf16, #tpu.memory_space<vmem>>, vector<256x1024xbf16>
    %cst_29 = arith.constant dense<0.000000e+00> : vector<2x1024xf32>
    %44 = tpu.matmul %42, %43, %cst_29 {dimension_numbers = #tpu.dot_dimension_numbers<[1], [0], [0], [1], [0, 0, 1, 1], [], []>} : vector<2x256xbf16>, vector<256x1024xbf16>, vector<2x1024xf32> -> vector<2x1024xf32>
    %c0_30 = arith.constant 0 : index
    %c0_31 = arith.constant 0 : index
    %45 = vector.load %arg9[%c0_30, %c0_31] : memref<1x1024xf32, #tpu.memory_space<vmem>>, vector<1x1024xf32>
    %46 = vector.broadcast %45 : vector<1x1024xf32> to vector<2x1024xf32>
    %47 = arith.addf %44, %46 : vector<2x1024xf32>
    %cst_32 = arith.constant 0.000000e+00 : f32
    %48 = vector.broadcast %cst_32 : f32 to vector<2x1024xf32>
    %49 = arith.maximumf %47, %48 : vector<2x1024xf32>
    %50 = arith.truncf %49 : vector<2x1024xf32> to vector<2x1024xbf16>
    %c0_33 = arith.constant 0 : index
    %c0_34 = arith.constant 0 : index
    %51 = vector.load %arg13[%c0_33, %c0_34] : memref<2x1024xbf16, #tpu.memory_space<vmem>>, vector<2x1024xbf16>
    tpu.vector_store %arg13[%c0_33, %c0_34], %50 {strides = array<i32>} : memref<2x1024xbf16, #tpu.memory_space<vmem>>, vector<2x1024xbf16>,
    return
  }
}

module attributes {stable_mosaic.version = 11 : i64} {
  func.func @_mm_bias_act_kernel(%arg0: i32, %arg1: memref<16x640xbf16, #tpu.memory_space<vmem>>, %arg2: memref<640x256xbf16, #tpu.memory_space<vmem>>, %arg3: memref<1x256xf32, #tpu.memory_space<vmem>>, %arg4: memref<16x256xbf16, #tpu.memory_space<vmem>>) attributes {dimension_semantics = [#tpu.dimension_semantics<parallel>], iteration_bounds = array<i64: 2>, scalar_prefetch = 0 : i64, scratch_operands = 0 : i64, tpu.core_type = #tpu.core_type<tc>, window_params = [{transform_indices = @transform_0, window_bounds = array<i64: 16, 640>}, {pipeline_mode = #tpu.pipeline_mode<synchronous>, transform_indices = @transform_1, window_bounds = array<i64: 640, 256>}, {pipeline_mode = #tpu.pipeline_mode<synchronous>, transform_indices = @transform_2, window_bounds = array<i64: 1, 256>}, {transform_indices = @transform_3, window_bounds = array<i64: 16, 256>}]} {
    %c0 = arith.constant 0 : index
    %c0_0 = arith.constant 0 : index
    %0 = vector.load %arg1[%c0, %c0_0] : memref<16x640xbf16, #tpu.memory_space<vmem>>, vector<16x640xbf16>
    %c0_1 = arith.constant 0 : index
    %c0_2 = arith.constant 0 : index
    %1 = vector.load %arg2[%c0_1, %c0_2] : memref<640x256xbf16, #tpu.memory_space<vmem>>, vector<640x256xbf16>
    %cst = arith.constant dense<0.000000e+00> : vector<16x256xf32>
    %2 = tpu.matmul %0, %1, %cst {dimension_numbers = #tpu.dot_dimension_numbers<[1], [0], [0], [1], [0, 0, 1, 1], [], []>} : vector<16x640xbf16>, vector<640x256xbf16>, vector<16x256xf32> -> vector<16x256xf32>
    %c0_3 = arith.constant 0 : index
    %c0_4 = arith.constant 0 : index
    %3 = vector.load %arg3[%c0_3, %c0_4] : memref<1x256xf32, #tpu.memory_space<vmem>>, vector<1x256xf32>
    %4 = vector.broadcast %3 : vector<1x256xf32> to vector<16x256xf32>
    %5 = arith.addf %2, %4 : vector<16x256xf32>
    %cst_5 = arith.constant 0.000000e+00 : f32
    %6 = vector.broadcast %cst_5 : f32 to vector<16x256xf32>
    %7 = arith.maximumf %5, %6 : vector<16x256xf32>
    %8 = arith.truncf %7 : vector<16x256xf32> to vector<16x256xbf16>
    %c0_6 = arith.constant 0 : index
    %c0_7 = arith.constant 0 : index
    %9 = vector.load %arg4[%c0_6, %c0_7] : memref<16x256xbf16, #tpu.memory_space<vmem>>, vector<16x256xbf16>
    tpu.vector_store %arg4[%c0_6, %c0_7], %8 {strides = array<i32>} : memref<16x256xbf16, #tpu.memory_space<vmem>>, vector<16x256xbf16>,
    return
  }
  func.func @transform_0(%arg0: i32) -> (i32, i32) {
    %c0_i32 = arith.constant 0 : i32
    %c0_i32_0 = arith.constant 0 : i32
    return %arg0, %c0_i32 : i32, i32
  }
  func.func @transform_1(%arg0: i32) -> (i32, i32) {
    %c0_i32 = arith.constant 0 : i32
    %c0_i32_0 = arith.constant 0 : i32
    %c0_i32_1 = arith.constant 0 : i32
    return %c0_i32, %c0_i32_0 : i32, i32
  }
  func.func @transform_2(%arg0: i32) -> (i32, i32) {
    %c0_i32 = arith.constant 0 : i32
    %c0_i32_0 = arith.constant 0 : i32
    %c0_i32_1 = arith.constant 0 : i32
    return %c0_i32, %c0_i32_0 : i32, i32
  }
  func.func @transform_3(%arg0: i32) -> (i32, i32) {
    %c0_i32 = arith.constant 0 : i32
    %c0_i32_0 = arith.constant 0 : i32
    return %arg0, %c0_i32 : i32, i32
  }
}

module attributes {stable_mosaic.version = 11 : i64} {
  func.func @_mm_bias_act_kernel(%arg0: i32, %arg1: memref<64x640xbf16, #tpu.memory_space<vmem>>, %arg2: memref<640x128xbf16, #tpu.memory_space<vmem>>, %arg3: memref<1x128xf32, #tpu.memory_space<vmem>>, %arg4: memref<64x128xbf16, #tpu.memory_space<vmem>>) attributes {dimension_semantics = [#tpu.dimension_semantics<parallel>], iteration_bounds = array<i64: 2>, scalar_prefetch = 0 : i64, scratch_operands = 0 : i64, tpu.core_type = #tpu.core_type<tc>, window_params = [{transform_indices = @transform_0, window_bounds = array<i64: 64, 640>}, {pipeline_mode = #tpu.pipeline_mode<synchronous>, transform_indices = @transform_1, window_bounds = array<i64: 640, 128>}, {pipeline_mode = #tpu.pipeline_mode<synchronous>, transform_indices = @transform_2, window_bounds = array<i64: 1, 128>}, {transform_indices = @transform_3, window_bounds = array<i64: 64, 128>}]} {
    %c0 = arith.constant 0 : index
    %c0_0 = arith.constant 0 : index
    %0 = vector.load %arg1[%c0, %c0_0] : memref<64x640xbf16, #tpu.memory_space<vmem>>, vector<64x640xbf16>
    %c0_1 = arith.constant 0 : index
    %c0_2 = arith.constant 0 : index
    %1 = vector.load %arg2[%c0_1, %c0_2] : memref<640x128xbf16, #tpu.memory_space<vmem>>, vector<640x128xbf16>
    %cst = arith.constant dense<0.000000e+00> : vector<64x128xf32>
    %2 = tpu.matmul %0, %1, %cst {dimension_numbers = #tpu.dot_dimension_numbers<[1], [0], [0], [1], [0, 0, 1, 1], [], []>} : vector<64x640xbf16>, vector<640x128xbf16>, vector<64x128xf32> -> vector<64x128xf32>
    %c0_3 = arith.constant 0 : index
    %c0_4 = arith.constant 0 : index
    %3 = vector.load %arg3[%c0_3, %c0_4] : memref<1x128xf32, #tpu.memory_space<vmem>>, vector<1x128xf32>
    %4 = vector.broadcast %3 : vector<1x128xf32> to vector<64x128xf32>
    %5 = arith.addf %2, %4 : vector<64x128xf32>
    %cst_5 = arith.constant 0.000000e+00 : f32
    %6 = vector.broadcast %cst_5 : f32 to vector<64x128xf32>
    %7 = arith.maximumf %5, %6 : vector<64x128xf32>
    %8 = arith.truncf %7 : vector<64x128xf32> to vector<64x128xbf16>
    %c0_6 = arith.constant 0 : index
    %c0_7 = arith.constant 0 : index
    %9 = vector.load %arg4[%c0_6, %c0_7] : memref<64x128xbf16, #tpu.memory_space<vmem>>, vector<64x128xbf16>
    tpu.vector_store %arg4[%c0_6, %c0_7], %8 {strides = array<i32>} : memref<64x128xbf16, #tpu.memory_space<vmem>>, vector<64x128xbf16>,
    return
  }
  func.func @transform_0(%arg0: i32) -> (i32, i32) {
    %c0_i32 = arith.constant 0 : i32
    %c0_i32_0 = arith.constant 0 : i32
    return %arg0, %c0_i32 : i32, i32
  }
  func.func @transform_1(%arg0: i32) -> (i32, i32) {
    %c0_i32 = arith.constant 0 : i32
    %c0_i32_0 = arith.constant 0 : i32
    %c0_i32_1 = arith.constant 0 : i32
    return %c0_i32, %c0_i32_0 : i32, i32
  }
  func.func @transform_2(%arg0: i32) -> (i32, i32) {
    %c0_i32 = arith.constant 0 : i32
    %c0_i32_0 = arith.constant 0 : i32
    %c0_i32_1 = arith.constant 0 : i32
    return %c0_i32, %c0_i32_0 : i32, i32
  }
  func.func @transform_3(%arg0: i32) -> (i32, i32) {
    %c0_i32 = arith.constant 0 : i32
    %c0_i32_0 = arith.constant 0 : i32
    return %arg0, %c0_i32 : i32, i32
  }
}

module attributes {stable_mosaic.version = 11 : i64} {
  func.func @_mm_bias_act_kernel(%arg0: i32, %arg1: memref<256x384xbf16, #tpu.memory_space<vmem>>, %arg2: memref<384x128xbf16, #tpu.memory_space<vmem>>, %arg3: memref<1x128xf32, #tpu.memory_space<vmem>>, %arg4: memref<256x128xbf16, #tpu.memory_space<vmem>>) attributes {dimension_semantics = [#tpu.dimension_semantics<parallel>], iteration_bounds = array<i64: 2>, scalar_prefetch = 0 : i64, scratch_operands = 0 : i64, tpu.core_type = #tpu.core_type<tc>, window_params = [{transform_indices = @transform_0, window_bounds = array<i64: 256, 384>}, {pipeline_mode = #tpu.pipeline_mode<synchronous>, transform_indices = @transform_1, window_bounds = array<i64: 384, 128>}, {pipeline_mode = #tpu.pipeline_mode<synchronous>, transform_indices = @transform_2, window_bounds = array<i64: 1, 128>}, {transform_indices = @transform_3, window_bounds = array<i64: 256, 128>}]} {
    %c0 = arith.constant 0 : index
    %c0_0 = arith.constant 0 : index
    %0 = vector.load %arg1[%c0, %c0_0] : memref<256x384xbf16, #tpu.memory_space<vmem>>, vector<256x384xbf16>
    %c0_1 = arith.constant 0 : index
    %c0_2 = arith.constant 0 : index
    %1 = vector.load %arg2[%c0_1, %c0_2] : memref<384x128xbf16, #tpu.memory_space<vmem>>, vector<384x128xbf16>
    %cst = arith.constant dense<0.000000e+00> : vector<256x128xf32>
    %2 = tpu.matmul %0, %1, %cst {dimension_numbers = #tpu.dot_dimension_numbers<[1], [0], [0], [1], [0, 0, 1, 1], [], []>} : vector<256x384xbf16>, vector<384x128xbf16>, vector<256x128xf32> -> vector<256x128xf32>
    %c0_3 = arith.constant 0 : index
    %c0_4 = arith.constant 0 : index
    %3 = vector.load %arg3[%c0_3, %c0_4] : memref<1x128xf32, #tpu.memory_space<vmem>>, vector<1x128xf32>
    %4 = vector.broadcast %3 : vector<1x128xf32> to vector<256x128xf32>
    %5 = arith.addf %2, %4 : vector<256x128xf32>
    %cst_5 = arith.constant 0.000000e+00 : f32
    %6 = vector.broadcast %cst_5 : f32 to vector<256x128xf32>
    %7 = arith.maximumf %5, %6 : vector<256x128xf32>
    %8 = arith.truncf %7 : vector<256x128xf32> to vector<256x128xbf16>
    %c0_6 = arith.constant 0 : index
    %c0_7 = arith.constant 0 : index
    %9 = vector.load %arg4[%c0_6, %c0_7] : memref<256x128xbf16, #tpu.memory_space<vmem>>, vector<256x128xbf16>
    tpu.vector_store %arg4[%c0_6, %c0_7], %8 {strides = array<i32>} : memref<256x128xbf16, #tpu.memory_space<vmem>>, vector<256x128xbf16>,
    return
  }
  func.func @transform_0(%arg0: i32) -> (i32, i32) {
    %c0_i32 = arith.constant 0 : i32
    %c0_i32_0 = arith.constant 0 : i32
    return %arg0, %c0_i32 : i32, i32
  }
  func.func @transform_1(%arg0: i32) -> (i32, i32) {
    %c0_i32 = arith.constant 0 : i32
    %c0_i32_0 = arith.constant 0 : i32
    %c0_i32_1 = arith.constant 0 : i32
    return %c0_i32, %c0_i32_0 : i32, i32
  }
  func.func @transform_2(%arg0: i32) -> (i32, i32) {
    %c0_i32 = arith.constant 0 : i32
    %c0_i32_0 = arith.constant 0 : i32
    %c0_i32_1 = arith.constant 0 : i32
    return %c0_i32, %c0_i32_0 : i32, i32
  }
  func.func @transform_3(%arg0: i32) -> (i32, i32) {
    %c0_i32 = arith.constant 0 : i32
    %c0_i32_0 = arith.constant 0 : i32
    return %arg0, %c0_i32 : i32, i32
  }
}

module attributes {stable_mosaic.version = 11 : i64} {
  func.func @_mm_bias_act_kernel(%arg0: i32, %arg1: memref<1024x384xbf16, #tpu.memory_space<vmem>>, %arg2: memref<384x128xbf16, #tpu.memory_space<vmem>>, %arg3: memref<1x128xf32, #tpu.memory_space<vmem>>, %arg4: memref<1024x128xf32, #tpu.memory_space<vmem>>) attributes {dimension_semantics = [#tpu.dimension_semantics<parallel>], iteration_bounds = array<i64: 2>, scalar_prefetch = 0 : i64, scratch_operands = 0 : i64, tpu.core_type = #tpu.core_type<tc>, window_params = [{transform_indices = @transform_0, window_bounds = array<i64: 1024, 384>}, {pipeline_mode = #tpu.pipeline_mode<synchronous>, transform_indices = @transform_1, window_bounds = array<i64: 384, 128>}, {pipeline_mode = #tpu.pipeline_mode<synchronous>, transform_indices = @transform_2, window_bounds = array<i64: 1, 128>}, {transform_indices = @transform_3, window_bounds = array<i64: 1024, 128>}]} {
    %c0 = arith.constant 0 : index
    %c0_0 = arith.constant 0 : index
    %0 = vector.load %arg1[%c0, %c0_0] : memref<1024x384xbf16, #tpu.memory_space<vmem>>, vector<1024x384xbf16>
    %c0_1 = arith.constant 0 : index
    %c0_2 = arith.constant 0 : index
    %1 = vector.load %arg2[%c0_1, %c0_2] : memref<384x128xbf16, #tpu.memory_space<vmem>>, vector<384x128xbf16>
    %cst = arith.constant dense<0.000000e+00> : vector<1024x128xf32>
    %2 = tpu.matmul %0, %1, %cst {dimension_numbers = #tpu.dot_dimension_numbers<[1], [0], [0], [1], [0, 0, 1, 1], [], []>} : vector<1024x384xbf16>, vector<384x128xbf16>, vector<1024x128xf32> -> vector<1024x128xf32>
    %c0_3 = arith.constant 0 : index
    %c0_4 = arith.constant 0 : index
    %3 = vector.load %arg3[%c0_3, %c0_4] : memref<1x128xf32, #tpu.memory_space<vmem>>, vector<1x128xf32>
    %4 = vector.broadcast %3 : vector<1x128xf32> to vector<1024x128xf32>
    %5 = arith.addf %2, %4 : vector<1024x128xf32>
    %cst_5 = arith.constant 0.000000e+00 : f32
    %6 = vector.broadcast %cst_5 : f32 to vector<1024x128xf32>
    %7 = arith.subf %6, %5 : vector<1024x128xf32>
    %8 = math.exp %7 : vector<1024x128xf32>
    %cst_6 = arith.constant 1.000000e+00 : f32
    %9 = vector.broadcast %cst_6 : f32 to vector<1024x128xf32>
    %10 = arith.addf %9, %8 : vector<1024x128xf32>
    %11 = tpu.reciprocal %10 {approx = true} : vector<1024x128xf32> -> vector<1024x128xf32>
    %c0_7 = arith.constant 0 : index
    %c0_8 = arith.constant 0 : index
    %12 = vector.load %arg4[%c0_7, %c0_8] : memref<1024x128xf32, #tpu.memory_space<vmem>>, vector<1024x128xf32>
    tpu.vector_store %arg4[%c0_7, %c0_8], %11 {strides = array<i32>} : memref<1024x128xf32, #tpu.memory_space<vmem>>, vector<1024x128xf32>,
    return
  }
  func.func @transform_0(%arg0: i32) -> (i32, i32) {
    %c0_i32 = arith.constant 0 : i32
    %c0_i32_0 = arith.constant 0 : i32
    return %arg0, %c0_i32 : i32, i32
  }
  func.func @transform_1(%arg0: i32) -> (i32, i32) {
    %c0_i32 = arith.constant 0 : i32
    %c0_i32_0 = arith.constant 0 : i32
    %c0_i32_1 = arith.constant 0 : i32
    return %c0_i32, %c0_i32_0 : i32, i32
  }
  func.func @transform_2(%arg0: i32) -> (i32, i32) {
    %c0_i32 = arith.constant 0 : i32
    %c0_i32_0 = arith.constant 0 : i32
    %c0_i32_1 = arith.constant 0 : i32
    return %c0_i32, %c0_i32_0 : i32, i32
  }
  func.func @transform_3(%arg0: i32) -> (i32, i32) {
    %c0_i32 = arith.constant 0 : i32
    %c0_i32_0 = arith.constant 0 : i32
    return %arg0, %c0_i32 : i32, i32
  }
}

</mosaic_0001>

<bundles_post_ra>
// kernel: rho_betavae_forward.9
= control target key start
LH: loop header
LB: loop body
LE: loop exit
PB: predicated region body
PF: predicated region fallthrough
CT: control target
= control target key end

     0   :  { %s3190_s12 = smov 0   ;;  %s3503_s0 = inlined_call_operand.vmem [shape: bf16[2048,128], index: 0, kind: input, shape index: {}]   ;;  %s3504_s1 = inlined_call_operand.vmem [shape: bf16[128,128], index: 1, kind: input, shape index: {}]   ;;  %s3505_s2 = inlined_call_operand.vmem [shape: f32[1,128], index: 2, kind: input, shape index: {}]   ;;  %s3506_s3 = inlined_call_operand.vmem [shape: bf16[2048,128], index: 3, kind: output, shape index: {}]  }
   0x1 LB: > { %s2127_s13 = sadd.s32 4294967295, %s3168_s12   ;;  %p2131_p0 = scmp.ge.s32.totalorder %s3168_s12, 1  ;;  %s3168_s12 = sphi %s3190_s12, %s13_s12  }
   0x2   : > { %p138_p1 = scmp.lt.s32.totalorder %s3168_s12, 3 }
   0x4   : > { %p139_p2 = pnand %p2131_p0, %p138_p1 }
   0x5   : > { %v3090_v0 = vld [vmem:[%s3504_s1] sm:$0xff] (!%p139_p2)   ;;  %s2132_s16 = sshll.u32 (!%p139_p2), %s2127_s13, 7  ;;  %v3091_v1 = vld [vmem:[%s3504_s1 + $0x8] sm:$0xff] (!%p139_p2)   ;;  %v3092_v2 = vld [vmem:[%s3504_s1 + $0x10] sm:$0xff] (!%p139_p2)  }
   0x6   : > { %142 = sbr.rel (%p139_p2) target bundleno = 380 (0x17c), region = 32  ;;  %p163_p3 = scmp.lt.s32.totalorder (!%p139_p2), %s2132_s16, 255  ;;  %2922 = vmatprep.subr.bf16.mxu0 (!%p139_p2), %v3090_v0  ;;  %3066 = vmatprep.subr.bf16.mxu1 (!%p139_p2), %v3090_v0  ;;  %v3093_v3 = vld [vmem:[%s3504_s1 + $0x18] sm:$0xff] (!%p139_p2)   ;;  %v3094_v6 = vld [vmem:[%s3504_s1 + $0x20] sm:$0xff] (!%p139_p2)   ;;  %v3095_v7 = vld [vmem:[%s3504_s1 + $0x28] sm:$0xff] (!%p139_p2)  }
   0x7   : > { %2923 = vmatpush3.bf16.msra.mxu0 (!%p139_p2), %v3090_v0  ;;  %3074 = vmatpush3.bf16.msra.mxu1 (!%p139_p2), %v3090_v0  ;;  %v3096_v8 = vld [vmem:[%s3504_s1 + $0x30] sm:$0xff] (!%p139_p2)   ;;  %v3097_v9 = vld [vmem:[%s3504_s1 + $0x38] sm:$0xff] (!%p139_p2)  }
   0x8   : > { %2924 = vmatprep.subr.bf16.mxu0 (!%p139_p2), %v3091_v1  ;;  %3067 = vmatprep.subr.bf16.mxu1 (!%p139_p2), %v3091_v1 }
   0xb   : > { %2925 = vmatpush3.bf16.msra.mxu0 (!%p139_p2), %v3091_v1  ;;  %3075 = vmatpush3.bf16.msra.mxu1 (!%p139_p2), %v3091_v1 }
   0xc   : > { %2926 = vmatprep.subr.bf16.mxu0 (!%p139_p2), %v3092_v2  ;;  %3068 = vmatprep.subr.bf16.mxu1 (!%p139_p2), %v3092_v2 }
   0xd   : > { %s3508_s16 = smov (!%p163_p3, %s2132_s16), 255 }
   0xe   : > { %s2133_s21 = sshll.u32 %s3508_s16, 2 }
   0xf   : > { %s3215_s24 = scalar_lea.vmem %s3503_s0, %s2133_s21  ;;  %2927 = vmatpush3.bf16.msra.mxu0 %v3092_v2  ;;  %3076 = vmatpush3.bf16.msra.mxu1 %v3092_v2  ;;  %s3314_s13 = scalar_lea.vmem %s3506_s3, %s2133_s21 }
  0x10   : > { %v3098_v4 = vld [vmem:[%s3215_s24] sm:$0xff]   ;;  %2928 = vmatprep.subr.bf16.mxu0 %v3093_v3  ;;  %3069 = vmatprep.subr.bf16.mxu1 %v3093_v3  ;;  %v3100_v10 = vld [vmem:[%s3215_s24 + $0x8] sm:$0xff]   ;;  %v3102_v12 = vld [vmem:[%s3215_s24 + $0x10] sm:$0xff]  }
  0x11   : > { %v3099_v5 = vld [vmem:[%s3215_s24 + $0x100] sm:$0xff]   ;;  %2938 = vmatprep.mubr.bf16.mxu0 %v3098_v4  ;;  %v3101_v11 = vld [vmem:[%s3215_s24 + $0x108] sm:$0xff]   ;;  %v3103_v13 = vld [vmem:[%s3215_s24 + $0x110] sm:$0xff]  }
  0x12   : > { %3002 = vmatprep.mubr.bf16.mxu1 %v3099_v5  ;;  %v3104_v14 = vld [vmem:[%s3215_s24 + $0x18] sm:$0xff]   ;;  %v3106_v16 = vld [vmem:[%s3215_s24 + $0x20] sm:$0xff]   ;;  %v3108_v18 = vld [vmem:[%s3215_s24 + $0x28] sm:$0xff]  }
  0x13   : > { %2929 = vmatpush3.bf16.msra.mxu0 %v3093_v3  ;;  %3077 = vmatpush3.bf16.msra.mxu1 %v3093_v3  ;;  %v3105_v15 = vld [vmem:[%s3215_s24 + $0x118] sm:$0xff]   ;;  %v3107_v17 = vld [vmem:[%s3215_s24 + $0x120] sm:$0xff]   ;;  %v3109_v19 = vld [vmem:[%s3215_s24 + $0x128] sm:$0xff]  }
  0x14   : > { %2930 = vmatprep.subr.bf16.mxu0 %v3094_v6  ;;  %3070 = vmatprep.subr.bf16.mxu1 %v3094_v6  ;;  %v3110_v20 = vld [vmem:[%s3215_s24 + $0x30] sm:$0xff]   ;;  %v3112_v22 = vld [vmem:[%s3215_s24 + $0x38] sm:$0xff]   ;;  %v3114_v24 = vld [vmem:[%s3215_s24 + $0x40] sm:$0xff]  }
  0x15   : > { %v3111_v21 = vld [vmem:[%s3215_s24 + $0x130] sm:$0xff]   ;;  %v3113_v23 = vld [vmem:[%s3215_s24 + $0x138] sm:$0xff]   ;;  %v3115_v25 = vld [vmem:[%s3215_s24 + $0x140] sm:$0xff]  }
  0x16   : > { %v3116_v26 = vld [vmem:[%s3215_s24 + $0x48] sm:$0xff]   ;;  %v3118_v28 = vld [vmem:[%s3215_s24 + $0x50] sm:$0xff]   ;;  %v3120_v30 = vld [vmem:[%s3215_s24 + $0x58] sm:$0xff]  }
  0x17   : > { %2931 = vmatpush3.bf16.msra.mxu0 %v3094_v6  ;;  %3078 = vmatpush3.bf16.msra.mxu1 %v3094_v6  ;;  %v3117_v27 = vld [vmem:[%s3215_s24 + $0x148] sm:$0xff]   ;;  %v3119_v29 = vld [vmem:[%s3215_s24 + $0x150] sm:$0xff]   ;;  %v3121_v31 = vld [vmem:[%s3215_s24 + $0x158] sm:$0xff]  }
  0x18   : > { %2932 = vmatprep.subr.bf16.mxu0 %v3095_v7  ;;  %3071 = vmatprep.subr.bf16.mxu1 %v3095_v7  ;;  %v3122_v32 = vld [vmem:[%s3215_s24 + $0x60] sm:$0xff]   ;;  %v3124_v34 = vld [vmem:[%s3215_s24 + $0x68] sm:$0xff]   ;;  %v3126_v36 = vld [vmem:[%s3215_s24 + $0x70] sm:$0xff]  }
  0x19   : > { %v3123_v33 = vld [vmem:[%s3215_s24 + $0x160] sm:$0xff]   ;;  %v3125_v35 = vld [vmem:[%s3215_s24 + $0x168] sm:$0xff]   ;;  %v3127_v37 = vld [vmem:[%s3215_s24 + $0x170] sm:$0xff]  }
  0x1a   : > { %v3128_v38 = vld [vmem:[%s3215_s24 + $0x78] sm:$0xff]   ;;  %v3130_v40 = vld [vmem:[%s3215_s24 + $0x80] sm:$0xff]   ;;  %v3132_v42 = vld [vmem:[%s3215_s24 + $0x88] sm:$0xff]  }
  0x1b   : > { %2933 = vmatpush3.bf16.msra.mxu0 %v3095_v7  ;;  %3079 = vmatpush3.bf16.msra.mxu1 %v3095_v7  ;;  %v3129_v39 = vld [vmem:[%s3215_s24 + $0x178] sm:$0xff]   ;;  %v3131_v41 = vld [vmem:[%s3215_s24 + $0x180] sm:$0xff]   ;;  %v3133_v43 = vld [vmem:[%s3215_s24 + $0x188] sm:$0xff]  }
  0x1c   : > { %2934 = vmatprep.subr.bf16.mxu0 %v3096_v8  ;;  %3072 = vmatprep.subr.bf16.mxu1 %v3096_v8  ;;  %v3134_v44 = vld [vmem:[%s3215_s24 + $0x90] sm:$0xff]   ;;  %v3136_v46 = vld [vmem:[%s3215_s24 + $0x98] sm:$0xff]   ;;  %v3138_v48 = vld [vmem:[%s3215_s24 + $0xa0] sm:$0xff]  }
  0x1d   : > { %v3135_v45 = vld [vmem:[%s3215_s24 + $0x190] sm:$0xff]   ;;  %v3137_v47 = vld [vmem:[%s3215_s24 + $0x198] sm:$0xff]   ;;  %v3139_v49 = vld [vmem:[%s3215_s24 + $0x1a0] sm:$0xff]  }
  0x1e   : > { %v3140_v50 = vld [vmem:[%s3215_s24 + $0xa8] sm:$0xff]   ;;  %v3142_v52 = vld [vmem:[%s3215_s24 + $0xb0] sm:$0xff]   ;;  %v3144_v54 = vld [vmem:[%s3215_s24 + $0xb8] sm:$0xff]  }
  0x1f   : > { %2935 = vmatpush3.bf16.msra.mxu0 %v3096_v8  ;;  %3080 = vmatpush3.bf16.msra.mxu1 %v3096_v8  ;;  %v3141_v51 = vld [vmem:[%s3215_s24 + $0x1a8] sm:$0xff]   ;;  %v3143_v53 = vld [vmem:[%s3215_s24 + $0x1b0] sm:$0xff]   ;;  %v3145_v55 = vld [vmem:[%s3215_s24 + $0x1b8] sm:$0xff]  }
  0x20   : > { %2936 = vmatprep.subr.bf16.mxu0 %v3097_v9  ;;  %3073 = vmatprep.subr.bf16.mxu1 %v3097_v9  ;;  %v3146_v56 = vld [vmem:[%s3215_s24 + $0xc0] sm:$0xff]   ;;  %v3148_v58 = vld [vmem:[%s3215_s24 + $0xc8] sm:$0xff]   ;;  %v3150_v60 = vld [vmem:[%s3215_s24 + $0xd0] sm:$0xff]  }
  0x21   : > { %v3147_v57 = vld [vmem:[%s3215_s24 + $0x1c0] sm:$0xff]   ;;  %v3149_v59 = vld [vmem:[%s3215_s24 + $0x1c8] sm:$0xff]   ;;  %v3151_v61 = vld [vmem:[%s3215_s24 + $0x1d0] sm:$0xff]  }
  0x22   : > { %v3152_v62 = vld [vmem:[%s3215_s24 + $0xd8] sm:$0xff]   ;;  %v3154_v0 = vld [vmem:[%s3215_s24 + $0xe0] sm:$0xff]   ;;  %v3156_v2 = vld [vmem:[%s3215_s24 + $0xe8] sm:$0xff]  }
  0x23   : > { %2937 = vmatpush3.bf16.msra.mxu0 %v3097_v9  ;;  %3081 = vmatpush3.bf16.msra.mxu1 %v3097_v9  ;;  %v3153_v63 = vld [vmem:[%s3215_s24 + $0x1d8] sm:$0xff]   ;;  %v3155_v1 = vld [vmem:[%s3215_s24 + $0x1e0] sm:$0xff]   ;;  %v3157_v3 = vld [vmem:[%s3215_s24 + $0x1e8] sm:$0xff]  }
  0x24   : > { %v3158_v4 = vld [vmem:[%s3215_s24 + $0xf0] sm:$0xff]   ;;  %v3160_v6 = vld [vmem:[%s3215_s24 + $0xf8] sm:$0xff]   ;;  %v3299_v8 = vld [vmem:[%s3505_s2] ss:$0 sm:$0xff] }
  0x25   : > { %v3159_v5 = vld [vmem:[%s3215_s24 + $0x1f0] sm:$0xff]   ;;  %v3161_v7 = vld [vmem:[%s3215_s24 + $0x1f8] sm:$0xff]  }
  0x26   : > { %2939 = vmatmul.mubr.bf16.vlgmr.msra.gmra.mrb[0].mxu0 %v3100_v10  ;;  %3003 = vmatmul.mubr.bf16.vlgmr.msra.gmra.mrb[0].mxu1 %v3101_v11 }
  0x27   : > { %2942 = vmatprep.mubr.bf16.mxu0 %v3102_v12  ;;  %3006 = vmatprep.mubr.bf16.mxu1 %v3103_v13 }
  0x2e   : > { %2943 = vmatmul.mubr.bf16.gmra.mrb[4].mxu0 %v3104_v14  ;;  %3007 = vmatmul.mubr.bf16.gmra.mrb[4].mxu1 %v3105_v15 }
  0x2f   : > { %2946 = vmatprep.mubr.bf16.mxu0 %v3106_v16  ;;  %3010 = vmatprep.mubr.bf16.mxu1 %v3107_v17 }
  0x36   : > { %2947 = vmatmul.mubr.bf16.gmra.mrb[8].mxu0 %v3108_v18  ;;  %3011 = vmatmul.mubr.bf16.gmra.mrb[8].mxu1 %v3109_v19 }
  0x37   : > { %2950 = vmatprep.mubr.bf16.mxu0 %v3110_v20  ;;  %3014 = vmatprep.mubr.bf16.mxu1 %v3111_v21 }
  0x3e   : > { %2951 = vmatmul.mubr.bf16.gmra.mrb[12].mxu0 %v3112_v22  ;;  %3015 = vmatmul.mubr.bf16.gmra.mrb[12].mxu1 %v3113_v23 }
  0x3f   : > { %2954 = vmatprep.mubr.bf16.mxu0 %v3114_v24  ;;  %3018 = vmatprep.mubr.bf16.mxu1 %v3115_v25 }
  0x46   : > { %2955 = vmatmul.mubr.bf16.gmra.mrb[16].mxu0 %v3116_v26  ;;  %3019 = vmatmul.mubr.bf16.gmra.mrb[16].mxu1 %v3117_v27 }
  0x47   : > { %2958 = vmatprep.mubr.bf16.mxu0 %v3118_v28  ;;  %3022 = vmatprep.mubr.bf16.mxu1 %v3119_v29 }
  0x4e   : > { %2959 = vmatmul.mubr.bf16.gmra.mrb[20].mxu0 %v3120_v30  ;;  %3023 = vmatmul.mubr.bf16.gmra.mrb[20].mxu1 %v3121_v31 }
  0x4f   : > { %2962 = vmatprep.mubr.bf16.mxu0 %v3122_v32  ;;  %3026 = vmatprep.mubr.bf16.mxu1 %v3123_v33 }
  0x56   : > { %2963 = vmatmul.mubr.bf16.gmra.mrb[24].mxu0 %v3124_v34  ;;  %3027 = vmatmul.mubr.bf16.gmra.mrb[24].mxu1 %v3125_v35 }
  0x57   : > { %2966 = vmatprep.mubr.bf16.mxu0 %v3126_v36  ;;  %3030 = vmatprep.mubr.bf16.mxu1 %v3127_v37 }
  0x5e   : > { %2967 = vmatmul.mubr.bf16.gmra.mrb[28].mxu0 %v3128_v38  ;;  %3031 = vmatmul.mubr.bf16.gmra.mrb[28].mxu1 %v3129_v39 }
  0x5f   : > { %2970 = vmatprep.mubr.bf16.mxu0 %v3130_v40  ;;  %3034 = vmatprep.mubr.bf16.mxu1 %v3131_v41 }
  0x66   : > { %2971 = vmatmul.mubr.bf16.gmra.mrb[32].mxu0 %v3132_v42  ;;  %3035 = vmatmul.mubr.bf16.gmra.mrb[32].mxu1 %v3133_v43 }
  0x67   : > { %2974 = vmatprep.mubr.bf16.mxu0 %v3134_v44  ;;  %3038 = vmatprep.mubr.bf16.mxu1 %v3135_v45 }
  0x6e   : > { %2975 = vmatmul.mubr.bf16.gmra.mrb[36].mxu0 %v3136_v46  ;;  %3039 = vmatmul.mubr.bf16.gmra.mrb[36].mxu1 %v3137_v47 }
  0x6f   : > { %2978 = vmatprep.mubr.bf16.mxu0 %v3138_v48  ;;  %3042 = vmatprep.mubr.bf16.mxu1 %v3139_v49 }
  0x76   : > { %2979 = vmatmul.mubr.bf16.gmra.mrb[40].mxu0 %v3140_v50  ;;  %3043 = vmatmul.mubr.bf16.gmra.mrb[40].mxu1 %v3141_v51 }
  0x77   : > { %2982 = vmatprep.mubr.bf16.mxu0 %v3142_v52  ;;  %3046 = vmatprep.mubr.bf16.mxu1 %v3143_v53 }
  0x7e   : > { %2983 = vmatmul.mubr.bf16.gmra.mrb[44].mxu0 %v3144_v54  ;;  %3047 = vmatmul.mubr.bf16.gmra.mrb[44].mxu1 %v3145_v55 }
  0x7f   : > { %2986 = vmatprep.mubr.bf16.mxu0 %v3146_v56  ;;  %3050 = vmatprep.mubr.bf16.mxu1 %v3147_v57 }
  0x86   : > { %2987 = vmatmul.mubr.bf16.gmra.mrb[48].mxu0 %v3148_v58  ;;  %3051 = vmatmul.mubr.bf16.gmra.mrb[48].mxu1 %v3149_v59 }
  0x87   : > { %2990 = vmatprep.mubr.bf16.mxu0 %v3150_v60  ;;  %3054 = vmatprep.mubr.bf16.mxu1 %v3151_v61 }
  0x8e   : > { %2991 = vmatmul.mubr.bf16.gmra.mrb[52].mxu0 %v3152_v62  ;;  %3055 = vmatmul.mubr.bf16.gmra.mrb[52].mxu1 %v3153_v63 }
  0x8f   : > { %2994 = vmatprep.mubr.bf16.mxu0 %v3154_v0  ;;  %3058 = vmatprep.mubr.bf16.mxu1 %v3155_v1 }
  0x96   : > { %2995 = vmatmul.mubr.bf16.gmra.mrb[56].mxu0 %v3156_v2  ;;  %3059 = vmatmul.mubr.bf16.gmra.mrb[56].mxu1 %v3157_v3 }
  0x97   : > { %2998 = vmatprep.mubr.bf16.mxu0 %v3158_v4  ;;  %3062 = vmatprep.mubr.bf16.mxu1 %v3159_v5 }
  0x9e   : > { %2999 = vmatmul.mubr.bf16.gmra.mrb[60].mxu0 %v3160_v6  ;;  %3063 = vmatmul.mubr.bf16.gmra.mrb[60].mxu1 %v3161_v7 }
  0xf9   : > { %v2940_v9 = vpop.f32.mrb[0].mxu0  ;;  %v3004_v10 = vpop.f32.mrb[0].mxu1 }
  0xfa   : > { %v801_v11 = vadd.f32 %v2940_v9, %v3299_v8  ;;  %v1057_v12 = vadd.f32 %v3004_v10, %v3299_v8  ;;  %v792_v13 = vpop.f32.mrb[1].mxu0  ;;  %v1048_v14 = vpop.f32.mrb[1].mxu1 }
  0xfb   : > { %v793_v15 = vadd.f32 %v3299_v8, %v792_v13  ;;  %v1049_v16 = vadd.f32 %v3299_v8, %v1048_v14  ;;  %v2941_v17 = vpop.f32.mrb[2].mxu0  ;;  %v3005_v18 = vpop.f32.mrb[2].mxu1 }
  0xfc   : > { %v804_v19 = vadd.f32 %v2941_v17, %v3299_v8  ;;  %v1060_v20 = vadd.f32 %v3005_v18, %v3299_v8  ;;  %v795_v21 = vpop.f32.mrb[3].mxu0  ;;  %v1051_v22 = vpop.f32.mrb[3].mxu1  ;;  %v1305_v25 = vmax.f32 %v801_v11, 0.0  ;;  %v1369_v26 = vmax.f32 %v1057_v12, 0.0 }
  0xfd   : > { %v796_v23 = vadd.f32 %v3299_v8, %v795_v21  ;;  %v1052_v24 = vadd.f32 %v3299_v8, %v1051_v22  ;;  %v1303_v29 = vmax.f32 %v793_v15, 0.0  ;;  %v1367_v30 = vmax.f32 %v1049_v16, 0.0 }
  0xfe   : > { %v1306_v27 = vmax.f32 %v804_v19, 0.0  ;;  %v1370_v28 = vmax.f32 %v1060_v20, 0.0 }
  0xff   : > { %v1304_v31 = vmax.f32 %v796_v23, 0.0  ;;  %v1368_v32 = vmax.f32 %v1052_v24, 0.0 }
 0x100   : > { %v2475_v33 = vpack.c.bf16 %v1306_v27, %v1305_v25  ;;  %v2635_v34 = vpack.c.bf16 %v1370_v28, %v1369_v26 }
 0x101   : > { %v2470_v35 = vpack.c.bf16 %v1304_v31, %v1303_v29  ;;  %v2630_v36 = vpack.c.bf16 %v1368_v32, %v1367_v30  ;;  %v2944_v37 = vpop.f32.mrb[4].mxu0  ;;  %v3008_v38 = vpop.f32.mrb[4].mxu1 }
 0x102   : > { %2787 = vst [vmem:[%s3314_s13 + $0x8] sm:$0xff] %v2475_v33   ;;  %2819 = vst [vmem:[%s3314_s13 + $0x108] sm:$0xff] %v2635_v34   ;;  %v817_v39 = vadd.f32 %v2944_v37, %v3299_v8  ;;  %v1073_v40 = vadd.f32 %v3008_v38, %v3299_v8  ;;  %v808_v41 = vpop.f32.mrb[5].mxu0  ;;  %v1064_v42 = vpop.f32.mrb[5].mxu1 }
 0x103   : > { %2471 = vst [vmem:[%s3314_s13] sm:$0xff] %v2470_v35   ;;  %2818 = vst [vmem:[%s3314_s13 + $0x100] sm:$0xff] %v2630_v36   ;;  %v809_v43 = vadd.f32 %v3299_v8, %v808_v41  ;;  %v1065_v44 = vadd.f32 %v3299_v8, %v1064_v42  ;;  %v2945_v45 = vpop.f32.mrb[6].mxu0  ;;  %v3009_v46 = vpop.f32.mrb[6].mxu1 }
 0x104   : > { %v820_v47 = vadd.f32 %v2945_v45, %v3299_v8  ;;  %v1076_v48 = vadd.f32 %v3009_v46, %v3299_v8  ;;  %v811_v49 = vpop.f32.mrb[7].mxu0  ;;  %v1067_v50 = vpop.f32.mrb[7].mxu1  ;;  %v1309_v53 = vmax.f32 %v817_v39, 0.0  ;;  %v1373_v54 = vmax.f32 %v1073_v40, 0.0 }
 0x105   : > { %v812_v51 = vadd.f32 %v3299_v8, %v811_v49  ;;  %v1068_v52 = vadd.f32 %v3299_v8, %v1067_v50  ;;  %v1307_v57 = vmax.f32 %v809_v43, 0.0  ;;  %v1371_v58 = vmax.f32 %v1065_v44, 0.0 }
 0x106   : > { %v1310_v55 = vmax.f32 %v820_v47, 0.0  ;;  %v1374_v56 = vmax.f32 %v1076_v48, 0.0 }
 0x107   : > { %v1308_v59 = vmax.f32 %v812_v51, 0.0  ;;  %v1372_v60 = vmax.f32 %v1068_v52, 0.0 }
 0x108   : > { %v2485_v61 = vpack.c.bf16 %v1310_v55, %v1309_v53  ;;  %v2645_v62 = vpack.c.bf16 %v1374_v56, %v1373_v54 }
 0x109   : > { %v2480_v63 = vpack.c.bf16 %v1308_v59, %v1307_v57  ;;  %v2640_v0 = vpack.c.bf16 %v1372_v60, %v1371_v58  ;;  %v2948_v1 = vpop.f32.mrb[8].mxu0  ;;  %v3012_v2 = vpop.f32.mrb[8].mxu1 }
 0x10a   : > { %2789 = vst [vmem:[%s3314_s13 + $0x18] sm:$0xff] %v2485_v61   ;;  %2821 = vst [vmem:[%s3314_s13 + $0x118] sm:$0xff] %v2645_v62   ;;  %v833_v3 = vadd.f32 %v2948_v1, %v3299_v8  ;;  %v1089_v4 = vadd.f32 %v3012_v2, %v3299_v8  ;;  %v824_v5 = vpop.f32.mrb[9].mxu0  ;;  %v1080_v6 = vpop.f32.mrb[9].mxu1 }
 0x10b   : > { %2788 = vst [vmem:[%s3314_s13 + $0x10] sm:$0xff] %v2480_v63   ;;  %2820 = vst [vmem:[%s3314_s13 + $0x110] sm:$0xff] %v2640_v0   ;;  %v825_v7 = vadd.f32 %v3299_v8, %v824_v5  ;;  %v1081_v9 = vadd.f32 %v3299_v8, %v1080_v6  ;;  %v2949_v10 = vpop.f32.mrb[10].mxu0  ;;  %v3013_v11 = vpop.f32.mrb[10].mxu1 }
 0x10c   : > { %v836_v12 = vadd.f32 %v2949_v10, %v3299_v8  ;;  %v1092_v13 = vadd.f32 %v3013_v11, %v3299_v8  ;;  %v827_v14 = vpop.f32.mrb[11].mxu0  ;;  %v1083_v15 = vpop.f32.mrb[11].mxu1  ;;  %v1313_v18 = vmax.f32 %v833_v3, 0.0  ;;  %v1377_v19 = vmax.f32 %v1089_v4, 0.0 }
 0x10d   : > { %v828_v16 = vadd.f32 %v3299_v8, %v827_v14  ;;  %v1084_v17 = vadd.f32 %v3299_v8, %v1083_v15  ;;  %v1311_v22 = vmax.f32 %v825_v7, 0.0  ;;  %v1375_v23 = vmax.f32 %v1081_v9, 0.0 }
 0x10e   : > { %v1314_v20 = vmax.f32 %v836_v12, 0.0  ;;  %v1378_v21 = vmax.f32 %v1092_v13, 0.0 }
 0x10f   : > { %v1312_v24 = vmax.f32 %v828_v16, 0.0  ;;  %v1376_v25 = vmax.f32 %v1084_v17, 0.0 }
 0x110   : > { %v2495_v26 = vpack.c.bf16 %v1314_v20, %v1313_v18  ;;  %v2655_v27 = vpack.c.bf16 %v1378_v21, %v1377_v19 }
 0x111   : > { %v2490_v28 = vpack.c.bf16 %v1312_v24, %v1311_v22  ;;  %v2650_v29 = vpack.c.bf16 %v1376_v25, %v1375_v23  ;;  %v2952_v30 = vpop.f32.mrb[12].mxu0  ;;  %v3016_v31 = vpop.f32.mrb[12].mxu1 }
 0x112   : > { %2791 = vst [vmem:[%s3314_s13 + $0x28] sm:$0xff] %v2495_v26   ;;  %2823 = vst [vmem:[%s3314_s13 + $0x128] sm:$0xff] %v2655_v27   ;;  %v849_v32 = vadd.f32 %v2952_v30, %v3299_v8  ;;  %v1105_v33 = vadd.f32 %v3016_v31, %v3299_v8  ;;  %v840_v34 = vpop.f32.mrb[13].mxu0  ;;  %v1096_v35 = vpop.f32.mrb[13].mxu1 }
 0x113   : > { %2790 = vst [vmem:[%s3314_s13 + $0x20] sm:$0xff] %v2490_v28   ;;  %2822 = vst [vmem:[%s3314_s13 + $0x120] sm:$0xff] %v2650_v29   ;;  %v841_v36 = vadd.f32 %v3299_v8, %v840_v34  ;;  %v1097_v37 = vadd.f32 %v3299_v8, %v1096_v35  ;;  %v2953_v38 = vpop.f32.mrb[14].mxu0  ;;  %v3017_v39 = vpop.f32.mrb[14].mxu1 }
 0x114   : > { %v852_v40 = vadd.f32 %v2953_v38, %v3299_v8  ;;  %v1108_v41 = vadd.f32 %v3017_v39, %v3299_v8  ;;  %v843_v42 = vpop.f32.mrb[15].mxu0  ;;  %v1099_v43 = vpop.f32.mrb[15].mxu1  ;;  %v1317_v46 = vmax.f32 %v849_v32, 0.0  ;;  %v1381_v47 = vmax.f32 %v1105_v33, 0.0 }
 0x115   : > { %v844_v44 = vadd.f32 %v3299_v8, %v843_v42  ;;  %v1100_v45 = vadd.f32 %v3299_v8, %v1099_v43  ;;  %v1315_v50 = vmax.f32 %v841_v36, 0.0  ;;  %v1379_v51 = vmax.f32 %v1097_v37, 0.0 }
 0x116   : > { %v1318_v48 = vmax.f32 %v852_v40, 0.0  ;;  %v1382_v49 = vmax.f32 %v1108_v41, 0.0 }
 0x117   : > { %v1316_v52 = vmax.f32 %v844_v44, 0.0  ;;  %v1380_v53 = vmax.f32 %v1100_v45, 0.0 }
 0x118   : > { %v2505_v54 = vpack.c.bf16 %v1318_v48, %v1317_v46  ;;  %v2665_v55 = vpack.c.bf16 %v1382_v49, %v1381_v47 }
 0x119   : > { %v2500_v56 = vpack.c.bf16 %v1316_v52, %v1315_v50  ;;  %v2660_v57 = vpack.c.bf16 %v1380_v53, %v1379_v51  ;;  %v2956_v58 = vpop.f32.mrb[16].mxu0  ;;  %v3020_v59 = vpop.f32.mrb[16].mxu1 }
 0x11a   : > { %2793 = vst [vmem:[%s3314_s13 + $0x38] sm:$0xff] %v2505_v54   ;;  %2825 = vst [vmem:[%s3314_s13 + $0x138] sm:$0xff] %v2665_v55   ;;  %v865_v60 = vadd.f32 %v2956_v58, %v3299_v8  ;;  %v1121_v61 = vadd.f32 %v3020_v59, %v3299_v8  ;;  %v856_v62 = vpop.f32.mrb[17].mxu0  ;;  %v1112_v63 = vpop.f32.mrb[17].mxu1 }
 0x11b   : > { %2792 = vst [vmem:[%s3314_s13 + $0x30] sm:$0xff] %v2500_v56   ;;  %2824 = vst [vmem:[%s3314_s13 + $0x130] sm:$0xff] %v2660_v57   ;;  %v857_v0 = vadd.f32 %v3299_v8, %v856_v62  ;;  %v1113_v1 = vadd.f32 %v3299_v8, %v1112_v63  ;;  %v2957_v2 = vpop.f32.mrb[18].mxu0  ;;  %v3021_v3 = vpop.f32.mrb[18].mxu1 }
 0x11c   : > { %v868_v4 = vadd.f32 %v2957_v2, %v3299_v8  ;;  %v1124_v5 = vadd.f32 %v3021_v3, %v3299_v8  ;;  %v859_v6 = vpop.f32.mrb[19].mxu0  ;;  %v1115_v7 = vpop.f32.mrb[19].mxu1  ;;  %v1321_v11 = vmax.f32 %v865_v60, 0.0  ;;  %v1385_v12 = vmax.f32 %v1121_v61, 0.0 }
 0x11d   : > { %v860_v9 = vadd.f32 %v3299_v8, %v859_v6  ;;  %v1116_v10 = vadd.f32 %v3299_v8, %v1115_v7  ;;  %v1319_v15 = vmax.f32 %v857_v0, 0.0  ;;  %v1383_v16 = vmax.f32 %v1113_v1, 0.0 }
 0x11e   : > { %v1322_v13 = vmax.f32 %v868_v4, 0.0  ;;  %v1386_v14 = vmax.f32 %v1124_v5, 0.0 }
 0x11f   : > { %v1320_v17 = vmax.f32 %v860_v9, 0.0  ;;  %v1384_v18 = vmax.f32 %v1116_v10, 0.0 }
 0x120   : > { %v2515_v19 = vpack.c.bf16 %v1322_v13, %v1321_v11  ;;  %v2675_v20 = vpack.c.bf16 %v1386_v14, %v1385_v12 }
 0x121   : > { %v2510_v21 = vpack.c.bf16 %v1320_v17, %v1319_v15  ;;  %v2670_v22 = vpack.c.bf16 %v1384_v18, %v1383_v16  ;;  %v2960_v23 = vpop.f32.mrb[20].mxu0  ;;  %v3024_v24 = vpop.f32.mrb[20].mxu1 }
 0x122   : > { %2795 = vst [vmem:[%s3314_s13 + $0x48] sm:$0xff] %v2515_v19   ;;  %2827 = vst [vmem:[%s3314_s13 + $0x148] sm:$0xff] %v2675_v20   ;;  %v881_v25 = vadd.f32 %v2960_v23, %v3299_v8  ;;  %v1137_v26 = vadd.f32 %v3024_v24, %v3299_v8  ;;  %v872_v27 = vpop.f32.mrb[21].mxu0  ;;  %v1128_v28 = vpop.f32.mrb[21].mxu1 }
 0x123   : > { %2794 = vst [vmem:[%s3314_s13 + $0x40] sm:$0xff] %v2510_v21   ;;  %2826 = vst [vmem:[%s3314_s13 + $0x140] sm:$0xff] %v2670_v22   ;;  %v873_v29 = vadd.f32 %v3299_v8, %v872_v27  ;;  %v1129_v30 = vadd.f32 %v3299_v8, %v1128_v28  ;;  %v2961_v31 = vpop.f32.mrb[22].mxu0  ;;  %v3025_v32 = vpop.f32.mrb[22].mxu1 }
 0x124   : > { %v884_v33 = vadd.f32 %v2961_v31, %v3299_v8  ;;  %v1140_v34 = vadd.f32 %v3025_v32, %v3299_v8  ;;  %v875_v35 = vpop.f32.mrb[23].mxu0  ;;  %v1131_v36 = vpop.f32.mrb[23].mxu1  ;;  %v1325_v39 = vmax.f32 %v881_v25, 0.0  ;;  %v1389_v40 = vmax.f32 %v1137_v26, 0.0 }
 0x125   : > { %v876_v37 = vadd.f32 %v3299_v8, %v875_v35  ;;  %v1132_v38 = vadd.f32 %v3299_v8, %v1131_v36  ;;  %v1323_v43 = vmax.f32 %v873_v29, 0.0  ;;  %v1387_v44 = vmax.f32 %v1129_v30, 0.0 }
 0x126   : > { %v1326_v41 = vmax.f32 %v884_v33, 0.0  ;;  %v1390_v42 = vmax.f32 %v1140_v34, 0.0 }
 0x127   : > { %v1324_v45 = vmax.f32 %v876_v37, 0.0  ;;  %v1388_v46 = vmax.f32 %v1132_v38, 0.0 }
 0x128   : > { %v2525_v47 = vpack.c.bf16 %v1326_v41, %v1325_v39  ;;  %v2685_v48 = vpack.c.bf16 %v1390_v42, %v1389_v40 }
 0x129   : > { %v2520_v49 = vpack.c.bf16 %v1324_v45, %v1323_v43  ;;  %v2680_v50 = vpack.c.bf16 %v1388_v46, %v1387_v44  ;;  %v2964_v51 = vpop.f32.mrb[24].mxu0  ;;  %v3028_v52 = vpop.f32.mrb[24].mxu1 }
 0x12a   : > { %2797 = vst [vmem:[%s3314_s13 + $0x58] sm:$0xff] %v2525_v47   ;;  %2829 = vst [vmem:[%s3314_s13 + $0x158] sm:$0xff] %v2685_v48   ;;  %v897_v53 = vadd.f32 %v2964_v51, %v3299_v8  ;;  %v1153_v54 = vadd.f32 %v3028_v52, %v3299_v8  ;;  %v888_v55 = vpop.f32.mrb[25].mxu0  ;;  %v1144_v56 = vpop.f32.mrb[25].mxu1 }
 0x12b   : > { %2796 = vst [vmem:[%s3314_s13 + $0x50] sm:$0xff] %v2520_v49   ;;  %2828 = vst [vmem:[%s3314_s13 + $0x150] sm:$0xff] %v2680_v50   ;;  %v889_v57 = vadd.f32 %v3299_v8, %v888_v55  ;;  %v1145_v58 = vadd.f32 %v3299_v8, %v1144_v56  ;;  %v2965_v59 = vpop.f32.mrb[26].mxu0  ;;  %v3029_v60 = vpop.f32.mrb[26].mxu1 }
 0x12c   : > { %v900_v61 = vadd.f32 %v2965_v59, %v3299_v8  ;;  %v1156_v62 = vadd.f32 %v3029_v60, %v3299_v8  ;;  %v891_v63 = vpop.f32.mrb[27].mxu0  ;;  %v1147_v0 = vpop.f32.mrb[27].mxu1  ;;  %v1329_v3 = vmax.f32 %v897_v53, 0.0  ;;  %v1393_v4 = vmax.f32 %v1153_v54, 0.0 }
 0x12d   : > { %v892_v1 = vadd.f32 %v3299_v8, %v891_v63  ;;  %v1148_v2 = vadd.f32 %v3299_v8, %v1147_v0  ;;  %v1327_v7 = vmax.f32 %v889_v57, 0.0  ;;  %v1391_v9 = vmax.f32 %v1145_v58, 0.0 }
 0x12e   : > { %v1330_v5 = vmax.f32 %v900_v61, 0.0  ;;  %v1394_v6 = vmax.f32 %v1156_v62, 0.0 }
 0x12f   : > { %v1328_v10 = vmax.f32 %v892_v1, 0.0  ;;  %v1392_v11 = vmax.f32 %v1148_v2, 0.0 }
 0x130   : > { %v2535_v12 = vpack.c.bf16 %v1330_v5, %v1329_v3  ;;  %v2695_v13 = vpack.c.bf16 %v1394_v6, %v1393_v4 }
 0x131   : > { %v2530_v14 = vpack.c.bf16 %v1328_v10, %v1327_v7  ;;  %v2690_v15 = vpack.c.bf16 %v1392_v11, %v1391_v9  ;;  %v2968_v16 = vpop.f32.mrb[28].mxu0  ;;  %v3032_v17 = vpop.f32.mrb[28].mxu1 }
 0x132   : > { %2799 = vst [vmem:[%s3314_s13 + $0x68] sm:$0xff] %v2535_v12   ;;  %2831 = vst [vmem:[%s3314_s13 + $0x168] sm:$0xff] %v2695_v13   ;;  %v913_v18 = vadd.f32 %v2968_v16, %v3299_v8  ;;  %v1169_v19 = vadd.f32 %v3032_v17, %v3299_v8  ;;  %v904_v20 = vpop.f32.mrb[29].mxu0  ;;  %v1160_v21 = vpop.f32.mrb[29].mxu1 }
 0x133   : > { %2798 = vst [vmem:[%s3314_s13 + $0x60] sm:$0xff] %v2530_v14   ;;  %2830 = vst [vmem:[%s3314_s13 + $0x160] sm:$0xff] %v2690_v15   ;;  %v905_v22 = vadd.f32 %v3299_v8, %v904_v20  ;;  %v1161_v23 = vadd.f32 %v3299_v8, %v1160_v21  ;;  %v2969_v24 = vpop.f32.mrb[30].mxu0  ;;  %v3033_v25 = vpop.f32.mrb[30].mxu1 }
 0x134   : > { %v916_v26 = vadd.f32 %v2969_v24, %v3299_v8  ;;  %v1172_v27 = vadd.f32 %v3033_v25, %v3299_v8  ;;  %v907_v28 = vpop.f32.mrb[31].mxu0  ;;  %v1163_v29 = vpop.f32.mrb[31].mxu1  ;;  %v1333_v32 = vmax.f32 %v913_v18, 0.0  ;;  %v1397_v33 = vmax.f32 %v1169_v19, 0.0 }
 0x135   : > { %v908_v30 = vadd.f32 %v3299_v8, %v907_v28  ;;  %v1164_v31 = vadd.f32 %v3299_v8, %v1163_v29  ;;  %v1331_v36 = vmax.f32 %v905_v22, 0.0  ;;  %v1395_v37 = vmax.f32 %v1161_v23, 0.0 }
 0x136   : > { %v1334_v34 = vmax.f32 %v916_v26, 0.0  ;;  %v1398_v35 = vmax.f32 %v1172_v27, 0.0 }
 0x137   : > { %v1332_v38 = vmax.f32 %v908_v30, 0.0  ;;  %v1396_v39 = vmax.f32 %v1164_v31, 0.0 }
 0x138   : > { %v2545_v40 = vpack.c.bf16 %v1334_v34, %v1333_v32  ;;  %v2705_v41 = vpack.c.bf16 %v1398_v35, %v1397_v33 }
 0x139   : > { %v2540_v42 = vpack.c.bf16 %v1332_v38, %v1331_v36  ;;  %v2700_v43 = vpack.c.bf16 %v1396_v39, %v1395_v37  ;;  %v2972_v44 = vpop.f32.mrb[32].mxu0  ;;  %v3036_v45 = vpop.f32.mrb[32].mxu1 }
 0x13a   : > { %2801 = vst [vmem:[%s3314_s13 + $0x78] sm:$0xff] %v2545_v40   ;;  %2833 = vst [vmem:[%s3314_s13 + $0x178] sm:$0xff] %v2705_v41   ;;  %v929_v46 = vadd.f32 %v2972_v44, %v3299_v8  ;;  %v1185_v47 = vadd.f32 %v3036_v45, %v3299_v8  ;;  %v920_v48 = vpop.f32.mrb[33].mxu0  ;;  %v1176_v49 = vpop.f32.mrb[33].mxu1 }
 0x13b   : > { %2800 = vst [vmem:[%s3314_s13 + $0x70] sm:$0xff] %v2540_v42   ;;  %2832 = vst [vmem:[%s3314_s13 + $0x170] sm:$0xff] %v2700_v43   ;;  %v921_v50 = vadd.f32 %v3299_v8, %v920_v48  ;;  %v1177_v51 = vadd.f32 %v3299_v8, %v1176_v49  ;;  %v2973_v52 = vpop.f32.mrb[34].mxu0  ;;  %v3037_v53 = vpop.f32.mrb[34].mxu1 }
 0x13c   : > { %v932_v54 = vadd.f32 %v2973_v52, %v3299_v8  ;;  %v1188_v55 = vadd.f32 %v3037_v53, %v3299_v8  ;;  %v923_v56 = vpop.f32.mrb[35].mxu0  ;;  %v1179_v57 = vpop.f32.mrb[35].mxu1  ;;  %v1337_v60 = vmax.f32 %v929_v46, 0.0  ;;  %v1401_v61 = vmax.f32 %v1185_v47, 0.0 }
 0x13d   : > { %v924_v58 = vadd.f32 %v3299_v8, %v923_v56  ;;  %v1180_v59 = vadd.f32 %v3299_v8, %v1179_v57  ;;  %v1335_v0 = vmax.f32 %v921_v50, 0.0  ;;  %v1399_v1 = vmax.f32 %v1177_v51, 0.0 }
 0x13e   : > { %v1338_v62 = vmax.f32 %v932_v54, 0.0  ;;  %v1402_v63 = vmax.f32 %v1188_v55, 0.0 }
 0x13f   : > { %v1336_v2 = vmax.f32 %v924_v58, 0.0  ;;  %v1400_v3 = vmax.f32 %v1180_v59, 0.0 }
 0x140   : > { %v2555_v4 = vpack.c.bf16 %v1338_v62, %v1337_v60  ;;  %v2715_v5 = vpack.c.bf16 %v1402_v63, %v1401_v61 }
 0x141   : > { %v2550_v6 = vpack.c.bf16 %v1336_v2, %v1335_v0  ;;  %v2710_v7 = vpack.c.bf16 %v1400_v3, %v1399_v1  ;;  %v2976_v9 = vpop.f32.mrb[36].mxu0  ;;  %v3040_v10 = vpop.f32.mrb[36].mxu1 }
 0x142   : > { %2803 = vst [vmem:[%s3314_s13 + $0x88] sm:$0xff] %v2555_v4   ;;  %2835 = vst [vmem:[%s3314_s13 + $0x188] sm:$0xff] %v2715_v5   ;;  %v945_v11 = vadd.f32 %v2976_v9, %v3299_v8  ;;  %v1201_v12 = vadd.f32 %v3040_v10, %v3299_v8  ;;  %v936_v13 = vpop.f32.mrb[37].mxu0  ;;  %v1192_v14 = vpop.f32.mrb[37].mxu1 }
 0x143   : > { %2802 = vst [vmem:[%s3314_s13 + $0x80] sm:$0xff] %v2550_v6   ;;  %2834 = vst [vmem:[%s3314_s13 + $0x180] sm:$0xff] %v2710_v7   ;;  %v937_v15 = vadd.f32 %v3299_v8, %v936_v13  ;;  %v1193_v16 = vadd.f32 %v3299_v8, %v1192_v14  ;;  %v2977_v17 = vpop.f32.mrb[38].mxu0  ;;  %v3041_v18 = vpop.f32.mrb[38].mxu1 }
 0x144   : > { %v948_v19 = vadd.f32 %v2977_v17, %v3299_v8  ;;  %v1204_v20 = vadd.f32 %v3041_v18, %v3299_v8  ;;  %v939_v21 = vpop.f32.mrb[39].mxu0  ;;  %v1195_v22 = vpop.f32.mrb[39].mxu1  ;;  %v1341_v25 = vmax.f32 %v945_v11, 0.0  ;;  %v1405_v26 = vmax.f32 %v1201_v12, 0.0 }
 0x145   : > { %v940_v23 = vadd.f32 %v3299_v8, %v939_v21  ;;  %v1196_v24 = vadd.f32 %v3299_v8, %v1195_v22  ;;  %v1339_v29 = vmax.f32 %v937_v15, 0.0  ;;  %v1403_v30 = vmax.f32 %v1193_v16, 0.0 }
 0x146   : > { %v1342_v27 = vmax.f32 %v948_v19, 0.0  ;;  %v1406_v28 = vmax.f32 %v1204_v20, 0.0 }
 0x147   : > { %v1340_v31 = vmax.f32 %v940_v23, 0.0  ;;  %v1404_v32 = vmax.f32 %v1196_v24, 0.0 }
 0x148   : > { %v2565_v33 = vpack.c.bf16 %v1342_v27, %v1341_v25  ;;  %v2725_v34 = vpack.c.bf16 %v1406_v28, %v1405_v26 }
 0x149   : > { %v2560_v35 = vpack.c.bf16 %v1340_v31, %v1339_v29  ;;  %v2720_v36 = vpack.c.bf16 %v1404_v32, %v1403_v30  ;;  %v2980_v37 = vpop.f32.mrb[40].mxu0  ;;  %v3044_v38 = vpop.f32.mrb[40].mxu1 }
 0x14a   : > { %2805 = vst [vmem:[%s3314_s13 + $0x98] sm:$0xff] %v2565_v33   ;;  %2837 = vst [vmem:[%s3314_s13 + $0x198] sm:$0xff] %v2725_v34   ;;  %v961_v39 = vadd.f32 %v2980_v37, %v3299_v8  ;;  %v1217_v40 = vadd.f32 %v3044_v38, %v3299_v8  ;;  %v952_v41 = vpop.f32.mrb[41].mxu0  ;;  %v1208_v42 = vpop.f32.mrb[41].mxu1 }
 0x14b   : > { %2804 = vst [vmem:[%s3314_s13 + $0x90] sm:$0xff] %v2560_v35   ;;  %2836 = vst [vmem:[%s3314_s13 + $0x190] sm:$0xff] %v2720_v36   ;;  %v953_v43 = vadd.f32 %v3299_v8, %v952_v41  ;;  %v1209_v44 = vadd.f32 %v3299_v8, %v1208_v42  ;;  %v2981_v45 = vpop.f32.mrb[42].mxu0  ;;  %v3045_v46 = vpop.f32.mrb[42].mxu1 }
 0x14c   : > { %v964_v47 = vadd.f32 %v2981_v45, %v3299_v8  ;;  %v1220_v48 = vadd.f32 %v3045_v46, %v3299_v8  ;;  %v955_v49 = vpop.f32.mrb[43].mxu0  ;;  %v1211_v50 = vpop.f32.mrb[43].mxu1  ;;  %v1345_v53 = vmax.f32 %v961_v39, 0.0  ;;  %v1409_v54 = vmax.f32 %v1217_v40, 0.0 }
 0x14d   : > { %v956_v51 = vadd.f32 %v3299_v8, %v955_v49  ;;  %v1212_v52 = vadd.f32 %v3299_v8, %v1211_v50  ;;  %v1343_v57 = vmax.f32 %v953_v43, 0.0  ;;  %v1407_v58 = vmax.f32 %v1209_v44, 0.0 }
 0x14e   : > { %v1346_v55 = vmax.f32 %v964_v47, 0.0  ;;  %v1410_v56 = vmax.f32 %v1220_v48, 0.0 }
 0x14f   : > { %v1344_v59 = vmax.f32 %v956_v51, 0.0  ;;  %v1408_v60 = vmax.f32 %v1212_v52, 0.0 }
 0x150   : > { %v2575_v61 = vpack.c.bf16 %v1346_v55, %v1345_v53  ;;  %v2735_v62 = vpack.c.bf16 %v1410_v56, %v1409_v54 }
 0x151   : > { %v2570_v63 = vpack.c.bf16 %v1344_v59, %v1343_v57  ;;  %v2730_v0 = vpack.c.bf16 %v1408_v60, %v1407_v58  ;;  %v2984_v1 = vpop.f32.mrb[44].mxu0  ;;  %v3048_v2 = vpop.f32.mrb[44].mxu1 }
 0x152   : > { %2807 = vst [vmem:[%s3314_s13 + $0xa8] sm:$0xff] %v2575_v61   ;;  %2839 = vst [vmem:[%s3314_s13 + $0x1a8] sm:$0xff] %v2735_v62   ;;  %v977_v3 = vadd.f32 %v2984_v1, %v3299_v8  ;;  %v1233_v4 = vadd.f32 %v3048_v2, %v3299_v8  ;;  %v968_v5 = vpop.f32.mrb[45].mxu0  ;;  %v1224_v6 = vpop.f32.mrb[45].mxu1 }
 0x153   : > { %2806 = vst [vmem:[%s3314_s13 + $0xa0] sm:$0xff] %v2570_v63   ;;  %2838 = vst [vmem:[%s3314_s13 + $0x1a0] sm:$0xff] %v2730_v0   ;;  %v969_v7 = vadd.f32 %v3299_v8, %v968_v5  ;;  %v1225_v9 = vadd.f32 %v3299_v8, %v1224_v6  ;;  %v2985_v10 = vpop.f32.mrb[46].mxu0  ;;  %v3049_v11 = vpop.f32.mrb[46].mxu1 }
 0x154   : > { %v980_v12 = vadd.f32 %v2985_v10, %v3299_v8  ;;  %v1236_v13 = vadd.f32 %v3049_v11, %v3299_v8  ;;  %v971_v14 = vpop.f32.mrb[47].mxu0  ;;  %v1227_v15 = vpop.f32.mrb[47].mxu1  ;;  %v1349_v18 = vmax.f32 %v977_v3, 0.0  ;;  %v1413_v19 = vmax.f32 %v1233_v4, 0.0 }
 0x155   : > { %v972_v16 = vadd.f32 %v3299_v8, %v971_v14  ;;  %v1228_v17 = vadd.f32 %v3299_v8, %v1227_v15  ;;  %v1347_v22 = vmax.f32 %v969_v7, 0.0  ;;  %v1411_v23 = vmax.f32 %v1225_v9, 0.0 }
 0x156   : > { %v1350_v20 = vmax.f32 %v980_v12, 0.0  ;;  %v1414_v21 = vmax.f32 %v1236_v13, 0.0 }
 0x157   : > { %v1348_v24 = vmax.f32 %v972_v16, 0.0  ;;  %v1412_v25 = vmax.f32 %v1228_v17, 0.0 }
 0x158   : > { %v2585_v26 = vpack.c.bf16 %v1350_v20, %v1349_v18  ;;  %v2745_v27 = vpack.c.bf16 %v1414_v21, %v1413_v19 }
 0x159   : > { %v2580_v28 = vpack.c.bf16 %v1348_v24, %v1347_v22  ;;  %v2740_v29 = vpack.c.bf16 %v1412_v25, %v1411_v23  ;;  %v2988_v30 = vpop.f32.mrb[48].mxu0  ;;  %v3052_v31 = vpop.f32.mrb[48].mxu1 }
 0x15a   : > { %2809 = vst [vmem:[%s3314_s13 + $0xb8] sm:$0xff] %v2585_v26   ;;  %2841 = vst [vmem:[%s3314_s13 + $0x1b8] sm:$0xff] %v2745_v27   ;;  %v993_v32 = vadd.f32 %v2988_v30, %v3299_v8  ;;  %v1249_v33 = vadd.f32 %v3052_v31, %v3299_v8  ;;  %v984_v34 = vpop.f32.mrb[49].mxu0  ;;  %v1240_v35 = vpop.f32.mrb[49].mxu1 }
 0x15b   : > { %2808 = vst [vmem:[%s3314_s13 + $0xb0] sm:$0xff] %v2580_v28   ;;  %2840 = vst [vmem:[%s3314_s13 + $0x1b0] sm:$0xff] %v2740_v29   ;;  %v985_v36 = vadd.f32 %v3299_v8, %v984_v34  ;;  %v1241_v37 = vadd.f32 %v3299_v8, %v1240_v35  ;;  %v2989_v38 = vpop.f32.mrb[50].mxu0  ;;  %v3053_v39 = vpop.f32.mrb[50].mxu1 }
 0x15c   : > { %v996_v40 = vadd.f32 %v2989_v38, %v3299_v8  ;;  %v1252_v41 = vadd.f32 %v3053_v39, %v3299_v8  ;;  %v987_v42 = vpop.f32.mrb[51].mxu0  ;;  %v1243_v43 = vpop.f32.mrb[51].mxu1  ;;  %v1353_v46 = vmax.f32 %v993_v32, 0.0  ;;  %v1417_v47 = vmax.f32 %v1249_v33, 0.0 }
 0x15d   : > { %v988_v44 = vadd.f32 %v3299_v8, %v987_v42  ;;  %v1244_v45 = vadd.f32 %v3299_v8, %v1243_v43  ;;  %v1351_v50 = vmax.f32 %v985_v36, 0.0  ;;  %v1415_v51 = vmax.f32 %v1241_v37, 0.0 }
 0x15e   : > { %v1354_v48 = vmax.f32 %v996_v40, 0.0  ;;  %v1418_v49 = vmax.f32 %v1252_v41, 0.0 }
 0x15f   : > { %v1352_v52 = vmax.f32 %v988_v44, 0.0  ;;  %v1416_v53 = vmax.f32 %v1244_v45, 0.0 }
 0x160   : > { %v2595_v54 = vpack.c.bf16 %v1354_v48, %v1353_v46  ;;  %v2755_v55 = vpack.c.bf16 %v1418_v49, %v1417_v47 }
 0x161   : > { %v2590_v56 = vpack.c.bf16 %v1352_v52, %v1351_v50  ;;  %v2750_v57 = vpack.c.bf16 %v1416_v53, %v1415_v51  ;;  %v2992_v58 = vpop.f32.mrb[52].mxu0  ;;  %v3056_v59 = vpop.f32.mrb[52].mxu1 }
 0x162   : > { %2811 = vst [vmem:[%s3314_s13 + $0xc8] sm:$0xff] %v2595_v54   ;;  %2843 = vst [vmem:[%s3314_s13 + $0x1c8] sm:$0xff] %v2755_v55   ;;  %v1009_v60 = vadd.f32 %v2992_v58, %v3299_v8  ;;  %v1265_v61 = vadd.f32 %v3056_v59, %v3299_v8  ;;  %v1000_v62 = vpop.f32.mrb[53].mxu0  ;;  %v1256_v63 = vpop.f32.mrb[53].mxu1 }
 0x163   : > { %2810 = vst [vmem:[%s3314_s13 + $0xc0] sm:$0xff] %v2590_v56   ;;  %2842 = vst [vmem:[%s3314_s13 + $0x1c0] sm:$0xff] %v2750_v57   ;;  %v1001_v0 = vadd.f32 %v3299_v8, %v1000_v62  ;;  %v1257_v1 = vadd.f32 %v3299_v8, %v1256_v63  ;;  %v2993_v2 = vpop.f32.mrb[54].mxu0  ;;  %v3057_v3 = vpop.f32.mrb[54].mxu1 }
 0x164   : > { %v1012_v4 = vadd.f32 %v2993_v2, %v3299_v8  ;;  %v1268_v5 = vadd.f32 %v3057_v3, %v3299_v8  ;;  %v1003_v6 = vpop.f32.mrb[55].mxu0  ;;  %v1259_v7 = vpop.f32.mrb[55].mxu1  ;;  %v1357_v11 = vmax.f32 %v1009_v60, 0.0  ;;  %v1421_v12 = vmax.f32 %v1265_v61, 0.0 }
 0x165   : > { %v1004_v9 = vadd.f32 %v3299_v8, %v1003_v6  ;;  %v1260_v10 = vadd.f32 %v3299_v8, %v1259_v7  ;;  %v1355_v15 = vmax.f32 %v1001_v0, 0.0  ;;  %v1419_v16 = vmax.f32 %v1257_v1, 0.0 }
 0x166   : > { %v1358_v13 = vmax.f32 %v1012_v4, 0.0  ;;  %v1422_v14 = vmax.f32 %v1268_v5, 0.0 }
 0x167   : > { %v1356_v17 = vmax.f32 %v1004_v9, 0.0  ;;  %v1420_v18 = vmax.f32 %v1260_v10, 0.0 }
 0x168   : > { %v2605_v19 = vpack.c.bf16 %v1358_v13, %v1357_v11  ;;  %v2765_v20 = vpack.c.bf16 %v1422_v14, %v1421_v12 }
 0x169   : > { %v2600_v21 = vpack.c.bf16 %v1356_v17, %v1355_v15  ;;  %v2760_v22 = vpack.c.bf16 %v1420_v18, %v1419_v16  ;;  %v2996_v23 = vpop.f32.mrb[56].mxu0  ;;  %v3060_v24 = vpop.f32.mrb[56].mxu1 }
 0x16a   : > { %2813 = vst [vmem:[%s3314_s13 + $0xd8] sm:$0xff] %v2605_v19   ;;  %2845 = vst [vmem:[%s3314_s13 + $0x1d8] sm:$0xff] %v2765_v20   ;;  %v1025_v25 = vadd.f32 %v2996_v23, %v3299_v8  ;;  %v1281_v26 = vadd.f32 %v3060_v24, %v3299_v8  ;;  %v1016_v27 = vpop.f32.mrb[57].mxu0  ;;  %v1272_v28 = vpop.f32.mrb[57].mxu1 }
 0x16b   : > { %2812 = vst [vmem:[%s3314_s13 + $0xd0] sm:$0xff] %v2600_v21   ;;  %2844 = vst [vmem:[%s3314_s13 + $0x1d0] sm:$0xff] %v2760_v22   ;;  %v1017_v29 = vadd.f32 %v3299_v8, %v1016_v27  ;;  %v1273_v30 = vadd.f32 %v3299_v8, %v1272_v28  ;;  %v2997_v31 = vpop.f32.mrb[58].mxu0  ;;  %v3061_v32 = vpop.f32.mrb[58].mxu1 }
 0x16c   : > { %v1028_v33 = vadd.f32 %v2997_v31, %v3299_v8  ;;  %v1284_v34 = vadd.f32 %v3061_v32, %v3299_v8  ;;  %v1019_v35 = vpop.f32.mrb[59].mxu0  ;;  %v1275_v36 = vpop.f32.mrb[59].mxu1  ;;  %v1361_v39 = vmax.f32 %v1025_v25, 0.0  ;;  %v1425_v40 = vmax.f32 %v1281_v26, 0.0 }
 0x16d   : > { %v1020_v37 = vadd.f32 %v3299_v8, %v1019_v35  ;;  %v1276_v38 = vadd.f32 %v3299_v8, %v1275_v36  ;;  %v1359_v43 = vmax.f32 %v1017_v29, 0.0  ;;  %v1423_v44 = vmax.f32 %v1273_v30, 0.0 }
 0x16e   : > { %v1362_v41 = vmax.f32 %v1028_v33, 0.0  ;;  %v1426_v42 = vmax.f32 %v1284_v34, 0.0 }
 0x16f   : > { %v1360_v45 = vmax.f32 %v1020_v37, 0.0  ;;  %v1424_v46 = vmax.f32 %v1276_v38, 0.0 }
 0x170   : > { %v2615_v47 = vpack.c.bf16 %v1362_v41, %v1361_v39  ;;  %v2775_v48 = vpack.c.bf16 %v1426_v42, %v1425_v40 }
 0x171   : > { %v2610_v49 = vpack.c.bf16 %v1360_v45, %v1359_v43  ;;  %v2770_v50 = vpack.c.bf16 %v1424_v46, %v1423_v44  ;;  %v3000_v51 = vpop.f32.mrb[60].mxu0  ;;  %v3064_v52 = vpop.f32.mrb[60].mxu1 }
 0x172   : > { %2815 = vst [vmem:[%s3314_s13 + $0xe8] sm:$0xff] %v2615_v47   ;;  %2847 = vst [vmem:[%s3314_s13 + $0x1e8] sm:$0xff] %v2775_v48   ;;  %v1041_v53 = vadd.f32 %v3000_v51, %v3299_v8  ;;  %v1297_v54 = vadd.f32 %v3064_v52, %v3299_v8  ;;  %v1032_v55 = vpop.f32.mrb[61].mxu0  ;;  %v1288_v56 = vpop.f32.mrb[61].mxu1 }
 0x173   : > { %2814 = vst [vmem:[%s3314_s13 + $0xe0] sm:$0xff] %v2610_v49   ;;  %2846 = vst [vmem:[%s3314_s13 + $0x1e0] sm:$0xff] %v2770_v50   ;;  %v1033_v57 = vadd.f32 %v3299_v8, %v1032_v55  ;;  %v1289_v58 = vadd.f32 %v3299_v8, %v1288_v56  ;;  %v3001_v59 = vpop.f32.mrb[62].mxu0  ;;  %v3065_v60 = vpop.f32.mrb[62].mxu1 }
 0x174   : > { %v1044_v61 = vadd.f32 %v3001_v59, %v3299_v8  ;;  %v1300_v62 = vadd.f32 %v3065_v60, %v3299_v8  ;;  %v1035_v63 = vpop.f32.mrb[63].mxu0  ;;  %v1291_v0 = vpop.f32.mrb[63].mxu1  ;;  %v1365_v3 = vmax.f32 %v1041_v53, 0.0  ;;  %v1429_v4 = vmax.f32 %v1297_v54, 0.0 }
 0x175   : > { %v1036_v1 = vadd.f32 %v3299_v8, %v1035_v63  ;;  %v1292_v2 = vadd.f32 %v3299_v8, %v1291_v0  ;;  %v1363_v7 = vmax.f32 %v1033_v57, 0.0  ;;  %v1427_v9 = vmax.f32 %v1289_v58, 0.0 }
 0x176   : > { %v1366_v5 = vmax.f32 %v1044_v61, 0.0  ;;  %v1430_v6 = vmax.f32 %v1300_v62, 0.0 }
 0x177   : > { %v1364_v10 = vmax.f32 %v1036_v1, 0.0  ;;  %v1428_v11 = vmax.f32 %v1292_v2, 0.0 }
 0x178   : > { %v2625_v12 = vpack.c.bf16 %v1366_v5, %v1365_v3  ;;  %v2785_v13 = vpack.c.bf16 %v1430_v6, %v1429_v4 }
 0x179   : > { %v2620_v14 = vpack.c.bf16 %v1364_v10, %v1363_v7  ;;  %v2780_v15 = vpack.c.bf16 %v1428_v11, %v1427_v9 }
 0x17a   : > { %2817 = vst [vmem:[%s3314_s13 + $0xf8] sm:$0xff] %v2625_v12   ;;  %2849 = vst [vmem:[%s3314_s13 + $0x1f8] sm:$0xff] %v2785_v13  }
 0x17b   : > { %2816 = vst [vmem:[%s3314_s13 + $0xf0] sm:$0xff] %v2620_v14   ;;  %2848 = vst [vmem:[%s3314_s13 + $0x1f0] sm:$0xff] %v2780_v15  }
 0x17c PF: > { %s13_s12 = sadd.s32 1, %s3168_s12  }
 0x17d   : > { %p10_p4 = scmp.ge.s32.totalorder %s13_s12, 4  }
 0x17f   :  { %12 = sbr.rel (!%p10_p4) target bundleno = 1 (0x1), region = 62 }

// kernel: rho_betavae_forward.10
= control target key start
LH: loop header
LB: loop body
LE: loop exit
PB: predicated region body
PF: predicated region fallthrough
CT: control target
= control target key end

     0   :  { %s2052_s12 = smov 0   ;;  %s2292_s0 = inlined_call_operand.vmem [shape: bf16[512,512], index: 0, kind: input, shape index: {}]   ;;  %s2293_s1 = inlined_call_operand.vmem [shape: bf16[512,128], index: 1, kind: input, shape index: {}]   ;;  %s2294_s2 = inlined_call_operand.vmem [shape: f32[1,128], index: 2, kind: input, shape index: {}]   ;;  %s2295_s3 = inlined_call_operand.vmem [shape: bf16[512,128], index: 3, kind: output, shape index: {}]  }
   0x1 LB: > { %s1395_s13 = sadd.s32 4294967295, %s2030_s12   ;;  %p1399_p0 = scmp.ge.s32.totalorder %s2030_s12, 1  ;;  %s2030_s12 = sphi %s2052_s12, %s13_s12  }
   0x2   : > { %p139_p1 = scmp.lt.s32.totalorder %s2030_s12, 3 }
   0x4   : > { %p140_p2 = pnand %p1399_p0, %p139_p1 }
   0x5   : > { %v1896_v0 = vld [vmem:[%s2293_s1 + $0x40] sm:$0xff] (!%p140_p2)   ;;  %v1900_v4 = vld [vmem:[%s2293_s1 + $0x48] sm:$0xff] (!%p140_p2)   ;;  %v1904_v8 = vld [vmem:[%s2293_s1 + $0x50] sm:$0xff] (!%p140_p2)   ;;  %s1400_s21 = sshll.u32 (!%p140_p2), %s1395_s13, 5 }
   0x6   : > { %143 = sbr.rel (%p140_p2) target bundleno = 385 (0x181), region = 32  ;;  %v1897_v1 = vld [vmem:[%s2293_s1 + $0xc0] sm:$0xff] (!%p140_p2)   ;;  %1664 = vmatprep.subr.bf16.mxu0 (!%p140_p2), %v1896_v0  ;;  %v1901_v5 = vld [vmem:[%s2293_s1 + $0xc8] sm:$0xff] (!%p140_p2)   ;;  %v1905_v9 = vld [vmem:[%s2293_s1 + $0xd0] sm:$0xff] (!%p140_p2)   ;;  %p165_p3 = scmp.lt.s32.totalorder (!%p140_p2), %s1400_s21, 63 }
   0x7   : > { %v1898_v2 = vld [vmem:[%s2293_s1] sm:$0xff] (!%p140_p2)   ;;  %1776 = vmatprep.subr.bf16.mxu1 (!%p140_p2), %v1897_v1  ;;  %v1902_v6 = vld [vmem:[%s2293_s1 + $0x8] sm:$0xff] (!%p140_p2)   ;;  %v1906_v10 = vld [vmem:[%s2293_s1 + $0x10] sm:$0xff] (!%p140_p2)  }
   0x8   : > { %v1899_v3 = vld [vmem:[%s2293_s1 + $0x80] sm:$0xff] (!%p140_p2)   ;;  %1665 = vmatpush3.bf16.msra.mxu0 (!%p140_p2), %v1898_v2  ;;  %v1903_v7 = vld [vmem:[%s2293_s1 + $0x88] sm:$0xff] (!%p140_p2)   ;;  %v1907_v11 = vld [vmem:[%s2293_s1 + $0x90] sm:$0xff] (!%p140_p2)  }
   0x9   : > { %1777 = vmatpush3.bf16.msra.mxu1 (!%p140_p2), %v1899_v3  ;;  %1666 = vmatprep.subr.bf16.mxu0 (!%p140_p2), %v1900_v4  ;;  %v1908_v12 = vld [vmem:[%s2293_s1 + $0x58] sm:$0xff] (!%p140_p2)   ;;  %v1912_v16 = vld [vmem:[%s2293_s1 + $0x60] sm:$0xff] (!%p140_p2)   ;;  %v1916_v20 = vld [vmem:[%s2293_s1 + $0x68] sm:$0xff] (!%p140_p2)  }
   0xa   : > { %1778 = vmatprep.subr.bf16.mxu1 (!%p140_p2), %v1901_v5  ;;  %v1909_v13 = vld [vmem:[%s2293_s1 + $0xd8] sm:$0xff] (!%p140_p2)   ;;  %v1913_v17 = vld [vmem:[%s2293_s1 + $0xe0] sm:$0xff] (!%p140_p2)   ;;  %v1917_v21 = vld [vmem:[%s2293_s1 + $0xe8] sm:$0xff] (!%p140_p2)  }
   0xb   : > { %v1910_v14 = vld [vmem:[%s2293_s1 + $0x18] sm:$0xff] (!%p140_p2)   ;;  %v1914_v18 = vld [vmem:[%s2293_s1 + $0x20] sm:$0xff] (!%p140_p2)   ;;  %v1918_v22 = vld [vmem:[%s2293_s1 + $0x28] sm:$0xff] (!%p140_p2)  }
   0xc   : > { %1667 = vmatpush3.bf16.msra.mxu0 (!%p140_p2), %v1902_v6  ;;  %v1911_v15 = vld [vmem:[%s2293_s1 + $0x98] sm:$0xff] (!%p140_p2)   ;;  %v1915_v19 = vld [vmem:[%s2293_s1 + $0xa0] sm:$0xff] (!%p140_p2)   ;;  %v1919_v23 = vld [vmem:[%s2293_s1 + $0xa8] sm:$0xff] (!%p140_p2)  }
   0xd   : > { %1779 = vmatpush3.bf16.msra.mxu1 %v1903_v7  ;;  %1668 = vmatprep.subr.bf16.mxu0 %v1904_v8  ;;  %s2297_s21 = smov (!%p165_p3, %s1400_s21), 63  ;;  %v1920_v24 = vld [vmem:[%s2293_s1 + $0x70] sm:$0xff]   ;;  %v1924_v28 = vld [vmem:[%s2293_s1 + $0x78] sm:$0xff]  }
   0xe   : > { %1780 = vmatprep.subr.bf16.mxu1 %v1905_v9  ;;  %v1921_v25 = vld [vmem:[%s2293_s1 + $0xf0] sm:$0xff]   ;;  %s1536_s18 = sshll.u32 %s2297_s21, 4  ;;  %v1925_v29 = vld [vmem:[%s2293_s1 + $0xf8] sm:$0xff]   ;;  %s1404_s7 = sshll.u32 %s2297_s21, 2 }
   0xf   : > { %v1922_v26 = vld [vmem:[%s2293_s1 + $0x30] sm:$0xff]   ;;  %s2158_s28 = scalar_lea.vmem %s2292_s0, %s1536_s18  ;;  %v1926_v30 = vld [vmem:[%s2293_s1 + $0x38] sm:$0xff]   ;;  %s2241_s10 = scalar_lea.vmem %s2295_s3, %s1404_s7 }
  0x10   : > { %1669 = vmatpush3.bf16.msra.mxu0 %v1906_v10  ;;  %v1923_v27 = vld [vmem:[%s2293_s1 + $0xb0] sm:$0xff]   ;;  %v1927_v31 = vld [vmem:[%s2293_s1 + $0xb8] sm:$0xff]  }
  0x11   : > { %1781 = vmatpush3.bf16.msra.mxu1 %v1907_v11  ;;  %1670 = vmatprep.subr.bf16.mxu0 %v1908_v12  ;;  %v1928_v32 = vld [vmem:[%s2158_s28] ss:$16 sps:$4 sm:$0xff]   ;;  %v1930_v33 = vld [vmem:[%s2158_s28 + $0x4] ss:$16 sps:$4 sm:$0xff]   ;;  %v1931_v34 = vld [vmem:[%s2158_s28 + $0x8] ss:$16 sps:$4 sm:$0xff]  }
  0x12   : > { %1782 = vmatprep.subr.bf16.mxu1 %v1909_v13  ;;  %v1933_v35 = vld [vmem:[%s2158_s28 + $0xc] ss:$16 sps:$4 sm:$0xff]   ;;  %857 = vmatprep.mubr.bf16.mxu0 %v1930_v33  ;;  %v1934_v36 = vld [vmem:[%s2158_s28 + $0x24] ss:$16 sps:$4 sm:$0xff]   ;;  %v1938_v38 = vld [vmem:[%s2158_s28 + $0x20] ss:$16 sps:$4 sm:$0xff]  }
  0x13   : > { %1018 = vmatprep.mubr.bf16.mxu1 %v1933_v35  ;;  %v1936_v37 = vld [vmem:[%s2158_s28 + $0x2c] ss:$16 sps:$4 sm:$0xff]   ;;  %v1939_v39 = vld [vmem:[%s2158_s28 + $0x28] ss:$16 sps:$4 sm:$0xff]   ;;  %v1940_v40 = vld [vmem:[%s2158_s28 + $0x44] ss:$16 sps:$4 sm:$0xff]  }
  0x14   : > { %1671 = vmatpush3.bf16.msra.mxu0 %v1910_v14  ;;  %v1942_v41 = vld [vmem:[%s2158_s28 + $0x4c] ss:$16 sps:$4 sm:$0xff]   ;;  %v1944_v42 = vld [vmem:[%s2158_s28 + $0x40] ss:$16 sps:$4 sm:$0xff]   ;;  %v1945_v43 = vld [vmem:[%s2158_s28 + $0x48] ss:$16 sps:$4 sm:$0xff]  }
  0x15   : > { %1783 = vmatpush3.bf16.msra.mxu1 %v1911_v15  ;;  %1672 = vmatprep.subr.bf16.mxu0 %v1912_v16  ;;  %v1946_v44 = vld [vmem:[%s2158_s28 + $0x64] ss:$16 sps:$4 sm:$0xff]   ;;  %v1948_v45 = vld [vmem:[%s2158_s28 + $0x6c] ss:$16 sps:$4 sm:$0xff]   ;;  %v1950_v46 = vld [vmem:[%s2158_s28 + $0x60] ss:$16 sps:$4 sm:$0xff]  }
  0x16   : > { %1784 = vmatprep.subr.bf16.mxu1 %v1913_v17  ;;  %v1951_v47 = vld [vmem:[%s2158_s28 + $0x68] ss:$16 sps:$4 sm:$0xff]   ;;  %v1952_v48 = vld [vmem:[%s2158_s28 + $0x84] ss:$16 sps:$4 sm:$0xff]   ;;  %v1954_v49 = vld [vmem:[%s2158_s28 + $0x8c] ss:$16 sps:$4 sm:$0xff]  }
  0x17   : > { %v1956_v50 = vld [vmem:[%s2158_s28 + $0x80] ss:$16 sps:$4 sm:$0xff]   ;;  %v1957_v51 = vld [vmem:[%s2158_s28 + $0x88] ss:$16 sps:$4 sm:$0xff]   ;;  %v1958_v52 = vld [vmem:[%s2158_s28 + $0xa4] ss:$16 sps:$4 sm:$0xff]  }
  0x18   : > { %1673 = vmatpush3.bf16.msra.mxu0 %v1914_v18  ;;  %v1960_v53 = vld [vmem:[%s2158_s28 + $0xac] ss:$16 sps:$4 sm:$0xff]   ;;  %v1962_v54 = vld [vmem:[%s2158_s28 + $0xa0] ss:$16 sps:$4 sm:$0xff]   ;;  %v1963_v55 = vld [vmem:[%s2158_s28 + $0xa8] ss:$16 sps:$4 sm:$0xff]  }
  0x19   : > { %1785 = vmatpush3.bf16.msra.mxu1 %v1915_v19  ;;  %1674 = vmatprep.subr.bf16.mxu0 %v1916_v20  ;;  %v1964_v56 = vld [vmem:[%s2158_s28 + $0xc4] ss:$16 sps:$4 sm:$0xff]   ;;  %v1966_v57 = vld [vmem:[%s2158_s28 + $0xcc] ss:$16 sps:$4 sm:$0xff]   ;;  %v1968_v58 = vld [vmem:[%s2158_s28 + $0xc0] ss:$16 sps:$4 sm:$0xff]  }
  0x1a   : > { %1786 = vmatprep.subr.bf16.mxu1 %v1917_v21  ;;  %v1969_v59 = vld [vmem:[%s2158_s28 + $0xc8] ss:$16 sps:$4 sm:$0xff]   ;;  %v1970_v60 = vld [vmem:[%s2158_s28 + $0xe4] ss:$16 sps:$4 sm:$0xff]   ;;  %v1972_v61 = vld [vmem:[%s2158_s28 + $0xec] ss:$16 sps:$4 sm:$0xff]  }
  0x1b   : > { %v1974_v62 = vld [vmem:[%s2158_s28 + $0xe0] ss:$16 sps:$4 sm:$0xff]   ;;  %v1975_v63 = vld [vmem:[%s2158_s28 + $0xe8] ss:$16 sps:$4 sm:$0xff]   ;;  %v1976_v0 = vld [vmem:[%s2158_s28 + $0x104] ss:$16 sps:$4 sm:$0xff]  }
  0x1c   : > { %1675 = vmatpush3.bf16.msra.mxu0 %v1918_v22  ;;  %v1978_v1 = vld [vmem:[%s2158_s28 + $0x10c] ss:$16 sps:$4 sm:$0xff]   ;;  %v1980_v2 = vld [vmem:[%s2158_s28 + $0x100] ss:$16 sps:$4 sm:$0xff]   ;;  %v1981_v3 = vld [vmem:[%s2158_s28 + $0x108] ss:$16 sps:$4 sm:$0xff]  }
  0x1d   : > { %1787 = vmatpush3.bf16.msra.mxu1 %v1919_v23  ;;  %1676 = vmatprep.subr.bf16.mxu0 %v1920_v24  ;;  %v1982_v4 = vld [vmem:[%s2158_s28 + $0x124] ss:$16 sps:$4 sm:$0xff]   ;;  %v1984_v5 = vld [vmem:[%s2158_s28 + $0x12c] ss:$16 sps:$4 sm:$0xff]   ;;  %v1986_v6 = vld [vmem:[%s2158_s28 + $0x120] ss:$16 sps:$4 sm:$0xff]  }
  0x1e   : > { %1788 = vmatprep.subr.bf16.mxu1 %v1921_v25  ;;  %v1987_v7 = vld [vmem:[%s2158_s28 + $0x128] ss:$16 sps:$4 sm:$0xff]   ;;  %v1988_v8 = vld [vmem:[%s2158_s28 + $0x144] ss:$16 sps:$4 sm:$0xff]   ;;  %v1990_v9 = vld [vmem:[%s2158_s28 + $0x14c] ss:$16 sps:$4 sm:$0xff]  }
  0x1f   : > { %v1992_v10 = vld [vmem:[%s2158_s28 + $0x140] ss:$16 sps:$4 sm:$0xff]   ;;  %v1993_v11 = vld [vmem:[%s2158_s28 + $0x148] ss:$16 sps:$4 sm:$0xff]   ;;  %v1994_v12 = vld [vmem:[%s2158_s28 + $0x164] ss:$16 sps:$4 sm:$0xff]  }
  0x20   : > { %1677 = vmatpush3.bf16.msra.mxu0 %v1922_v26  ;;  %v1996_v13 = vld [vmem:[%s2158_s28 + $0x16c] ss:$16 sps:$4 sm:$0xff]   ;;  %v1998_v14 = vld [vmem:[%s2158_s28 + $0x160] ss:$16 sps:$4 sm:$0xff]   ;;  %v1999_v15 = vld [vmem:[%s2158_s28 + $0x168] ss:$16 sps:$4 sm:$0xff]  }
  0x21   : > { %1789 = vmatpush3.bf16.msra.mxu1 %v1923_v27  ;;  %1678 = vmatprep.subr.bf16.mxu0 %v1924_v28  ;;  %v2000_v16 = vld [vmem:[%s2158_s28 + $0x184] ss:$16 sps:$4 sm:$0xff]   ;;  %v2002_v17 = vld [vmem:[%s2158_s28 + $0x18c] ss:$16 sps:$4 sm:$0xff]   ;;  %v2004_v18 = vld [vmem:[%s2158_s28 + $0x180] ss:$16 sps:$4 sm:$0xff]  }
  0x22   : > { %1790 = vmatprep.subr.bf16.mxu1 %v1925_v29  ;;  %v2005_v19 = vld [vmem:[%s2158_s28 + $0x188] ss:$16 sps:$4 sm:$0xff]   ;;  %v2006_v20 = vld [vmem:[%s2158_s28 + $0x1a4] ss:$16 sps:$4 sm:$0xff]   ;;  %v2008_v21 = vld [vmem:[%s2158_s28 + $0x1ac] ss:$16 sps:$4 sm:$0xff]  }
  0x23   : > { %v2010_v22 = vld [vmem:[%s2158_s28 + $0x1a0] ss:$16 sps:$4 sm:$0xff]   ;;  %v2011_v23 = vld [vmem:[%s2158_s28 + $0x1a8] ss:$16 sps:$4 sm:$0xff]   ;;  %v2012_v24 = vld [vmem:[%s2158_s28 + $0x1c4] ss:$16 sps:$4 sm:$0xff]  }
  0x24   : > { %1679 = vmatpush3.bf16.msra.mxu0 %v1926_v30  ;;  %v2014_v25 = vld [vmem:[%s2158_s28 + $0x1cc] ss:$16 sps:$4 sm:$0xff]   ;;  %v2016_v26 = vld [vmem:[%s2158_s28 + $0x1c0] ss:$16 sps:$4 sm:$0xff]   ;;  %v2017_v27 = vld [vmem:[%s2158_s28 + $0x1c8] ss:$16 sps:$4 sm:$0xff]  }
  0x25   : > { %1791 = vmatpush3.bf16.msra.mxu1 %v1927_v31  ;;  %v2018_v28 = vld [vmem:[%s2158_s28 + $0x1e4] ss:$16 sps:$4 sm:$0xff]   ;;  %v2020_v29 = vld [vmem:[%s2158_s28 + $0x1ec] ss:$16 sps:$4 sm:$0xff]   ;;  %v2022_v30 = vld [vmem:[%s2158_s28 + $0x1e0] ss:$16 sps:$4 sm:$0xff]  }
  0x26   : > { %v2023_v31 = vld [vmem:[%s2158_s28 + $0x1e8] ss:$16 sps:$4 sm:$0xff]  }
  0x27   : > { %858 = vmatmul.mubr.bf16.vlgmr.msra.gmra.mrb[0].mxu0 %v1928_v32 }
  0x28   : > { %1019 = vmatmul.mubr.bf16.vlgmr.msra.gmra.mrb[0].mxu1 %v1931_v34  ;;  %865 = vmatprep.mubr.bf16.mxu0 %v1934_v36  ;;  %v2233_v34 = vld [vmem:[%s2294_s2] ss:$0 sm:$0xff] }
  0x29   : > { %1026 = vmatprep.mubr.bf16.mxu1 %v1936_v37 }
  0x2f   : > { %866 = vmatmul.mubr.bf16.gmra.mrb[4].mxu0 %v1938_v38 }
  0x30   : > { %1027 = vmatmul.mubr.bf16.gmra.mrb[4].mxu1 %v1939_v39  ;;  %873 = vmatprep.mubr.bf16.mxu0 %v1940_v40 }
  0x31   : > { %1034 = vmatprep.mubr.bf16.mxu1 %v1942_v41 }
  0x37   : > { %874 = vmatmul.mubr.bf16.gmra.mrb[8].mxu0 %v1944_v42 }
  0x38   : > { %1035 = vmatmul.mubr.bf16.gmra.mrb[8].mxu1 %v1945_v43  ;;  %881 = vmatprep.mubr.bf16.mxu0 %v1946_v44 }
  0x39   : > { %1042 = vmatprep.mubr.bf16.mxu1 %v1948_v45 }
  0x3f   : > { %882 = vmatmul.mubr.bf16.gmra.mrb[12].mxu0 %v1950_v46 }
  0x40   : > { %1043 = vmatmul.mubr.bf16.gmra.mrb[12].mxu1 %v1951_v47  ;;  %889 = vmatprep.mubr.bf16.mxu0 %v1952_v48 }
  0x41   : > { %1050 = vmatprep.mubr.bf16.mxu1 %v1954_v49 }
  0x47   : > { %890 = vmatmul.mubr.bf16.gmra.mrb[16].mxu0 %v1956_v50 }
  0x48   : > { %1051 = vmatmul.mubr.bf16.gmra.mrb[16].mxu1 %v1957_v51  ;;  %897 = vmatprep.mubr.bf16.mxu0 %v1958_v52 }
  0x49   : > { %1058 = vmatprep.mubr.bf16.mxu1 %v1960_v53 }
  0x4f   : > { %898 = vmatmul.mubr.bf16.gmra.mrb[20].mxu0 %v1962_v54 }
  0x50   : > { %1059 = vmatmul.mubr.bf16.gmra.mrb[20].mxu1 %v1963_v55  ;;  %905 = vmatprep.mubr.bf16.mxu0 %v1964_v56 }
  0x51   : > { %1066 = vmatprep.mubr.bf16.mxu1 %v1966_v57 }
  0x57   : > { %906 = vmatmul.mubr.bf16.gmra.mrb[24].mxu0 %v1968_v58 }
  0x58   : > { %1067 = vmatmul.mubr.bf16.gmra.mrb[24].mxu1 %v1969_v59  ;;  %913 = vmatprep.mubr.bf16.mxu0 %v1970_v60 }
  0x59   : > { %1074 = vmatprep.mubr.bf16.mxu1 %v1972_v61 }
  0x5f   : > { %914 = vmatmul.mubr.bf16.gmra.mrb[28].mxu0 %v1974_v62 }
  0x60   : > { %1075 = vmatmul.mubr.bf16.gmra.mrb[28].mxu1 %v1975_v63  ;;  %921 = vmatprep.mubr.bf16.mxu0 %v1976_v0 }
  0x61   : > { %1082 = vmatprep.mubr.bf16.mxu1 %v1978_v1 }
  0x67   : > { %922 = vmatmul.mubr.bf16.gmra.mrb[32].mxu0 %v1980_v2 }
  0x68   : > { %1083 = vmatmul.mubr.bf16.gmra.mrb[32].mxu1 %v1981_v3  ;;  %929 = vmatprep.mubr.bf16.mxu0 %v1982_v4 }
  0x69   : > { %1090 = vmatprep.mubr.bf16.mxu1 %v1984_v5 }
  0x6f   : > { %930 = vmatmul.mubr.bf16.gmra.mrb[36].mxu0 %v1986_v6 }
  0x70   : > { %1091 = vmatmul.mubr.bf16.gmra.mrb[36].mxu1 %v1987_v7  ;;  %937 = vmatprep.mubr.bf16.mxu0 %v1988_v8 }
  0x71   : > { %1098 = vmatprep.mubr.bf16.mxu1 %v1990_v9 }
  0x77   : > { %938 = vmatmul.mubr.bf16.gmra.mrb[40].mxu0 %v1992_v10 }
  0x78   : > { %1099 = vmatmul.mubr.bf16.gmra.mrb[40].mxu1 %v1993_v11  ;;  %945 = vmatprep.mubr.bf16.mxu0 %v1994_v12 }
  0x79   : > { %1106 = vmatprep.mubr.bf16.mxu1 %v1996_v13 }
  0x7f   : > { %946 = vmatmul.mubr.bf16.gmra.mrb[44].mxu0 %v1998_v14 }
  0x80   : > { %1107 = vmatmul.mubr.bf16.gmra.mrb[44].mxu1 %v1999_v15  ;;  %953 = vmatprep.mubr.bf16.mxu0 %v2000_v16 }
  0x81   : > { %1114 = vmatprep.mubr.bf16.mxu1 %v2002_v17 }
  0x87   : > { %954 = vmatmul.mubr.bf16.gmra.mrb[48].mxu0 %v2004_v18 }
  0x88   : > { %1115 = vmatmul.mubr.bf16.gmra.mrb[48].mxu1 %v2005_v19  ;;  %961 = vmatprep.mubr.bf16.mxu0 %v2006_v20 }
  0x89   : > { %1122 = vmatprep.mubr.bf16.mxu1 %v2008_v21 }
  0x8f   : > { %962 = vmatmul.mubr.bf16.gmra.mrb[52].mxu0 %v2010_v22 }
  0x90   : > { %1123 = vmatmul.mubr.bf16.gmra.mrb[52].mxu1 %v2011_v23  ;;  %969 = vmatprep.mubr.bf16.mxu0 %v2012_v24 }
  0x91   : > { %1130 = vmatprep.mubr.bf16.mxu1 %v2014_v25 }
  0x97   : > { %970 = vmatmul.mubr.bf16.gmra.mrb[56].mxu0 %v2016_v26 }
  0x98   : > { %1131 = vmatmul.mubr.bf16.gmra.mrb[56].mxu1 %v2017_v27  ;;  %977 = vmatprep.mubr.bf16.mxu0 %v2018_v28 }
  0x99   : > { %1138 = vmatprep.mubr.bf16.mxu1 %v2020_v29 }
  0x9f   : > { %978 = vmatmul.mubr.bf16.gmra.mrb[60].mxu0 %v2022_v30 }
  0xa0   : > { %1139 = vmatmul.mubr.bf16.gmra.mrb[60].mxu1 %v2023_v31 }
  0xfa   : > { %v1680_v32 = vpop.f32.mrb[0].mxu0 }
  0xfb   : > { %v1792_v33 = vpop.f32.mrb[0].mxu1  ;;  %v1681_v35 = vpop.f32.mrb[1].mxu0 }
  0xfc   : > { %v1682_v36 = vadd.f32 %v1681_v35, %v1680_v32  ;;  %v1793_v37 = vpop.f32.mrb[1].mxu1  ;;  %v1683_v38 = vpop.f32.mrb[2].mxu0 }
  0xfd   : > { %v1794_v39 = vadd.f32 %v1793_v37, %v1792_v33  ;;  %v1795_v40 = vpop.f32.mrb[2].mxu1  ;;  %v1684_v41 = vpop.f32.mrb[3].mxu0 }
  0xfe   : > { %v860_v42 = vadd.f32 %v1682_v36, %v2233_v34  ;;  %v1685_v43 = vadd.f32 %v1684_v41, %v1683_v38  ;;  %v1796_v44 = vpop.f32.mrb[3].mxu1 }
  0xff   : > { %v1797_v45 = vadd.f32 %v1796_v44, %v1795_v40 }
 0x100   : > { %v1021_v46 = vadd.f32 %v1794_v39, %v860_v42  ;;  %v863_v47 = vadd.f32 %v1685_v43, %v2233_v34 }
 0x102   : > { %v1024_v48 = vadd.f32 %v1797_v45, %v863_v47  ;;  %v1686_v49 = vpop.f32.mrb[4].mxu0  ;;  %v1147_v52 = vmax.f32 %v1021_v46, 0.0 }
 0x103   : > { %v1798_v50 = vpop.f32.mrb[4].mxu1  ;;  %v1687_v51 = vpop.f32.mrb[5].mxu0 }
 0x104   : > { %v1148_v53 = vmax.f32 %v1024_v48, 0.0  ;;  %v1688_v54 = vadd.f32 %v1687_v51, %v1686_v49  ;;  %v1799_v55 = vpop.f32.mrb[5].mxu1  ;;  %v1689_v56 = vpop.f32.mrb[6].mxu0 }
 0x105   : > { %v1800_v57 = vadd.f32 %v1799_v55, %v1798_v50  ;;  %v1801_v58 = vpop.f32.mrb[6].mxu1  ;;  %v1690_v59 = vpop.f32.mrb[7].mxu0 }
 0x106   : > { %v1572_v60 = vpack.c.bf16 %v1148_v53, %v1147_v52  ;;  %v868_v61 = vadd.f32 %v1688_v54, %v2233_v34  ;;  %v1691_v62 = vadd.f32 %v1690_v59, %v1689_v56  ;;  %v1802_v63 = vpop.f32.mrb[7].mxu1 }
 0x107   : > { %v1803_v0 = vadd.f32 %v1802_v63, %v1801_v58 }
 0x108   : > { %1573 = vst [vmem:[%s2241_s10] sm:$0xff] %v1572_v60   ;;  %v1029_v1 = vadd.f32 %v1800_v57, %v868_v61  ;;  %v871_v2 = vadd.f32 %v1691_v62, %v2233_v34 }
 0x10a   : > { %v1032_v3 = vadd.f32 %v1803_v0, %v871_v2  ;;  %v1692_v4 = vpop.f32.mrb[8].mxu0  ;;  %v1149_v7 = vmax.f32 %v1029_v1, 0.0 }
 0x10b   : > { %v1804_v5 = vpop.f32.mrb[8].mxu1  ;;  %v1693_v6 = vpop.f32.mrb[9].mxu0 }
 0x10c   : > { %v1150_v8 = vmax.f32 %v1032_v3, 0.0  ;;  %v1694_v9 = vadd.f32 %v1693_v6, %v1692_v4  ;;  %v1805_v10 = vpop.f32.mrb[9].mxu1  ;;  %v1695_v11 = vpop.f32.mrb[10].mxu0 }
 0x10d   : > { %v1806_v12 = vadd.f32 %v1805_v10, %v1804_v5  ;;  %v1807_v13 = vpop.f32.mrb[10].mxu1  ;;  %v1696_v14 = vpop.f32.mrb[11].mxu0 }
 0x10e   : > { %v1577_v15 = vpack.c.bf16 %v1150_v8, %v1149_v7  ;;  %v876_v16 = vadd.f32 %v1694_v9, %v2233_v34  ;;  %v1697_v17 = vadd.f32 %v1696_v14, %v1695_v11  ;;  %v1808_v18 = vpop.f32.mrb[11].mxu1 }
 0x10f   : > { %v1809_v19 = vadd.f32 %v1808_v18, %v1807_v13 }
 0x110   : > { %1649 = vst [vmem:[%s2241_s10 + $0x8] sm:$0xff] %v1577_v15   ;;  %v1037_v20 = vadd.f32 %v1806_v12, %v876_v16  ;;  %v879_v21 = vadd.f32 %v1697_v17, %v2233_v34 }
 0x112   : > { %v1040_v22 = vadd.f32 %v1809_v19, %v879_v21  ;;  %v1698_v23 = vpop.f32.mrb[12].mxu0  ;;  %v1151_v26 = vmax.f32 %v1037_v20, 0.0 }
 0x113   : > { %v1810_v24 = vpop.f32.mrb[12].mxu1  ;;  %v1699_v25 = vpop.f32.mrb[13].mxu0 }
 0x114   : > { %v1152_v27 = vmax.f32 %v1040_v22, 0.0  ;;  %v1700_v28 = vadd.f32 %v1699_v25, %v1698_v23  ;;  %v1811_v29 = vpop.f32.mrb[13].mxu1  ;;  %v1701_v30 = vpop.f32.mrb[14].mxu0 }
 0x115   : > { %v1812_v31 = vadd.f32 %v1811_v29, %v1810_v24  ;;  %v1813_v32 = vpop.f32.mrb[14].mxu1  ;;  %v1702_v33 = vpop.f32.mrb[15].mxu0 }
 0x116   : > { %v1582_v35 = vpack.c.bf16 %v1152_v27, %v1151_v26  ;;  %v884_v36 = vadd.f32 %v1700_v28, %v2233_v34  ;;  %v1703_v37 = vadd.f32 %v1702_v33, %v1701_v30  ;;  %v1814_v38 = vpop.f32.mrb[15].mxu1 }
 0x117   : > { %v1815_v39 = vadd.f32 %v1814_v38, %v1813_v32 }
 0x118   : > { %1650 = vst [vmem:[%s2241_s10 + $0x10] sm:$0xff] %v1582_v35   ;;  %v1045_v40 = vadd.f32 %v1812_v31, %v884_v36  ;;  %v887_v41 = vadd.f32 %v1703_v37, %v2233_v34 }
 0x11a   : > { %v1048_v42 = vadd.f32 %v1815_v39, %v887_v41  ;;  %v1704_v43 = vpop.f32.mrb[16].mxu0  ;;  %v1153_v46 = vmax.f32 %v1045_v40, 0.0 }
 0x11b   : > { %v1816_v44 = vpop.f32.mrb[16].mxu1  ;;  %v1705_v45 = vpop.f32.mrb[17].mxu0 }
 0x11c   : > { %v1154_v47 = vmax.f32 %v1048_v42, 0.0  ;;  %v1706_v48 = vadd.f32 %v1705_v45, %v1704_v43  ;;  %v1817_v49 = vpop.f32.mrb[17].mxu1  ;;  %v1707_v50 = vpop.f32.mrb[18].mxu0 }
 0x11d   : > { %v1818_v51 = vadd.f32 %v1817_v49, %v1816_v44  ;;  %v1819_v52 = vpop.f32.mrb[18].mxu1  ;;  %v1708_v53 = vpop.f32.mrb[19].mxu0 }
 0x11e   : > { %v1587_v54 = vpack.c.bf16 %v1154_v47, %v1153_v46  ;;  %v892_v55 = vadd.f32 %v1706_v48, %v2233_v34  ;;  %v1709_v56 = vadd.f32 %v1708_v53, %v1707_v50  ;;  %v1820_v57 = vpop.f32.mrb[19].mxu1 }
 0x11f   : > { %v1821_v58 = vadd.f32 %v1820_v57, %v1819_v52 }
 0x120   : > { %1651 = vst [vmem:[%s2241_s10 + $0x18] sm:$0xff] %v1587_v54   ;;  %v1053_v59 = vadd.f32 %v1818_v51, %v892_v55  ;;  %v895_v60 = vadd.f32 %v1709_v56, %v2233_v34 }
 0x122   : > { %v1056_v61 = vadd.f32 %v1821_v58, %v895_v60  ;;  %v1710_v62 = vpop.f32.mrb[20].mxu0  ;;  %v1155_v1 = vmax.f32 %v1053_v59, 0.0 }
 0x123   : > { %v1822_v63 = vpop.f32.mrb[20].mxu1  ;;  %v1711_v0 = vpop.f32.mrb[21].mxu0 }
 0x124   : > { %v1156_v2 = vmax.f32 %v1056_v61, 0.0  ;;  %v1712_v3 = vadd.f32 %v1711_v0, %v1710_v62  ;;  %v1823_v4 = vpop.f32.mrb[21].mxu1  ;;  %v1713_v5 = vpop.f32.mrb[22].mxu0 }
 0x125   : > { %v1824_v6 = vadd.f32 %v1823_v4, %v1822_v63  ;;  %v1825_v7 = vpop.f32.mrb[22].mxu1  ;;  %v1714_v8 = vpop.f32.mrb[23].mxu0 }
 0x126   : > { %v1592_v9 = vpack.c.bf16 %v1156_v2, %v1155_v1  ;;  %v900_v10 = vadd.f32 %v1712_v3, %v2233_v34  ;;  %v1715_v11 = vadd.f32 %v1714_v8, %v1713_v5  ;;  %v1826_v12 = vpop.f32.mrb[23].mxu1 }
 0x127   : > { %v1827_v13 = vadd.f32 %v1826_v12, %v1825_v7 }
 0x128   : > { %1652 = vst [vmem:[%s2241_s10 + $0x20] sm:$0xff] %v1592_v9   ;;  %v1061_v14 = vadd.f32 %v1824_v6, %v900_v10  ;;  %v903_v15 = vadd.f32 %v1715_v11, %v2233_v34 }
 0x12a   : > { %v1064_v16 = vadd.f32 %v1827_v13, %v903_v15  ;;  %v1716_v17 = vpop.f32.mrb[24].mxu0  ;;  %v1157_v20 = vmax.f32 %v1061_v14, 0.0 }
 0x12b   : > { %v1828_v18 = vpop.f32.mrb[24].mxu1  ;;  %v1717_v19 = vpop.f32.mrb[25].mxu0 }
 0x12c   : > { %v1158_v21 = vmax.f32 %v1064_v16, 0.0  ;;  %v1718_v22 = vadd.f32 %v1717_v19, %v1716_v17  ;;  %v1829_v23 = vpop.f32.mrb[25].mxu1  ;;  %v1719_v24 = vpop.f32.mrb[26].mxu0 }
 0x12d   : > { %v1830_v25 = vadd.f32 %v1829_v23, %v1828_v18  ;;  %v1831_v26 = vpop.f32.mrb[26].mxu1  ;;  %v1720_v27 = vpop.f32.mrb[27].mxu0 }
 0x12e   : > { %v1597_v28 = vpack.c.bf16 %v1158_v21, %v1157_v20  ;;  %v908_v29 = vadd.f32 %v1718_v22, %v2233_v34  ;;  %v1721_v30 = vadd.f32 %v1720_v27, %v1719_v24  ;;  %v1832_v31 = vpop.f32.mrb[27].mxu1 }
 0x12f   : > { %v1833_v32 = vadd.f32 %v1832_v31, %v1831_v26 }
 0x130   : > { %1653 = vst [vmem:[%s2241_s10 + $0x28] sm:$0xff] %v1597_v28   ;;  %v1069_v33 = vadd.f32 %v1830_v25, %v908_v29  ;;  %v911_v35 = vadd.f32 %v1721_v30, %v2233_v34 }
 0x132   : > { %v1072_v36 = vadd.f32 %v1833_v32, %v911_v35  ;;  %v1722_v37 = vpop.f32.mrb[28].mxu0  ;;  %v1159_v40 = vmax.f32 %v1069_v33, 0.0 }
 0x133   : > { %v1834_v38 = vpop.f32.mrb[28].mxu1  ;;  %v1723_v39 = vpop.f32.mrb[29].mxu0 }
 0x134   : > { %v1160_v41 = vmax.f32 %v1072_v36, 0.0  ;;  %v1724_v42 = vadd.f32 %v1723_v39, %v1722_v37  ;;  %v1835_v43 = vpop.f32.mrb[29].mxu1  ;;  %v1725_v44 = vpop.f32.mrb[30].mxu0 }
 0x135   : > { %v1836_v45 = vadd.f32 %v1835_v43, %v1834_v38  ;;  %v1837_v46 = vpop.f32.mrb[30].mxu1  ;;  %v1726_v47 = vpop.f32.mrb[31].mxu0 }
 0x136   : > { %v1602_v48 = vpack.c.bf16 %v1160_v41, %v1159_v40  ;;  %v916_v49 = vadd.f32 %v1724_v42, %v2233_v34  ;;  %v1727_v50 = vadd.f32 %v1726_v47, %v1725_v44  ;;  %v1838_v51 = vpop.f32.mrb[31].mxu1 }
 0x137   : > { %v1839_v52 = vadd.f32 %v1838_v51, %v1837_v46 }
 0x138   : > { %1654 = vst [vmem:[%s2241_s10 + $0x30] sm:$0xff] %v1602_v48   ;;  %v1077_v53 = vadd.f32 %v1836_v45, %v916_v49  ;;  %v919_v54 = vadd.f32 %v1727_v50, %v2233_v34 }
 0x13a   : > { %v1080_v55 = vadd.f32 %v1839_v52, %v919_v54  ;;  %v1728_v56 = vpop.f32.mrb[32].mxu0  ;;  %v1161_v59 = vmax.f32 %v1077_v53, 0.0 }
 0x13b   : > { %v1840_v57 = vpop.f32.mrb[32].mxu1  ;;  %v1729_v58 = vpop.f32.mrb[33].mxu0 }
 0x13c   : > { %v1162_v60 = vmax.f32 %v1080_v55, 0.0  ;;  %v1730_v61 = vadd.f32 %v1729_v58, %v1728_v56  ;;  %v1841_v62 = vpop.f32.mrb[33].mxu1  ;;  %v1731_v63 = vpop.f32.mrb[34].mxu0 }
 0x13d   : > { %v1842_v0 = vadd.f32 %v1841_v62, %v1840_v57  ;;  %v1843_v1 = vpop.f32.mrb[34].mxu1  ;;  %v1732_v2 = vpop.f32.mrb[35].mxu0 }
 0x13e   : > { %v1607_v3 = vpack.c.bf16 %v1162_v60, %v1161_v59  ;;  %v924_v4 = vadd.f32 %v1730_v61, %v2233_v34  ;;  %v1733_v5 = vadd.f32 %v1732_v2, %v1731_v63  ;;  %v1844_v6 = vpop.f32.mrb[35].mxu1 }
 0x13f   : > { %v1845_v7 = vadd.f32 %v1844_v6, %v1843_v1 }
 0x140   : > { %1655 = vst [vmem:[%s2241_s10 + $0x38] sm:$0xff] %v1607_v3   ;;  %v1085_v8 = vadd.f32 %v1842_v0, %v924_v4  ;;  %v927_v9 = vadd.f32 %v1733_v5, %v2233_v34 }
 0x142   : > { %v1088_v10 = vadd.f32 %v1845_v7, %v927_v9  ;;  %v1734_v11 = vpop.f32.mrb[36].mxu0  ;;  %v1163_v14 = vmax.f32 %v1085_v8, 0.0 }
 0x143   : > { %v1846_v12 = vpop.f32.mrb[36].mxu1  ;;  %v1735_v13 = vpop.f32.mrb[37].mxu0 }
 0x144   : > { %v1164_v15 = vmax.f32 %v1088_v10, 0.0  ;;  %v1736_v16 = vadd.f32 %v1735_v13, %v1734_v11  ;;  %v1847_v17 = vpop.f32.mrb[37].mxu1  ;;  %v1737_v18 = vpop.f32.mrb[38].mxu0 }
 0x145   : > { %v1848_v19 = vadd.f32 %v1847_v17, %v1846_v12  ;;  %v1849_v20 = vpop.f32.mrb[38].mxu1  ;;  %v1738_v21 = vpop.f32.mrb[39].mxu0 }
 0x146   : > { %v1612_v22 = vpack.c.bf16 %v1164_v15, %v1163_v14  ;;  %v932_v23 = vadd.f32 %v1736_v16, %v2233_v34  ;;  %v1739_v24 = vadd.f32 %v1738_v21, %v1737_v18  ;;  %v1850_v25 = vpop.f32.mrb[39].mxu1 }
 0x147   : > { %v1851_v26 = vadd.f32 %v1850_v25, %v1849_v20 }
 0x148   : > { %1656 = vst [vmem:[%s2241_s10 + $0x40] sm:$0xff] %v1612_v22   ;;  %v1093_v27 = vadd.f32 %v1848_v19, %v932_v23  ;;  %v935_v28 = vadd.f32 %v1739_v24, %v2233_v34 }
 0x14a   : > { %v1096_v29 = vadd.f32 %v1851_v26, %v935_v28  ;;  %v1740_v30 = vpop.f32.mrb[40].mxu0  ;;  %v1165_v33 = vmax.f32 %v1093_v27, 0.0 }
 0x14b   : > { %v1852_v31 = vpop.f32.mrb[40].mxu1  ;;  %v1741_v32 = vpop.f32.mrb[41].mxu0 }
 0x14c   : > { %v1166_v35 = vmax.f32 %v1096_v29, 0.0  ;;  %v1742_v36 = vadd.f32 %v1741_v32, %v1740_v30  ;;  %v1853_v37 = vpop.f32.mrb[41].mxu1  ;;  %v1743_v38 = vpop.f32.mrb[42].mxu0 }
 0x14d   : > { %v1854_v39 = vadd.f32 %v1853_v37, %v1852_v31  ;;  %v1855_v40 = vpop.f32.mrb[42].mxu1  ;;  %v1744_v41 = vpop.f32.mrb[43].mxu0 }
 0x14e   : > { %v1617_v42 = vpack.c.bf16 %v1166_v35, %v1165_v33  ;;  %v940_v43 = vadd.f32 %v1742_v36, %v2233_v34  ;;  %v1745_v44 = vadd.f32 %v1744_v41, %v1743_v38  ;;  %v1856_v45 = vpop.f32.mrb[43].mxu1 }
 0x14f   : > { %v1857_v46 = vadd.f32 %v1856_v45, %v1855_v40 }
 0x150   : > { %1657 = vst [vmem:[%s2241_s10 + $0x48] sm:$0xff] %v1617_v42   ;;  %v1101_v47 = vadd.f32 %v1854_v39, %v940_v43  ;;  %v943_v48 = vadd.f32 %v1745_v44, %v2233_v34 }
 0x152   : > { %v1104_v49 = vadd.f32 %v1857_v46, %v943_v48  ;;  %v1746_v50 = vpop.f32.mrb[44].mxu0  ;;  %v1167_v53 = vmax.f32 %v1101_v47, 0.0 }
 0x153   : > { %v1858_v51 = vpop.f32.mrb[44].mxu1  ;;  %v1747_v52 = vpop.f32.mrb[45].mxu0 }
 0x154   : > { %v1168_v54 = vmax.f32 %v1104_v49, 0.0  ;;  %v1748_v55 = vadd.f32 %v1747_v52, %v1746_v50  ;;  %v1859_v56 = vpop.f32.mrb[45].mxu1  ;;  %v1749_v57 = vpop.f32.mrb[46].mxu0 }
 0x155   : > { %v1860_v58 = vadd.f32 %v1859_v56, %v1858_v51  ;;  %v1861_v59 = vpop.f32.mrb[46].mxu1  ;;  %v1750_v60 = vpop.f32.mrb[47].mxu0 }
 0x156   : > { %v1622_v61 = vpack.c.bf16 %v1168_v54, %v1167_v53  ;;  %v948_v62 = vadd.f32 %v1748_v55, %v2233_v34  ;;  %v1751_v63 = vadd.f32 %v1750_v60, %v1749_v57  ;;  %v1862_v0 = vpop.f32.mrb[47].mxu1 }
 0x157   : > { %v1863_v1 = vadd.f32 %v1862_v0, %v1861_v59 }
 0x158   : > { %1658 = vst [vmem:[%s2241_s10 + $0x50] sm:$0xff] %v1622_v61   ;;  %v1109_v2 = vadd.f32 %v1860_v58, %v948_v62  ;;  %v951_v3 = vadd.f32 %v1751_v63, %v2233_v34 }
 0x15a   : > { %v1112_v4 = vadd.f32 %v1863_v1, %v951_v3  ;;  %v1752_v5 = vpop.f32.mrb[48].mxu0  ;;  %v1169_v8 = vmax.f32 %v1109_v2, 0.0 }
 0x15b   : > { %v1864_v6 = vpop.f32.mrb[48].mxu1  ;;  %v1753_v7 = vpop.f32.mrb[49].mxu0 }
 0x15c   : > { %v1170_v9 = vmax.f32 %v1112_v4, 0.0  ;;  %v1754_v10 = vadd.f32 %v1753_v7, %v1752_v5  ;;  %v1865_v11 = vpop.f32.mrb[49].mxu1  ;;  %v1755_v12 = vpop.f32.mrb[50].mxu0 }
 0x15d   : > { %v1866_v13 = vadd.f32 %v1865_v11, %v1864_v6  ;;  %v1867_v14 = vpop.f32.mrb[50].mxu1  ;;  %v1756_v15 = vpop.f32.mrb[51].mxu0 }
 0x15e   : > { %v1627_v16 = vpack.c.bf16 %v1170_v9, %v1169_v8  ;;  %v956_v17 = vadd.f32 %v1754_v10, %v2233_v34  ;;  %v1757_v18 = vadd.f32 %v1756_v15, %v1755_v12  ;;  %v1868_v19 = vpop.f32.mrb[51].mxu1 }
 0x15f   : > { %v1869_v20 = vadd.f32 %v1868_v19, %v1867_v14 }
 0x160   : > { %1659 = vst [vmem:[%s2241_s10 + $0x58] sm:$0xff] %v1627_v16   ;;  %v1117_v21 = vadd.f32 %v1866_v13, %v956_v17  ;;  %v959_v22 = vadd.f32 %v1757_v18, %v2233_v34 }
 0x162   : > { %v1120_v23 = vadd.f32 %v1869_v20, %v959_v22  ;;  %v1758_v24 = vpop.f32.mrb[52].mxu0  ;;  %v1171_v27 = vmax.f32 %v1117_v21, 0.0 }
 0x163   : > { %v1870_v25 = vpop.f32.mrb[52].mxu1  ;;  %v1759_v26 = vpop.f32.mrb[53].mxu0 }
 0x164   : > { %v1172_v28 = vmax.f32 %v1120_v23, 0.0  ;;  %v1760_v29 = vadd.f32 %v1759_v26, %v1758_v24  ;;  %v1871_v30 = vpop.f32.mrb[53].mxu1  ;;  %v1761_v31 = vpop.f32.mrb[54].mxu0 }
 0x165   : > { %v1872_v32 = vadd.f32 %v1871_v30, %v1870_v25  ;;  %v1873_v33 = vpop.f32.mrb[54].mxu1  ;;  %v1762_v35 = vpop.f32.mrb[55].mxu0 }
 0x166   : > { %v1632_v36 = vpack.c.bf16 %v1172_v28, %v1171_v27  ;;  %v964_v37 = vadd.f32 %v1760_v29, %v2233_v34  ;;  %v1763_v38 = vadd.f32 %v1762_v35, %v1761_v31  ;;  %v1874_v39 = vpop.f32.mrb[55].mxu1 }
 0x167   : > { %v1875_v40 = vadd.f32 %v1874_v39, %v1873_v33 }
 0x168   : > { %1660 = vst [vmem:[%s2241_s10 + $0x60] sm:$0xff] %v1632_v36   ;;  %v1125_v41 = vadd.f32 %v1872_v32, %v964_v37  ;;  %v967_v42 = vadd.f32 %v1763_v38, %v2233_v34 }
 0x16a   : > { %v1128_v43 = vadd.f32 %v1875_v40, %v967_v42  ;;  %v1764_v44 = vpop.f32.mrb[56].mxu0  ;;  %v1173_v47 = vmax.f32 %v1125_v41, 0.0 }
 0x16b   : > { %v1876_v45 = vpop.f32.mrb[56].mxu1  ;;  %v1765_v46 = vpop.f32.mrb[57].mxu0 }
 0x16c   : > { %v1174_v48 = vmax.f32 %v1128_v43, 0.0  ;;  %v1766_v49 = vadd.f32 %v1765_v46, %v1764_v44  ;;  %v1877_v50 = vpop.f32.mrb[57].mxu1  ;;  %v1767_v51 = vpop.f32.mrb[58].mxu0 }
 0x16d   : > { %v1878_v52 = vadd.f32 %v1877_v50, %v1876_v45  ;;  %v1879_v53 = vpop.f32.mrb[58].mxu1  ;;  %v1768_v54 = vpop.f32.mrb[59].mxu0 }
 0x16e   : > { %v1637_v55 = vpack.c.bf16 %v1174_v48, %v1173_v47  ;;  %v972_v56 = vadd.f32 %v1766_v49, %v2233_v34  ;;  %v1769_v57 = vadd.f32 %v1768_v54, %v1767_v51  ;;  %v1880_v58 = vpop.f32.mrb[59].mxu1 }
 0x16f   : > { %v1881_v59 = vadd.f32 %v1880_v58, %v1879_v53 }
 0x170   : > { %1661 = vst [vmem:[%s2241_s10 + $0x68] sm:$0xff] %v1637_v55   ;;  %v1133_v60 = vadd.f32 %v1878_v52, %v972_v56  ;;  %v975_v61 = vadd.f32 %v1769_v57, %v2233_v34 }
 0x172   : > { %v1136_v62 = vadd.f32 %v1881_v59, %v975_v61  ;;  %v1770_v63 = vpop.f32.mrb[60].mxu0  ;;  %v1175_v2 = vmax.f32 %v1133_v60, 0.0 }
 0x173   : > { %v1882_v0 = vpop.f32.mrb[60].mxu1  ;;  %v1771_v1 = vpop.f32.mrb[61].mxu0 }
 0x174   : > { %v1176_v3 = vmax.f32 %v1136_v62, 0.0  ;;  %v1772_v4 = vadd.f32 %v1771_v1, %v1770_v63  ;;  %v1883_v5 = vpop.f32.mrb[61].mxu1  ;;  %v1773_v6 = vpop.f32.mrb[62].mxu0 }
 0x175   : > { %v1884_v7 = vadd.f32 %v1883_v5, %v1882_v0  ;;  %v1885_v8 = vpop.f32.mrb[62].mxu1  ;;  %v1774_v9 = vpop.f32.mrb[63].mxu0 }
 0x176   : > { %v1642_v10 = vpack.c.bf16 %v1176_v3, %v1175_v2  ;;  %v980_v11 = vadd.f32 %v1772_v4, %v2233_v34  ;;  %v1775_v12 = vadd.f32 %v1774_v9, %v1773_v6  ;;  %v1886_v13 = vpop.f32.mrb[63].mxu1 }
 0x177   : > { %v1887_v14 = vadd.f32 %v1886_v13, %v1885_v8 }
 0x178   : > { %1662 = vst [vmem:[%s2241_s10 + $0x70] sm:$0xff] %v1642_v10   ;;  %v1141_v15 = vadd.f32 %v1884_v7, %v980_v11  ;;  %v983_v16 = vadd.f32 %v1775_v12, %v2233_v34 }
 0x17a   : > { %v1144_v17 = vadd.f32 %v1887_v14, %v983_v16  ;;  %v1177_v18 = vmax.f32 %v1141_v15, 0.0 }
 0x17c   : > { %v1178_v19 = vmax.f32 %v1144_v17, 0.0 }
 0x17e   : > { %v1647_v20 = vpack.c.bf16 %v1178_v19, %v1177_v18 }
 0x180   : > { %1663 = vst [vmem:[%s2241_s10 + $0x78] sm:$0xff] %v1647_v20  }
 0x181 PF: > { %s13_s12 = sadd.s32 1, %s2030_s12  }
 0x182   : > { %p10_p4 = scmp.ge.s32.totalorder %s13_s12, 4  }
 0x184   :  { %12 = sbr.rel (!%p10_p4) target bundleno = 1 (0x1), region = 62 }

// kernel: rho_betavae_forward.11
= control target key start
LH: loop header
LB: loop body
LE: loop exit
PB: predicated region body
PF: predicated region fallthrough
CT: control target
= control target key end

     0   :  { %s1044_s12 = smov 0   ;;  %s1200_s0 = inlined_call_operand.vmem [shape: bf16[128,512], index: 0, kind: input, shape index: {}]   ;;  %s1201_s1 = inlined_call_operand.vmem [shape: bf16[512,128], index: 1, kind: input, shape index: {}]   ;;  %s1202_s2 = inlined_call_operand.vmem [shape: f32[1,128], index: 2, kind: input, shape index: {}]   ;;  %s1203_s3 = inlined_call_operand.vmem [shape: bf16[128,128], index: 3, kind: output, shape index: {}]  }
   0x1 LB: > { %s771_s13 = sadd.s32 4294967295, %s1022_s12   ;;  %p775_p0 = scmp.ge.s32.totalorder %s1022_s12, 1  ;;  %s1022_s12 = sphi %s1044_s12, %s13_s12  }
   0x2   : > { %p139_p1 = scmp.lt.s32.totalorder %s1022_s12, 3 }
   0x4   : > { %p140_p2 = pnand %p775_p0, %p139_p1 }
   0x5   : > { %v960_v0 = vld [vmem:[%s1201_s1 + $0x40] sm:$0xff] (!%p140_p2)   ;;  %v964_v4 = vld [vmem:[%s1201_s1 + $0x48] sm:$0xff] (!%p140_p2)   ;;  %v968_v8 = vld [vmem:[%s1201_s1 + $0x50] sm:$0xff] (!%p140_p2)   ;;  %s776_s21 = sshll.u32 (!%p140_p2), %s771_s13, 3 }
   0x6   : > { %143 = sbr.rel (%p140_p2) target bundleno = 289 (0x121), region = 32  ;;  %v961_v1 = vld [vmem:[%s1201_s1 + $0xc0] sm:$0xff] (!%p140_p2)   ;;  %872 = vmatprep.subr.bf16.mxu0 (!%p140_p2), %v960_v0  ;;  %v965_v5 = vld [vmem:[%s1201_s1 + $0xc8] sm:$0xff] (!%p140_p2)   ;;  %v969_v9 = vld [vmem:[%s1201_s1 + $0xd0] sm:$0xff] (!%p140_p2)   ;;  %p165_p3 = scmp.lt.s32.totalorder (!%p140_p2), %s776_s21, 15 }
   0x7   : > { %v962_v2 = vld [vmem:[%s1201_s1] sm:$0xff] (!%p140_p2)   ;;  %912 = vmatprep.subr.bf16.mxu1 (!%p140_p2), %v961_v1  ;;  %v966_v6 = vld [vmem:[%s1201_s1 + $0x8] sm:$0xff] (!%p140_p2)   ;;  %v970_v10 = vld [vmem:[%s1201_s1 + $0x10] sm:$0xff] (!%p140_p2)  }
   0x8   : > { %v963_v3 = vld [vmem:[%s1201_s1 + $0x80] sm:$0xff] (!%p140_p2)   ;;  %873 = vmatpush3.bf16.msra.mxu0 (!%p140_p2), %v962_v2  ;;  %v967_v7 = vld [vmem:[%s1201_s1 + $0x88] sm:$0xff] (!%p140_p2)   ;;  %v971_v11 = vld [vmem:[%s1201_s1 + $0x90] sm:$0xff] (!%p140_p2)  }
   0x9   : > { %913 = vmatpush3.bf16.msra.mxu1 (!%p140_p2), %v963_v3  ;;  %874 = vmatprep.subr.bf16.mxu0 (!%p140_p2), %v964_v4  ;;  %v972_v12 = vld [vmem:[%s1201_s1 + $0x58] sm:$0xff] (!%p140_p2)   ;;  %v976_v16 = vld [vmem:[%s1201_s1 + $0x60] sm:$0xff] (!%p140_p2)   ;;  %v980_v20 = vld [vmem:[%s1201_s1 + $0x68] sm:$0xff] (!%p140_p2)  }
   0xa   : > { %914 = vmatprep.subr.bf16.mxu1 (!%p140_p2), %v965_v5  ;;  %v973_v13 = vld [vmem:[%s1201_s1 + $0xd8] sm:$0xff] (!%p140_p2)   ;;  %v977_v17 = vld [vmem:[%s1201_s1 + $0xe0] sm:$0xff] (!%p140_p2)   ;;  %v981_v21 = vld [vmem:[%s1201_s1 + $0xe8] sm:$0xff] (!%p140_p2)  }
   0xb   : > { %v974_v14 = vld [vmem:[%s1201_s1 + $0x18] sm:$0xff] (!%p140_p2)   ;;  %v978_v18 = vld [vmem:[%s1201_s1 + $0x20] sm:$0xff] (!%p140_p2)   ;;  %v982_v22 = vld [vmem:[%s1201_s1 + $0x28] sm:$0xff] (!%p140_p2)  }
   0xc   : > { %875 = vmatpush3.bf16.msra.mxu0 (!%p140_p2), %v966_v6  ;;  %v975_v15 = vld [vmem:[%s1201_s1 + $0x98] sm:$0xff] (!%p140_p2)   ;;  %v979_v19 = vld [vmem:[%s1201_s1 + $0xa0] sm:$0xff] (!%p140_p2)   ;;  %v983_v23 = vld [vmem:[%s1201_s1 + $0xa8] sm:$0xff] (!%p140_p2)  }
   0xd   : > { %915 = vmatpush3.bf16.msra.mxu1 %v967_v7  ;;  %876 = vmatprep.subr.bf16.mxu0 %v968_v8  ;;  %s1205_s21 = smov (!%p165_p3, %s776_s21), 15  ;;  %v984_v24 = vld [vmem:[%s1201_s1 + $0x70] sm:$0xff]   ;;  %v988_v28 = vld [vmem:[%s1201_s1 + $0x78] sm:$0xff]   ;;  %v1177_v50 = vld [vmem:[%s1202_s2] ss:$0 sm:$0xff] }
   0xe   : > { %916 = vmatprep.subr.bf16.mxu1 %v969_v9  ;;  %v985_v25 = vld [vmem:[%s1201_s1 + $0xf0] sm:$0xff]   ;;  %s840_s18 = sshll.u32 %s1205_s21, 4  ;;  %v989_v29 = vld [vmem:[%s1201_s1 + $0xf8] sm:$0xff]   ;;  %s780_s7 = sshll.u32 %s1205_s21, 2 }
   0xf   : > { %v986_v26 = vld [vmem:[%s1201_s1 + $0x30] sm:$0xff]   ;;  %s1150_s28 = scalar_lea.vmem %s1200_s0, %s840_s18  ;;  %v990_v30 = vld [vmem:[%s1201_s1 + $0x38] sm:$0xff]   ;;  %s1185_s10 = scalar_lea.vmem %s1203_s3, %s780_s7 }
  0x10   : > { %877 = vmatpush3.bf16.msra.mxu0 %v970_v10  ;;  %v987_v27 = vld [vmem:[%s1201_s1 + $0xb0] sm:$0xff]   ;;  %v991_v31 = vld [vmem:[%s1201_s1 + $0xb8] sm:$0xff]  }
  0x11   : > { %917 = vmatpush3.bf16.msra.mxu1 %v971_v11  ;;  %878 = vmatprep.subr.bf16.mxu0 %v972_v12  ;;  %v992_v32 = vld [vmem:[%s1150_s28] ss:$16 sps:$4 sm:$0xff]   ;;  %v994_v33 = vld [vmem:[%s1150_s28 + $0x4] ss:$16 sps:$4 sm:$0xff]   ;;  %v995_v34 = vld [vmem:[%s1150_s28 + $0x8] ss:$16 sps:$4 sm:$0xff]  }
  0x12   : > { %918 = vmatprep.subr.bf16.mxu1 %v973_v13  ;;  %v997_v35 = vld [vmem:[%s1150_s28 + $0xc] ss:$16 sps:$4 sm:$0xff]   ;;  %569 = vmatprep.mubr.bf16.mxu0 %v994_v33  ;;  %v998_v36 = vld [vmem:[%s1150_s28 + $0x24] ss:$16 sps:$4 sm:$0xff]   ;;  %v1002_v38 = vld [vmem:[%s1150_s28 + $0x20] ss:$16 sps:$4 sm:$0xff]  }
  0x13   : > { %634 = vmatprep.mubr.bf16.mxu1 %v997_v35  ;;  %v1000_v37 = vld [vmem:[%s1150_s28 + $0x2c] ss:$16 sps:$4 sm:$0xff]   ;;  %v1003_v39 = vld [vmem:[%s1150_s28 + $0x28] ss:$16 sps:$4 sm:$0xff]   ;;  %v1004_v40 = vld [vmem:[%s1150_s28 + $0x44] ss:$16 sps:$4 sm:$0xff]  }
  0x14   : > { %879 = vmatpush3.bf16.msra.mxu0 %v974_v14  ;;  %v1006_v41 = vld [vmem:[%s1150_s28 + $0x4c] ss:$16 sps:$4 sm:$0xff]   ;;  %v1008_v42 = vld [vmem:[%s1150_s28 + $0x40] ss:$16 sps:$4 sm:$0xff]   ;;  %v1009_v43 = vld [vmem:[%s1150_s28 + $0x48] ss:$16 sps:$4 sm:$0xff]  }
  0x15   : > { %919 = vmatpush3.bf16.msra.mxu1 %v975_v15  ;;  %880 = vmatprep.subr.bf16.mxu0 %v976_v16  ;;  %v1010_v44 = vld [vmem:[%s1150_s28 + $0x64] ss:$16 sps:$4 sm:$0xff]   ;;  %v1012_v45 = vld [vmem:[%s1150_s28 + $0x6c] ss:$16 sps:$4 sm:$0xff]   ;;  %v1014_v46 = vld [vmem:[%s1150_s28 + $0x60] ss:$16 sps:$4 sm:$0xff]  }
  0x16   : > { %920 = vmatprep.subr.bf16.mxu1 %v977_v17  ;;  %v1015_v47 = vld [vmem:[%s1150_s28 + $0x68] ss:$16 sps:$4 sm:$0xff]  }
  0x18   : > { %881 = vmatpush3.bf16.msra.mxu0 %v978_v18 }
  0x19   : > { %921 = vmatpush3.bf16.msra.mxu1 %v979_v19  ;;  %882 = vmatprep.subr.bf16.mxu0 %v980_v20 }
  0x1a   : > { %922 = vmatprep.subr.bf16.mxu1 %v981_v21 }
  0x1c   : > { %883 = vmatpush3.bf16.msra.mxu0 %v982_v22 }
  0x1d   : > { %923 = vmatpush3.bf16.msra.mxu1 %v983_v23  ;;  %884 = vmatprep.subr.bf16.mxu0 %v984_v24 }
  0x1e   : > { %924 = vmatprep.subr.bf16.mxu1 %v985_v25 }
  0x20   : > { %885 = vmatpush3.bf16.msra.mxu0 %v986_v26 }
  0x21   : > { %925 = vmatpush3.bf16.msra.mxu1 %v987_v27  ;;  %886 = vmatprep.subr.bf16.mxu0 %v988_v28 }
  0x22   : > { %926 = vmatprep.subr.bf16.mxu1 %v989_v29 }
  0x24   : > { %887 = vmatpush3.bf16.msra.mxu0 %v990_v30 }
  0x25   : > { %927 = vmatpush3.bf16.msra.mxu1 %v991_v31 }
  0x27   : > { %570 = vmatmul.mubr.bf16.vlgmr.msra.gmra.mrb[0].mxu0 %v992_v32 }
  0x28   : > { %635 = vmatmul.mubr.bf16.vlgmr.msra.gmra.mrb[0].mxu1 %v995_v34  ;;  %577 = vmatprep.mubr.bf16.mxu0 %v998_v36 }
  0x29   : > { %642 = vmatprep.mubr.bf16.mxu1 %v1000_v37 }
  0x2f   : > { %578 = vmatmul.mubr.bf16.gmra.mrb[4].mxu0 %v1002_v38 }
  0x30   : > { %643 = vmatmul.mubr.bf16.gmra.mrb[4].mxu1 %v1003_v39  ;;  %585 = vmatprep.mubr.bf16.mxu0 %v1004_v40 }
  0x31   : > { %650 = vmatprep.mubr.bf16.mxu1 %v1006_v41 }
  0x37   : > { %586 = vmatmul.mubr.bf16.gmra.mrb[8].mxu0 %v1008_v42 }
  0x38   : > { %651 = vmatmul.mubr.bf16.gmra.mrb[8].mxu1 %v1009_v43  ;;  %593 = vmatprep.mubr.bf16.mxu0 %v1010_v44 }
  0x39   : > { %658 = vmatprep.mubr.bf16.mxu1 %v1012_v45 }
  0x3f   : > { %594 = vmatmul.mubr.bf16.gmra.mrb[12].mxu0 %v1014_v46 }
  0x40   : > { %659 = vmatmul.mubr.bf16.gmra.mrb[12].mxu1 %v1015_v47 }
  0xfa   : > { %v888_v48 = vpop.f32.mrb[0].mxu0 }
  0xfb   : > { %v928_v49 = vpop.f32.mrb[0].mxu1  ;;  %v889_v51 = vpop.f32.mrb[1].mxu0 }
  0xfc   : > { %v890_v52 = vadd.f32 %v889_v51, %v888_v48  ;;  %v929_v53 = vpop.f32.mrb[1].mxu1  ;;  %v891_v54 = vpop.f32.mrb[2].mxu0 }
  0xfd   : > { %v930_v55 = vadd.f32 %v929_v53, %v928_v49  ;;  %v931_v56 = vpop.f32.mrb[2].mxu1  ;;  %v892_v57 = vpop.f32.mrb[3].mxu0 }
  0xfe   : > { %v572_v58 = vadd.f32 %v890_v52, %v1177_v50  ;;  %v893_v59 = vadd.f32 %v892_v57, %v891_v54  ;;  %v932_v60 = vpop.f32.mrb[3].mxu1 }
  0xff   : > { %v933_v61 = vadd.f32 %v932_v60, %v931_v56 }
 0x100   : > { %v637_v62 = vadd.f32 %v930_v55, %v572_v58  ;;  %v575_v63 = vadd.f32 %v893_v59, %v1177_v50 }
 0x102   : > { %v640_v0 = vadd.f32 %v933_v61, %v575_v63  ;;  %v894_v1 = vpop.f32.mrb[4].mxu0  ;;  %v667_v4 = vmax.f32 %v637_v62, 0.0 }
 0x103   : > { %v934_v2 = vpop.f32.mrb[4].mxu1  ;;  %v895_v3 = vpop.f32.mrb[5].mxu0 }
 0x104   : > { %v668_v5 = vmax.f32 %v640_v0, 0.0  ;;  %v896_v6 = vadd.f32 %v895_v3, %v894_v1  ;;  %v935_v7 = vpop.f32.mrb[5].mxu1  ;;  %v897_v8 = vpop.f32.mrb[6].mxu0 }
 0x105   : > { %v936_v9 = vadd.f32 %v935_v7, %v934_v2  ;;  %v937_v10 = vpop.f32.mrb[6].mxu1  ;;  %v898_v11 = vpop.f32.mrb[7].mxu0 }
 0x106   : > { %v852_v12 = vpack.c.bf16 %v668_v5, %v667_v4  ;;  %v580_v13 = vadd.f32 %v896_v6, %v1177_v50  ;;  %v899_v14 = vadd.f32 %v898_v11, %v897_v8  ;;  %v938_v15 = vpop.f32.mrb[7].mxu1 }
 0x107   : > { %v939_v16 = vadd.f32 %v938_v15, %v937_v10 }
 0x108   : > { %853 = vst [vmem:[%s1185_s10] sm:$0xff] %v852_v12   ;;  %v645_v17 = vadd.f32 %v936_v9, %v580_v13  ;;  %v583_v18 = vadd.f32 %v899_v14, %v1177_v50 }
 0x10a   : > { %v648_v19 = vadd.f32 %v939_v16, %v583_v18  ;;  %v900_v20 = vpop.f32.mrb[8].mxu0  ;;  %v669_v23 = vmax.f32 %v645_v17, 0.0 }
 0x10b   : > { %v940_v21 = vpop.f32.mrb[8].mxu1  ;;  %v901_v22 = vpop.f32.mrb[9].mxu0 }
 0x10c   : > { %v670_v24 = vmax.f32 %v648_v19, 0.0  ;;  %v902_v25 = vadd.f32 %v901_v22, %v900_v20  ;;  %v941_v26 = vpop.f32.mrb[9].mxu1  ;;  %v903_v27 = vpop.f32.mrb[10].mxu0 }
 0x10d   : > { %v942_v28 = vadd.f32 %v941_v26, %v940_v21  ;;  %v943_v29 = vpop.f32.mrb[10].mxu1  ;;  %v904_v30 = vpop.f32.mrb[11].mxu0 }
 0x10e   : > { %v857_v31 = vpack.c.bf16 %v670_v24, %v669_v23  ;;  %v588_v32 = vadd.f32 %v902_v25, %v1177_v50  ;;  %v905_v33 = vadd.f32 %v904_v30, %v903_v27  ;;  %v944_v34 = vpop.f32.mrb[11].mxu1 }
 0x10f   : > { %v945_v35 = vadd.f32 %v944_v34, %v943_v29 }
 0x110   : > { %869 = vst [vmem:[%s1185_s10 + $0x8] sm:$0xff] %v857_v31   ;;  %v653_v36 = vadd.f32 %v942_v28, %v588_v32  ;;  %v591_v37 = vadd.f32 %v905_v33, %v1177_v50 }
 0x112   : > { %v656_v38 = vadd.f32 %v945_v35, %v591_v37  ;;  %v906_v39 = vpop.f32.mrb[12].mxu0  ;;  %v671_v42 = vmax.f32 %v653_v36, 0.0 }
 0x113   : > { %v946_v40 = vpop.f32.mrb[12].mxu1  ;;  %v907_v41 = vpop.f32.mrb[13].mxu0 }
 0x114   : > { %v672_v43 = vmax.f32 %v656_v38, 0.0  ;;  %v908_v44 = vadd.f32 %v907_v41, %v906_v39  ;;  %v947_v45 = vpop.f32.mrb[13].mxu1  ;;  %v909_v46 = vpop.f32.mrb[14].mxu0 }
 0x115   : > { %v948_v47 = vadd.f32 %v947_v45, %v946_v40  ;;  %v949_v48 = vpop.f32.mrb[14].mxu1  ;;  %v910_v49 = vpop.f32.mrb[15].mxu0 }
 0x116   : > { %v862_v51 = vpack.c.bf16 %v672_v43, %v671_v42  ;;  %v596_v52 = vadd.f32 %v908_v44, %v1177_v50  ;;  %v911_v53 = vadd.f32 %v910_v49, %v909_v46  ;;  %v950_v54 = vpop.f32.mrb[15].mxu1 }
 0x117   : > { %v951_v55 = vadd.f32 %v950_v54, %v949_v48 }
 0x118   : > { %870 = vst [vmem:[%s1185_s10 + $0x10] sm:$0xff] %v862_v51   ;;  %v661_v56 = vadd.f32 %v948_v47, %v596_v52  ;;  %v599_v57 = vadd.f32 %v911_v53, %v1177_v50 }
 0x11a   : > { %v664_v58 = vadd.f32 %v951_v55, %v599_v57  ;;  %v673_v59 = vmax.f32 %v661_v56, 0.0 }
 0x11c   : > { %v674_v60 = vmax.f32 %v664_v58, 0.0 }
 0x11e   : > { %v867_v61 = vpack.c.bf16 %v674_v60, %v673_v59 }
 0x120   : > { %871 = vst [vmem:[%s1185_s10 + $0x18] sm:$0xff] %v867_v61  }
 0x121 PF: > { %s13_s12 = sadd.s32 1, %s1022_s12  }
 0x122   : > { %p10_p4 = scmp.ge.s32.totalorder %s13_s12, 4  }
 0x124   :  { %12 = sbr.rel (!%p10_p4) target bundleno = 1 (0x1), region = 62 }

// kernel: rho_betavae_forward.12
= control target key start
LH: loop header
LB: loop body
LE: loop exit
PB: predicated region body
PF: predicated region fallthrough
CT: control target
= control target key end

     0   :  { %s1260_s12 = smov 0   ;;  %s1488_s0 = inlined_call_operand.vmem [shape: bf16[32,1024], index: 0, kind: input, shape index: {}]   ;;  %s1489_s1 = inlined_call_operand.vmem [shape: bf16[1024,128], index: 1, kind: input, shape index: {}]   ;;  %s1490_s2 = inlined_call_operand.vmem [shape: f32[1,128], index: 2, kind: input, shape index: {}]   ;;  %s1491_s3 = inlined_call_operand.vmem [shape: bf16[32,128], index: 3, kind: output, shape index: {}]  }
   0x1 LB: > { %s977_s13 = sadd.s32 4294967295, %s1238_s12   ;;  %p981_p0 = scmp.ge.s32.totalorder %s1238_s12, 1  ;;  %s1238_s12 = sphi %s1260_s12, %s13_s12  }
   0x2   : > { %p139_p1 = scmp.lt.s32.totalorder %s1238_s12, 3 }
   0x4   : > { %p140_p2 = pnand %p981_p0, %p139_p1 }
   0x5   : > { %v1168_v0 = vld [vmem:[%s1489_s1 + $0x40] sm:$0xff] (!%p140_p2)   ;;  %v1172_v4 = vld [vmem:[%s1489_s1 + $0x48] sm:$0xff] (!%p140_p2)   ;;  %v1176_v8 = vld [vmem:[%s1489_s1 + $0x50] sm:$0xff] (!%p140_p2)   ;;  %s982_s21 = sshll.u32 (!%p140_p2), %s977_s13, 1 }
   0x6   : > { %143 = sbr.rel (%p140_p2) target bundleno = 297 (0x129), region = 32  ;;  %v1169_v1 = vld [vmem:[%s1489_s1 + $0xc0] sm:$0xff] (!%p140_p2)   ;;  %1072 = vmatprep.subr.bf16.mxu0 (!%p140_p2), %v1168_v0  ;;  %v1173_v5 = vld [vmem:[%s1489_s1 + $0xc8] sm:$0xff] (!%p140_p2)   ;;  %v1177_v9 = vld [vmem:[%s1489_s1 + $0xd0] sm:$0xff] (!%p140_p2)   ;;  %p165_p3 = scmp.lt.s32.totalorder (!%p140_p2), %s982_s21, 3 }
   0x7   : > { %v1170_v2 = vld [vmem:[%s1489_s1] sm:$0xff] (!%p140_p2)   ;;  %1094 = vmatprep.subr.bf16.mxu1 (!%p140_p2), %v1169_v1  ;;  %v1174_v6 = vld [vmem:[%s1489_s1 + $0x8] sm:$0xff] (!%p140_p2)   ;;  %v1178_v10 = vld [vmem:[%s1489_s1 + $0x10] sm:$0xff] (!%p140_p2)  }
   0x8   : > { %v1171_v3 = vld [vmem:[%s1489_s1 + $0x80] sm:$0xff] (!%p140_p2)   ;;  %1073 = vmatpush3.bf16.msra.mxu0 (!%p140_p2), %v1170_v2  ;;  %v1175_v7 = vld [vmem:[%s1489_s1 + $0x88] sm:$0xff] (!%p140_p2)   ;;  %v1179_v11 = vld [vmem:[%s1489_s1 + $0x90] sm:$0xff] (!%p140_p2)  }
   0x9   : > { %1095 = vmatpush3.bf16.msra.mxu1 (!%p140_p2), %v1171_v3  ;;  %1074 = vmatprep.subr.bf16.mxu0 (!%p140_p2), %v1172_v4  ;;  %v1180_v12 = vld [vmem:[%s1489_s1 + $0x58] sm:$0xff] (!%p140_p2)   ;;  %v1184_v16 = vld [vmem:[%s1489_s1 + $0x60] sm:$0xff] (!%p140_p2)   ;;  %v1188_v20 = vld [vmem:[%s1489_s1 + $0x68] sm:$0xff] (!%p140_p2)  }
   0xa   : > { %1096 = vmatprep.subr.bf16.mxu1 (!%p140_p2), %v1173_v5  ;;  %v1181_v13 = vld [vmem:[%s1489_s1 + $0xd8] sm:$0xff] (!%p140_p2)   ;;  %v1185_v17 = vld [vmem:[%s1489_s1 + $0xe0] sm:$0xff] (!%p140_p2)   ;;  %v1189_v21 = vld [vmem:[%s1489_s1 + $0xe8] sm:$0xff] (!%p140_p2)  }
   0xb   : > { %v1182_v14 = vld [vmem:[%s1489_s1 + $0x18] sm:$0xff] (!%p140_p2)   ;;  %v1186_v18 = vld [vmem:[%s1489_s1 + $0x20] sm:$0xff] (!%p140_p2)   ;;  %v1190_v22 = vld [vmem:[%s1489_s1 + $0x28] sm:$0xff] (!%p140_p2)  }
   0xc   : > { %1075 = vmatpush3.bf16.msra.mxu0 (!%p140_p2), %v1174_v6  ;;  %v1183_v15 = vld [vmem:[%s1489_s1 + $0x98] sm:$0xff] (!%p140_p2)   ;;  %v1187_v19 = vld [vmem:[%s1489_s1 + $0xa0] sm:$0xff] (!%p140_p2)   ;;  %v1191_v23 = vld [vmem:[%s1489_s1 + $0xa8] sm:$0xff] (!%p140_p2)  }
   0xd   : > { %1097 = vmatpush3.bf16.msra.mxu1 %v1175_v7  ;;  %1076 = vmatprep.subr.bf16.mxu0 %v1176_v8  ;;  %s1493_s21 = smov (!%p165_p3, %s982_s21), 3  ;;  %v1192_v24 = vld [vmem:[%s1489_s1 + $0x70] sm:$0xff]   ;;  %v1196_v28 = vld [vmem:[%s1489_s1 + $0x78] sm:$0xff]   ;;  %v1200_v40 = vld [vmem:[%s1489_s1 + $0x140] sm:$0xff]  }
   0xe   : > { %1098 = vmatprep.subr.bf16.mxu1 %v1177_v9  ;;  %v1193_v25 = vld [vmem:[%s1489_s1 + $0xf0] sm:$0xff]   ;;  %s1064_s18 = sshll.u32 %s1493_s21, 5  ;;  %v1197_v29 = vld [vmem:[%s1489_s1 + $0xf8] sm:$0xff]   ;;  %v1201_v41 = vld [vmem:[%s1489_s1 + $0x1c0] sm:$0xff]  }
   0xf   : > { %v1194_v26 = vld [vmem:[%s1489_s1 + $0x30] sm:$0xff]   ;;  %s1366_s28 = scalar_lea.vmem %s1488_s0, %s1064_s18  ;;  %v1198_v30 = vld [vmem:[%s1489_s1 + $0x38] sm:$0xff]   ;;  %v1202_v42 = vld [vmem:[%s1489_s1 + $0x100] sm:$0xff]  }
  0x10   : > { %1077 = vmatpush3.bf16.msra.mxu0 %v1178_v10  ;;  %v1195_v27 = vld [vmem:[%s1489_s1 + $0xb0] sm:$0xff]   ;;  %v1199_v31 = vld [vmem:[%s1489_s1 + $0xb8] sm:$0xff]   ;;  %v178_v32 = vld [vmem:[%s1366_s28] sm:$0xff] }
  0x11   : > { %1099 = vmatpush3.bf16.msra.mxu1 %v1179_v11  ;;  %1078 = vmatprep.subr.bf16.mxu0 %v1180_v12  ;;  %v182_v33 = vld [vmem:[%s1366_s28 + $0x20] sm:$0xff]  ;;  %v179_v34 = vld [vmem:[%s1366_s28 + $0x8] sm:$0xff]  ;;  %v1208_v48 = vld [vmem:[%s1489_s1 + $0x150] sm:$0xff]  }
  0x12   : > { %1100 = vmatprep.subr.bf16.mxu1 %v1181_v13  ;;  %v988_v35 = vcombine.low %v178_v32, %v182_v33  ;;  %v989_v36 = vcombine.high %v178_v32, %v182_v33  ;;  %v183_v37 = vld [vmem:[%s1366_s28 + $0x28] sm:$0xff]  ;;  %v1203_v43 = vld [vmem:[%s1489_s1 + $0x180] sm:$0xff]   ;;  %v1209_v49 = vld [vmem:[%s1489_s1 + $0x1d0] sm:$0xff]  }
  0x13   : > { %v990_v38 = vcombine.low %v179_v34, %v183_v37  ;;  %v991_v39 = vcombine.high %v179_v34, %v183_v37  ;;  %v1204_v44 = vld [vmem:[%s1489_s1 + $0x148] sm:$0xff]   ;;  %v1210_v50 = vld [vmem:[%s1489_s1 + $0x110] sm:$0xff]   ;;  %v1212_v52 = vld [vmem:[%s1489_s1 + $0x158] sm:$0xff]  }
  0x14   : > { %1079 = vmatpush3.bf16.msra.mxu0 %v1182_v14  ;;  %777 = vmatprep.mubr.bf16.mxu0 %v989_v36  ;;  %v1205_v45 = vld [vmem:[%s1489_s1 + $0x1c8] sm:$0xff]   ;;  %v1211_v51 = vld [vmem:[%s1489_s1 + $0x190] sm:$0xff]   ;;  %v1213_v53 = vld [vmem:[%s1489_s1 + $0x1d8] sm:$0xff]  }
  0x15   : > { %1101 = vmatpush3.bf16.msra.mxu1 %v1183_v15  ;;  %1080 = vmatprep.subr.bf16.mxu0 %v1184_v16  ;;  %v1206_v46 = vld [vmem:[%s1489_s1 + $0x108] sm:$0xff]   ;;  %v1214_v54 = vld [vmem:[%s1489_s1 + $0x118] sm:$0xff]   ;;  %v1216_v56 = vld [vmem:[%s1489_s1 + $0x160] sm:$0xff]  }
  0x16   : > { %1102 = vmatprep.subr.bf16.mxu1 %v1185_v17  ;;  %818 = vmatprep.mubr.bf16.mxu1 %v991_v39  ;;  %v1207_v47 = vld [vmem:[%s1489_s1 + $0x188] sm:$0xff]   ;;  %v1215_v55 = vld [vmem:[%s1489_s1 + $0x198] sm:$0xff]   ;;  %v1217_v57 = vld [vmem:[%s1489_s1 + $0x1e0] sm:$0xff]  }
  0x17   : > { %v1218_v58 = vld [vmem:[%s1489_s1 + $0x120] sm:$0xff]   ;;  %v1220_v60 = vld [vmem:[%s1489_s1 + $0x168] sm:$0xff]   ;;  %v1224_v0 = vld [vmem:[%s1489_s1 + $0x170] sm:$0xff]  }
  0x18   : > { %1081 = vmatpush3.bf16.msra.mxu0 %v1186_v18  ;;  %v1219_v59 = vld [vmem:[%s1489_s1 + $0x1a0] sm:$0xff]   ;;  %v1221_v61 = vld [vmem:[%s1489_s1 + $0x1e8] sm:$0xff]   ;;  %v1225_v1 = vld [vmem:[%s1489_s1 + $0x1f0] sm:$0xff]  }
  0x19   : > { %1103 = vmatpush3.bf16.msra.mxu1 %v1187_v19  ;;  %1082 = vmatprep.subr.bf16.mxu0 %v1188_v20  ;;  %v1222_v62 = vld [vmem:[%s1489_s1 + $0x128] sm:$0xff]   ;;  %v1226_v2 = vld [vmem:[%s1489_s1 + $0x130] sm:$0xff]   ;;  %v1228_v4 = vld [vmem:[%s1489_s1 + $0x178] sm:$0xff]  }
  0x1a   : > { %1104 = vmatprep.subr.bf16.mxu1 %v1189_v21  ;;  %v1223_v63 = vld [vmem:[%s1489_s1 + $0x1a8] sm:$0xff]   ;;  %v1227_v3 = vld [vmem:[%s1489_s1 + $0x1b0] sm:$0xff]   ;;  %v1229_v5 = vld [vmem:[%s1489_s1 + $0x1f8] sm:$0xff]  }
  0x1b   : > { %v1230_v6 = vld [vmem:[%s1489_s1 + $0x138] sm:$0xff]   ;;  %v180_v8 = vld [vmem:[%s1366_s28 + $0x10] sm:$0xff]  ;;  %v987_v18 = vld [vmem:[%s1490_s2] ss:$0 sm:$0xff] }
  0x1c   : > { %1083 = vmatpush3.bf16.msra.mxu0 %v1190_v22  ;;  %v1231_v7 = vld [vmem:[%s1489_s1 + $0x1b8] sm:$0xff]   ;;  %v184_v9 = vld [vmem:[%s1366_s28 + $0x30] sm:$0xff] }
  0x1d   : > { %1105 = vmatpush3.bf16.msra.mxu1 %v1191_v23  ;;  %1084 = vmatprep.subr.bf16.mxu0 %v1192_v24  ;;  %v992_v10 = vcombine.low %v180_v8, %v184_v9  ;;  %v993_v11 = vcombine.high %v180_v8, %v184_v9  ;;  %v181_v12 = vld [vmem:[%s1366_s28 + $0x18] sm:$0xff] }
  0x1e   : > { %1106 = vmatprep.subr.bf16.mxu1 %v1193_v25  ;;  %v185_v13 = vld [vmem:[%s1366_s28 + $0x38] sm:$0xff]  ;;  %s986_s28 = sshll.u32 %s1493_s21, 2 }
  0x1f   : > { %v994_v14 = vcombine.low %v181_v12, %v185_v13  ;;  %v995_v15 = vcombine.high %v181_v12, %v185_v13  ;;  %s175_s29 = scalar_lea.vmem %s1491_s3, %s986_s28 }
  0x20   : > { %1085 = vmatpush3.bf16.msra.mxu0 %v1194_v26 }
  0x21   : > { %1107 = vmatpush3.bf16.msra.mxu1 %v1195_v27  ;;  %1086 = vmatprep.subr.bf16.mxu0 %v1196_v28 }
  0x22   : > { %1108 = vmatprep.subr.bf16.mxu1 %v1197_v29 }
  0x24   : > { %1087 = vmatpush3.bf16.msra.mxu0 %v1198_v30 }
  0x25   : > { %1109 = vmatpush3.bf16.msra.mxu1 %v1199_v31  ;;  %1116 = vmatprep.subr.bf16.mxu0 %v1200_v40 }
  0x26   : > { %1138 = vmatprep.subr.bf16.mxu1 %v1201_v41 }
  0x27   : > { %778 = vmatmul.mubr.bf16.vlgmr.msra.gmra.mrb[0].mxu0 %v988_v35 }
  0x28   : > { %819 = vmatmul.mubr.bf16.vlgmr.msra.gmra.mrb[0].mxu1 %v990_v38  ;;  %1117 = vmatpush3.bf16.msra.mxu0 %v1202_v42 }
  0x29   : > { %1139 = vmatpush3.bf16.msra.mxu1 %v1203_v43  ;;  %1118 = vmatprep.subr.bf16.mxu0 %v1204_v44 }
  0x2a   : > { %1140 = vmatprep.subr.bf16.mxu1 %v1205_v45  ;;  %859 = vmatprep.mubr.bf16.mxu0 %v993_v11 }
  0x2b   : > { %900 = vmatprep.mubr.bf16.mxu1 %v995_v15 }
  0x2c   : > { %1119 = vmatpush3.bf16.msra.mxu0 %v1206_v46 }
  0x2d   : > { %1141 = vmatpush3.bf16.msra.mxu1 %v1207_v47  ;;  %1120 = vmatprep.subr.bf16.mxu0 %v1208_v48 }
  0x2e   : > { %1142 = vmatprep.subr.bf16.mxu1 %v1209_v49 }
  0x30   : > { %1121 = vmatpush3.bf16.msra.mxu0 %v1210_v50 }
  0x31   : > { %1143 = vmatpush3.bf16.msra.mxu1 %v1211_v51  ;;  %1122 = vmatprep.subr.bf16.mxu0 %v1212_v52 }
  0x32   : > { %1144 = vmatprep.subr.bf16.mxu1 %v1213_v53 }
  0x34   : > { %1123 = vmatpush3.bf16.msra.mxu0 %v1214_v54 }
  0x35   : > { %1145 = vmatpush3.bf16.msra.mxu1 %v1215_v55  ;;  %1124 = vmatprep.subr.bf16.mxu0 %v1216_v56 }
  0x36   : > { %1146 = vmatprep.subr.bf16.mxu1 %v1217_v57 }
  0x38   : > { %1125 = vmatpush3.bf16.msra.mxu0 %v1218_v58 }
  0x39   : > { %1147 = vmatpush3.bf16.msra.mxu1 %v1219_v59  ;;  %1126 = vmatprep.subr.bf16.mxu0 %v1220_v60 }
  0x3a   : > { %1148 = vmatprep.subr.bf16.mxu1 %v1221_v61 }
  0x3c   : > { %1127 = vmatpush3.bf16.msra.mxu0 %v1222_v62 }
  0x3d   : > { %1149 = vmatpush3.bf16.msra.mxu1 %v1223_v63  ;;  %1128 = vmatprep.subr.bf16.mxu0 %v1224_v0 }
  0x3e   : > { %1150 = vmatprep.subr.bf16.mxu1 %v1225_v1 }
  0x40   : > { %1129 = vmatpush3.bf16.msra.mxu0 %v1226_v2 }
  0x41   : > { %1151 = vmatpush3.bf16.msra.mxu1 %v1227_v3  ;;  %1130 = vmatprep.subr.bf16.mxu0 %v1228_v4 }
  0x42   : > { %1152 = vmatprep.subr.bf16.mxu1 %v1229_v5 }
  0x44   : > { %1131 = vmatpush3.bf16.msra.mxu0 %v1230_v6 }
  0x45   : > { %1153 = vmatpush3.bf16.msra.mxu1 %v1231_v7 }
  0x47   : > { %860 = vmatmul.mubr.bf16.vlgmr.msra.gmra.mrb[4].mxu0 %v992_v10 }
  0x48   : > { %901 = vmatmul.mubr.bf16.vlgmr.msra.gmra.mrb[4].mxu1 %v994_v14 }
  0xfa   : > { %v1088_v16 = vpop.f32.mrb[0].mxu0 }
  0xfb   : > { %v1110_v17 = vpop.f32.mrb[0].mxu1  ;;  %v1089_v19 = vpop.f32.mrb[1].mxu0 }
  0xfc   : > { %v1090_v20 = vadd.f32 %v1089_v19, %v1088_v16  ;;  %v1111_v21 = vpop.f32.mrb[1].mxu1  ;;  %v1091_v22 = vpop.f32.mrb[2].mxu0 }
  0xfd   : > { %v1112_v23 = vadd.f32 %v1111_v21, %v1110_v17  ;;  %v1113_v24 = vpop.f32.mrb[2].mxu1  ;;  %v1092_v25 = vpop.f32.mrb[3].mxu0 }
  0xfe   : > { %v780_v26 = vadd.f32 %v1090_v20, %v987_v18  ;;  %v1093_v27 = vadd.f32 %v1092_v25, %v1091_v22  ;;  %v1114_v28 = vpop.f32.mrb[3].mxu1 }
  0xff   : > { %v1115_v29 = vadd.f32 %v1114_v28, %v1113_v24 }
 0x100   : > { %v821_v30 = vadd.f32 %v1112_v23, %v780_v26  ;;  %v783_v31 = vadd.f32 %v1093_v27, %v987_v18 }
 0x102   : > { %v824_v32 = vadd.f32 %v1115_v29, %v783_v31 }
 0x11a   : > { %v1132_v33 = vpop.f32.mrb[4].mxu0 }
 0x11b   : > { %v1154_v34 = vpop.f32.mrb[4].mxu1  ;;  %v1133_v35 = vpop.f32.mrb[5].mxu0 }
 0x11c   : > { %v1134_v36 = vadd.f32 %v1133_v35, %v1132_v33  ;;  %v1155_v37 = vpop.f32.mrb[5].mxu1  ;;  %v1135_v38 = vpop.f32.mrb[6].mxu0 }
 0x11d   : > { %v1156_v39 = vadd.f32 %v1155_v37, %v1154_v34  ;;  %v1157_v40 = vpop.f32.mrb[6].mxu1  ;;  %v1136_v41 = vpop.f32.mrb[7].mxu0 }
 0x11e   : > { %v862_v42 = vadd.f32 %v1134_v36, %v821_v30  ;;  %v1137_v43 = vadd.f32 %v1136_v41, %v1135_v38  ;;  %v1158_v44 = vpop.f32.mrb[7].mxu1 }
 0x11f   : > { %v1159_v45 = vadd.f32 %v1158_v44, %v1157_v40 }
 0x120   : > { %v903_v46 = vadd.f32 %v1156_v39, %v862_v42  ;;  %v865_v47 = vadd.f32 %v1137_v43, %v824_v32 }
 0x122   : > { %v906_v48 = vadd.f32 %v1159_v45, %v865_v47  ;;  %v909_v49 = vmax.f32 %v903_v46, 0.0 }
 0x124   : > { %v910_v50 = vmax.f32 %v906_v48, 0.0 }
 0x126   : > { %v1070_v51 = vpack.c.bf16 %v910_v50, %v909_v49 }
 0x128   : > { %1071 = vst [vmem:[%s175_s29] sm:$0xff] %v1070_v51  }
 0x129 PF: > { %s13_s12 = sadd.s32 1, %s1238_s12  }
 0x12a   : > { %p10_p4 = scmp.ge.s32.totalorder %s13_s12, 4  }
 0x12c   :  { %12 = sbr.rel (!%p10_p4) target bundleno = 1 (0x1), region = 62 }

// kernel: rho_betavae_forward.13
= control target key start
LH: loop header
LB: loop body
LE: loop exit
PB: predicated region body
PF: predicated region fallthrough
CT: control target
= control target key end

     0   :  { %v172_v7 = vlaneseq  ;;  %v3054_v8 = vmov 1966171168   ;;  %s4068_s0 = inlined_call_operand.vmem [shape: bf16[2,1024], index: 0, kind: input, shape index: {}]   ;;  %s4069_s1 = inlined_call_operand.vmem [shape: f32[2,8], index: 1, kind: input, shape index: {}]   ;;  %s4070_s2 = inlined_call_operand.vmem [shape: bf16[1024,256], index: 2, kind: input, shape index: {}]   ;;  %s4071_s3 = inlined_call_operand.vmem [shape: f32[1,256], index: 3, kind: input, shape index: {}]   ;;  %s4072_s4 = inlined_call_operand.vmem [shape: bf16[256,128], index: 4, kind: input, shape index: {}]   ;;  %s4073_s5 = inlined_call_operand.vmem [shape: f32[1,128], index: 5, kind: input, shape index: {}]   ;;  %s4074_s6 = inlined_call_operand.vmem [shape: bf16[8,256], index: 6, kind: input, shape index: {}]   ;;  %s4075_s7 = inlined_call_operand.vmem [shape: f32[1,256], index: 7, kind: input, shape index: {}]   ;;  %s4076_s8 = inlined_call_operand.vmem [shape: bf16[256,1024], index: 8, kind: input, shape index: {}]   ;;  %s4077_s9 = inlined_call_operand.vmem [shape: f32[1,1024], index: 9, kind: input, shape index: {}]   ;;  %s4078_s10 = inlined_call_operand.hbm [shape: f32[2,8], index: 10, kind: output, shape index: {0}]   ;;  %s4079_s11 = inlined_call_operand.vmem [shape: f32[2,1], index: 11, kind: output, shape index: {1}]   ;;  %s4080_s12 = inlined_call_operand.vmem [shape: f32[2,1], index: 12, kind: output, shape index: {2}]   ;;  %s4081_s13 = inlined_call_operand.vmem [shape: bf16[2,1024], index: 13, kind: output, shape index: {3}]  }
   0x1   :  { %v2815_v0 = vld [vmem:[%s4070_s2 + $0x4] ss:$8 sps:$4 sm:$0xff]   ;;  %v2817_v1 = vld [vmem:[%s4070_s2] ss:$8 sps:$4 sm:$0xff]   ;;  %v2818_v2 = vld [vmem:[%s4070_s2 + $0x14] ss:$8 sps:$4 sm:$0xff]   ;;  %v185_v9 = vunpack.c.l.s4 %v3054_v8 }
   0x2   :  { %880 = vmatprep.subr.bf16.mxu0 %v2815_v0  ;;  %v2820_v3 = vld [vmem:[%s4070_s2 + $0x10] ss:$8 sps:$4 sm:$0xff]   ;;  %v2821_v4 = vld [vmem:[%s4070_s2 + $0x24] ss:$8 sps:$4 sm:$0xff]   ;;  %v2823_v5 = vld [vmem:[%s4070_s2 + $0x20] ss:$8 sps:$4 sm:$0xff]  }
   0x3   :  { %881 = vmatpush1.bf16.msra.mxu0 %v2817_v1  ;;  %v2824_v6 = vld [vmem:[%s4070_s2 + $0x34] ss:$8 sps:$4 sm:$0xff]   ;;  %v2826_v10 = vld [vmem:[%s4070_s2 + $0x30] ss:$8 sps:$4 sm:$0xff]   ;;  %v2827_v11 = vld [vmem:[%s4070_s2 + $0x44] ss:$8 sps:$4 sm:$0xff]   ;;  %v186_v13 = vunpack.c.0.s8 %v185_v9 }
   0x4   :  { %882 = vmatprep.subr.bf16.mxu0 %v2818_v2  ;;  %v3161_v12 = vshrl.u32 %v172_v7, 7  ;;  %v2829_v14 = vld [vmem:[%s4070_s2 + $0x40] ss:$8 sps:$4 sm:$0xff]   ;;  %v2830_v15 = vld [vmem:[%s4070_s2 + $0x54] ss:$8 sps:$4 sm:$0xff]  }
   0x5   :  { %v2832_v17 = vld [vmem:[%s4070_s2 + $0x50] ss:$8 sps:$4 sm:$0xff]   ;;  %v2833_v18 = vld [vmem:[%s4070_s2 + $0x64] ss:$8 sps:$4 sm:$0xff]   ;;  %v2835_v21 = vld [vmem:[%s4070_s2 + $0x60] ss:$8 sps:$4 sm:$0xff]  }
   0x6   :  { %v3170_v16 = vsub.s32 %v186_v13, %v3161_v12  ;;  %v3181_v19 = vld [vmem:[%s4068_s0] sm:$0xff]  ;;  %v2836_v22 = vld [vmem:[%s4070_s2 + $0x74] ss:$8 sps:$4 sm:$0xff]   ;;  %v2838_v25 = vld [vmem:[%s4070_s2 + $0x70] ss:$8 sps:$4 sm:$0xff]  }
   0x7   :  { %883 = vmatpush1.bf16.msra.mxu0 %v2820_v3  ;;  %v2839_v26 = vld [vmem:[%s4070_s2 + $0x84] ss:$8 sps:$4 sm:$0xff]   ;;  %v2841_v27 = vld [vmem:[%s4070_s2 + $0x80] ss:$8 sps:$4 sm:$0xff]   ;;  %v2842_v28 = vld [vmem:[%s4070_s2 + $0x94] ss:$8 sps:$4 sm:$0xff]  }
   0x8   :  { %884 = vmatprep.subr.bf16.mxu0 %v2821_v4  ;;  %v190_v20 = vrot.slane %v3181_v19, %v3170_v16  ;;  %v2844_v29 = vld [vmem:[%s4070_s2 + $0x90] ss:$8 sps:$4 sm:$0xff]   ;;  %v2845_v30 = vld [vmem:[%s4070_s2 + $0xa4] ss:$8 sps:$4 sm:$0xff]   ;;  %v2847_v31 = vld [vmem:[%s4070_s2 + $0xa0] ss:$8 sps:$4 sm:$0xff]  }
   0x9   :  { %v2848_v32 = vld [vmem:[%s4070_s2 + $0xb4] ss:$8 sps:$4 sm:$0xff]   ;;  %v2850_v33 = vld [vmem:[%s4070_s2 + $0xb0] ss:$8 sps:$4 sm:$0xff]   ;;  %v2851_v34 = vld [vmem:[%s4070_s2 + $0xc4] ss:$8 sps:$4 sm:$0xff]  }
   0xa   :  { %v198_v23 = vcombine.high %v190_v20, %v190_v20  ;;  %v2853_v35 = vld [vmem:[%s4070_s2 + $0xc0] ss:$8 sps:$4 sm:$0xff]   ;;  %v2854_v36 = vld [vmem:[%s4070_s2 + $0xd4] ss:$8 sps:$4 sm:$0xff]   ;;  %v2856_v37 = vld [vmem:[%s4070_s2 + $0xd0] ss:$8 sps:$4 sm:$0xff]   ;;  %v3247_v43 = vrot.slane %v190_v20, %v3170_v16 }
   0xb   :  { %885 = vmatpush1.bf16.msra.mxu0 %v2823_v5  ;;  %v2857_v38 = vld [vmem:[%s4070_s2 + $0xe4] ss:$8 sps:$4 sm:$0xff]   ;;  %v2859_v39 = vld [vmem:[%s4070_s2 + $0xe0] ss:$8 sps:$4 sm:$0xff]   ;;  %v2860_v40 = vld [vmem:[%s4070_s2 + $0xf4] ss:$8 sps:$4 sm:$0xff]  }
   0xc   :  { %886 = vmatprep.subr.bf16.mxu0 %v2824_v6  ;;  %v220_v24 = vrot.slane %v198_v23, %v3170_v16  ;;  %v2862_v41 = vld [vmem:[%s4070_s2 + $0xf0] ss:$8 sps:$4 sm:$0xff]   ;;  %v2866_v42 = vld [vmem:[%s4070_s2 + $0x104] ss:$8 sps:$4 sm:$0xff]   ;;  %v2864_v45 = vld [vmem:[%s4070_s2 + $0x100] ss:$8 sps:$4 sm:$0xff]  }
   0xd   :  { %v2869_v46 = vld [vmem:[%s4070_s2 + $0x114] ss:$8 sps:$4 sm:$0xff]   ;;  %v2867_v47 = vld [vmem:[%s4070_s2 + $0x110] ss:$8 sps:$4 sm:$0xff]   ;;  %v2872_v48 = vld [vmem:[%s4070_s2 + $0x124] ss:$8 sps:$4 sm:$0xff]  }
   0xe   :  { %912 = vmatprep.mubr.bf16.mxu0 %v220_v24  ;;  %v230_v44 = vcombine.high %v220_v24, %v220_v24  ;;  %v2870_v49 = vld [vmem:[%s4070_s2 + $0x120] ss:$8 sps:$4 sm:$0xff]   ;;  %v2875_v50 = vld [vmem:[%s4070_s2 + $0x134] ss:$8 sps:$4 sm:$0xff]   ;;  %v2873_v51 = vld [vmem:[%s4070_s2 + $0x130] ss:$8 sps:$4 sm:$0xff]  }
   0xf   :  { %887 = vmatpush1.bf16.msra.mxu0 %v2826_v10  ;;  %v2878_v52 = vld [vmem:[%s4070_s2 + $0x144] ss:$8 sps:$4 sm:$0xff]   ;;  %v2876_v53 = vld [vmem:[%s4070_s2 + $0x140] ss:$8 sps:$4 sm:$0xff]   ;;  %v2881_v54 = vld [vmem:[%s4070_s2 + $0x154] ss:$8 sps:$4 sm:$0xff]  }
  0x10   :  { %888 = vmatprep.subr.bf16.mxu0 %v2827_v11  ;;  %v2879_v55 = vld [vmem:[%s4070_s2 + $0x150] ss:$8 sps:$4 sm:$0xff]   ;;  %v2884_v56 = vld [vmem:[%s4070_s2 + $0x164] ss:$8 sps:$4 sm:$0xff]   ;;  %v2882_v57 = vld [vmem:[%s4070_s2 + $0x160] ss:$8 sps:$4 sm:$0xff]  }
  0x11   :  { %v2887_v58 = vld [vmem:[%s4070_s2 + $0x174] ss:$8 sps:$4 sm:$0xff]  }
  0x13   :  { %889 = vmatpush1.bf16.msra.mxu0 %v2829_v14 }
  0x14   :  { %890 = vmatprep.subr.bf16.mxu0 %v2830_v15 }
  0x17   :  { %891 = vmatpush1.bf16.msra.mxu0 %v2832_v17 }
  0x18   :  { %892 = vmatprep.subr.bf16.mxu0 %v2833_v18 }
  0x1b   :  { %893 = vmatpush1.bf16.msra.mxu0 %v2835_v21 }
  0x1c   :  { %894 = vmatprep.subr.bf16.mxu0 %v2836_v22 }
  0x1f   :  { %895 = vmatpush1.bf16.msra.mxu0 %v2838_v25 }
  0x20   :  { %896 = vmatprep.subr.bf16.mxu0 %v2839_v26 }
  0x23   :  { %897 = vmatpush1.bf16.msra.mxu0 %v2841_v27 }
  0x24   :  { %898 = vmatprep.subr.bf16.mxu0 %v2842_v28 }
  0x27   :  { %899 = vmatpush1.bf16.msra.mxu0 %v2844_v29 }
  0x28   :  { %900 = vmatprep.subr.bf16.mxu0 %v2845_v30 }
  0x2b   :  { %901 = vmatpush1.bf16.msra.mxu0 %v2847_v31 }
  0x2c   :  { %902 = vmatprep.subr.bf16.mxu0 %v2848_v32 }
  0x2f   :  { %903 = vmatpush1.bf16.msra.mxu0 %v2850_v33 }
  0x30   :  { %904 = vmatprep.subr.bf16.mxu0 %v2851_v34 }
  0x33   :  { %905 = vmatpush1.bf16.msra.mxu0 %v2853_v35 }
  0x34   :  { %906 = vmatprep.subr.bf16.mxu0 %v2854_v36 }
  0x37   :  { %907 = vmatpush1.bf16.msra.mxu0 %v2856_v37 }
  0x38   :  { %908 = vmatprep.subr.bf16.mxu0 %v2857_v38 }
  0x3b   :  { %909 = vmatpush1.bf16.msra.mxu0 %v2859_v39 }
  0x3c   :  { %910 = vmatprep.subr.bf16.mxu0 %v2860_v40 }
  0x3f   :  { %911 = vmatpush1.bf16.msra.mxu0 %v2862_v41 }
  0x40   :  { %921 = vmatprep.subr.bf16.mxu0 %v2866_v42 }
  0x42   :  { %913 = vmatmul.mubr.bf16.vlgmr.msra.gmra.mrb[0].mxu0 %v3247_v43 }
  0x43   :  { %922 = vmatpush1.bf16.msra.mxu0 %v2864_v45  ;;  %953 = vmatprep.mubr.bf16.mxu0 %v230_v44 }
  0x44   :  { %923 = vmatprep.subr.bf16.mxu0 %v2869_v46 }
  0x47   :  { %924 = vmatpush1.bf16.msra.mxu0 %v2867_v47 }
  0x48   :  { %925 = vmatprep.subr.bf16.mxu0 %v2872_v48 }
  0x4b   :  { %926 = vmatpush1.bf16.msra.mxu0 %v2870_v49 }
  0x4c   :  { %927 = vmatprep.subr.bf16.mxu0 %v2875_v50 }
  0x4f   :  { %928 = vmatpush1.bf16.msra.mxu0 %v2873_v51 }
  0x50   :  { %929 = vmatprep.subr.bf16.mxu0 %v2878_v52 }
  0x53   :  { %930 = vmatpush1.bf16.msra.mxu0 %v2876_v53 }
  0x54   :  { %931 = vmatprep.subr.bf16.mxu0 %v2881_v54 }
  0x57   :  { %932 = vmatpush1.bf16.msra.mxu0 %v2879_v55 }
  0x58   :  { %933 = vmatprep.subr.bf16.mxu0 %v2884_v56 }
  0x59   :  { %19 = vsyncpa [#allocation3], 0  ;;  %v2885_v59 = vld [vmem:[%s4070_s2 + $0x170] ss:$8 sps:$4 sm:$0xff]   ;;  %v2890_v60 = vld [vmem:[%s4070_s2 + $0x184] ss:$8 sps:$4 sm:$0xff]   ;;  %v183_v8 = vcombine.high %v3181_v19, %v3181_v19  ;;  %v228_v19 = vcombine.high %v3247_v43, %v3247_v43 }
  0x5a   :  { %v2888_v61 = vld [vmem:[%s4070_s2 + $0x180] ss:$8 sps:$4 sm:$0xff]   ;;  %v2893_v62 = vld [vmem:[%s4070_s2 + $0x194] ss:$8 sps:$4 sm:$0xff]   ;;  %v2891_v63 = vld [vmem:[%s4070_s2 + $0x190] ss:$8 sps:$4 sm:$0xff]  }
  0x5b   :  { %934 = vmatpush1.bf16.msra.mxu0 %v2882_v57  ;;  %v2896_v0 = vld [vmem:[%s4070_s2 + $0x1a4] ss:$8 sps:$4 sm:$0xff]   ;;  %v2894_v1 = vld [vmem:[%s4070_s2 + $0x1a0] ss:$8 sps:$4 sm:$0xff]   ;;  %v2899_v2 = vld [vmem:[%s4070_s2 + $0x1b4] ss:$8 sps:$4 sm:$0xff]   ;;  %v3340_v13 = vrot.slane %v183_v8, %v3170_v16 }
  0x5c   :  { %935 = vmatprep.subr.bf16.mxu0 %v2887_v58  ;;  %v2897_v3 = vld [vmem:[%s4070_s2 + $0x1b0] ss:$8 sps:$4 sm:$0xff]   ;;  %v2902_v4 = vld [vmem:[%s4070_s2 + $0x1c4] ss:$8 sps:$4 sm:$0xff]   ;;  %v2900_v5 = vld [vmem:[%s4070_s2 + $0x1c0] ss:$8 sps:$4 sm:$0xff]  }
  0x5d   :  { %v2905_v6 = vld [vmem:[%s4070_s2 + $0x1d4] ss:$8 sps:$4 sm:$0xff]   ;;  %v2903_v9 = vld [vmem:[%s4070_s2 + $0x1d0] ss:$8 sps:$4 sm:$0xff]   ;;  %v2908_v10 = vld [vmem:[%s4070_s2 + $0x1e4] ss:$8 sps:$4 sm:$0xff]   ;;  %v199_v17 = vcombine.high %v3340_v13, %v3340_v13  ;;  %v3457_v53 = vrot.slane %v3340_v13, %v3170_v16 }
  0x5e   :  { %v2906_v11 = vld [vmem:[%s4070_s2 + $0x1e0] ss:$8 sps:$4 sm:$0xff]   ;;  %v2911_v14 = vld [vmem:[%s4070_s2 + $0x1f4] ss:$8 sps:$4 sm:$0xff]   ;;  %v2909_v15 = vld [vmem:[%s4070_s2 + $0x1f0] ss:$8 sps:$4 sm:$0xff]  }
  0x5f   :  { %936 = vmatpush1.bf16.msra.mxu0 %v2885_v59  ;;  %v2914_v18 = vld [vmem:[%s4070_s2 + $0x204] ss:$8 sps:$4 sm:$0xff]   ;;  %v2912_v20 = vld [vmem:[%s4070_s2 + $0x200] ss:$8 sps:$4 sm:$0xff]   ;;  %v3359_v21 = vrot.slane %v199_v17, %v3170_v16  ;;  %v2917_v22 = vld [vmem:[%s4070_s2 + $0x214] ss:$8 sps:$4 sm:$0xff]  }
  0x60   :  { %937 = vmatprep.subr.bf16.mxu0 %v2890_v60  ;;  %v2915_v23 = vld [vmem:[%s4070_s2 + $0x210] ss:$8 sps:$4 sm:$0xff]   ;;  %v2920_v24 = vld [vmem:[%s4070_s2 + $0x224] ss:$8 sps:$4 sm:$0xff]   ;;  %v2918_v25 = vld [vmem:[%s4070_s2 + $0x220] ss:$8 sps:$4 sm:$0xff]  }
  0x61   :  { %v2923_v26 = vld [vmem:[%s4070_s2 + $0x234] ss:$8 sps:$4 sm:$0xff]   ;;  %v2921_v27 = vld [vmem:[%s4070_s2 + $0x230] ss:$8 sps:$4 sm:$0xff]   ;;  %v2926_v28 = vld [vmem:[%s4070_s2 + $0x244] ss:$8 sps:$4 sm:$0xff]   ;;  %v231_v55 = vcombine.high %v3359_v21, %v3359_v21 }
  0x62   :  { %v2924_v29 = vld [vmem:[%s4070_s2 + $0x240] ss:$8 sps:$4 sm:$0xff]   ;;  %v2929_v30 = vld [vmem:[%s4070_s2 + $0x254] ss:$8 sps:$4 sm:$0xff]   ;;  %v2927_v31 = vld [vmem:[%s4070_s2 + $0x250] ss:$8 sps:$4 sm:$0xff]  }
  0x63   :  { %938 = vmatpush1.bf16.msra.mxu0 %v2888_v61  ;;  %v2932_v32 = vld [vmem:[%s4070_s2 + $0x264] ss:$8 sps:$4 sm:$0xff]   ;;  %v2930_v33 = vld [vmem:[%s4070_s2 + $0x260] ss:$8 sps:$4 sm:$0xff]   ;;  %v2935_v34 = vld [vmem:[%s4070_s2 + $0x274] ss:$8 sps:$4 sm:$0xff]  }
  0x64   :  { %939 = vmatprep.subr.bf16.mxu0 %v2893_v62  ;;  %v2933_v35 = vld [vmem:[%s4070_s2 + $0x270] ss:$8 sps:$4 sm:$0xff]   ;;  %v2938_v36 = vld [vmem:[%s4070_s2 + $0x284] ss:$8 sps:$4 sm:$0xff]   ;;  %v2936_v37 = vld [vmem:[%s4070_s2 + $0x280] ss:$8 sps:$4 sm:$0xff]  }
  0x65   :  { %v2941_v38 = vld [vmem:[%s4070_s2 + $0x294] ss:$8 sps:$4 sm:$0xff]   ;;  %v2939_v39 = vld [vmem:[%s4070_s2 + $0x290] ss:$8 sps:$4 sm:$0xff]   ;;  %v2944_v40 = vld [vmem:[%s4070_s2 + $0x2a4] ss:$8 sps:$4 sm:$0xff]  }
  0x66   :  { %v2942_v41 = vld [vmem:[%s4070_s2 + $0x2a0] ss:$8 sps:$4 sm:$0xff]   ;;  %v2947_v42 = vld [vmem:[%s4070_s2 + $0x2b4] ss:$8 sps:$4 sm:$0xff]   ;;  %v2945_v43 = vld [vmem:[%s4070_s2 + $0x2b0] ss:$8 sps:$4 sm:$0xff]  }
  0x67   :  { %940 = vmatpush1.bf16.msra.mxu0 %v2891_v63  ;;  %v2950_v44 = vld [vmem:[%s4070_s2 + $0x2c4] ss:$8 sps:$4 sm:$0xff]   ;;  %v2948_v45 = vld [vmem:[%s4070_s2 + $0x2c0] ss:$8 sps:$4 sm:$0xff]   ;;  %v2953_v46 = vld [vmem:[%s4070_s2 + $0x2d4] ss:$8 sps:$4 sm:$0xff]  }
  0x68   :  { %941 = vmatprep.subr.bf16.mxu0 %v2896_v0  ;;  %v2951_v47 = vld [vmem:[%s4070_s2 + $0x2d0] ss:$8 sps:$4 sm:$0xff]   ;;  %v2956_v48 = vld [vmem:[%s4070_s2 + $0x2e4] ss:$8 sps:$4 sm:$0xff]   ;;  %v2954_v49 = vld [vmem:[%s4070_s2 + $0x2e0] ss:$8 sps:$4 sm:$0xff]  }
  0x69   :  { %v2959_v50 = vld [vmem:[%s4070_s2 + $0x2f4] ss:$8 sps:$4 sm:$0xff]   ;;  %v2957_v51 = vld [vmem:[%s4070_s2 + $0x2f0] ss:$8 sps:$4 sm:$0xff]   ;;  %v2962_v52 = vld [vmem:[%s4070_s2 + $0x304] ss:$8 sps:$4 sm:$0xff]  }
  0x6a   :  { %v2960_v54 = vld [vmem:[%s4070_s2 + $0x300] ss:$8 sps:$4 sm:$0xff]   ;;  %v2965_v56 = vld [vmem:[%s4070_s2 + $0x314] ss:$8 sps:$4 sm:$0xff]   ;;  %v2963_v57 = vld [vmem:[%s4070_s2 + $0x310] ss:$8 sps:$4 sm:$0xff]  }
  0x6b   :  { %942 = vmatpush1.bf16.msra.mxu0 %v2894_v1  ;;  %v2968_v58 = vld [vmem:[%s4070_s2 + $0x324] ss:$8 sps:$4 sm:$0xff]   ;;  %v2966_v59 = vld [vmem:[%s4070_s2 + $0x320] ss:$8 sps:$4 sm:$0xff]   ;;  %v2971_v60 = vld [vmem:[%s4070_s2 + $0x334] ss:$8 sps:$4 sm:$0xff]  }
  0x6c   :  { %943 = vmatprep.subr.bf16.mxu0 %v2899_v2  ;;  %v2969_v61 = vld [vmem:[%s4070_s2 + $0x330] ss:$8 sps:$4 sm:$0xff]   ;;  %v2974_v62 = vld [vmem:[%s4070_s2 + $0x344] ss:$8 sps:$4 sm:$0xff]   ;;  %v2972_v63 = vld [vmem:[%s4070_s2 + $0x340] ss:$8 sps:$4 sm:$0xff]  }
  0x6d   :  { %v2977_v0 = vld [vmem:[%s4070_s2 + $0x354] ss:$8 sps:$4 sm:$0xff]   ;;  %v2975_v1 = vld [vmem:[%s4070_s2 + $0x350] ss:$8 sps:$4 sm:$0xff]   ;;  %v2980_v2 = vld [vmem:[%s4070_s2 + $0x364] ss:$8 sps:$4 sm:$0xff]  }
  0x6e   :  { %v2984_v8 = vld [vmem:[%s4070_s2 + $0x380] ss:$8 sps:$4 sm:$0xff]   ;;  %v2998_v17 = vld [vmem:[%s4070_s2 + $0x3c4] ss:$8 sps:$4 sm:$0xff]   ;;  %vm3056_vm0 = vmmov 0   ;;  %vm1232_vm1 = vcmask 64512  }
  0x6f   :  { %944 = vmatpush1.bf16.msra.mxu0 %v2897_v3  ;;  %v2978_v3 = vld [vmem:[%s4070_s2 + $0x360] ss:$8 sps:$4 sm:$0xff]   ;;  %s3059_s29 = smov 119   ;;  %vm1351_vm3 = vcmask 1043456   ;;  %vm1322_vm4 = vcmask 1024   ;;  %vm1316_vm5 = vcmask 58368  }
  0x70   :  { %945 = vmatprep.subr.bf16.mxu0 %v2902_v4  ;;  %v2983_v4 = vld [vmem:[%s4070_s2 + $0x374] ss:$8 sps:$4 sm:$0xff]   ;;  %v2990_v13 = vld [vmem:[%s4070_s2 + $0x3a0] ss:$8 sps:$4 sm:$0xff]  }
  0x73   :  { %946 = vmatpush1.bf16.msra.mxu0 %v2900_v5  ;;  %v2981_v5 = vld [vmem:[%s4070_s2 + $0x370] ss:$8 sps:$4 sm:$0xff]  }
  0x74   :  { %947 = vmatprep.subr.bf16.mxu0 %v2905_v6  ;;  %v2986_v6 = vld [vmem:[%s4070_s2 + $0x384] ss:$8 sps:$4 sm:$0xff]  }
  0x77   :  { %948 = vmatpush1.bf16.msra.mxu0 %v2903_v9  ;;  %v2989_v9 = vld [vmem:[%s4070_s2 + $0x394] ss:$8 sps:$4 sm:$0xff]  }
  0x78   :  { %949 = vmatprep.subr.bf16.mxu0 %v2908_v10  ;;  %v2987_v10 = vld [vmem:[%s4070_s2 + $0x390] ss:$8 sps:$4 sm:$0xff]  }
  0x7b   :  { %950 = vmatpush1.bf16.msra.mxu0 %v2906_v11  ;;  %v2992_v11 = vld [vmem:[%s4070_s2 + $0x3a4] ss:$8 sps:$4 sm:$0xff]  }
  0x7c   :  { %951 = vmatprep.subr.bf16.mxu0 %v2911_v14  ;;  %v2995_v14 = vld [vmem:[%s4070_s2 + $0x3b4] ss:$8 sps:$4 sm:$0xff]  }
  0x7f   :  { %952 = vmatpush1.bf16.msra.mxu0 %v2909_v15  ;;  %v2993_v15 = vld [vmem:[%s4070_s2 + $0x3b0] ss:$8 sps:$4 sm:$0xff]  }
  0x80   :  { %962 = vmatprep.subr.bf16.mxu0 %v2914_v18  ;;  %v2996_v18 = vld [vmem:[%s4070_s2 + $0x3c0] ss:$8 sps:$4 sm:$0xff]  }
  0x82   :  { %954 = vmatmul.mubr.bf16.vlgmr.msra.gmra.mrb[0].mxu0 %v228_v19  ;;  %v3001_v19 = vld [vmem:[%s4070_s2 + $0x3d4] ss:$8 sps:$4 sm:$0xff]  }
  0x83   :  { %963 = vmatpush1.bf16.msra.mxu0 %v2912_v20  ;;  %994 = vmatprep.mubr.bf16.mxu0 %v3359_v21  ;;  %v2999_v20 = vld [vmem:[%s4070_s2 + $0x3d0] ss:$8 sps:$4 sm:$0xff]   ;;  %v3004_v21 = vld [vmem:[%s4070_s2 + $0x3e4] ss:$8 sps:$4 sm:$0xff]  }
  0x84   :  { %964 = vmatprep.subr.bf16.mxu0 %v2917_v22  ;;  %v3002_v22 = vld [vmem:[%s4070_s2 + $0x3e0] ss:$8 sps:$4 sm:$0xff]  }
  0x87   :  { %965 = vmatpush1.bf16.msra.mxu0 %v2915_v23  ;;  %v3007_v23 = vld [vmem:[%s4070_s2 + $0x3f4] ss:$8 sps:$4 sm:$0xff]  }
  0x88   :  { %966 = vmatprep.subr.bf16.mxu0 %v2920_v24  ;;  %v3005_v24 = vld [vmem:[%s4070_s2 + $0x3f0] ss:$8 sps:$4 sm:$0xff]  }
  0x8b   :  { %967 = vmatpush1.bf16.msra.mxu0 %v2918_v25  ;;  %v3008_v25 = vld [vmem:[%s4072_s4 + $0x40] sm:$0xff]  }
  0x8c   :  { %968 = vmatprep.subr.bf16.mxu0 %v2923_v26  ;;  %v229_v26 = vcombine.high %v3457_v53, %v3457_v53 }
  0x8f   :  { %969 = vmatpush1.bf16.msra.mxu0 %v2921_v27  ;;  %v3009_v27 = vld [vmem:[%s4072_s4] sm:$0xff]  }
  0x90   :  { %970 = vmatprep.subr.bf16.mxu0 %v2926_v28  ;;  %v3010_v28 = vld [vmem:[%s4072_s4 + $0x48] sm:$0xff]  }
  0x93   :  { %971 = vmatpush1.bf16.msra.mxu0 %v2924_v29  ;;  %v3011_v29 = vld [vmem:[%s4072_s4 + $0x8] sm:$0xff]  }
  0x94   :  { %972 = vmatprep.subr.bf16.mxu0 %v2929_v30  ;;  %v3012_v30 = vld [vmem:[%s4072_s4 + $0x50] sm:$0xff]  }
  0x97   :  { %973 = vmatpush1.bf16.msra.mxu0 %v2927_v31  ;;  %v3013_v31 = vld [vmem:[%s4072_s4 + $0x10] sm:$0xff]  }
  0x98   :  { %974 = vmatprep.subr.bf16.mxu0 %v2932_v32  ;;  %v3014_v32 = vld [vmem:[%s4072_s4 + $0x58] sm:$0xff]  }
  0x9b   :  { %975 = vmatpush1.bf16.msra.mxu0 %v2930_v33  ;;  %v3015_v33 = vld [vmem:[%s4072_s4 + $0x18] sm:$0xff]  }
  0x9c   :  { %976 = vmatprep.subr.bf16.mxu0 %v2935_v34  ;;  %v3016_v34 = vld [vmem:[%s4072_s4 + $0x60] sm:$0xff]  }
  0x9f   :  { %977 = vmatpush1.bf16.msra.mxu0 %v2933_v35  ;;  %v3017_v35 = vld [vmem:[%s4072_s4 + $0x20] sm:$0xff]  }
  0xa0   :  { %978 = vmatprep.subr.bf16.mxu0 %v2938_v36  ;;  %v3018_v36 = vld [vmem:[%s4072_s4 + $0x68] sm:$0xff]  }
  0xa3   :  { %979 = vmatpush1.bf16.msra.mxu0 %v2936_v37  ;;  %v3019_v37 = vld [vmem:[%s4072_s4 + $0x28] sm:$0xff]  }
  0xa4   :  { %980 = vmatprep.subr.bf16.mxu0 %v2941_v38  ;;  %v3020_v38 = vld [vmem:[%s4072_s4 + $0x70] sm:$0xff]  }
  0xa7   :  { %981 = vmatpush1.bf16.msra.mxu0 %v2939_v39  ;;  %v3021_v39 = vld [vmem:[%s4072_s4 + $0x30] sm:$0xff]  }
  0xa8   :  { %982 = vmatprep.subr.bf16.mxu0 %v2944_v40  ;;  %v3022_v40 = vld [vmem:[%s4072_s4 + $0x78] sm:$0xff]  }
  0xab   :  { %983 = vmatpush1.bf16.msra.mxu0 %v2942_v41  ;;  %v3023_v41 = vld [vmem:[%s4072_s4 + $0x38] sm:$0xff]  }
  0xac   :  { %984 = vmatprep.subr.bf16.mxu0 %v2947_v42  ;;  %v1227_v42 = vand.u32 127, %v172_v7  ;;  %v170_v7 = vld [vmem:[%s4071_s3] sm:$0x3] }
  0xae   :  { %vm1228_vm2 = vcmp.le.s32.totalorder %v3161_v12, %v1227_v42 }
  0xaf   :  { %985 = vmatpush1.bf16.msra.mxu0 %v2945_v43  ;;  %v3055_v43 = vmov 0.0  }
  0xb0   :  { %986 = vmatprep.subr.bf16.mxu0 %v2950_v44  ;;  %2786 = vmatprep.subr.mxu1 %v3055_v43  ;;  %v1231_v44 = vld [vmem:[%s4069_s1] sm:$0x3] }
  0xb1   :  { %2788 = vmatprep.mubr.msk.f32.mxu1 %vm3056_vm0, %v3055_v43  ;;  %v1443_v43 = vld [vmem:[%s4076_s8 + $0x140] sm:$0xff] }
  0xb3   :  { %987 = vmatpush1.bf16.msra.mxu0 %v2948_v45  ;;  %v3057_v45 = vmov 1.0  }
  0xb4   :  { %988 = vmatprep.subr.bf16.mxu0 %v2953_v46  ;;  %2787 = vmatpush3.msk.msra.mxu1 %vm1228_vm2, %v3057_v45  ;;  %v3612_v46 = vsub.s32 0, %v3161_v12 }
  0xb5   :  { %2789 = vmatmul.mubr.msk.f32.vlgmr.msra.gmra.mrb[0].mxu1 %vm1232_vm1, %v1231_v44  ;;  %v1447_v44 = vld [vmem:[%s4076_s8 + $0x160] sm:$0xff] }
  0xb7   :  { %989 = vmatpush1.bf16.msra.mxu0 %v2951_v47  ;;  %v3618_v47 = vsub.s32 1, %v3161_v12 }
  0xb8   :  { %990 = vmatprep.subr.bf16.mxu0 %v2956_v48  ;;  %v175_v48 = vrot.slane %v170_v7, %v3612_v46 }
  0xbb   :  { %991 = vmatpush1.bf16.msra.mxu0 %v2954_v49  ;;  %v179_v49 = vrot.slane %v170_v7, %v3618_v47  ;;  %v2671_v7 = vcombine.high %v1443_v43, %v1447_v44 }
  0xbc   :  { %992 = vmatprep.subr.bf16.mxu0 %v2959_v50 }
  0xbf   :  { %993 = vmatpush1.bf16.msra.mxu0 %v2957_v51 }
  0xc0   :  { %1003 = vmatprep.subr.bf16.mxu0 %v2962_v52 }
  0xc2   :  { %995 = vmatmul.mubr.bf16.vlgmr.msra.gmra.mrb[0].mxu0 %v3457_v53 }
  0xc3   :  { %1004 = vmatpush1.bf16.msra.mxu0 %v2960_v54  ;;  %1035 = vmatprep.mubr.bf16.mxu0 %v231_v55 }
  0xc4   :  { %1005 = vmatprep.subr.bf16.mxu0 %v2965_v56 }
  0xc7   :  { %1006 = vmatpush1.bf16.msra.mxu0 %v2963_v57 }
  0xc8   :  { %1007 = vmatprep.subr.bf16.mxu0 %v2968_v58 }
  0xcb   :  { %1008 = vmatpush1.bf16.msra.mxu0 %v2966_v59 }
  0xcc   :  { %1009 = vmatprep.subr.bf16.mxu0 %v2971_v60  ;;  %v3058_v60 = vmov 9  }
  0xcd   :  { %2814 = vset.pattern.permute.xlu0 %v3058_v60  ;;  %v1475_v60 = vld [vmem:[%s4076_s8 + $0x240] sm:$0xff] }
  0xcf   :  { %1010 = vmatpush1.bf16.msra.mxu0 %v2969_v61 }
  0xd0   :  { %1011 = vmatprep.subr.bf16.mxu0 %v2974_v62 }
  0xd3   :  { %1012 = vmatpush1.bf16.msra.mxu0 %v2972_v63 }
  0xd4   :  { %1013 = vmatprep.subr.bf16.mxu0 %v2977_v0  ;;  %v2606_v0 = vld [vmem:[%s4073_s5] ss:$0 sm:$0xff]  ;;  %s3060_s5 = smov 120  }
  0xd7   :  { %1014 = vmatpush1.bf16.msra.mxu0 %v2975_v1 }
  0xd8   :  { %1015 = vmatprep.subr.bf16.mxu0 %v2980_v2 }
  0xdb   :  { %1016 = vmatpush1.bf16.msra.mxu0 %v2978_v3 }
  0xdc   :  { %1017 = vmatprep.subr.bf16.mxu0 %v2983_v4 }
  0xdf   :  { %1018 = vmatpush1.bf16.msra.mxu0 %v2981_v5 }
  0xe0   :  { %1019 = vmatprep.subr.bf16.mxu0 %v2986_v6 }
  0xe3   :  { %1020 = vmatpush1.bf16.msra.mxu0 %v2984_v8 }
  0xe4   :  { %1021 = vmatprep.subr.bf16.mxu0 %v2989_v9 }
  0xe7   :  { %1022 = vmatpush1.bf16.msra.mxu0 %v2987_v10  ;;  %v1330_v10 = vld [vmem:[%s4074_s6] sm:$0xff] }
  0xe8   :  { %1023 = vmatprep.subr.bf16.mxu0 %v2992_v11  ;;  %v2627_v11 = vcombine.high %v1330_v10, %v1330_v10 }
  0xea   :  { %2628 = vmatprep.subr.msk.bf16.mxu1 %vm1351_vm3, %v2627_v11 }
  0xeb   :  { %1024 = vmatpush1.bf16.msra.mxu0 %v2990_v13  ;;  %v2626_v13 = vcombine.low %v1330_v10, %v1330_v10  ;;  %v1503_v10 = vld [vmem:[%s4076_s8 + $0x320] sm:$0xff] }
  0xec   :  { %1025 = vmatprep.subr.bf16.mxu0 %v2995_v14 }
  0xed   :  { %v1353_v14 = vsel %vm1351_vm3, %v2626_v13, 0 }
  0xee   :  { %1359 = vmatpush1.bf16.msra.mxu1 %v1353_v14  ;;  %v1507_v14 = vld [vmem:[%s4076_s8 + $0x340] sm:$0xff] }
  0xef   :  { %1026 = vmatpush1.bf16.msra.mxu0 %v2993_v15 }
  0xf0   :  { %1027 = vmatprep.subr.bf16.mxu0 %v2998_v17  ;;  %v3061_v17 = vmov 0  }
  0xf1   :  { %1390 = vmatprep.mubr.bf16.mxu1 %v3061_v17 }
  0xf3   :  { %1028 = vmatpush1.bf16.msra.mxu0 %v2996_v18  ;;  %v1403_v18 = vld [vmem:[%s4076_s8] sm:$0xff] }
  0xf4   :  { %1029 = vmatprep.subr.bf16.mxu0 %v3001_v19  ;;  %v1407_v19 = vld [vmem:[%s4076_s8 + $0x20] sm:$0xff] }
  0xf7   :  { %1030 = vmatpush1.bf16.msra.mxu0 %v2999_v20  ;;  %v2630_v20 = vcombine.low %v1403_v18, %v1407_v19 }
  0xf8   :  { %1031 = vmatprep.subr.bf16.mxu0 %v3004_v21  ;;  %v2631_v21 = vcombine.high %v1403_v18, %v1407_v19 }
  0xfa   :  { %2213 = vmatprep.subr.bf16.mxu1 %v2631_v21  ;;  %v1519_v21 = vld [vmem:[%s4076_s8 + $0x3a0] sm:$0xff] }
  0xfb   :  { %1032 = vmatpush1.bf16.msra.mxu0 %v3002_v22 }
  0xfc   :  { %1033 = vmatprep.subr.bf16.mxu0 %v3007_v23 }
  0xff   :  { %1034 = vmatpush1.bf16.msra.mxu0 %v3005_v24 }
 0x100   :  { %2762 = vmatprep.subr.bf16.mxu0 %v3008_v25  ;;  %v1411_v25 = vld [vmem:[%s4076_s8 + $0x40] sm:$0xff] }
 0x102   :  { %1036 = vmatmul.mubr.bf16.vlgmr.msra.gmra.mrb[0].mxu0 %v229_v26  ;;  %v1415_v26 = vld [vmem:[%s4076_s8 + $0x60] sm:$0xff] }
 0x103   :  { %2763 = vmatpush3.bf16.msra.mxu0 %v3009_v27 }
 0x104   :  { %2764 = vmatprep.subr.bf16.mxu0 %v3010_v28 }
 0x107   :  { %2765 = vmatpush3.bf16.msra.mxu0 %v3011_v29 }
 0x108   :  { %2766 = vmatprep.subr.bf16.mxu0 %v3012_v30  ;;  %v2639_v30 = vcombine.high %v1411_v25, %v1415_v26 }
 0x10b   :  { %2767 = vmatpush3.bf16.msra.mxu0 %v3013_v31  ;;  %v1419_v31 = vld [vmem:[%s4076_s8 + $0x80] sm:$0xff] }
 0x10c   :  { %2768 = vmatprep.subr.bf16.mxu0 %v3014_v32  ;;  %v1423_v32 = vld [vmem:[%s4076_s8 + $0xa0] sm:$0xff] }
 0x10f   :  { %2769 = vmatpush3.bf16.msra.mxu0 %v3015_v33  ;;  %v2638_v33 = vcombine.low %v1411_v25, %v1415_v26  ;;  %v1527_v25 = vld [vmem:[%s4076_s8 + $0x3e0] sm:$0xff] }
 0x110   :  { %2770 = vmatprep.subr.bf16.mxu0 %v3016_v34  ;;  %v2647_v34 = vcombine.high %v1419_v31, %v1423_v32 }
 0x113   :  { %2771 = vmatpush3.bf16.msra.mxu0 %v3017_v35  ;;  %v1427_v35 = vld [vmem:[%s4076_s8 + $0xc0] sm:$0xff] }
 0x114   :  { %2772 = vmatprep.subr.bf16.mxu0 %v3018_v36  ;;  %v1431_v36 = vld [vmem:[%s4076_s8 + $0xe0] sm:$0xff] }
 0x117   :  { %2773 = vmatpush3.bf16.msra.mxu0 %v3019_v37  ;;  %v2646_v37 = vcombine.low %v1419_v31, %v1423_v32  ;;  %v1331_v32 = vld [vmem:[%s4075_s7] sm:$0x3] }
 0x118   :  { %2774 = vmatprep.subr.bf16.mxu0 %v3020_v38  ;;  %v2655_v38 = vcombine.high %v1427_v35, %v1431_v36 }
 0x11b   :  { %2775 = vmatpush3.bf16.msra.mxu0 %v3021_v39  ;;  %v1435_v39 = vld [vmem:[%s4076_s8 + $0x100] sm:$0xff] }
 0x11c   :  { %2776 = vmatprep.subr.bf16.mxu0 %v3022_v40  ;;  %v1439_v40 = vld [vmem:[%s4076_s8 + $0x120] sm:$0xff] }
 0x11d   :  { %v2663_v42 = vcombine.high %v1435_v39, %v1439_v40  ;;  %v2662_v45 = vcombine.low %v1435_v39, %v1439_v40 }
 0x11f   :  { %2777 = vmatpush3.bf16.msra.mxu0 %v3023_v41  ;;  %v2654_v41 = vcombine.low %v1427_v35, %v1431_v36 }
 0x188   :  { %v1302_v61 = vpop.f32.mrb[0].mxu1 }
 0x189   :  { %v2790_v62 = vpop.f32.mrb[1].mxu1 }
 0x1d5   :  { %v1037_v50 = vpop.f32.mrb[0].mxu0 }
 0x1d6   :  { %v2791_v51 = vadd.f32 %v1037_v50, %v175_v48  ;;  %v1039_v52 = vpop.f32.mrb[1].mxu0  ;;  %v1451_v48 = vld [vmem:[%s4076_s8 + $0x180] sm:$0xff]  ;;  %v2670_v50 = vcombine.low %v1443_v43, %v1447_v44  ;;  %v1412_v43 = vld [vmem:[%s4076_s8 + $0x48] sm:$0xff] }
 0x1d7   :  { %v2792_v53 = vadd.f32 %v1039_v52, %v179_v49  ;;  %v1041_v54 = vpop.f32.mrb[2].mxu0  ;;  %v1455_v49 = vld [vmem:[%s4076_s8 + $0x1a0] sm:$0xff]  ;;  %v1416_v44 = vld [vmem:[%s4076_s8 + $0x68] sm:$0xff] }
 0x1d8   :  { %v1044_v55 = vmax.f32 %v2791_v51, 0.0  ;;  %v1042_v56 = vpop.f32.mrb[3].mxu0  ;;  %v2679_v51 = vcombine.high %v1451_v48, %v1455_v49  ;;  %v1459_v52 = vld [vmem:[%s4076_s8 + $0x1c0] sm:$0xff]  ;;  %v2678_v54 = vcombine.low %v1451_v48, %v1455_v49  ;;  %v2641_v48 = vcombine.high %v1412_v43, %v1416_v44  ;;  %v1420_v49 = vld [vmem:[%s4076_s8 + $0x88] sm:$0xff] }
 0x1d9   :  { %v1045_v57 = vmax.f32 %v2792_v53, 0.0  ;;  %v1463_v53 = vld [vmem:[%s4076_s8 + $0x1e0] sm:$0xff] }
 0x1da   :  { %v1046_v59 = vpack.c.bf16 %v1044_v55, %v1044_v55  ;;  %v2687_v55 = vcombine.high %v1459_v52, %v1463_v53  ;;  %v1467_v56 = vld [vmem:[%s4076_s8 + $0x200] sm:$0xff] }
 0x1db   :  { %v1047_v58 = vpack.c.bf16 %v1045_v57, %v1045_v57  ;;  %v1471_v57 = vld [vmem:[%s4076_s8 + $0x220] sm:$0xff] }
 0x1dc   :  { %v2694_v62 = vcombine.low %v1467_v56, %v1471_v57 }
 0x1dd   :  { %1215 = vmatprep.mubr.bf16.mxu0 %v1047_v58  ;;  %v2686_v58 = vcombine.low %v1459_v52, %v1463_v53  ;;  %v1428_v53 = vld [vmem:[%s4076_s8 + $0xc8] sm:$0xff] }
 0x1de   :  { %1216 = vmatmul.mubr.bf16.vlgmr.msra.gmra.mrb[4].mxu0 %v1046_v59  ;;  %v2695_v59 = vcombine.high %v1467_v56, %v1471_v57  ;;  %v1436_v57 = vld [vmem:[%s4076_s8 + $0x108] sm:$0xff] }
 0x2b1   :  { %v2778_v63 = vpop.f32.mrb[4].mxu0 }
 0x2b2   :  { %v2779_v1 = vpop.f32.mrb[5].mxu0 }
 0x2b3   :  { %v2780_v2 = vadd.f32 %v2779_v1, %v2778_v63  ;;  %v2781_v3 = vpop.f32.mrb[6].mxu0  ;;  %v1487_v1 = vld [vmem:[%s4076_s8 + $0x2a0] sm:$0xff] }
 0x2b4   :  { %v2782_v4 = vpop.f32.mrb[7].mxu0 }
 0x2b5   :  { %v1218_v5 = vadd.f32 %v2780_v2, %v2606_v0  ;;  %v1483_v0 = vld [vmem:[%s4076_s8 + $0x280] sm:$0xff] }
 0x2b6   :  { %v2711_v3 = vcombine.high %v1483_v0, %v1487_v1  ;;  %v1491_v4 = vld [vmem:[%s4076_s8 + $0x2c0] sm:$0xff] }
 0x2b7   :  { %v1306_v6 = vmul.f32 0.5, %v1218_v5  ;;  %1325 = vrot.lane.b32.xlu1 %v1218_v5, %s3059_s29 }
 0x2b9   :  { %v1307_v8 = vmul.f32 1.442695, %v1306_v6  ;;  %v2710_v6 = vcombine.low %v1483_v0, %v1487_v1  ;;  %v1452_v1 = vld [vmem:[%s4076_s8 + $0x188] sm:$0xff] }
 0x2bb   :  { %3026 = vpow2.f32 %v1307_v8 }
 0x2bc   :  { %3028 = vtanh.f32 %v1218_v5 }
 0x2c5   :  { %v3027_v9 = vpop.eup %3026 }
 0x2c6   :  { %1311 = vperm.xlu0 %2814, %v3027_v9   ;;  %v3029_v15 = vpop.eup %3028  ;;  %v1499_v9 = vld [vmem:[%s4076_s8 + $0x300] sm:$0xff] }
 0x2c7   :  { %v2727_v13 = vcombine.high %v1499_v9, %v1503_v10  ;;  %v2726_v17 = vcombine.low %v1499_v9, %v1503_v10  ;;  %v1468_v10 = vld [vmem:[%s4076_s8 + $0x208] sm:$0xff] }
 0x2ca   :  { %1319 = vrot.lane.b32.xlu0 %v3029_v15, %s3060_s5  ;;  %v1511_v15 = vld [vmem:[%s4076_s8 + $0x360] sm:$0xff] }
 0x2cb   :  { %v2735_v18 = vcombine.high %v1507_v14, %v1511_v15  ;;  %v2734_v19 = vcombine.low %v1507_v14, %v1511_v15  ;;  %v1476_v15 = vld [vmem:[%s4076_s8 + $0x248] sm:$0xff] }
 0x329   :  { %v1326_v22 = vpop.permute.xlu1 %1325 }
 0x32a   :  { %1328 = vst.msk [vmem:[%s4080_s12] sm:$0x3] %vm1322_vm4, %v1326_v22 }
 0x345   :  { %v1312_v23 = vpop.permute.xlu0 %1311 }
 0x346   :  { %v1314_v24 = vmul.f32 %v1312_v23, %v1302_v61  ;;  %v1479_v61 = vld [vmem:[%s4076_s8 + $0x260] sm:$0xff] }
 0x347   :  { %v2703_v63 = vcombine.high %v1475_v60, %v1479_v61  ;;  %v2702_v2 = vcombine.low %v1475_v60, %v1479_v61  ;;  %v1444_v61 = vld [vmem:[%s4076_s8 + $0x148] sm:$0xff] }
 0x348   :  { %v1315_v27 = vadd.f32 %v1314_v24, %v1218_v5  ;;  %v1495_v5 = vld [vmem:[%s4076_s8 + $0x2e0] sm:$0xff] }
 0x349   :  { %v1320_v28 = vpop.permute.xlu0 %1319  ;;  %v2719_v8 = vcombine.high %v1491_v4, %v1495_v5  ;;  %v2718_v11 = vcombine.low %v1491_v4, %v1495_v5  ;;  %v1523_v24 = vld [vmem:[%s4076_s8 + $0x3c0] sm:$0xff]  ;;  %v1460_v5 = vld [vmem:[%s4076_s8 + $0x1c8] sm:$0xff] }
 0x34a   :  { %v1329_v29 = vpack.c.bf16 %v1315_v27, %v1315_v27  ;;  %1323 = vst.msk [vmem:[%s4079_s11] sm:$0x3] %vm1322_vm4, %v1320_v28  ;;  %v2751_v26 = vcombine.high %v1523_v24, %v1527_v25  ;;  %v1404_v28 = vld [vmem:[%s4076_s8 + $0x8] sm:$0xff] }
 0x34b   :  { %1317 = vst.msk [vmem:[#allocation2] sm:$0x3] %vm1316_vm5, %v1315_v27  ;;  %v2750_v27 = vcombine.low %v1523_v24, %v1527_v25  ;;  %v1492_v24 = vld [vmem:[%s4076_s8 + $0x2c8] sm:$0xff] }
 0x34c   :  { %2629 = vmatmul.mubr.msk.bf16.vlgmr.msra.gmra.mrb[4].mxu1 %vm1232_vm1, %v1329_v29  ;;  %v1408_v29 = vld [vmem:[%s4076_s8 + $0x28] sm:$0xff] }
 0x34d   :  { %2214 = vmatpush1.bf16.msra.mxu1 %v2630_v20  ;;  %v1515_v20 = vld [vmem:[%s4076_s8 + $0x380] sm:$0xff]  ;;  %v2632_v31 = vcombine.low %v1404_v28, %v1408_v29  ;;  %v1496_v25 = vld [vmem:[%s4076_s8 + $0x2e8] sm:$0xff] }
 0x34e   :  { %2215 = vmatprep.subr.bf16.mxu1 %v2639_v30  ;;  %v2743_v22 = vcombine.high %v1515_v20, %v1519_v21  ;;  %v2742_v23 = vcombine.low %v1515_v20, %v1519_v21  ;;  %v2633_v30 = vcombine.high %v1404_v28, %v1408_v29  ;;  %v1484_v20 = vld [vmem:[%s4076_s8 + $0x288] sm:$0xff] }
 0x34f   :  { %v1488_v21 = vld [vmem:[%s4076_s8 + $0x2a8] sm:$0xff] }
 0x350   :  { %v1500_v28 = vld [vmem:[%s4076_s8 + $0x308] sm:$0xff] }
 0x351   :  { %2216 = vmatpush1.bf16.msra.mxu1 %v2638_v33  ;;  %v1336_v33 = vrot.slane %v1331_v32, %v3612_v46  ;;  %v1504_v29 = vld [vmem:[%s4076_s8 + $0x328] sm:$0xff] }
 0x352   :  { %2217 = vmatprep.subr.bf16.mxu1 %v2647_v34  ;;  %v1340_v34 = vrot.slane %v1331_v32, %v3618_v47  ;;  %v1508_v32 = vld [vmem:[%s4076_s8 + $0x348] sm:$0xff] }
 0x355   :  { %2218 = vmatpush1.bf16.msra.mxu1 %v2646_v37 }
 0x356   :  { %2219 = vmatprep.subr.bf16.mxu1 %v2655_v38 }
 0x359   :  { %2220 = vmatpush1.bf16.msra.mxu1 %v2654_v41 }
 0x35a   :  { %2221 = vmatprep.subr.bf16.mxu1 %v2663_v42 }
 0x35d   :  { %2222 = vmatpush1.bf16.msra.mxu1 %v2662_v45 }
 0x35e   :  { %2223 = vmatprep.subr.bf16.mxu1 %v2671_v7 }
 0x361   :  { %2224 = vmatpush1.bf16.msra.mxu1 %v2670_v50  ;;  %v1424_v50 = vld [vmem:[%s4076_s8 + $0xa8] sm:$0xff] }
 0x362   :  { %2225 = vmatprep.subr.bf16.mxu1 %v2679_v51  ;;  %v2640_v51 = vcombine.low %v1412_v43, %v1416_v44  ;;  %v2649_v52 = vcombine.high %v1420_v49, %v1424_v50  ;;  %v1405_v44 = vld [vmem:[%s4076_s8 + $0x10] sm:$0xff] }
 0x365   :  { %2226 = vmatpush1.bf16.msra.mxu1 %v2678_v54  ;;  %v1432_v54 = vld [vmem:[%s4076_s8 + $0xe8] sm:$0xff] }
 0x366   :  { %2227 = vmatprep.subr.bf16.mxu1 %v2687_v55  ;;  %v2648_v55 = vcombine.low %v1420_v49, %v1424_v50  ;;  %v2657_v56 = vcombine.high %v1428_v53, %v1432_v54 }
 0x369   :  { %2228 = vmatpush1.bf16.msra.mxu1 %v2686_v58  ;;  %v1440_v58 = vld [vmem:[%s4076_s8 + $0x128] sm:$0xff] }
 0x36a   :  { %2229 = vmatprep.subr.bf16.mxu1 %v2695_v59  ;;  %v2656_v59 = vcombine.low %v1428_v53, %v1432_v54  ;;  %v2665_v60 = vcombine.high %v1436_v57, %v1440_v58 }
 0x36d   :  { %2230 = vmatpush1.bf16.msra.mxu1 %v2694_v62  ;;  %v1448_v62 = vld [vmem:[%s4076_s8 + $0x168] sm:$0xff] }
 0x36e   :  { %2231 = vmatprep.subr.bf16.mxu1 %v2703_v63  ;;  %v2664_v63 = vcombine.low %v1436_v57, %v1440_v58  ;;  %v2673_v0 = vcombine.high %v1444_v61, %v1448_v62 }
 0x371   :  { %2232 = vmatpush1.bf16.msra.mxu1 %v2702_v2  ;;  %v1456_v2 = vld [vmem:[%s4076_s8 + $0x1a8] sm:$0xff] }
 0x372   :  { %2233 = vmatprep.subr.bf16.mxu1 %v2711_v3  ;;  %v2672_v3 = vcombine.low %v1444_v61, %v1448_v62  ;;  %v2681_v4 = vcombine.high %v1452_v1, %v1456_v2 }
 0x375   :  { %2234 = vmatpush1.bf16.msra.mxu1 %v2710_v6  ;;  %v1464_v6 = vld [vmem:[%s4076_s8 + $0x1e8] sm:$0xff] }
 0x376   :  { %2235 = vmatprep.subr.bf16.mxu1 %v2719_v8  ;;  %v2680_v8 = vcombine.low %v1452_v1, %v1456_v2  ;;  %v2689_v9 = vcombine.high %v1460_v5, %v1464_v6 }
 0x379   :  { %2236 = vmatpush1.bf16.msra.mxu1 %v2718_v11  ;;  %v1472_v11 = vld [vmem:[%s4076_s8 + $0x228] sm:$0xff] }
 0x37a   :  { %2237 = vmatprep.subr.bf16.mxu1 %v2727_v13  ;;  %v2688_v13 = vcombine.low %v1460_v5, %v1464_v6  ;;  %v2697_v14 = vcombine.high %v1468_v10, %v1472_v11 }
 0x37d   :  { %2238 = vmatpush1.bf16.msra.mxu1 %v2726_v17  ;;  %v1480_v17 = vld [vmem:[%s4076_s8 + $0x268] sm:$0xff] }
 0x37e   :  { %2239 = vmatprep.subr.bf16.mxu1 %v2735_v18  ;;  %v2696_v18 = vcombine.low %v1468_v10, %v1472_v11 }
 0x381   :  { %2240 = vmatpush1.bf16.msra.mxu1 %v2734_v19  ;;  %v2705_v19 = vcombine.high %v1476_v15, %v1480_v17 }
 0x382   :  { %2241 = vmatprep.subr.bf16.mxu1 %v2743_v22  ;;  %v2704_v22 = vcombine.low %v1476_v15, %v1480_v17 }
 0x385   :  { %2242 = vmatpush1.bf16.msra.mxu1 %v2742_v23  ;;  %v2713_v23 = vcombine.high %v1484_v20, %v1488_v21 }
 0x386   :  { %2243 = vmatprep.subr.bf16.mxu1 %v2751_v26  ;;  %v2712_v26 = vcombine.low %v1484_v20, %v1488_v21 }
 0x389   :  { %2244 = vmatpush1.bf16.msra.mxu1 %v2750_v27  ;;  %v2721_v27 = vcombine.high %v1492_v24, %v1496_v25 }
 0x38a   :  { %2254 = vmatprep.subr.bf16.mxu1 %v2633_v30  ;;  %v2720_v30 = vcombine.low %v1492_v24, %v1496_v25 }
 0x41f   :  { %v1392_v35 = vpop.f32.mrb[4].mxu1 }
 0x420   :  { %v1393_v36 = vadd.f32 %v1392_v35, %v1336_v33  ;;  %v1394_v37 = vpop.f32.mrb[5].mxu1  ;;  %v1512_v33 = vld [vmem:[%s4076_s8 + $0x368] sm:$0xff] }
 0x421   :  { %v1395_v38 = vadd.f32 %v1394_v37, %v1340_v34  ;;  %v1396_v39 = vpop.f32.mrb[6].mxu1  ;;  %v2728_v34 = vcombine.low %v1500_v28, %v1504_v29  ;;  %v2737_v35 = vcombine.high %v1508_v32, %v1512_v33  ;;  %v1520_v37 = vld [vmem:[%s4076_s8 + $0x3a8] sm:$0xff] }
 0x422   :  { %v1399_v40 = vmax.f32 %v1393_v36, 0.0  ;;  %v1397_v41 = vpop.f32.mrb[7].mxu1  ;;  %v1516_v36 = vld [vmem:[%s4076_s8 + $0x388] sm:$0xff] }
 0x423   :  { %v1400_v42 = vmax.f32 %v1395_v38, 0.0  ;;  %v2736_v38 = vcombine.low %v1508_v32, %v1512_v33  ;;  %v2745_v39 = vcombine.high %v1516_v36, %v1520_v37  ;;  %v1528_v41 = vld [vmem:[%s4076_s8 + $0x3e8] sm:$0xff] }
 0x424   :  { %v3750_v7 = vpack.c.bf16 %v1399_v40, %v1399_v40  ;;  %v1524_v40 = vld [vmem:[%s4076_s8 + $0x3c8] sm:$0xff] }
 0x425   :  { %v3748_v45 = vpack.c.bf16 %v1400_v42, %v1400_v42  ;;  %v2744_v42 = vcombine.low %v1516_v36, %v1520_v37  ;;  %v2753_v43 = vcombine.high %v1524_v40, %v1528_v41  ;;  %v2752_v49 = vcombine.low %v1524_v40, %v1528_v41 }
 0x427   :  { %2245 = vmatprep.mubr.bf16.mxu1 %v3748_v45 }
 0x428   :  { %2246 = vmatmul.mubr.bf16.vlgmr.msra.gmra.mrb[8].mxu1 %v3750_v7 }
 0x429   :  { %2255 = vmatpush1.bf16.msra.mxu1 %v2632_v31  ;;  %2286 = vmatprep.mubr.bf16.mxu1 %v3748_v45  ;;  %v2729_v31 = vcombine.high %v1500_v28, %v1504_v29 }
 0x42a   :  { %2256 = vmatprep.subr.bf16.mxu1 %v2641_v48  ;;  %v1409_v48 = vld [vmem:[%s4076_s8 + $0x30] sm:$0xff] }
 0x42b   :  { %v2635_v50 = vcombine.high %v1405_v44, %v1409_v48  ;;  %v2634_v53 = vcombine.low %v1405_v44, %v1409_v48 }
 0x42d   :  { %2257 = vmatpush1.bf16.msra.mxu1 %v2640_v51  ;;  %v1413_v51 = vld [vmem:[%s4076_s8 + $0x50] sm:$0xff] }
 0x42e   :  { %2258 = vmatprep.subr.bf16.mxu1 %v2649_v52  ;;  %v1417_v52 = vld [vmem:[%s4076_s8 + $0x70] sm:$0xff] }
 0x42f   :  { %v2643_v54 = vcombine.high %v1413_v51, %v1417_v52  ;;  %v2642_v57 = vcombine.low %v1413_v51, %v1417_v52 }
 0x431   :  { %2259 = vmatpush1.bf16.msra.mxu1 %v2648_v55  ;;  %v1421_v55 = vld [vmem:[%s4076_s8 + $0x90] sm:$0xff] }
 0x432   :  { %2260 = vmatprep.subr.bf16.mxu1 %v2657_v56  ;;  %v1425_v56 = vld [vmem:[%s4076_s8 + $0xb0] sm:$0xff] }
 0x433   :  { %v2651_v58 = vcombine.high %v1421_v55, %v1425_v56  ;;  %v2650_v61 = vcombine.low %v1421_v55, %v1425_v56 }
 0x435   :  { %2261 = vmatpush1.bf16.msra.mxu1 %v2656_v59  ;;  %v1429_v59 = vld [vmem:[%s4076_s8 + $0xd0] sm:$0xff] }
 0x436   :  { %2262 = vmatprep.subr.bf16.mxu1 %v2665_v60  ;;  %v1433_v60 = vld [vmem:[%s4076_s8 + $0xf0] sm:$0xff] }
 0x437   :  { %v2659_v62 = vcombine.high %v1429_v59, %v1433_v60  ;;  %v2658_v1 = vcombine.low %v1429_v59, %v1433_v60 }
 0x439   :  { %2263 = vmatpush1.bf16.msra.mxu1 %v2664_v63  ;;  %v1437_v63 = vld [vmem:[%s4076_s8 + $0x110] sm:$0xff] }
 0x43a   :  { %2264 = vmatprep.subr.bf16.mxu1 %v2673_v0  ;;  %v1441_v0 = vld [vmem:[%s4076_s8 + $0x130] sm:$0xff] }
 0x43b   :  { %v2667_v2 = vcombine.high %v1437_v63, %v1441_v0  ;;  %v2666_v5 = vcombine.low %v1437_v63, %v1441_v0 }
 0x43d   :  { %2265 = vmatpush1.bf16.msra.mxu1 %v2672_v3  ;;  %v1445_v3 = vld [vmem:[%s4076_s8 + $0x150] sm:$0xff] }
 0x43e   :  { %2266 = vmatprep.subr.bf16.mxu1 %v2681_v4  ;;  %v1449_v4 = vld [vmem:[%s4076_s8 + $0x170] sm:$0xff] }
 0x43f   :  { %v2675_v6 = vcombine.high %v1445_v3, %v1449_v4  ;;  %v2674_v10 = vcombine.low %v1445_v3, %v1449_v4 }
 0x441   :  { %2267 = vmatpush1.bf16.msra.mxu1 %v2680_v8  ;;  %v1453_v8 = vld [vmem:[%s4076_s8 + $0x190] sm:$0xff] }
 0x442   :  { %2268 = vmatprep.subr.bf16.mxu1 %v2689_v9  ;;  %v1457_v9 = vld [vmem:[%s4076_s8 + $0x1b0] sm:$0xff] }
 0x443   :  { %v2683_v11 = vcombine.high %v1453_v8, %v1457_v9  ;;  %v2682_v15 = vcombine.low %v1453_v8, %v1457_v9  ;;  %v1446_v9 = vld [vmem:[%s4076_s8 + $0x158] sm:$0xff] }
 0x445   :  { %2269 = vmatpush1.bf16.msra.mxu1 %v2688_v13  ;;  %v1461_v13 = vld [vmem:[%s4076_s8 + $0x1d0] sm:$0xff] }
 0x446   :  { %2270 = vmatprep.subr.bf16.mxu1 %v2697_v14  ;;  %v1465_v14 = vld [vmem:[%s4076_s8 + $0x1f0] sm:$0xff] }
 0x447   :  { %v2691_v17 = vcombine.high %v1461_v13, %v1465_v14  ;;  %v2690_v20 = vcombine.low %v1461_v13, %v1465_v14  ;;  %v1454_v14 = vld [vmem:[%s4076_s8 + $0x198] sm:$0xff] }
 0x449   :  { %2271 = vmatpush1.bf16.msra.mxu1 %v2696_v18  ;;  %v1469_v18 = vld [vmem:[%s4076_s8 + $0x210] sm:$0xff] }
 0x44a   :  { %2272 = vmatprep.subr.bf16.mxu1 %v2705_v19  ;;  %v1473_v19 = vld [vmem:[%s4076_s8 + $0x230] sm:$0xff] }
 0x44b   :  { %v2699_v21 = vcombine.high %v1469_v18, %v1473_v19  ;;  %v2698_v24 = vcombine.low %v1469_v18, %v1473_v19  ;;  %v1462_v19 = vld [vmem:[%s4076_s8 + $0x1d8] sm:$0xff] }
 0x44d   :  { %2273 = vmatpush1.bf16.msra.mxu1 %v2704_v22  ;;  %v1477_v22 = vld [vmem:[%s4076_s8 + $0x250] sm:$0xff] }
 0x44e   :  { %2274 = vmatprep.subr.bf16.mxu1 %v2713_v23  ;;  %v1481_v23 = vld [vmem:[%s4076_s8 + $0x270] sm:$0xff] }
 0x44f   :  { %v2707_v25 = vcombine.high %v1477_v22, %v1481_v23  ;;  %v2706_v28 = vcombine.low %v1477_v22, %v1481_v23  ;;  %v1470_v23 = vld [vmem:[%s4076_s8 + $0x218] sm:$0xff] }
 0x451   :  { %2275 = vmatpush1.bf16.msra.mxu1 %v2712_v26  ;;  %v1485_v26 = vld [vmem:[%s4076_s8 + $0x290] sm:$0xff] }
 0x452   :  { %2276 = vmatprep.subr.bf16.mxu1 %v2721_v27  ;;  %v1489_v27 = vld [vmem:[%s4076_s8 + $0x2b0] sm:$0xff] }
 0x453   :  { %v2715_v29 = vcombine.high %v1485_v26, %v1489_v27  ;;  %v2714_v32 = vcombine.low %v1485_v26, %v1489_v27  ;;  %v1478_v27 = vld [vmem:[%s4076_s8 + $0x258] sm:$0xff] }
 0x455   :  { %2277 = vmatpush1.bf16.msra.mxu1 %v2720_v30  ;;  %v1493_v30 = vld [vmem:[%s4076_s8 + $0x2d0] sm:$0xff] }
 0x456   :  { %2278 = vmatprep.subr.bf16.mxu1 %v2729_v31  ;;  %v1497_v31 = vld [vmem:[%s4076_s8 + $0x2f0] sm:$0xff] }
 0x457   :  { %v2723_v33 = vcombine.high %v1493_v30, %v1497_v31  ;;  %v2722_v36 = vcombine.low %v1493_v30, %v1497_v31  ;;  %v1486_v31 = vld [vmem:[%s4076_s8 + $0x298] sm:$0xff] }
 0x459   :  { %2279 = vmatpush1.bf16.msra.mxu1 %v2728_v34  ;;  %v1501_v34 = vld [vmem:[%s4076_s8 + $0x310] sm:$0xff] }
 0x45a   :  { %2280 = vmatprep.subr.bf16.mxu1 %v2737_v35  ;;  %v1505_v35 = vld [vmem:[%s4076_s8 + $0x330] sm:$0xff] }
 0x45b   :  { %v2731_v37 = vcombine.high %v1501_v34, %v1505_v35  ;;  %v2730_v40 = vcombine.low %v1501_v34, %v1505_v35  ;;  %v1494_v35 = vld [vmem:[%s4076_s8 + $0x2d8] sm:$0xff] }
 0x45d   :  { %2281 = vmatpush1.bf16.msra.mxu1 %v2736_v38  ;;  %v1509_v38 = vld [vmem:[%s4076_s8 + $0x350] sm:$0xff] }
 0x45e   :  { %2282 = vmatprep.subr.bf16.mxu1 %v2745_v39  ;;  %v1513_v39 = vld [vmem:[%s4076_s8 + $0x370] sm:$0xff] }
 0x45f   :  { %v2739_v41 = vcombine.high %v1509_v38, %v1513_v39  ;;  %v2738_v44 = vcombine.low %v1509_v38, %v1513_v39  ;;  %v1502_v39 = vld [vmem:[%s4076_s8 + $0x318] sm:$0xff] }
 0x461   :  { %2283 = vmatpush1.bf16.msra.mxu1 %v2744_v42  ;;  %v1517_v42 = vld [vmem:[%s4076_s8 + $0x390] sm:$0xff] }
 0x462   :  { %2284 = vmatprep.subr.bf16.mxu1 %v2753_v43  ;;  %v1521_v43 = vld [vmem:[%s4076_s8 + $0x3b0] sm:$0xff] }
 0x463   :  { %v2747_v48 = vcombine.high %v1517_v42, %v1521_v43  ;;  %v2746_v51 = vcombine.low %v1517_v42, %v1521_v43  ;;  %v1510_v43 = vld [vmem:[%s4076_s8 + $0x358] sm:$0xff] }
 0x465   :  { %2285 = vmatpush1.bf16.msra.mxu1 %v2752_v49  ;;  %v1525_v49 = vld [vmem:[%s4076_s8 + $0x3d0] sm:$0xff] }
 0x466   :  { %2295 = vmatprep.subr.bf16.mxu1 %v2635_v50  ;;  %v1529_v50 = vld [vmem:[%s4076_s8 + $0x3f0] sm:$0xff] }
 0x467   :  { %v2755_v52 = vcombine.high %v1525_v49, %v1529_v50  ;;  %v2754_v55 = vcombine.low %v1525_v49, %v1529_v50  ;;  %v1518_v50 = vld [vmem:[%s4076_s8 + $0x398] sm:$0xff] }
 0x468   :  { %2287 = vmatmul.mubr.bf16.vlgmr.msra.gmra.mrb[12].mxu1 %v3750_v7 }
 0x469   :  { %2296 = vmatpush1.bf16.msra.mxu1 %v2634_v53  ;;  %2327 = vmatprep.mubr.bf16.mxu1 %v3748_v45  ;;  %v1406_v53 = vld [vmem:[%s4076_s8 + $0x18] sm:$0xff] }
 0x46a   :  { %2297 = vmatprep.subr.bf16.mxu1 %v2643_v54  ;;  %v1410_v54 = vld [vmem:[%s4076_s8 + $0x38] sm:$0xff] }
 0x46b   :  { %v2637_v56 = vcombine.high %v1406_v53, %v1410_v54  ;;  %v2636_v59 = vcombine.low %v1406_v53, %v1410_v54  ;;  %v1526_v54 = vld [vmem:[%s4076_s8 + $0x3d8] sm:$0xff] }
 0x46d   :  { %2298 = vmatpush1.bf16.msra.mxu1 %v2642_v57  ;;  %v1414_v57 = vld [vmem:[%s4076_s8 + $0x58] sm:$0xff] }
 0x46e   :  { %2299 = vmatprep.subr.bf16.mxu1 %v2651_v58  ;;  %v1418_v58 = vld [vmem:[%s4076_s8 + $0x78] sm:$0xff] }
 0x46f   :  { %v2645_v60 = vcombine.high %v1414_v57, %v1418_v58  ;;  %v2644_v63 = vcombine.low %v1414_v57, %v1418_v58 }
 0x471   :  { %2300 = vmatpush1.bf16.msra.mxu1 %v2650_v61  ;;  %v1422_v61 = vld [vmem:[%s4076_s8 + $0x98] sm:$0xff] }
 0x472   :  { %2301 = vmatprep.subr.bf16.mxu1 %v2659_v62  ;;  %v1426_v62 = vld [vmem:[%s4076_s8 + $0xb8] sm:$0xff] }
 0x473   :  { %v2653_v0 = vcombine.high %v1422_v61, %v1426_v62  ;;  %v2652_v3 = vcombine.low %v1422_v61, %v1426_v62 }
 0x475   :  { %2302 = vmatpush1.bf16.msra.mxu1 %v2658_v1  ;;  %v1430_v1 = vld [vmem:[%s4076_s8 + $0xd8] sm:$0xff] }
 0x476   :  { %2303 = vmatprep.subr.bf16.mxu1 %v2667_v2  ;;  %v1434_v2 = vld [vmem:[%s4076_s8 + $0xf8] sm:$0xff] }
 0x477   :  { %v2661_v4 = vcombine.high %v1430_v1, %v1434_v2 }
 0x479   :  { %2304 = vmatpush1.bf16.msra.mxu1 %v2666_v5  ;;  %v1438_v5 = vld [vmem:[%s4076_s8 + $0x118] sm:$0xff] }
 0x47a   :  { %2305 = vmatprep.subr.bf16.mxu1 %v2675_v6  ;;  %v2660_v6 = vcombine.low %v1430_v1, %v1434_v2 }
 0x47d   :  { %2306 = vmatpush1.bf16.msra.mxu1 %v2674_v10  ;;  %v1450_v10 = vld [vmem:[%s4076_s8 + $0x178] sm:$0xff] }
 0x47e   :  { %2307 = vmatprep.subr.bf16.mxu1 %v2683_v11  ;;  %v2677_v13 = vcombine.high %v1446_v9, %v1450_v10 }
 0x481   :  { %2308 = vmatpush1.bf16.msra.mxu1 %v2682_v15  ;;  %v1458_v15 = vld [vmem:[%s4076_s8 + $0x1b8] sm:$0xff] }
 0x482   :  { %2309 = vmatprep.subr.bf16.mxu1 %v2691_v17  ;;  %v2676_v17 = vcombine.low %v1446_v9, %v1450_v10  ;;  %v2685_v18 = vcombine.high %v1454_v14, %v1458_v15 }
 0x485   :  { %2310 = vmatpush1.bf16.msra.mxu1 %v2690_v20  ;;  %v1466_v20 = vld [vmem:[%s4076_s8 + $0x1f8] sm:$0xff] }
 0x486   :  { %2311 = vmatprep.subr.bf16.mxu1 %v2699_v21  ;;  %v2684_v21 = vcombine.low %v1454_v14, %v1458_v15  ;;  %v2693_v22 = vcombine.high %v1462_v19, %v1466_v20 }
 0x489   :  { %2312 = vmatpush1.bf16.msra.mxu1 %v2698_v24  ;;  %v1474_v24 = vld [vmem:[%s4076_s8 + $0x238] sm:$0xff] }
 0x48a   :  { %2313 = vmatprep.subr.bf16.mxu1 %v2707_v25  ;;  %v2692_v25 = vcombine.low %v1462_v19, %v1466_v20  ;;  %v2701_v26 = vcombine.high %v1470_v23, %v1474_v24 }
 0x48d   :  { %2314 = vmatpush1.bf16.msra.mxu1 %v2706_v28  ;;  %v1482_v28 = vld [vmem:[%s4076_s8 + $0x278] sm:$0xff] }
 0x48e   :  { %2315 = vmatprep.subr.bf16.mxu1 %v2715_v29  ;;  %v2700_v29 = vcombine.low %v1470_v23, %v1474_v24  ;;  %v2709_v30 = vcombine.high %v1478_v27, %v1482_v28 }
 0x491   :  { %2316 = vmatpush1.bf16.msra.mxu1 %v2714_v32  ;;  %v1490_v32 = vld [vmem:[%s4076_s8 + $0x2b8] sm:$0xff] }
 0x492   :  { %2317 = vmatprep.subr.bf16.mxu1 %v2723_v33  ;;  %v2708_v33 = vcombine.low %v1478_v27, %v1482_v28  ;;  %v2717_v34 = vcombine.high %v1486_v31, %v1490_v32 }
 0x495   :  { %2318 = vmatpush1.bf16.msra.mxu1 %v2722_v36  ;;  %v1498_v36 = vld [vmem:[%s4076_s8 + $0x2f8] sm:$0xff] }
 0x496   :  { %2319 = vmatprep.subr.bf16.mxu1 %v2731_v37  ;;  %v2716_v37 = vcombine.low %v1486_v31, %v1490_v32  ;;  %v2725_v38 = vcombine.high %v1494_v35, %v1498_v36 }
 0x499   :  { %2320 = vmatpush1.bf16.msra.mxu1 %v2730_v40  ;;  %v1506_v40 = vld [vmem:[%s4076_s8 + $0x338] sm:$0xff] }
 0x49a   :  { %2321 = vmatprep.subr.bf16.mxu1 %v2739_v41  ;;  %v2724_v41 = vcombine.low %v1494_v35, %v1498_v36  ;;  %v2733_v42 = vcombine.high %v1502_v39, %v1506_v40 }
 0x49d   :  { %2322 = vmatpush1.bf16.msra.mxu1 %v2738_v44  ;;  %v1514_v44 = vld [vmem:[%s4076_s8 + $0x378] sm:$0xff] }
 0x49e   :  { %2323 = vmatprep.subr.bf16.mxu1 %v2747_v48  ;;  %v2732_v48 = vcombine.low %v1502_v39, %v1506_v40  ;;  %v2741_v49 = vcombine.high %v1510_v43, %v1514_v44 }
 0x4a1   :  { %2324 = vmatpush1.bf16.msra.mxu1 %v2746_v51  ;;  %v1522_v51 = vld [vmem:[%s4076_s8 + $0x3b8] sm:$0xff] }
 0x4a2   :  { %2325 = vmatprep.subr.bf16.mxu1 %v2755_v52  ;;  %v2740_v52 = vcombine.low %v1510_v43, %v1514_v44  ;;  %v2749_v53 = vcombine.high %v1518_v50, %v1522_v51 }
 0x4a5   :  { %2326 = vmatpush1.bf16.msra.mxu1 %v2754_v55  ;;  %v1530_v55 = vld [vmem:[%s4076_s8 + $0x3f8] sm:$0xff] }
 0x4a6   :  { %2336 = vmatprep.subr.bf16.mxu1 %v2637_v56  ;;  %v2748_v56 = vcombine.low %v1518_v50, %v1522_v51  ;;  %v2757_v57 = vcombine.high %v1526_v54, %v1530_v55  ;;  %v2756_v58 = vcombine.low %v1526_v54, %v1530_v55 }
 0x4a8   :  { %2328 = vmatmul.mubr.bf16.vlgmr.msra.gmra.mrb[16].mxu1 %v3750_v7 }
 0x4a9   :  { %2337 = vmatpush1.bf16.msra.mxu1 %v2636_v59  ;;  %2368 = vmatprep.mubr.bf16.mxu1 %v3748_v45  ;;  %v1442_v45 = vld [vmem:[%s4076_s8 + $0x138] sm:$0xff]  ;;  %v1531_v59 = vld [vmem:[%s4077_s9] sm:$0xff]  ;;  %s3062_s8 = smov [#allocation2]  }
 0x4aa   :  { %2338 = vmatprep.subr.bf16.mxu1 %v2645_v60  ;;  %v2669_v8 = vcombine.high %v1438_v5, %v1442_v45  ;;  %v2668_v11 = vcombine.low %v1438_v5, %v1442_v45  ;;  %v1536_v60 = vrot.slane %v1531_v59, %v3612_v46  ;;  %v1540_v61 = vrot.slane %v1531_v59, %v3618_v47  ;;  %s2458_s9 = sshll.u32 %s3062_s8, 4  ;;  %s2459_s9 = int_to_ptr.vmem [resolvable:$true] %s2458_s9 }
 0x4ab   :  { %s3030_s30 = scalar_lea.vmem %s2459_s9, 32  ;;  %p3035_p1 = scmp.lt.s32.totalorder %s2459_s9, %s2459_s9 }
 0x4ac   :  { %p3031_p0 = scmp.ne.s32.totalorder %s2459_s9, %s3030_s30  ;;  %p3036_p2 = scmp.lt.s32.totalorder %s3030_s30, %s3030_s30 }
 0x4ad   :  { %2339 = vmatpush1.bf16.msra.mxu1 %v2644_v63 }
 0x4ae   :  { %2340 = vmatprep.subr.bf16.mxu1 %v2653_v0  ;;  %p3037_p3 = por %p3036_p2, %p3035_p1 }
 0x4b0   :  { %p3038_p4 = pnand %p3037_p3, %p3031_p0 }
 0x4b1   :  { %2341 = vmatpush1.bf16.msra.mxu1 %v2652_v3 }
 0x4b2   :  { %2342 = vmatprep.subr.bf16.mxu1 %v2661_v4 }
 0x4b5   :  { %2343 = vmatpush1.bf16.msra.mxu1 %v2660_v6  ;;  %v1543_v6 = vsub.s32 2, %v3161_v12 }
 0x4b6   :  { %2344 = vmatprep.subr.bf16.mxu1 %v2669_v8 }
 0x4b7   :  { %v1544_v8 = vrot.slane %v1531_v59, %v1543_v6 }
 0x4b9   :  { %2345 = vmatpush1.bf16.msra.mxu1 %v2668_v11 }
 0x4ba   :  { %2346 = vmatprep.subr.bf16.mxu1 %v2677_v13 }
 0x4bd   :  { %2347 = vmatpush1.bf16.msra.mxu1 %v2676_v17 }
 0x4be   :  { %2348 = vmatprep.subr.bf16.mxu1 %v2685_v18 }
 0x4c1   :  { %2349 = vmatpush1.bf16.msra.mxu1 %v2684_v21 }
 0x4c2   :  { %2350 = vmatprep.subr.bf16.mxu1 %v2693_v22 }
 0x4c5   :  { %2351 = vmatpush1.bf16.msra.mxu1 %v2692_v25 }
 0x4c6   :  { %2352 = vmatprep.subr.bf16.mxu1 %v2701_v26 }
 0x4c9   :  { %2353 = vmatpush1.bf16.msra.mxu1 %v2700_v29 }
 0x4ca   :  { %2354 = vmatprep.subr.bf16.mxu1 %v2709_v30 }
 0x4cd   :  { %2355 = vmatpush1.bf16.msra.mxu1 %v2708_v33 }
 0x4ce   :  { %2356 = vmatprep.subr.bf16.mxu1 %v2717_v34 }
 0x4d1   :  { %2357 = vmatpush1.bf16.msra.mxu1 %v2716_v37 }
 0x4d2   :  { %2358 = vmatprep.subr.bf16.mxu1 %v2725_v38 }
 0x4d5   :  { %2359 = vmatpush1.bf16.msra.mxu1 %v2724_v41 }
 0x4d6   :  { %2360 = vmatprep.subr.bf16.mxu1 %v2733_v42 }
 0x4d9   :  { %2361 = vmatpush1.bf16.msra.mxu1 %v2732_v48 }
 0x4da   :  { %2362 = vmatprep.subr.bf16.mxu1 %v2741_v49 }
 0x4dd   :  { %2363 = vmatpush1.bf16.msra.mxu1 %v2740_v52 }
 0x4de   :  { %2364 = vmatprep.subr.bf16.mxu1 %v2749_v53 }
 0x4e1   :  { %2365 = vmatpush1.bf16.msra.mxu1 %v2748_v56 }
 0x4e2   :  { %2366 = vmatprep.subr.bf16.mxu1 %v2757_v57 }
 0x4e5   :  { %2367 = vmatpush1.bf16.msra.mxu1 %v2756_v58 }
 0x4e8   :  { %2369 = vmatmul.mubr.bf16.vlgmr.msra.gmra.mrb[20].mxu1 %v3750_v7  ;;  %v1547_v7 = vsub.s32 3, %v3161_v12 }
 0x4ea   :  { %v1548_v9 = vrot.slane %v1531_v59, %v1547_v7 }
 0x4fb   :  { %v2247_v62 = vpop.f32.mrb[8].mxu1 }
 0x4fc   :  { %v2248_v63 = vadd.f32 %v2247_v62, %v1536_v60  ;;  %v2249_v0 = vpop.f32.mrb[9].mxu1 }
 0x4fd   :  { %v2250_v1 = vadd.f32 %v2249_v0, %v1540_v61  ;;  %v2251_v2 = vpop.f32.mrb[10].mxu1 }
 0x4fe   :  { %v2377_v3 = vmax.f32 %v2248_v63, 0.0  ;;  %v2252_v4 = vpop.f32.mrb[11].mxu1 }
 0x4ff   :  { %v2378_v5 = vmax.f32 %v2250_v1, 0.0 }
 0x501   :  { %v2758_v45 = vpack.c.bf16 %v2378_v5, %v2377_v3 }
 0x503   :  { %v2411_v19 = vrot.slane %v2758_v45, %v3170_v16 }
 0x53b   :  { %v2288_v10 = vpop.f32.mrb[12].mxu1 }
 0x53c   :  { %v2289_v11 = vadd.f32 %v2288_v10, %v1544_v8  ;;  %v2290_v46 = vpop.f32.mrb[13].mxu1 }
 0x53d   :  { %v2291_v13 = vadd.f32 %v2290_v46, %v1548_v9  ;;  %v2292_v47 = vpop.f32.mrb[14].mxu1 }
 0x53e   :  { %v2379_v14 = vmax.f32 %v2289_v11, 0.0  ;;  %v2293_v15 = vpop.f32.mrb[15].mxu1 }
 0x53f   :  { %v2380_v17 = vmax.f32 %v2291_v13, 0.0 }
 0x541   :  { %v2759_v18 = vpack.c.bf16 %v2380_v17, %v2379_v14 }
 0x543   :  { %v2418_v20 = vrot.slane %v2759_v18, %v3170_v16 }
 0x545   :  { %v2433_v21 = vcombine.low %v2411_v19, %v2418_v20 }
 0x546   :  { %3041 = shalt.err (!%p3038_p4)
}
 0x547   :  { %s3042_s7 = scalar_lea.hbm %s4078_s10, 32 }
 0x548   :  { %p3043_p5 = scmp.ne.s32.totalorder %s4078_s10, %s3042_s7  ;;  %p3046_p6 = scmp.lt.u32.totalorder %s3042_s7, %s4078_s10 }
 0x54a   :  { %p3048_p7 = pnand %p3046_p6, %p3043_p5 }
 0x54c   :  { %3051 = shalt.err (!%p3048_p7)
}
 0x54d   :  { %2461 = dma.vmem_to_hbm [thread:$0]  %s2459_s9, 32, %s4078_s10, [#allocation3]   ;;  %v1551_v22 = vsub.s32 4, %v3161_v12  ;;  %v1555_v23 = vsub.s32 5, %v3161_v12  ;;  %v1559_v35 = vsub.s32 6, %v3161_v12  ;;  %v1563_v36 = vsub.s32 7, %v3161_v12 }
 0x54e   :  { %v2441_v54 = vrot.slane %v2433_v21, %v3170_v16 }
 0x54f   :  { %v1552_v24 = vrot.slane %v1531_v59, %v1551_v22  ;;  %v1556_v25 = vrot.slane %v1531_v59, %v1555_v23  ;;  %v1560_v37 = vrot.slane %v1531_v59, %v1559_v35  ;;  %v1564_v38 = vrot.slane %v1531_v59, %v1563_v36 }
 0x57b   :  { %v2329_v26 = vpop.f32.mrb[16].mxu1 }
 0x57c   :  { %v2330_v27 = vadd.f32 %v2329_v26, %v1552_v24  ;;  %v2331_v28 = vpop.f32.mrb[17].mxu1 }
 0x57d   :  { %v2332_v29 = vadd.f32 %v2331_v28, %v1556_v25  ;;  %v2333_v30 = vpop.f32.mrb[18].mxu1 }
 0x57e   :  { %v2381_v31 = vmax.f32 %v2330_v27, 0.0  ;;  %v2334_v32 = vpop.f32.mrb[19].mxu1 }
 0x57f   :  { %v2382_v33 = vmax.f32 %v2332_v29, 0.0 }
 0x581   :  { %v2760_v34 = vpack.c.bf16 %v2382_v33, %v2381_v31 }
 0x583   :  { %v2425_v51 = vrot.slane %v2760_v34, %v3170_v16 }
 0x5bb   :  { %v2370_v39 = vpop.f32.mrb[20].mxu1 }
 0x5bc   :  { %v2371_v40 = vadd.f32 %v2370_v39, %v1560_v37  ;;  %v2372_v41 = vpop.f32.mrb[21].mxu1 }
 0x5bd   :  { %v2373_v42 = vadd.f32 %v2372_v41, %v1564_v38  ;;  %v2374_v43 = vpop.f32.mrb[22].mxu1 }
 0x5be   :  { %v2383_v44 = vmax.f32 %v2371_v40, 0.0  ;;  %v2375_v48 = vpop.f32.mrb[23].mxu1 }
 0x5bf   :  { %v2384_v49 = vmax.f32 %v2373_v42, 0.0 }
 0x5c1   :  { %v2761_v50 = vpack.c.bf16 %v2384_v49, %v2383_v44 }
 0x5c3   :  { %v2432_v52 = vrot.slane %v2761_v50, %v3170_v16 }
 0x5c5   :  { %v2434_v53 = vcombine.low %v2425_v51, %v2432_v52 }
 0x5c7   :  { %v2448_v12 = vrot.slane %v2434_v53, %v3170_v16 }
 0x5c9   :  { %v2449_v55 = vcombine.low %v2441_v54, %v2448_v12 }
 0x5cb   :  { %2451 = vst [vmem:[%s4081_s13] sm:$0xff] %v2449_v55 }
 0x5cc   :  { %3052 = dma.done.wait [#allocation3], 32  }
 0x5cd   :  { %3053 = vsyncadd [#allocation3], 4294967264 }
 0x5ce   :  { %2477 = vsyncpa [#allocation3], 1 }

// kernel: rho_betavae_forward.14
= control target key start
LH: loop header
LB: loop body
LE: loop exit
PB: predicated region body
PF: predicated region fallthrough
CT: control target
= control target key end

     0   :  { %s1189_s12 = smov 0   ;;  %s1462_s0 = inlined_call_operand.vmem [shape: bf16[32,640], index: 0, kind: input, shape index: {}]   ;;  %s1463_s1 = inlined_call_operand.vmem [shape: bf16[640,256], index: 1, kind: input, shape index: {}]   ;;  %s1464_s2 = inlined_call_operand.vmem [shape: f32[1,256], index: 2, kind: input, shape index: {}]   ;;  %s1465_s3 = inlined_call_operand.vmem [shape: bf16[32,256], index: 3, kind: output, shape index: {}]  }
   0x1 LB: > { %s909_s13 = sadd.s32 4294967295, %s1166_s12   ;;  %p913_p0 = scmp.ge.s32.totalorder %s1166_s12, 1  ;;  %s1166_s12 = sphi %s1189_s12, %s13_s12  }
   0x2   : > { %p139_p1 = scmp.lt.s32.totalorder %s1166_s12, 3 }
   0x4   : > { %p140_p2 = pnand %p913_p0, %p139_p1 }
   0x5   : > { %v1033_v0 = vld [vmem:[%s1463_s1 + $0x104] ss:$8 sps:$4 sm:$0xff] (!%p140_p2)   ;;  %v1035_v1 = vld [vmem:[%s1463_s1 + $0x100] ss:$8 sps:$4 sm:$0xff] (!%p140_p2)   ;;  %v1036_v2 = vld [vmem:[%s1463_s1 + $0x114] ss:$8 sps:$4 sm:$0xff] (!%p140_p2)  }
   0x6   : > { %143 = sbr.rel (%p140_p2) target bundleno = 324 (0x144), region = 32  ;;  %747 = vmatprep.subr.bf16.mxu0 (!%p140_p2), %v1033_v0  ;;  %v1038_v3 = vld [vmem:[%s1463_s1 + $0x110] ss:$8 sps:$4 sm:$0xff] (!%p140_p2)   ;;  %v1039_v4 = vld [vmem:[%s1463_s1 + $0x124] ss:$8 sps:$4 sm:$0xff] (!%p140_p2)   ;;  %s914_s23 = sshll.u32 (!%p140_p2), %s909_s13, 1 }
   0x7   : > { %748 = vmatpush1.bf16.msra.mxu0 (!%p140_p2), %v1035_v1  ;;  %v1041_v5 = vld [vmem:[%s1463_s1 + $0x120] ss:$8 sps:$4 sm:$0xff] (!%p140_p2)   ;;  %v1042_v6 = vld [vmem:[%s1463_s1 + $0x134] ss:$8 sps:$4 sm:$0xff] (!%p140_p2)   ;;  %v1054_v7 = vld [vmem:[%s1463_s1 + $0x4] ss:$8 sps:$4 sm:$0xff] (!%p140_p2)  }
   0x8   : > { %749 = vmatprep.subr.bf16.mxu0 (!%p140_p2), %v1036_v2  ;;  %v1056_v8 = vld [vmem:[%s1463_s1] ss:$8 sps:$4 sm:$0xff] (!%p140_p2)   ;;  %v1044_v9 = vld [vmem:[%s1463_s1 + $0x130] ss:$8 sps:$4 sm:$0xff] (!%p140_p2)   ;;  %v1045_v10 = vld [vmem:[%s1463_s1 + $0x144] ss:$8 sps:$4 sm:$0xff] (!%p140_p2)   ;;  %704 = vmatprep.subr.bf16.mxu1 (!%p140_p2), %v1054_v7 }
   0x9   : > { %v1060_v11 = vld [vmem:[%s1463_s1 + $0x14] ss:$8 sps:$4 sm:$0xff] (!%p140_p2)   ;;  %705 = vmatpush1.bf16.msra.mxu1 (!%p140_p2), %v1056_v8  ;;  %v1062_v12 = vld [vmem:[%s1463_s1 + $0x10] ss:$8 sps:$4 sm:$0xff] (!%p140_p2)   ;;  %v1047_v13 = vld [vmem:[%s1463_s1 + $0x140] ss:$8 sps:$4 sm:$0xff] (!%p140_p2)  }
   0xa   : > { %706 = vmatprep.subr.bf16.mxu1 (!%p140_p2), %v1060_v11  ;;  %v1066_v14 = vld [vmem:[%s1463_s1 + $0x24] ss:$8 sps:$4 sm:$0xff] (!%p140_p2)   ;;  %v1048_v15 = vld [vmem:[%s1463_s1 + $0x154] ss:$8 sps:$4 sm:$0xff] (!%p140_p2)   ;;  %v1068_v16 = vld [vmem:[%s1463_s1 + $0x20] ss:$8 sps:$4 sm:$0xff] (!%p140_p2)  }
   0xb   : > { %750 = vmatpush1.bf16.msra.mxu0 (!%p140_p2), %v1038_v3  ;;  %v1072_v17 = vld [vmem:[%s1463_s1 + $0x34] ss:$8 sps:$4 sm:$0xff] (!%p140_p2)   ;;  %v1050_v18 = vld [vmem:[%s1463_s1 + $0x150] ss:$8 sps:$4 sm:$0xff] (!%p140_p2)   ;;  %v1051_v19 = vld [vmem:[%s1463_s1 + $0x164] ss:$8 sps:$4 sm:$0xff] (!%p140_p2)  }
   0xc   : > { %751 = vmatprep.subr.bf16.mxu0 (!%p140_p2), %v1039_v4  ;;  %p166_p3 = scmp.lt.s32.totalorder (!%p140_p2), %s914_s23, 3  ;;  %v1074_v20 = vld [vmem:[%s1463_s1 + $0x30] ss:$8 sps:$4 sm:$0xff] (!%p140_p2)   ;;  %v1078_v21 = vld [vmem:[%s1463_s1 + $0x44] ss:$8 sps:$4 sm:$0xff] (!%p140_p2)  }
   0xd   : > { %707 = vmatpush1.bf16.msra.mxu1 %v1062_v12  ;;  %v1053_v22 = vld [vmem:[%s1463_s1 + $0x160] ss:$8 sps:$4 sm:$0xff]   ;;  %v1057_v23 = vld [vmem:[%s1463_s1 + $0x174] ss:$8 sps:$4 sm:$0xff]   ;;  %v1059_v26 = vld [vmem:[%s1463_s1 + $0x170] ss:$8 sps:$4 sm:$0xff]  }
   0xe   : > { %708 = vmatprep.subr.bf16.mxu1 %v1066_v14  ;;  %s1467_s23 = smov (!%p166_p3, %s914_s23), 3  ;;  %v1080_v24 = vld [vmem:[%s1463_s1 + $0x40] ss:$8 sps:$4 sm:$0xff]   ;;  %v1084_v25 = vld [vmem:[%s1463_s1 + $0x54] ss:$8 sps:$4 sm:$0xff]  }
   0xf   : > { %752 = vmatpush1.bf16.msra.mxu0 %v1041_v5  ;;  %v1063_v27 = vld [vmem:[%s1463_s1 + $0x184] ss:$8 sps:$4 sm:$0xff]   ;;  %s1023_s20 = smul.u32 20, %s1467_s23  ;;  %v1086_v28 = vld [vmem:[%s1463_s1 + $0x50] ss:$8 sps:$4 sm:$0xff]  }
  0x10   : > { %753 = vmatprep.subr.bf16.mxu0 %v1042_v6  ;;  %v1090_v29 = vld [vmem:[%s1463_s1 + $0x64] ss:$8 sps:$4 sm:$0xff]   ;;  %v1065_v30 = vld [vmem:[%s1463_s1 + $0x180] ss:$8 sps:$4 sm:$0xff]   ;;  %v1069_v31 = vld [vmem:[%s1463_s1 + $0x194] ss:$8 sps:$4 sm:$0xff]  }
  0x11   : > { %709 = vmatpush1.bf16.msra.mxu1 %v1068_v16  ;;  %s1301_s13 = scalar_lea.vmem %s1462_s0, %s1023_s20  ;;  %v1092_v32 = vld [vmem:[%s1463_s1 + $0x60] ss:$8 sps:$4 sm:$0xff]   ;;  %v1096_v33 = vld [vmem:[%s1463_s1 + $0x74] ss:$8 sps:$4 sm:$0xff]   ;;  %v1071_v34 = vld [vmem:[%s1463_s1 + $0x190] ss:$8 sps:$4 sm:$0xff]  }
  0x12   : > { %710 = vmatprep.subr.bf16.mxu1 %v1072_v17  ;;  %v1113_v35 = vld [vmem:[%s1301_s13 + $0xc] ss:$20 sps:$4 sm:$0xff]   ;;  %v1098_v37 = vld [vmem:[%s1463_s1 + $0x70] ss:$8 sps:$4 sm:$0xff]   ;;  %v1081_v40 = vld [vmem:[%s1463_s1 + $0x1b4] ss:$8 sps:$4 sm:$0xff]  }
  0x13   : > { %754 = vmatpush1.bf16.msra.mxu0 %v1044_v9  ;;  %v1075_v36 = vld [vmem:[%s1463_s1 + $0x1a4] ss:$8 sps:$4 sm:$0xff]   ;;  %779 = vmatprep.mubr.bf16.mxu0 %v1113_v35  ;;  %v1077_v39 = vld [vmem:[%s1463_s1 + $0x1a0] ss:$8 sps:$4 sm:$0xff]   ;;  %v1108_v42 = vld [vmem:[%s1463_s1 + $0x94] ss:$8 sps:$4 sm:$0xff]  }
  0x14   : > { %755 = vmatprep.subr.bf16.mxu0 %v1045_v10  ;;  %v1102_v38 = vld [vmem:[%s1463_s1 + $0x84] ss:$8 sps:$4 sm:$0xff]   ;;  %v1104_v41 = vld [vmem:[%s1463_s1 + $0x80] ss:$8 sps:$4 sm:$0xff]   ;;  %v1083_v43 = vld [vmem:[%s1463_s1 + $0x1b0] ss:$8 sps:$4 sm:$0xff]  }
  0x15   : > { %711 = vmatpush1.bf16.msra.mxu1 %v1074_v20  ;;  %v1087_v44 = vld [vmem:[%s1463_s1 + $0x1c4] ss:$8 sps:$4 sm:$0xff]   ;;  %v1110_v45 = vld [vmem:[%s1463_s1 + $0x90] ss:$8 sps:$4 sm:$0xff]   ;;  %v1089_v47 = vld [vmem:[%s1463_s1 + $0x1c0] ss:$8 sps:$4 sm:$0xff]  }
  0x16   : > { %712 = vmatprep.subr.bf16.mxu1 %v1078_v21  ;;  %v1117_v46 = vld [vmem:[%s1463_s1 + $0xa4] ss:$8 sps:$4 sm:$0xff]   ;;  %v1093_v48 = vld [vmem:[%s1463_s1 + $0x1d4] ss:$8 sps:$4 sm:$0xff]   ;;  %v1119_v49 = vld [vmem:[%s1463_s1 + $0xa0] ss:$8 sps:$4 sm:$0xff]  }
  0x17   : > { %756 = vmatpush1.bf16.msra.mxu0 %v1047_v13  ;;  %v1123_v50 = vld [vmem:[%s1463_s1 + $0xb4] ss:$8 sps:$4 sm:$0xff]   ;;  %v1095_v51 = vld [vmem:[%s1463_s1 + $0x1d0] ss:$8 sps:$4 sm:$0xff]   ;;  %v1099_v52 = vld [vmem:[%s1463_s1 + $0x1e4] ss:$8 sps:$4 sm:$0xff]  }
  0x18   : > { %757 = vmatprep.subr.bf16.mxu0 %v1048_v15  ;;  %v1125_v53 = vld [vmem:[%s1463_s1 + $0xb0] ss:$8 sps:$4 sm:$0xff]   ;;  %v1129_v54 = vld [vmem:[%s1463_s1 + $0xc4] ss:$8 sps:$4 sm:$0xff]   ;;  %v1101_v56 = vld [vmem:[%s1463_s1 + $0x1e0] ss:$8 sps:$4 sm:$0xff]  }
  0x19   : > { %713 = vmatpush1.bf16.msra.mxu1 %v1080_v24  ;;  %v1155_v55 = vld [vmem:[%s1301_s13 + $0x4] ss:$20 sps:$4 sm:$0xff]   ;;  %v1105_v57 = vld [vmem:[%s1463_s1 + $0x1f4] ss:$8 sps:$4 sm:$0xff]   ;;  %v1131_v58 = vld [vmem:[%s1463_s1 + $0xc0] ss:$8 sps:$4 sm:$0xff]  }
  0x1a   : > { %714 = vmatprep.subr.bf16.mxu1 %v1084_v25  ;;  %736 = vmatprep.mubr.bf16.mxu1 %v1155_v55  ;;  %v1135_v59 = vld [vmem:[%s1463_s1 + $0xd4] ss:$8 sps:$4 sm:$0xff]   ;;  %v1107_v60 = vld [vmem:[%s1463_s1 + $0x1f0] ss:$8 sps:$4 sm:$0xff]   ;;  %v1116_v61 = vld [vmem:[%s1463_s1 + $0x204] ss:$8 sps:$4 sm:$0xff]   ;;  %v268_v25 = vlaneseq }
  0x1b   : > { %758 = vmatpush1.bf16.msra.mxu0 %v1050_v18  ;;  %v1137_v62 = vld [vmem:[%s1463_s1 + $0xd0] ss:$8 sps:$4 sm:$0xff]   ;;  %v1111_v63 = vld [vmem:[%s1301_s13 + $0x8] ss:$20 sps:$4 sm:$0xff]   ;;  %v1141_v0 = vld [vmem:[%s1463_s1 + $0xe4] ss:$8 sps:$4 sm:$0xff]  }
  0x1c   : > { %759 = vmatprep.subr.bf16.mxu0 %v1051_v19  ;;  %v1114_v1 = vld [vmem:[%s1463_s1 + $0x200] ss:$8 sps:$4 sm:$0xff]   ;;  %v1122_v2 = vld [vmem:[%s1463_s1 + $0x214] ss:$8 sps:$4 sm:$0xff]   ;;  %v1120_v5 = vld [vmem:[%s1463_s1 + $0x210] ss:$8 sps:$4 sm:$0xff]  }
  0x1d   : > { %715 = vmatpush1.bf16.msra.mxu1 %v1086_v28  ;;  %v1143_v3 = vld [vmem:[%s1463_s1 + $0xe0] ss:$8 sps:$4 sm:$0xff]   ;;  %v1147_v4 = vld [vmem:[%s1463_s1 + $0xf4] ss:$8 sps:$4 sm:$0xff]   ;;  %v1168_v6 = vmov 0  }
  0x1e   : > { %716 = vmatprep.subr.bf16.mxu1 %v1090_v29  ;;  %v1128_v7 = vld [vmem:[%s1463_s1 + $0x224] ss:$8 sps:$4 sm:$0xff]   ;;  %v1149_v8 = vld [vmem:[%s1463_s1 + $0xf0] ss:$8 sps:$4 sm:$0xff]   ;;  %v1126_v9 = vld [vmem:[%s1463_s1 + $0x220] ss:$8 sps:$4 sm:$0xff]  }
  0x1f   : > { %760 = vmatpush1.bf16.msra.mxu0 %v1053_v22  ;;  %v1134_v10 = vld [vmem:[%s1463_s1 + $0x234] ss:$8 sps:$4 sm:$0xff]   ;;  %v1132_v12 = vld [vmem:[%s1463_s1 + $0x230] ss:$8 sps:$4 sm:$0xff]   ;;  %v1140_v13 = vld [vmem:[%s1463_s1 + $0x244] ss:$8 sps:$4 sm:$0xff]  }
  0x20   : > { %761 = vmatprep.subr.bf16.mxu0 %v1057_v23  ;;  %v1153_v11 = vld [vmem:[%s1301_s13] ss:$20 sps:$4 sm:$0xff]   ;;  %v1144_v16 = vld [vmem:[%s1463_s1 + $0x250] ss:$8 sps:$4 sm:$0xff]   ;;  %v1152_v17 = vld [vmem:[%s1463_s1 + $0x264] ss:$8 sps:$4 sm:$0xff]  }
  0x21   : > { %717 = vmatpush1.bf16.msra.mxu1 %v1092_v32  ;;  %v1138_v14 = vld [vmem:[%s1463_s1 + $0x240] ss:$8 sps:$4 sm:$0xff]   ;;  %v1146_v15 = vld [vmem:[%s1463_s1 + $0x254] ss:$8 sps:$4 sm:$0xff]   ;;  %v1156_v20 = vld [vmem:[%s1463_s1 + $0x270] ss:$8 sps:$4 sm:$0xff]  }
  0x22   : > { %718 = vmatprep.subr.bf16.mxu1 %v1096_v33  ;;  %v1150_v18 = vld [vmem:[%s1463_s1 + $0x260] ss:$8 sps:$4 sm:$0xff]   ;;  %v1158_v19 = vld [vmem:[%s1463_s1 + $0x274] ss:$8 sps:$4 sm:$0xff]   ;;  %v1159_v21 = vld [vmem:[%s1301_s13 + $0x10] ss:$20 sps:$4 sm:$0xff]  }
  0x23   : > { %762 = vmatpush1.bf16.msra.mxu0 %v1059_v26  ;;  %v266_v29 = vld [vmem:[%s1464_s2] sm:$0x3]  ;;  %s1008_s13 = sshll.u32 %s1467_s23, 3 }
  0x24   : > { %763 = vmatprep.subr.bf16.mxu0 %v1063_v27  ;;  %v269_v27 = vshrl.u32 %v268_v25, 7  ;;  %s177_s9 = scalar_lea.vmem %s1465_s3, %s1008_s13 }
  0x25   : > { %719 = vmatpush1.bf16.msra.mxu1 %v1098_v37 }
  0x26   : > { %720 = vmatprep.subr.bf16.mxu1 %v1102_v38  ;;  %v270_v28 = vsub.s32 0, %v269_v27 }
  0x27   : > { %764 = vmatpush1.bf16.msra.mxu0 %v1065_v30  ;;  %v274_v30 = vsub.s32 1, %v269_v27 }
  0x28   : > { %765 = vmatprep.subr.bf16.mxu0 %v1069_v31  ;;  %v271_v31 = vrot.slane %v266_v29, %v270_v28 }
  0x29   : > { %721 = vmatpush1.bf16.msra.mxu1 %v1104_v41  ;;  %v275_v32 = vrot.slane %v266_v29, %v274_v30 }
  0x2a   : > { %722 = vmatprep.subr.bf16.mxu1 %v1108_v42 }
  0x2b   : > { %766 = vmatpush1.bf16.msra.mxu0 %v1071_v34 }
  0x2c   : > { %767 = vmatprep.subr.bf16.mxu0 %v1075_v36 }
  0x2d   : > { %723 = vmatpush1.bf16.msra.mxu1 %v1110_v45 }
  0x2e   : > { %724 = vmatprep.subr.bf16.mxu1 %v1117_v46 }
  0x2f   : > { %768 = vmatpush1.bf16.msra.mxu0 %v1077_v39 }
  0x30   : > { %769 = vmatprep.subr.bf16.mxu0 %v1081_v40 }
  0x31   : > { %725 = vmatpush1.bf16.msra.mxu1 %v1119_v49 }
  0x32   : > { %726 = vmatprep.subr.bf16.mxu1 %v1123_v50 }
  0x33   : > { %770 = vmatpush1.bf16.msra.mxu0 %v1083_v43 }
  0x34   : > { %771 = vmatprep.subr.bf16.mxu0 %v1087_v44 }
  0x35   : > { %727 = vmatpush1.bf16.msra.mxu1 %v1125_v53 }
  0x36   : > { %728 = vmatprep.subr.bf16.mxu1 %v1129_v54 }
  0x37   : > { %772 = vmatpush1.bf16.msra.mxu0 %v1089_v47 }
  0x38   : > { %773 = vmatprep.subr.bf16.mxu0 %v1093_v48 }
  0x39   : > { %729 = vmatpush1.bf16.msra.mxu1 %v1131_v58 }
  0x3a   : > { %730 = vmatprep.subr.bf16.mxu1 %v1135_v59 }
  0x3b   : > { %774 = vmatpush1.bf16.msra.mxu0 %v1095_v51 }
  0x3c   : > { %775 = vmatprep.subr.bf16.mxu0 %v1099_v52 }
  0x3d   : > { %731 = vmatpush1.bf16.msra.mxu1 %v1137_v62 }
  0x3e   : > { %732 = vmatprep.subr.bf16.mxu1 %v1141_v0 }
  0x3f   : > { %776 = vmatpush1.bf16.msra.mxu0 %v1101_v56 }
  0x40   : > { %777 = vmatprep.subr.bf16.mxu0 %v1105_v57 }
  0x41   : > { %733 = vmatpush1.bf16.msra.mxu1 %v1143_v3 }
  0x42   : > { %734 = vmatprep.subr.bf16.mxu1 %v1147_v4 }
  0x43   : > { %778 = vmatpush1.bf16.msra.mxu0 %v1107_v60 }
  0x44   : > { %790 = vmatprep.subr.bf16.mxu0 %v1116_v61 }
  0x45   : > { %735 = vmatpush1.bf16.msra.mxu1 %v1149_v8 }
  0x46   : > { %780 = vmatmul.mubr.bf16.vlgmr.msra.gmra.mrb[0].mxu0 %v1111_v63 }
  0x47   : > { %791 = vmatpush1.bf16.msra.mxu0 %v1114_v1  ;;  %822 = vmatprep.mubr.bf16.mxu0 %v1168_v6 }
  0x48   : > { %792 = vmatprep.subr.bf16.mxu0 %v1122_v2  ;;  %737 = vmatmul.mubr.bf16.vlgmr.msra.gmra.mrb[0].mxu1 %v1153_v11 }
  0x4b   : > { %793 = vmatpush1.bf16.msra.mxu0 %v1120_v5 }
  0x4c   : > { %794 = vmatprep.subr.bf16.mxu0 %v1128_v7 }
  0x4f   : > { %795 = vmatpush1.bf16.msra.mxu0 %v1126_v9 }
  0x50   : > { %796 = vmatprep.subr.bf16.mxu0 %v1134_v10 }
  0x53   : > { %797 = vmatpush1.bf16.msra.mxu0 %v1132_v12 }
  0x54   : > { %798 = vmatprep.subr.bf16.mxu0 %v1140_v13 }
  0x57   : > { %799 = vmatpush1.bf16.msra.mxu0 %v1138_v14 }
  0x58   : > { %800 = vmatprep.subr.bf16.mxu0 %v1146_v15 }
  0x5b   : > { %801 = vmatpush1.bf16.msra.mxu0 %v1144_v16 }
  0x5c   : > { %802 = vmatprep.subr.bf16.mxu0 %v1152_v17 }
  0x5f   : > { %803 = vmatpush1.bf16.msra.mxu0 %v1150_v18 }
  0x60   : > { %804 = vmatprep.subr.bf16.mxu0 %v1158_v19 }
  0x63   : > { %805 = vmatpush1.bf16.msra.mxu0 %v1156_v20 }
  0x66   : > { %823 = vmatmul.mubr.bf16.vlgmr.msra.gmra.mrb[0].mxu0 %v1159_v21 }
 0x11b   : > { %v738_v22 = vpop.f32.mrb[0].mxu1 }
 0x11c   : > { %v740_v23 = vpop.f32.mrb[1].mxu1  ;;  %v739_v33 = vadd.f32 %v738_v22, %v271_v31 }
 0x11d   : > { %v742_v24 = vpop.f32.mrb[2].mxu1  ;;  %v741_v34 = vadd.f32 %v740_v23, %v275_v32 }
 0x11e   : > { %v744_v26 = vpop.f32.mrb[3].mxu1  ;;  %v743_v36 = vadd.f32 %v742_v24, %v271_v31 }
 0x11f   : > { %v745_v39 = vadd.f32 %v744_v26, %v275_v32 }
 0x139   : > { %v824_v35 = vpop.f32.mrb[0].mxu0 }
 0x13a   : > { %v1012_v37 = vadd.f32 %v824_v35, %v739_v33  ;;  %v826_v38 = vpop.f32.mrb[1].mxu0 }
 0x13b   : > { %v1014_v40 = vadd.f32 %v826_v38, %v741_v34  ;;  %v828_v41 = vpop.f32.mrb[2].mxu0 }
 0x13c   : > { %v833_v42 = vmax.f32 %v1012_v37, 0.0  ;;  %v1016_v43 = vadd.f32 %v828_v41, %v743_v36  ;;  %v830_v44 = vpop.f32.mrb[3].mxu0 }
 0x13d   : > { %v834_v45 = vmax.f32 %v1014_v40, 0.0  ;;  %v1018_v46 = vadd.f32 %v830_v44, %v745_v39 }
 0x13e   : > { %v835_v47 = vmax.f32 %v1016_v43, 0.0 }
 0x13f   : > { %v1009_v48 = vpack.c.bf16 %v834_v45, %v833_v42  ;;  %v836_v49 = vmax.f32 %v1018_v46, 0.0 }
 0x141   : > { %849 = vst [vmem:[%s177_s9] sm:$0xff] %v1009_v48  ;;  %v1010_v50 = vpack.c.bf16 %v836_v49, %v835_v47 }
 0x143   : > { %850 = vst [vmem:[%s177_s9 + $0x8] sm:$0xff] %v1010_v50 }
 0x144 PF: > { %s13_s12 = sadd.s32 1, %s1166_s12  }
 0x145   : > { %p10_p4 = scmp.ge.s32.totalorder %s13_s12, 4  }
 0x147   :  { %12 = sbr.rel (!%p10_p4) target bundleno = 1 (0x1), region = 62 }

// kernel: rho_betavae_forward.15
= control target key start
LH: loop header
LB: loop body
LE: loop exit
PB: predicated region body
PF: predicated region fallthrough
CT: control target
= control target key end

     0   :  { %s1280_s12 = smov 0   ;;  %s1448_s0 = inlined_call_operand.vmem [shape: bf16[128,640], index: 0, kind: input, shape index: {}]   ;;  %s1449_s1 = inlined_call_operand.vmem [shape: bf16[640,128], index: 1, kind: input, shape index: {}]   ;;  %s1450_s2 = inlined_call_operand.vmem [shape: f32[1,128], index: 2, kind: input, shape index: {}]   ;;  %s1451_s3 = inlined_call_operand.vmem [shape: bf16[128,128], index: 3, kind: output, shape index: {}]  }
   0x1 LB: > { %s932_s13 = sadd.s32 4294967295, %s1258_s12   ;;  %p936_p0 = scmp.ge.s32.totalorder %s1258_s12, 1  ;;  %s1258_s12 = sphi %s1280_s12, %s13_s12  }
   0x2   : > { %p139_p1 = scmp.lt.s32.totalorder %s1258_s12, 3 }
   0x4   : > { %p140_p2 = pnand %p936_p0, %p139_p1 }
   0x5   : > { %v1184_v0 = vld [vmem:[%s1449_s1 + $0x40] sm:$0xff] (!%p140_p2)   ;;  %v1188_v4 = vld [vmem:[%s1449_s1 + $0x48] sm:$0xff] (!%p140_p2)   ;;  %v1192_v8 = vld [vmem:[%s1449_s1 + $0x50] sm:$0xff] (!%p140_p2)   ;;  %s937_s19 = sshll.u32 (!%p140_p2), %s932_s13, 3 }
   0x6   : > { %143 = sbr.rel (%p140_p2) target bundleno = 295 (0x127), region = 32  ;;  %v1185_v1 = vld [vmem:[%s1449_s1 + $0xc0] sm:$0xff] (!%p140_p2)   ;;  %1043 = vmatprep.subr.bf16.mxu0 (!%p140_p2), %v1184_v0  ;;  %v1189_v5 = vld [vmem:[%s1449_s1 + $0xc8] sm:$0xff] (!%p140_p2)   ;;  %v1193_v9 = vld [vmem:[%s1449_s1 + $0xd0] sm:$0xff] (!%p140_p2)   ;;  %p165_p3 = scmp.lt.s32.totalorder (!%p140_p2), %s937_s19, 15 }
   0x7   : > { %v1186_v2 = vld [vmem:[%s1449_s1] sm:$0xff] (!%p140_p2)   ;;  %1083 = vmatprep.subr.bf16.mxu1 (!%p140_p2), %v1185_v1  ;;  %v1190_v6 = vld [vmem:[%s1449_s1 + $0x8] sm:$0xff] (!%p140_p2)   ;;  %v1194_v10 = vld [vmem:[%s1449_s1 + $0x10] sm:$0xff] (!%p140_p2)  }
   0x8   : > { %v1187_v3 = vld [vmem:[%s1449_s1 + $0x80] sm:$0xff] (!%p140_p2)   ;;  %1044 = vmatpush3.bf16.msra.mxu0 (!%p140_p2), %v1186_v2  ;;  %v1191_v7 = vld [vmem:[%s1449_s1 + $0x88] sm:$0xff] (!%p140_p2)   ;;  %v1195_v11 = vld [vmem:[%s1449_s1 + $0x90] sm:$0xff] (!%p140_p2)  }
   0x9   : > { %1084 = vmatpush3.bf16.msra.mxu1 (!%p140_p2), %v1187_v3  ;;  %1045 = vmatprep.subr.bf16.mxu0 (!%p140_p2), %v1188_v4  ;;  %v1196_v12 = vld [vmem:[%s1449_s1 + $0x58] sm:$0xff] (!%p140_p2)   ;;  %v1200_v16 = vld [vmem:[%s1449_s1 + $0x60] sm:$0xff] (!%p140_p2)   ;;  %v1204_v20 = vld [vmem:[%s1449_s1 + $0x68] sm:$0xff] (!%p140_p2)  }
   0xa   : > { %1085 = vmatprep.subr.bf16.mxu1 (!%p140_p2), %v1189_v5  ;;  %v1197_v13 = vld [vmem:[%s1449_s1 + $0xd8] sm:$0xff] (!%p140_p2)   ;;  %v1201_v17 = vld [vmem:[%s1449_s1 + $0xe0] sm:$0xff] (!%p140_p2)   ;;  %v1205_v21 = vld [vmem:[%s1449_s1 + $0xe8] sm:$0xff] (!%p140_p2)  }
   0xb   : > { %v1198_v14 = vld [vmem:[%s1449_s1 + $0x18] sm:$0xff] (!%p140_p2)   ;;  %v1202_v18 = vld [vmem:[%s1449_s1 + $0x20] sm:$0xff] (!%p140_p2)   ;;  %v1206_v22 = vld [vmem:[%s1449_s1 + $0x28] sm:$0xff] (!%p140_p2)  }
   0xc   : > { %1046 = vmatpush3.bf16.msra.mxu0 (!%p140_p2), %v1190_v6  ;;  %v1199_v15 = vld [vmem:[%s1449_s1 + $0x98] sm:$0xff] (!%p140_p2)   ;;  %v1203_v19 = vld [vmem:[%s1449_s1 + $0xa0] sm:$0xff] (!%p140_p2)   ;;  %v1207_v23 = vld [vmem:[%s1449_s1 + $0xa8] sm:$0xff] (!%p140_p2)  }
   0xd   : > { %1086 = vmatpush3.bf16.msra.mxu1 %v1191_v7  ;;  %1047 = vmatprep.subr.bf16.mxu0 %v1192_v8  ;;  %s1453_s19 = smov (!%p165_p3, %s937_s19), 15  ;;  %v1208_v24 = vld [vmem:[%s1449_s1 + $0x70] sm:$0xff]   ;;  %v1212_v28 = vld [vmem:[%s1449_s1 + $0x78] sm:$0xff]   ;;  %v1222_v36 = vld [vmem:[%s1449_s1 + $0x100] sm:$0xff]  }
   0xe   : > { %1087 = vmatprep.subr.bf16.mxu1 %v1193_v9  ;;  %v1209_v25 = vld [vmem:[%s1449_s1 + $0xf0] sm:$0xff]   ;;  %s1175_s16 = smul.u32 20, %s1453_s19  ;;  %v1213_v29 = vld [vmem:[%s1449_s1 + $0xf8] sm:$0xff]   ;;  %v1223_v37 = vld [vmem:[%s1449_s1 + $0x108] sm:$0xff]   ;;  %s940_s26 = sshll.u32 %s1453_s19, 2 }
   0xf   : > { %v1210_v26 = vld [vmem:[%s1449_s1 + $0x30] sm:$0xff]   ;;  %v1214_v30 = vld [vmem:[%s1449_s1 + $0x38] sm:$0xff]   ;;  %v1238_v46 = vld [vmem:[%s1449_s1 + $0x120] sm:$0xff]   ;;  %s175_s28 = scalar_lea.vmem %s1451_s3, %s940_s26 }
  0x10   : > { %1048 = vmatpush3.bf16.msra.mxu0 %v1194_v10  ;;  %v1211_v27 = vld [vmem:[%s1449_s1 + $0xb0] sm:$0xff]   ;;  %s1386_s13 = scalar_lea.vmem %s1448_s0, %s1175_s16  ;;  %v1215_v31 = vld [vmem:[%s1449_s1 + $0xb8] sm:$0xff]   ;;  %v1239_v51 = vld [vmem:[%s1449_s1 + $0x128] sm:$0xff]  }
  0x11   : > { %1088 = vmatpush3.bf16.msra.mxu1 %v1195_v11  ;;  %1049 = vmatprep.subr.bf16.mxu0 %v1196_v12  ;;  %v1216_v32 = vld [vmem:[%s1386_s13] ss:$20 sps:$4 sm:$0xff]   ;;  %v1218_v33 = vld [vmem:[%s1386_s13 + $0x4] ss:$20 sps:$4 sm:$0xff]   ;;  %v1219_v34 = vld [vmem:[%s1386_s13 + $0x8] ss:$20 sps:$4 sm:$0xff]  }
  0x12   : > { %1089 = vmatprep.subr.bf16.mxu1 %v1197_v13  ;;  %v1221_v35 = vld [vmem:[%s1386_s13 + $0xc] ss:$20 sps:$4 sm:$0xff]   ;;  %665 = vmatprep.mubr.bf16.mxu0 %v1218_v33  ;;  %v1226_v39 = vld [vmem:[%s1386_s13 + $0x34] ss:$20 sps:$4 sm:$0xff]   ;;  %v1229_v42 = vld [vmem:[%s1386_s13 + $0x30] ss:$20 sps:$4 sm:$0xff]  }
  0x13   : > { %730 = vmatprep.mubr.bf16.mxu1 %v1221_v35  ;;  %v1224_v38 = vld [vmem:[%s1386_s13 + $0x2c] ss:$20 sps:$4 sm:$0xff]   ;;  %v1228_v40 = vld [vmem:[%s1386_s13 + $0x28] ss:$20 sps:$4 sm:$0xff]   ;;  %v1230_v41 = vld [vmem:[%s1449_s1 + $0x110] sm:$0xff]  }
  0x14   : > { %1050 = vmatpush3.bf16.msra.mxu0 %v1198_v14  ;;  %v1232_v43 = vld [vmem:[%s1386_s13 + $0x54] ss:$20 sps:$4 sm:$0xff]   ;;  %v1231_v44 = vld [vmem:[%s1449_s1 + $0x118] sm:$0xff]   ;;  %v1236_v47 = vld [vmem:[%s1386_s13 + $0x50] ss:$20 sps:$4 sm:$0xff]  }
  0x15   : > { %1090 = vmatpush3.bf16.msra.mxu1 %v1199_v15  ;;  %1051 = vmatprep.subr.bf16.mxu0 %v1200_v16  ;;  %v1234_v45 = vld [vmem:[%s1386_s13 + $0x5c] ss:$20 sps:$4 sm:$0xff]   ;;  %v1237_v48 = vld [vmem:[%s1386_s13 + $0x58] ss:$20 sps:$4 sm:$0xff]   ;;  %v1245_v54 = vld [vmem:[%s1386_s13 + $0x80] ss:$20 sps:$4 sm:$0xff]  }
  0x16   : > { %1091 = vmatprep.subr.bf16.mxu1 %v1201_v17  ;;  %v1240_v49 = vld [vmem:[%s1386_s13 + $0x7c] ss:$20 sps:$4 sm:$0xff]   ;;  %v1242_v50 = vld [vmem:[%s1386_s13 + $0x84] ss:$20 sps:$4 sm:$0xff]   ;;  %v1249_v56 = vld [vmem:[%s1386_s13 + $0x60] ss:$20 sps:$4 sm:$0xff]  }
  0x17   : > { %v1246_v52 = vld [vmem:[%s1449_s1 + $0x130] sm:$0xff]   ;;  %v1244_v53 = vld [vmem:[%s1386_s13 + $0x78] ss:$20 sps:$4 sm:$0xff]   ;;  %v1251_v59 = vld [vmem:[%s1386_s13 + $0x88] ss:$20 sps:$4 sm:$0xff]  }
  0x18   : > { %1052 = vmatpush3.bf16.msra.mxu0 %v1202_v18  ;;  %v1248_v55 = vld [vmem:[%s1386_s13 + $0x10] ss:$20 sps:$4 sm:$0xff]   ;;  %v1247_v57 = vld [vmem:[%s1449_s1 + $0x138] sm:$0xff]   ;;  %v941_v62 = vld [vmem:[%s1450_s2] ss:$0 sm:$0xff] }
  0x19   : > { %1092 = vmatpush3.bf16.msra.mxu1 %v1203_v19  ;;  %1053 = vmatprep.subr.bf16.mxu0 %v1204_v20  ;;  %v1250_v58 = vld [vmem:[%s1386_s13 + $0x38] ss:$20 sps:$4 sm:$0xff]  }
  0x1a   : > { %1093 = vmatprep.subr.bf16.mxu1 %v1205_v21 }
  0x1c   : > { %1054 = vmatpush3.bf16.msra.mxu0 %v1206_v22 }
  0x1d   : > { %1094 = vmatpush3.bf16.msra.mxu1 %v1207_v23  ;;  %1055 = vmatprep.subr.bf16.mxu0 %v1208_v24 }
  0x1e   : > { %1095 = vmatprep.subr.bf16.mxu1 %v1209_v25 }
  0x20   : > { %1056 = vmatpush3.bf16.msra.mxu0 %v1210_v26 }
  0x21   : > { %1096 = vmatpush3.bf16.msra.mxu1 %v1211_v27  ;;  %1057 = vmatprep.subr.bf16.mxu0 %v1212_v28 }
  0x22   : > { %1097 = vmatprep.subr.bf16.mxu1 %v1213_v29 }
  0x24   : > { %1058 = vmatpush3.bf16.msra.mxu0 %v1214_v30 }
  0x25   : > { %1098 = vmatpush3.bf16.msra.mxu1 %v1215_v31  ;;  %1135 = vmatprep.subr.bf16.mxu0 %v1222_v36 }
  0x26   : > { %1159 = vmatprep.subr.bf16.mxu1 %v1222_v36 }
  0x27   : > { %666 = vmatmul.mubr.bf16.vlgmr.msra.gmra.mrb[0].mxu0 %v1216_v32 }
  0x28   : > { %731 = vmatmul.mubr.bf16.vlgmr.msra.gmra.mrb[0].mxu1 %v1219_v34  ;;  %1136 = vmatpush3.bf16.msra.mxu0 %v1222_v36 }
  0x29   : > { %1167 = vmatpush3.bf16.msra.mxu1 %v1222_v36  ;;  %1137 = vmatprep.subr.bf16.mxu0 %v1223_v37 }
  0x2a   : > { %1160 = vmatprep.subr.bf16.mxu1 %v1223_v37  ;;  %673 = vmatprep.mubr.bf16.mxu0 %v1224_v38 }
  0x2b   : > { %738 = vmatprep.mubr.bf16.mxu1 %v1226_v39 }
  0x2c   : > { %1138 = vmatpush3.bf16.msra.mxu0 %v1223_v37 }
  0x2d   : > { %1168 = vmatpush3.bf16.msra.mxu1 %v1223_v37  ;;  %1139 = vmatprep.subr.bf16.mxu0 %v1230_v41 }
  0x2e   : > { %1161 = vmatprep.subr.bf16.mxu1 %v1230_v41 }
  0x2f   : > { %674 = vmatmul.mubr.bf16.gmra.mrb[4].mxu0 %v1228_v40 }
  0x30   : > { %739 = vmatmul.mubr.bf16.gmra.mrb[4].mxu1 %v1229_v42  ;;  %681 = vmatprep.mubr.bf16.mxu0 %v1232_v43 }
  0x31   : > { %1140 = vmatpush3.bf16.msra.mxu0 %v1230_v41  ;;  %746 = vmatprep.mubr.bf16.mxu1 %v1234_v45 }
  0x32   : > { %1169 = vmatpush3.bf16.msra.mxu1 %v1230_v41  ;;  %1141 = vmatprep.subr.bf16.mxu0 %v1231_v44 }
  0x33   : > { %1162 = vmatprep.subr.bf16.mxu1 %v1231_v44 }
  0x35   : > { %1142 = vmatpush3.bf16.msra.mxu0 %v1231_v44 }
  0x36   : > { %1170 = vmatpush3.bf16.msra.mxu1 %v1231_v44  ;;  %1143 = vmatprep.subr.bf16.mxu0 %v1238_v46 }
  0x37   : > { %682 = vmatmul.mubr.bf16.gmra.mrb[8].mxu0 %v1236_v47  ;;  %1163 = vmatprep.subr.bf16.mxu1 %v1238_v46 }
  0x38   : > { %747 = vmatmul.mubr.bf16.gmra.mrb[8].mxu1 %v1237_v48  ;;  %689 = vmatprep.mubr.bf16.mxu0 %v1240_v49 }
  0x39   : > { %1144 = vmatpush3.bf16.msra.mxu0 %v1238_v46  ;;  %754 = vmatprep.mubr.bf16.mxu1 %v1242_v50 }
  0x3a   : > { %1171 = vmatpush3.bf16.msra.mxu1 %v1238_v46  ;;  %1145 = vmatprep.subr.bf16.mxu0 %v1239_v51 }
  0x3b   : > { %1164 = vmatprep.subr.bf16.mxu1 %v1239_v51 }
  0x3d   : > { %1146 = vmatpush3.bf16.msra.mxu0 %v1239_v51 }
  0x3e   : > { %1172 = vmatpush3.bf16.msra.mxu1 %v1239_v51  ;;  %1147 = vmatprep.subr.bf16.mxu0 %v1246_v52 }
  0x3f   : > { %690 = vmatmul.mubr.bf16.gmra.mrb[12].mxu0 %v1244_v53  ;;  %1165 = vmatprep.subr.bf16.mxu1 %v1246_v52 }
  0x40   : > { %755 = vmatmul.mubr.bf16.gmra.mrb[12].mxu1 %v1245_v54  ;;  %1151 = vmatprep.mubr.bf16.mxu0 %v1248_v55 }
  0x41   : > { %1148 = vmatpush3.bf16.msra.mxu0 %v1246_v52  ;;  %1155 = vmatprep.mubr.bf16.mxu1 %v1249_v56 }
  0x42   : > { %1173 = vmatpush3.bf16.msra.mxu1 %v1246_v52  ;;  %1149 = vmatprep.subr.bf16.mxu0 %v1247_v57 }
  0x43   : > { %1166 = vmatprep.subr.bf16.mxu1 %v1247_v57 }
  0x45   : > { %1150 = vmatpush3.bf16.msra.mxu0 %v1247_v57 }
  0x46   : > { %1174 = vmatpush3.bf16.msra.mxu1 %v1247_v57 }
  0x48   : > { %1152 = vmatmul.mubr.bf16.vlgmr.msra.gmra.mrb[16].mxu0 %v1250_v58 }
  0x49   : > { %1156 = vmatmul.mubr.bf16.vlgmr.msra.gmra.mrb[16].mxu1 %v1251_v59 }
  0xfa   : > { %v1059_v60 = vpop.f32.mrb[0].mxu0 }
  0xfb   : > { %v1099_v61 = vpop.f32.mrb[0].mxu1  ;;  %v1060_v63 = vpop.f32.mrb[1].mxu0 }
  0xfc   : > { %v1061_v0 = vadd.f32 %v1060_v63, %v1059_v60  ;;  %v1100_v1 = vpop.f32.mrb[1].mxu1  ;;  %v1062_v2 = vpop.f32.mrb[2].mxu0 }
  0xfd   : > { %v1101_v3 = vadd.f32 %v1100_v1, %v1099_v61  ;;  %v1102_v4 = vpop.f32.mrb[2].mxu1  ;;  %v1063_v5 = vpop.f32.mrb[3].mxu0 }
  0xfe   : > { %v668_v6 = vadd.f32 %v1061_v0, %v941_v62  ;;  %v1064_v7 = vadd.f32 %v1063_v5, %v1062_v2  ;;  %v1103_v8 = vpop.f32.mrb[3].mxu1 }
  0xff   : > { %v1104_v9 = vadd.f32 %v1103_v8, %v1102_v4 }
 0x100   : > { %v671_v10 = vadd.f32 %v1064_v7, %v941_v62  ;;  %v733_v11 = vadd.f32 %v1101_v3, %v668_v6 }
 0x102   : > { %v1065_v12 = vpop.f32.mrb[4].mxu0  ;;  %v736_v13 = vadd.f32 %v1104_v9, %v671_v10 }
 0x103   : > { %v1105_v14 = vpop.f32.mrb[4].mxu1  ;;  %v1066_v15 = vpop.f32.mrb[5].mxu0 }
 0x104   : > { %v1067_v16 = vadd.f32 %v1066_v15, %v1065_v12  ;;  %v1106_v17 = vpop.f32.mrb[5].mxu1  ;;  %v1068_v18 = vpop.f32.mrb[6].mxu0 }
 0x105   : > { %v1107_v19 = vadd.f32 %v1106_v17, %v1105_v14  ;;  %v1108_v20 = vpop.f32.mrb[6].mxu1  ;;  %v1069_v21 = vpop.f32.mrb[7].mxu0 }
 0x106   : > { %v676_v22 = vadd.f32 %v1067_v16, %v941_v62  ;;  %v1070_v23 = vadd.f32 %v1069_v21, %v1068_v18  ;;  %v1109_v24 = vpop.f32.mrb[7].mxu1 }
 0x107   : > { %v1110_v25 = vadd.f32 %v1109_v24, %v1108_v20 }
 0x108   : > { %v679_v26 = vadd.f32 %v1070_v23, %v941_v62  ;;  %v741_v27 = vadd.f32 %v1107_v19, %v676_v22 }
 0x10a   : > { %v1071_v28 = vpop.f32.mrb[8].mxu0  ;;  %v744_v29 = vadd.f32 %v1110_v25, %v679_v26 }
 0x10b   : > { %v1111_v30 = vpop.f32.mrb[8].mxu1  ;;  %v1072_v31 = vpop.f32.mrb[9].mxu0 }
 0x10c   : > { %v1073_v32 = vadd.f32 %v1072_v31, %v1071_v28  ;;  %v1112_v33 = vpop.f32.mrb[9].mxu1  ;;  %v1074_v34 = vpop.f32.mrb[10].mxu0 }
 0x10d   : > { %v1113_v35 = vadd.f32 %v1112_v33, %v1111_v30  ;;  %v1114_v36 = vpop.f32.mrb[10].mxu1  ;;  %v1075_v37 = vpop.f32.mrb[11].mxu0 }
 0x10e   : > { %v684_v38 = vadd.f32 %v1073_v32, %v941_v62  ;;  %v1076_v39 = vadd.f32 %v1075_v37, %v1074_v34  ;;  %v1115_v40 = vpop.f32.mrb[11].mxu1 }
 0x10f   : > { %v1116_v41 = vadd.f32 %v1115_v40, %v1114_v36 }
 0x110   : > { %v687_v42 = vadd.f32 %v1076_v39, %v941_v62  ;;  %v749_v43 = vadd.f32 %v1113_v35, %v684_v38 }
 0x112   : > { %v1077_v44 = vpop.f32.mrb[12].mxu0  ;;  %v752_v45 = vadd.f32 %v1116_v41, %v687_v42 }
 0x113   : > { %v1117_v46 = vpop.f32.mrb[12].mxu1  ;;  %v1078_v47 = vpop.f32.mrb[13].mxu0 }
 0x114   : > { %v1079_v48 = vadd.f32 %v1078_v47, %v1077_v44  ;;  %v1118_v49 = vpop.f32.mrb[13].mxu1  ;;  %v1080_v50 = vpop.f32.mrb[14].mxu0 }
 0x115   : > { %v1119_v51 = vadd.f32 %v1118_v49, %v1117_v46  ;;  %v1120_v52 = vpop.f32.mrb[14].mxu1  ;;  %v1081_v53 = vpop.f32.mrb[15].mxu0 }
 0x116   : > { %v692_v54 = vadd.f32 %v1079_v48, %v941_v62  ;;  %v1082_v55 = vadd.f32 %v1081_v53, %v1080_v50  ;;  %v1121_v56 = vpop.f32.mrb[15].mxu1 }
 0x117   : > { %v1122_v57 = vadd.f32 %v1121_v56, %v1120_v52 }
 0x118   : > { %v695_v58 = vadd.f32 %v1082_v55, %v941_v62  ;;  %v757_v59 = vadd.f32 %v1119_v51, %v692_v54 }
 0x11a   : > { %v760_v60 = vadd.f32 %v1122_v57, %v695_v58 }
 0x11b   : > { %v1153_v61 = vpop.f32.mrb[16].mxu0 }
 0x11c   : > { %v806_v63 = vadd.f32 %v1153_v61, %v741_v27  ;;  %v1157_v0 = vpop.f32.mrb[16].mxu1  ;;  %v797_v1 = vpop.f32.mrb[17].mxu0 }
 0x11d   : > { %v822_v2 = vadd.f32 %v1157_v0, %v757_v59  ;;  %v798_v3 = vadd.f32 %v797_v1, %v733_v11  ;;  %v813_v4 = vpop.f32.mrb[17].mxu1  ;;  %v1154_v5 = vpop.f32.mrb[18].mxu0 }
 0x11e   : > { %v814_v6 = vadd.f32 %v813_v4, %v749_v43  ;;  %v809_v7 = vadd.f32 %v1154_v5, %v744_v29  ;;  %v1158_v8 = vpop.f32.mrb[18].mxu1  ;;  %v800_v9 = vpop.f32.mrb[19].mxu0  ;;  %v830_v15 = vmax.f32 %v806_v63, 0.0 }
 0x11f   : > { %v825_v10 = vadd.f32 %v1158_v8, %v760_v60  ;;  %v801_v12 = vadd.f32 %v800_v9, %v736_v13  ;;  %v816_v14 = vpop.f32.mrb[19].mxu1  ;;  %v834_v17 = vmax.f32 %v822_v2, 0.0  ;;  %v828_v18 = vmax.f32 %v798_v3, 0.0 }
 0x120   : > { %v831_v62 = vmax.f32 %v809_v7, 0.0  ;;  %v817_v16 = vadd.f32 %v816_v14, %v752_v45  ;;  %v832_v20 = vmax.f32 %v814_v6, 0.0 }
 0x121   : > { %v835_v11 = vmax.f32 %v825_v10, 0.0  ;;  %v829_v19 = vmax.f32 %v801_v12, 0.0 }
 0x122   : > { %v1028_v21 = vpack.c.bf16 %v831_v62, %v830_v15  ;;  %v833_v22 = vmax.f32 %v817_v16, 0.0 }
 0x123   : > { %v1038_v23 = vpack.c.bf16 %v835_v11, %v834_v17  ;;  %v1023_v24 = vpack.c.bf16 %v829_v19, %v828_v18 }
 0x124   : > { %1040 = vst [vmem:[%s175_s28 + $0x8] sm:$0xff] %v1028_v21   ;;  %v1033_v25 = vpack.c.bf16 %v833_v22, %v832_v20 }
 0x125   : > { %1042 = vst [vmem:[%s175_s28 + $0x18] sm:$0xff] %v1038_v23   ;;  %1024 = vst [vmem:[%s175_s28] sm:$0xff] %v1023_v24  }
 0x126   : > { %1041 = vst [vmem:[%s175_s28 + $0x10] sm:$0xff] %v1033_v25  }
 0x127 PF: > { %s13_s12 = sadd.s32 1, %s1258_s12  }
 0x128   : > { %p10_p4 = scmp.ge.s32.totalorder %s13_s12, 4  }
 0x12a   :  { %12 = sbr.rel (!%p10_p4) target bundleno = 1 (0x1), region = 62 }

// kernel: rho_betavae_forward.16
= control target key start
LH: loop header
LB: loop body
LE: loop exit
PB: predicated region body
PF: predicated region fallthrough
CT: control target
= control target key end

     0   :  { %s1835_s12 = smov 0   ;;  %s2063_s0 = inlined_call_operand.vmem [shape: bf16[512,384], index: 0, kind: input, shape index: {}]   ;;  %s2064_s1 = inlined_call_operand.vmem [shape: bf16[384,128], index: 1, kind: input, shape index: {}]   ;;  %s2065_s2 = inlined_call_operand.vmem [shape: f32[1,128], index: 2, kind: input, shape index: {}]   ;;  %s2066_s3 = inlined_call_operand.vmem [shape: bf16[512,128], index: 3, kind: output, shape index: {}]  }
   0x1 LB: > { %s1267_s13 = sadd.s32 4294967295, %s1813_s12   ;;  %p1271_p0 = scmp.ge.s32.totalorder %s1813_s12, 1  ;;  %s1813_s12 = sphi %s1835_s12, %s13_s12  }
   0x2   : > { %p139_p1 = scmp.lt.s32.totalorder %s1813_s12, 3 }
   0x4   : > { %p140_p2 = pnand %p1271_p0, %p139_p1 }
   0x5   : > { %v1719_v0 = vld [vmem:[%s2064_s1 + $0x40] sm:$0xff] (!%p140_p2)   ;;  %s1272_s16 = sshll.u32 (!%p140_p2), %s1267_s13, 5  ;;  %v1721_v2 = vld [vmem:[%s2064_s1 + $0x48] sm:$0xff] (!%p140_p2)   ;;  %v1723_v4 = vld [vmem:[%s2064_s1 + $0x50] sm:$0xff] (!%p140_p2)  }
   0x6   : > { %143 = sbr.rel (%p140_p2) target bundleno = 352 (0x160), region = 32  ;;  %v1720_v1 = vld [vmem:[%s2064_s1] sm:$0xff] (!%p140_p2)   ;;  %1510 = vmatprep.subr.bf16.mxu0 (!%p140_p2), %v1719_v0  ;;  %1694 = vmatprep.subr.bf16.mxu1 (!%p140_p2), %v1719_v0  ;;  %p165_p3 = scmp.lt.s32.totalorder (!%p140_p2), %s1272_s16, 63  ;;  %v1722_v3 = vld [vmem:[%s2064_s1 + $0x8] sm:$0xff] (!%p140_p2)   ;;  %v1724_v5 = vld [vmem:[%s2064_s1 + $0x10] sm:$0xff] (!%p140_p2)  }
   0x7   : > { %1511 = vmatpush3.bf16.msra.mxu0 (!%p140_p2), %v1720_v1  ;;  %1702 = vmatpush3.bf16.msra.mxu1 (!%p140_p2), %v1720_v1  ;;  %v1725_v6 = vld [vmem:[%s2064_s1 + $0x58] sm:$0xff] (!%p140_p2)   ;;  %v1727_v8 = vld [vmem:[%s2064_s1 + $0x60] sm:$0xff] (!%p140_p2)   ;;  %v1729_v10 = vld [vmem:[%s2064_s1 + $0x68] sm:$0xff] (!%p140_p2)  }
   0x8   : > { %1512 = vmatprep.subr.bf16.mxu0 (!%p140_p2), %v1721_v2  ;;  %1695 = vmatprep.subr.bf16.mxu1 (!%p140_p2), %v1721_v2  ;;  %v1726_v7 = vld [vmem:[%s2064_s1 + $0x18] sm:$0xff] (!%p140_p2)   ;;  %v1728_v9 = vld [vmem:[%s2064_s1 + $0x20] sm:$0xff] (!%p140_p2)   ;;  %v1730_v13 = vld [vmem:[%s2064_s1 + $0x28] sm:$0xff] (!%p140_p2)  }
   0x9   : > { %v1731_v14 = vld [vmem:[%s2064_s1 + $0x70] sm:$0xff] (!%p140_p2)   ;;  %v1733_v16 = vld [vmem:[%s2064_s1 + $0x78] sm:$0xff] (!%p140_p2)   ;;  %v1741_v18 = vld [vmem:[%s2064_s1 + $0x80] sm:$0xff] (!%p140_p2)  }
   0xa   : > { %v1732_v15 = vld [vmem:[%s2064_s1 + $0x30] sm:$0xff] (!%p140_p2)   ;;  %v1734_v17 = vld [vmem:[%s2064_s1 + $0x38] sm:$0xff] (!%p140_p2)   ;;  %v1742_v22 = vld [vmem:[%s2064_s1 + $0x88] sm:$0xff] (!%p140_p2)  }
   0xb   : > { %1513 = vmatpush3.bf16.msra.mxu0 (!%p140_p2), %v1722_v3  ;;  %1703 = vmatpush3.bf16.msra.mxu1 (!%p140_p2), %v1722_v3  ;;  %v1749_v25 = vld [vmem:[%s2064_s1 + $0x90] sm:$0xff] (!%p140_p2)   ;;  %v1750_v27 = vld [vmem:[%s2064_s1 + $0x98] sm:$0xff] (!%p140_p2)   ;;  %v1757_v30 = vld [vmem:[%s2064_s1 + $0xa0] sm:$0xff] (!%p140_p2)  }
   0xc   : > { %1514 = vmatprep.subr.bf16.mxu0 (!%p140_p2), %v1723_v4  ;;  %1696 = vmatprep.subr.bf16.mxu1 (!%p140_p2), %v1723_v4  ;;  %v1758_v33 = vld [vmem:[%s2064_s1 + $0xa8] sm:$0xff] (!%p140_p2)   ;;  %v1765_v36 = vld [vmem:[%s2064_s1 + $0xb0] sm:$0xff] (!%p140_p2)   ;;  %v1766_v40 = vld [vmem:[%s2064_s1 + $0xb8] sm:$0xff] (!%p140_p2)  }
   0xd   : > { %s2068_s16 = smov (!%p165_p3, %s1272_s16), 63 }
   0xe   : > { %s1710_s29 = smul.u32 12, %s2068_s16  ;;  %s1275_s19 = sshll.u32 %s2068_s16, 2 }
   0xf   : > { %1515 = vmatpush3.bf16.msra.mxu0 %v1724_v5  ;;  %1704 = vmatpush3.bf16.msra.mxu1 %v1724_v5  ;;  %s2000_s22 = scalar_lea.vmem %s2066_s3, %s1275_s19 }
  0x10   : > { %1516 = vmatprep.subr.bf16.mxu0 %v1725_v6  ;;  %1697 = vmatprep.subr.bf16.mxu1 %v1725_v6  ;;  %s1876_s9 = scalar_lea.vmem %s2063_s0, %s1710_s29 }
  0x11   : > { %v1737_v11 = vld [vmem:[%s1876_s9 + $0x4] ss:$12 sps:$4 sm:$0xff]   ;;  %v1735_v19 = vld [vmem:[%s1876_s9] ss:$12 sps:$4 sm:$0xff]   ;;  %v1743_v21 = vld [vmem:[%s1876_s9 + $0x1c] ss:$12 sps:$4 sm:$0xff]  }
  0x12   : > { %v1740_v12 = vld [vmem:[%s1876_s9 + $0x124] ss:$12 sps:$4 sm:$0xff]   ;;  %729 = vmatprep.mubr.bf16.mxu0 %v1737_v11  ;;  %v1738_v20 = vld [vmem:[%s1876_s9 + $0x120] ss:$12 sps:$4 sm:$0xff]   ;;  %v1745_v23 = vld [vmem:[%s1876_s9 + $0x13c] ss:$12 sps:$4 sm:$0xff]  }
  0x13   : > { %1517 = vmatpush3.bf16.msra.mxu0 %v1726_v7  ;;  %1705 = vmatpush3.bf16.msra.mxu1 %v1726_v7  ;;  %v1747_v24 = vld [vmem:[%s1876_s9 + $0x18] ss:$12 sps:$4 sm:$0xff]   ;;  %v1751_v28 = vld [vmem:[%s1876_s9 + $0x34] ss:$12 sps:$4 sm:$0xff]   ;;  %v1755_v31 = vld [vmem:[%s1876_s9 + $0x30] ss:$12 sps:$4 sm:$0xff]  }
  0x14   : > { %1518 = vmatprep.subr.bf16.mxu0 %v1727_v8  ;;  %1698 = vmatprep.subr.bf16.mxu1 %v1727_v8  ;;  %v1748_v26 = vld [vmem:[%s1876_s9 + $0x138] ss:$12 sps:$4 sm:$0xff]   ;;  %v1753_v29 = vld [vmem:[%s1876_s9 + $0x154] ss:$12 sps:$4 sm:$0xff]   ;;  %v1756_v32 = vld [vmem:[%s1876_s9 + $0x150] ss:$12 sps:$4 sm:$0xff]  }
  0x15   : > { %825 = vmatprep.mubr.bf16.mxu1 %v1740_v12  ;;  %v1759_v34 = vld [vmem:[%s1876_s9 + $0x4c] ss:$12 sps:$4 sm:$0xff]   ;;  %v1763_v37 = vld [vmem:[%s1876_s9 + $0x48] ss:$12 sps:$4 sm:$0xff]   ;;  %v1767_v39 = vld [vmem:[%s1876_s9 + $0x64] ss:$12 sps:$4 sm:$0xff]  }
  0x16   : > { %v1761_v35 = vld [vmem:[%s1876_s9 + $0x16c] ss:$12 sps:$4 sm:$0xff]   ;;  %v1764_v38 = vld [vmem:[%s1876_s9 + $0x168] ss:$12 sps:$4 sm:$0xff]   ;;  %v1776_v47 = vld [vmem:[%s1876_s9 + $0x50] ss:$12 sps:$4 sm:$0xff]  }
  0x17   : > { %1519 = vmatpush3.bf16.msra.mxu0 %v1728_v9  ;;  %1706 = vmatpush3.bf16.msra.mxu1 %v1728_v9  ;;  %v1769_v41 = vld [vmem:[%s1876_s9 + $0x8] ss:$12 sps:$4 sm:$0xff]   ;;  %v1770_v42 = vld [vmem:[%s1876_s9 + $0x60] ss:$12 sps:$4 sm:$0xff]   ;;  %v1774_v45 = vld [vmem:[%s1876_s9 + $0x38] ss:$12 sps:$4 sm:$0xff]  }
  0x18   : > { %1520 = vmatprep.subr.bf16.mxu0 %v1729_v10  ;;  %1699 = vmatprep.subr.bf16.mxu1 %v1729_v10  ;;  %v1771_v43 = vld [vmem:[%s1876_s9 + $0x20] ss:$12 sps:$4 sm:$0xff]   ;;  %v1772_v44 = vld [vmem:[%s1876_s9 + $0x7c] ss:$12 sps:$4 sm:$0xff]   ;;  %v1775_v46 = vld [vmem:[%s1876_s9 + $0x78] ss:$12 sps:$4 sm:$0xff]  }
  0x19   : > { %v1777_v48 = vld [vmem:[%s1876_s9 + $0x94] ss:$12 sps:$4 sm:$0xff]   ;;  %v1780_v50 = vld [vmem:[%s1876_s9 + $0x90] ss:$12 sps:$4 sm:$0xff]   ;;  %v1782_v52 = vld [vmem:[%s1876_s9 + $0xac] ss:$12 sps:$4 sm:$0xff]  }
  0x1a   : > { %v1779_v49 = vld [vmem:[%s1876_s9 + $0x68] ss:$12 sps:$4 sm:$0xff]   ;;  %v1781_v51 = vld [vmem:[%s1876_s9 + $0x80] ss:$12 sps:$4 sm:$0xff]   ;;  %v1784_v53 = vld [vmem:[%s1876_s9 + $0x98] ss:$12 sps:$4 sm:$0xff]  }
  0x1b   : > { %1521 = vmatpush3.bf16.msra.mxu0 %v1730_v13  ;;  %1707 = vmatpush3.bf16.msra.mxu1 %v1730_v13  ;;  %v1785_v54 = vld [vmem:[%s1876_s9 + $0xa8] ss:$12 sps:$4 sm:$0xff]   ;;  %v1786_v55 = vld [vmem:[%s1876_s9 + $0xb0] ss:$12 sps:$4 sm:$0xff]   ;;  %v1790_v58 = vld [vmem:[%s1876_s9 + $0xc0] ss:$12 sps:$4 sm:$0xff]  }
  0x1c   : > { %1522 = vmatprep.subr.bf16.mxu0 %v1731_v14  ;;  %1700 = vmatprep.subr.bf16.mxu1 %v1731_v14  ;;  %v1787_v56 = vld [vmem:[%s1876_s9 + $0xc4] ss:$12 sps:$4 sm:$0xff]   ;;  %v1789_v57 = vld [vmem:[%s1876_s9 + $0xc8] ss:$12 sps:$4 sm:$0xff]   ;;  %v1791_v59 = vld [vmem:[%s1876_s9 + $0xe0] ss:$12 sps:$4 sm:$0xff]  }
  0x1d   : > { %v1792_v60 = vld [vmem:[%s1876_s9 + $0xdc] ss:$12 sps:$4 sm:$0xff]   ;;  %v1794_v61 = vld [vmem:[%s1876_s9 + $0xf8] ss:$12 sps:$4 sm:$0xff]   ;;  %v1797_v0 = vld [vmem:[%s1876_s9 + $0xf4] ss:$12 sps:$4 sm:$0xff]  }
  0x1e   : > { %v1795_v62 = vld [vmem:[%s1876_s9 + $0xd8] ss:$12 sps:$4 sm:$0xff]   ;;  %v1796_v63 = vld [vmem:[%s1876_s9 + $0x110] ss:$12 sps:$4 sm:$0xff]   ;;  %v1799_v1 = vld [vmem:[%s1876_s9 + $0x128] ss:$12 sps:$4 sm:$0xff]  }
  0x1f   : > { %1523 = vmatpush3.bf16.msra.mxu0 %v1732_v15  ;;  %1708 = vmatpush3.bf16.msra.mxu1 %v1732_v15  ;;  %v1800_v2 = vld [vmem:[%s1876_s9 + $0xf0] ss:$12 sps:$4 sm:$0xff]   ;;  %v1801_v3 = vld [vmem:[%s1876_s9 + $0x140] ss:$12 sps:$4 sm:$0xff]   ;;  %v1804_v5 = vld [vmem:[%s1876_s9 + $0x158] ss:$12 sps:$4 sm:$0xff]  }
  0x20   : > { %1524 = vmatprep.subr.bf16.mxu0 %v1733_v16  ;;  %1701 = vmatprep.subr.bf16.mxu1 %v1733_v16  ;;  %v1802_v4 = vld [vmem:[%s1876_s9 + $0x10c] ss:$12 sps:$4 sm:$0xff]   ;;  %v1805_v6 = vld [vmem:[%s1876_s9 + $0x108] ss:$12 sps:$4 sm:$0xff]   ;;  %v1806_v7 = vld [vmem:[%s1876_s9 + $0x170] ss:$12 sps:$4 sm:$0xff]  }
  0x23   : > { %1525 = vmatpush3.bf16.msra.mxu0 %v1734_v17  ;;  %1709 = vmatpush3.bf16.msra.mxu1 %v1734_v17 }
  0x24   : > { %1646 = vmatprep.subr.bf16.mxu1 %v1741_v18 }
  0x26   : > { %730 = vmatmul.mubr.bf16.vlgmr.msra.gmra.mrb[0].mxu0 %v1735_v19  ;;  %826 = vmatmul.mubr.bf16.vlgmr.msra.gmra.mrb[0].mxu1 %v1738_v20 }
  0x27   : > { %1647 = vmatpush3.bf16.msra.mxu1 %v1741_v18  ;;  %737 = vmatprep.mubr.bf16.mxu0 %v1743_v21 }
  0x28   : > { %1648 = vmatprep.subr.bf16.mxu1 %v1742_v22  ;;  %833 = vmatprep.mubr.bf16.mxu1 %v1745_v23 }
  0x2b   : > { %1649 = vmatpush3.bf16.msra.mxu1 %v1742_v22 }
  0x2c   : > { %1650 = vmatprep.subr.bf16.mxu1 %v1749_v25 }
  0x2e   : > { %738 = vmatmul.mubr.bf16.gmra.mrb[4].mxu0 %v1747_v24  ;;  %834 = vmatmul.mubr.bf16.gmra.mrb[4].mxu1 %v1748_v26 }
  0x2f   : > { %1651 = vmatpush3.bf16.msra.mxu1 %v1749_v25  ;;  %745 = vmatprep.mubr.bf16.mxu0 %v1751_v28 }
  0x30   : > { %1652 = vmatprep.subr.bf16.mxu1 %v1750_v27  ;;  %841 = vmatprep.mubr.bf16.mxu1 %v1753_v29 }
  0x33   : > { %1653 = vmatpush3.bf16.msra.mxu1 %v1750_v27 }
  0x34   : > { %1654 = vmatprep.subr.bf16.mxu1 %v1757_v30 }
  0x36   : > { %746 = vmatmul.mubr.bf16.gmra.mrb[8].mxu0 %v1755_v31  ;;  %842 = vmatmul.mubr.bf16.gmra.mrb[8].mxu1 %v1756_v32 }
  0x37   : > { %1655 = vmatpush3.bf16.msra.mxu1 %v1757_v30  ;;  %753 = vmatprep.mubr.bf16.mxu0 %v1759_v34 }
  0x38   : > { %1656 = vmatprep.subr.bf16.mxu1 %v1758_v33  ;;  %849 = vmatprep.mubr.bf16.mxu1 %v1761_v35 }
  0x3b   : > { %1657 = vmatpush3.bf16.msra.mxu1 %v1758_v33 }
  0x3c   : > { %1658 = vmatprep.subr.bf16.mxu1 %v1765_v36 }
  0x3e   : > { %754 = vmatmul.mubr.bf16.gmra.mrb[12].mxu0 %v1763_v37  ;;  %850 = vmatmul.mubr.bf16.gmra.mrb[12].mxu1 %v1764_v38 }
  0x3f   : > { %1659 = vmatpush3.bf16.msra.mxu1 %v1765_v36  ;;  %761 = vmatprep.mubr.bf16.mxu0 %v1767_v39 }
  0x40   : > { %1660 = vmatprep.subr.bf16.mxu1 %v1766_v40  ;;  %1662 = vmatprep.mubr.bf16.mxu1 %v1769_v41 }
  0x43   : > { %1661 = vmatpush3.bf16.msra.mxu1 %v1766_v40 }
  0x46   : > { %762 = vmatmul.mubr.bf16.gmra.mrb[16].mxu0 %v1770_v42  ;;  %1663 = vmatmul.mubr.bf16.vlgmr.msra.gmra.mrb[16].mxu1 %v1771_v43 }
  0x47   : > { %769 = vmatprep.mubr.bf16.mxu0 %v1772_v44  ;;  %1666 = vmatprep.mubr.bf16.mxu1 %v1774_v45 }
  0x4e   : > { %770 = vmatmul.mubr.bf16.gmra.mrb[20].mxu0 %v1775_v46  ;;  %1667 = vmatmul.mubr.bf16.gmra.mrb[20].mxu1 %v1776_v47 }
  0x4f   : > { %777 = vmatprep.mubr.bf16.mxu0 %v1777_v48  ;;  %1670 = vmatprep.mubr.bf16.mxu1 %v1779_v49 }
  0x56   : > { %778 = vmatmul.mubr.bf16.gmra.mrb[24].mxu0 %v1780_v50  ;;  %1671 = vmatmul.mubr.bf16.gmra.mrb[24].mxu1 %v1781_v51 }
  0x57   : > { %785 = vmatprep.mubr.bf16.mxu0 %v1782_v52  ;;  %1674 = vmatprep.mubr.bf16.mxu1 %v1784_v53 }
  0x5e   : > { %786 = vmatmul.mubr.bf16.gmra.mrb[28].mxu0 %v1785_v54  ;;  %1675 = vmatmul.mubr.bf16.gmra.mrb[28].mxu1 %v1786_v55 }
  0x5f   : > { %793 = vmatprep.mubr.bf16.mxu0 %v1787_v56  ;;  %1678 = vmatprep.mubr.bf16.mxu1 %v1789_v57  ;;  %v1990_v56 = vld [vmem:[%s2065_s2] ss:$0 sm:$0xff] }
  0x66   : > { %794 = vmatmul.mubr.bf16.gmra.mrb[32].mxu0 %v1790_v58  ;;  %1679 = vmatmul.mubr.bf16.gmra.mrb[32].mxu1 %v1791_v59 }
  0x67   : > { %801 = vmatprep.mubr.bf16.mxu0 %v1792_v60  ;;  %1682 = vmatprep.mubr.bf16.mxu1 %v1794_v61 }
  0x6e   : > { %802 = vmatmul.mubr.bf16.gmra.mrb[36].mxu0 %v1795_v62  ;;  %1683 = vmatmul.mubr.bf16.gmra.mrb[36].mxu1 %v1796_v63 }
  0x6f   : > { %809 = vmatprep.mubr.bf16.mxu0 %v1797_v0  ;;  %1686 = vmatprep.mubr.bf16.mxu1 %v1799_v1 }
  0x76   : > { %810 = vmatmul.mubr.bf16.gmra.mrb[40].mxu0 %v1800_v2  ;;  %1687 = vmatmul.mubr.bf16.gmra.mrb[40].mxu1 %v1801_v3 }
  0x77   : > { %817 = vmatprep.mubr.bf16.mxu0 %v1802_v4  ;;  %1690 = vmatprep.mubr.bf16.mxu1 %v1804_v5 }
  0x7e   : > { %818 = vmatmul.mubr.bf16.gmra.mrb[44].mxu0 %v1805_v6  ;;  %1691 = vmatmul.mubr.bf16.gmra.mrb[44].mxu1 %v1806_v7 }
  0xf9   : > { %v1526_v8 = vpop.f32.mrb[0].mxu0  ;;  %v1598_v9 = vpop.f32.mrb[0].mxu1 }
  0xfa   : > { %v1527_v10 = vpop.f32.mrb[1].mxu0  ;;  %v1599_v11 = vpop.f32.mrb[1].mxu1 }
  0xfb   : > { %v1528_v12 = vadd.f32 %v1527_v10, %v1526_v8  ;;  %v1529_v13 = vpop.f32.mrb[2].mxu0  ;;  %v1971_v14 = vadd.f32 %v1599_v11, %v1598_v9  ;;  %v1601_v15 = vpop.f32.mrb[2].mxu1 }
  0xfc   : > { %v1530_v16 = vpop.f32.mrb[3].mxu0  ;;  %v1602_v17 = vpop.f32.mrb[3].mxu1 }
  0xfd   : > { %v1531_v18 = vadd.f32 %v1530_v16, %v1529_v13  ;;  %v1973_v19 = vadd.f32 %v1602_v17, %v1601_v15  ;;  %v732_v60 = vadd.f32 %v1528_v12, %v1990_v56 }
  0xff   : > { %v735_v5 = vadd.f32 %v1531_v18, %v1990_v56 }
 0x101   : > { %v1532_v20 = vpop.f32.mrb[4].mxu0  ;;  %v1604_v21 = vpop.f32.mrb[4].mxu1 }
 0x102   : > { %v1533_v22 = vpop.f32.mrb[5].mxu0  ;;  %v1605_v23 = vpop.f32.mrb[5].mxu1 }
 0x103   : > { %v1534_v24 = vadd.f32 %v1533_v22, %v1532_v20  ;;  %v1535_v25 = vpop.f32.mrb[6].mxu0  ;;  %v1975_v26 = vadd.f32 %v1605_v23, %v1604_v21  ;;  %v1607_v27 = vpop.f32.mrb[6].mxu1 }
 0x104   : > { %v1536_v28 = vpop.f32.mrb[7].mxu0  ;;  %v1608_v29 = vpop.f32.mrb[7].mxu1 }
 0x105   : > { %v1537_v30 = vadd.f32 %v1536_v28, %v1535_v25  ;;  %v1977_v31 = vadd.f32 %v1608_v29, %v1607_v27  ;;  %v740_v57 = vadd.f32 %v1534_v24, %v1990_v56 }
 0x107   : > { %v743_v0 = vadd.f32 %v1537_v30, %v1990_v56 }
 0x109   : > { %v1538_v32 = vpop.f32.mrb[8].mxu0  ;;  %v1610_v33 = vpop.f32.mrb[8].mxu1 }
 0x10a   : > { %v1539_v34 = vpop.f32.mrb[9].mxu0  ;;  %v1611_v35 = vpop.f32.mrb[9].mxu1 }
 0x10b   : > { %v1540_v36 = vadd.f32 %v1539_v34, %v1538_v32  ;;  %v1541_v37 = vpop.f32.mrb[10].mxu0  ;;  %v1979_v38 = vadd.f32 %v1611_v35, %v1610_v33  ;;  %v1613_v39 = vpop.f32.mrb[10].mxu1 }
 0x10c   : > { %v1542_v40 = vpop.f32.mrb[11].mxu0  ;;  %v1614_v41 = vpop.f32.mrb[11].mxu1 }
 0x10d   : > { %v1543_v42 = vadd.f32 %v1542_v40, %v1541_v37  ;;  %v1981_v43 = vadd.f32 %v1614_v41, %v1613_v39  ;;  %v748_v22 = vadd.f32 %v1540_v36, %v1990_v56 }
 0x10f   : > { %v751_v33 = vadd.f32 %v1543_v42, %v1990_v56 }
 0x111   : > { %v1544_v44 = vpop.f32.mrb[12].mxu0  ;;  %v1616_v45 = vpop.f32.mrb[12].mxu1 }
 0x112   : > { %v1545_v46 = vpop.f32.mrb[13].mxu0  ;;  %v1617_v47 = vpop.f32.mrb[13].mxu1 }
 0x113   : > { %v1546_v48 = vadd.f32 %v1545_v46, %v1544_v44  ;;  %v1547_v49 = vpop.f32.mrb[14].mxu0  ;;  %v1983_v50 = vadd.f32 %v1617_v47, %v1616_v45  ;;  %v1619_v51 = vpop.f32.mrb[14].mxu1 }
 0x114   : > { %v1548_v52 = vpop.f32.mrb[15].mxu0  ;;  %v1620_v53 = vpop.f32.mrb[15].mxu1 }
 0x115   : > { %v1549_v54 = vadd.f32 %v1548_v52, %v1547_v49  ;;  %v1985_v55 = vadd.f32 %v1620_v53, %v1619_v51  ;;  %v756_v17 = vadd.f32 %v1546_v48, %v1990_v56 }
 0x117   : > { %v759_v27 = vadd.f32 %v1549_v54, %v1990_v56 }
 0x119   : > { %v1550_v58 = vpop.f32.mrb[16].mxu0  ;;  %v1664_v59 = vpop.f32.mrb[16].mxu1 }
 0x11a   : > { %v901_v61 = vadd.f32 %v1664_v59, %v740_v57  ;;  %v1551_v62 = vpop.f32.mrb[17].mxu0  ;;  %v892_v63 = vpop.f32.mrb[17].mxu1 }
 0x11b   : > { %v1552_v1 = vadd.f32 %v1551_v62, %v1550_v58  ;;  %v893_v2 = vadd.f32 %v892_v63, %v732_v60  ;;  %v1553_v3 = vpop.f32.mrb[18].mxu0  ;;  %v1665_v4 = vpop.f32.mrb[18].mxu1 }
 0x11c   : > { %v904_v6 = vadd.f32 %v1665_v4, %v743_v0  ;;  %v1554_v7 = vpop.f32.mrb[19].mxu0  ;;  %v895_v8 = vpop.f32.mrb[19].mxu1  ;;  %v1021_v11 = vmax.f32 %v901_v61, 0.0 }
 0x11d   : > { %v1555_v9 = vadd.f32 %v1554_v7, %v1553_v3  ;;  %v896_v10 = vadd.f32 %v895_v8, %v735_v5  ;;  %v1019_v12 = vmax.f32 %v893_v2, 0.0  ;;  %v764_v52 = vadd.f32 %v1552_v1, %v1990_v56 }
 0x11e   : > { %v1022_v13 = vmax.f32 %v904_v6, 0.0 }
 0x11f   : > { %v1020_v15 = vmax.f32 %v896_v10, 0.0  ;;  %v767_v62 = vadd.f32 %v1555_v9, %v1990_v56 }
 0x120   : > { %v1423_v16 = vpack.c.bf16 %v1022_v13, %v1021_v11 }
 0x121   : > { %v1418_v18 = vpack.c.bf16 %v1020_v15, %v1019_v12  ;;  %v1556_v20 = vpop.f32.mrb[20].mxu0  ;;  %v1668_v21 = vpop.f32.mrb[20].mxu1 }
 0x122   : > { %1495 = vst [vmem:[%s2000_s22 + $0x8] sm:$0xff] %v1423_v16   ;;  %v917_v23 = vadd.f32 %v1668_v21, %v756_v17  ;;  %v1557_v24 = vpop.f32.mrb[21].mxu0  ;;  %v908_v25 = vpop.f32.mrb[21].mxu1 }
 0x123   : > { %1419 = vst [vmem:[%s2000_s22] sm:$0xff] %v1418_v18   ;;  %v1558_v28 = vadd.f32 %v1557_v24, %v1556_v20  ;;  %v909_v29 = vadd.f32 %v908_v25, %v748_v22  ;;  %v1559_v30 = vpop.f32.mrb[22].mxu0  ;;  %v1669_v32 = vpop.f32.mrb[22].mxu1 }
 0x124   : > { %v920_v34 = vadd.f32 %v1669_v32, %v759_v27  ;;  %v1560_v35 = vpop.f32.mrb[23].mxu0  ;;  %v911_v37 = vpop.f32.mrb[23].mxu1  ;;  %v1025_v36 = vmax.f32 %v917_v23, 0.0 }
 0x125   : > { %v1561_v39 = vadd.f32 %v1560_v35, %v1559_v30  ;;  %v912_v40 = vadd.f32 %v911_v37, %v751_v33  ;;  %v1023_v44 = vmax.f32 %v909_v29, 0.0  ;;  %v772_v47 = vadd.f32 %v1558_v28, %v1990_v56 }
 0x126   : > { %v1026_v41 = vmax.f32 %v920_v34, 0.0 }
 0x127   : > { %v1024_v45 = vmax.f32 %v912_v40, 0.0  ;;  %v775_v57 = vadd.f32 %v1561_v39, %v1990_v56 }
 0x128   : > { %v1433_v46 = vpack.c.bf16 %v1026_v41, %v1025_v36 }
 0x129   : > { %v1428_v48 = vpack.c.bf16 %v1024_v45, %v1023_v44  ;;  %v1562_v49 = vpop.f32.mrb[24].mxu0  ;;  %v1672_v51 = vpop.f32.mrb[24].mxu1 }
 0x12a   : > { %1497 = vst [vmem:[%s2000_s22 + $0x18] sm:$0xff] %v1433_v46   ;;  %v933_v42 = vadd.f32 %v1672_v51, %v772_v47  ;;  %v1563_v53 = vpop.f32.mrb[25].mxu0  ;;  %v924_v54 = vpop.f32.mrb[25].mxu1 }
 0x12b   : > { %1496 = vst [vmem:[%s2000_s22 + $0x10] sm:$0xff] %v1428_v48   ;;  %v1564_v58 = vadd.f32 %v1563_v53, %v1562_v49  ;;  %v925_v59 = vadd.f32 %v924_v54, %v764_v52  ;;  %v1565_v60 = vpop.f32.mrb[26].mxu0  ;;  %v1673_v61 = vpop.f32.mrb[26].mxu1 }
 0x12c   : > { %v936_v63 = vadd.f32 %v1673_v61, %v775_v57  ;;  %v1566_v0 = vpop.f32.mrb[27].mxu0  ;;  %v927_v2 = vpop.f32.mrb[27].mxu1  ;;  %v1029_v4 = vmax.f32 %v933_v42, 0.0 }
 0x12d   : > { %v1567_v3 = vadd.f32 %v1566_v0, %v1565_v60  ;;  %v928_v1 = vadd.f32 %v927_v2, %v767_v62  ;;  %v1027_v6 = vmax.f32 %v925_v59, 0.0  ;;  %v780_v12 = vadd.f32 %v1564_v58, %v1990_v56 }
 0x12e   : > { %v1030_v5 = vmax.f32 %v936_v63, 0.0 }
 0x12f   : > { %v1028_v7 = vmax.f32 %v928_v1, 0.0  ;;  %v783_v21 = vadd.f32 %v1567_v3, %v1990_v56 }
 0x130   : > { %v1443_v8 = vpack.c.bf16 %v1030_v5, %v1029_v4 }
 0x131   : > { %v1438_v10 = vpack.c.bf16 %v1028_v7, %v1027_v6  ;;  %v1568_v11 = vpop.f32.mrb[28].mxu0  ;;  %v1676_v13 = vpop.f32.mrb[28].mxu1 }
 0x132   : > { %1499 = vst [vmem:[%s2000_s22 + $0x28] sm:$0xff] %v1443_v8   ;;  %v1569_v15 = vpop.f32.mrb[29].mxu0  ;;  %v940_v16 = vpop.f32.mrb[29].mxu1 }
 0x133   : > { %1498 = vst [vmem:[%s2000_s22 + $0x20] sm:$0xff] %v1438_v10   ;;  %v1570_v9 = vadd.f32 %v1569_v15, %v1568_v11  ;;  %v941_v17 = vadd.f32 %v940_v16, %v780_v12  ;;  %v1571_v18 = vpop.f32.mrb[30].mxu0  ;;  %v1677_v20 = vpop.f32.mrb[30].mxu1  ;;  %v836_v10 = vadd.f32 %v1975_v26, %v1990_v56  ;;  %v828_v15 = vadd.f32 %v1971_v14, %v1990_v56 }
 0x134   : > { %v1572_v22 = vpop.f32.mrb[31].mxu0  ;;  %v943_v23 = vpop.f32.mrb[31].mxu1 }
 0x135   : > { %v788_v24 = vadd.f32 %v1570_v9, %v1990_v56  ;;  %v1573_v25 = vadd.f32 %v1572_v22, %v1571_v18  ;;  %v944_v27 = vadd.f32 %v943_v23, %v783_v21  ;;  %v1031_v29 = vmax.f32 %v941_v17, 0.0 }
 0x136   : > { %v839_v18 = vadd.f32 %v1977_v31, %v1990_v56 }
 0x137   : > { %v949_v28 = vadd.f32 %v1676_v13, %v788_v24  ;;  %v791_v30 = vadd.f32 %v1573_v25, %v1990_v56  ;;  %v1032_v32 = vmax.f32 %v944_v27, 0.0 }
 0x139   : > { %v952_v33 = vadd.f32 %v1677_v20, %v791_v30  ;;  %v1448_v34 = vpack.c.bf16 %v1032_v32, %v1031_v29  ;;  %v1574_v35 = vpop.f32.mrb[32].mxu0  ;;  %v1680_v37 = vpop.f32.mrb[32].mxu1  ;;  %v1033_v36 = vmax.f32 %v949_v28, 0.0  ;;  %v831_v28 = vadd.f32 %v1973_v19, %v1990_v56 }
 0x13a   : > { %v1575_v39 = vpop.f32.mrb[33].mxu0  ;;  %v956_v40 = vpop.f32.mrb[33].mxu1 }
 0x13b   : > { %v1034_v41 = vmax.f32 %v952_v33, 0.0  ;;  %1500 = vst [vmem:[%s2000_s22 + $0x30] sm:$0xff] %v1448_v34   ;;  %v1576_v44 = vadd.f32 %v1575_v39, %v1574_v35  ;;  %v1577_v45 = vpop.f32.mrb[34].mxu0  ;;  %v1681_v46 = vpop.f32.mrb[34].mxu1 }
 0x13c   : > { %v1578_v47 = vpop.f32.mrb[35].mxu0  ;;  %v959_v48 = vpop.f32.mrb[35].mxu1 }
 0x13d   : > { %v1453_v49 = vpack.c.bf16 %v1034_v41, %v1033_v36  ;;  %v796_v51 = vadd.f32 %v1576_v44, %v1990_v56  ;;  %v1579_v52 = vadd.f32 %v1578_v47, %v1577_v45  ;;  %v852_v41 = vadd.f32 %v1983_v50, %v1990_v56 }
 0x13f   : > { %1501 = vst [vmem:[%s2000_s22 + $0x38] sm:$0xff] %v1453_v49   ;;  %v957_v42 = vadd.f32 %v956_v40, %v796_v51  ;;  %v799_v53 = vadd.f32 %v1579_v52, %v1990_v56  ;;  %v855_v52 = vadd.f32 %v1985_v55, %v1990_v56 }
 0x141   : > { %v960_v54 = vadd.f32 %v959_v48, %v799_v53  ;;  %v1580_v57 = vpop.f32.mrb[36].mxu0  ;;  %v2024_v58 = vpop.f32.mrb[36].mxu1  ;;  %v1035_v61 = vmax.f32 %v957_v42, 0.0 }
 0x142   : > { %v1581_v59 = vpop.f32.mrb[37].mxu0  ;;  %v972_v60 = vpop.f32.mrb[37].mxu1 }
 0x143   : > { %v1036_v62 = vmax.f32 %v960_v54, 0.0  ;;  %v1582_v63 = vadd.f32 %v1581_v59, %v1580_v57  ;;  %v1583_v0 = vpop.f32.mrb[38].mxu0  ;;  %v2026_v2 = vpop.f32.mrb[38].mxu1 }
 0x144   : > { %v1584_v3 = vpop.f32.mrb[39].mxu0  ;;  %v975_v1 = vpop.f32.mrb[39].mxu1 }
 0x145   : > { %v1458_v4 = vpack.c.bf16 %v1036_v62, %v1035_v61  ;;  %v804_v5 = vadd.f32 %v1582_v63, %v1990_v56  ;;  %v1585_v6 = vadd.f32 %v1584_v3, %v1583_v0 }
 0x147   : > { %1502 = vst [vmem:[%s2000_s22 + $0x40] sm:$0xff] %v1458_v4   ;;  %v965_v7 = vadd.f32 %v1680_v37, %v804_v5  ;;  %v807_v8 = vadd.f32 %v1585_v6, %v1990_v56 }
 0x149   : > { %v968_v11 = vadd.f32 %v1681_v46, %v807_v8  ;;  %v1586_v13 = vpop.f32.mrb[40].mxu0  ;;  %v1688_v12 = vpop.f32.mrb[40].mxu1  ;;  %v1037_v20 = vmax.f32 %v965_v7, 0.0  ;;  %v844_v46 = vadd.f32 %v1979_v38, %v1990_v56  ;;  %v847_v38 = vadd.f32 %v1981_v43, %v1990_v56 }
 0x14a   : > { %v997_v16 = vadd.f32 %v1688_v12, %v836_v10  ;;  %v1587_v9 = vpop.f32.mrb[41].mxu0  ;;  %v988_v17 = vpop.f32.mrb[41].mxu1 }
 0x14b   : > { %v1038_v21 = vmax.f32 %v968_v11, 0.0  ;;  %v1588_v22 = vadd.f32 %v1587_v9, %v1586_v13  ;;  %v989_v23 = vadd.f32 %v988_v17, %v828_v15  ;;  %v1589_v24 = vpop.f32.mrb[42].mxu0  ;;  %v1689_v25 = vpop.f32.mrb[42].mxu1 }
 0x14c   : > { %v1000_v26 = vadd.f32 %v1689_v25, %v839_v18  ;;  %v1590_v27 = vpop.f32.mrb[43].mxu0  ;;  %v991_v29 = vpop.f32.mrb[43].mxu1  ;;  %v1045_v33 = vmax.f32 %v997_v16, 0.0 }
 0x14d   : > { %v1463_v14 = vpack.c.bf16 %v1038_v21, %v1037_v20  ;;  %v812_v30 = vadd.f32 %v1588_v22, %v1990_v56  ;;  %v1591_v32 = vadd.f32 %v1590_v27, %v1589_v24  ;;  %v992_v34 = vadd.f32 %v991_v29, %v831_v28 }
 0x14e   : > { %v1046_v31 = vmax.f32 %v1000_v26, 0.0  ;;  %v1043_v39 = vmax.f32 %v989_v23, 0.0 }
 0x14f   : > { %1503 = vst [vmem:[%s2000_s22 + $0x48] sm:$0xff] %v1463_v14   ;;  %v973_v35 = vadd.f32 %v972_v60, %v812_v30  ;;  %v815_v37 = vadd.f32 %v1591_v32, %v1990_v56  ;;  %v1044_v36 = vmax.f32 %v992_v34, 0.0 }
 0x150   : > { %v1483_v40 = vpack.c.bf16 %v1046_v31, %v1045_v33 }
 0x151   : > { %v976_v19 = vadd.f32 %v975_v1, %v815_v37  ;;  %v1592_v44 = vpop.f32.mrb[44].mxu0  ;;  %v1692_v45 = vpop.f32.mrb[44].mxu1  ;;  %v1478_v47 = vpack.c.bf16 %v1044_v36, %v1043_v39  ;;  %v1039_v42 = vmax.f32 %v973_v35, 0.0 }
 0x152   : > { %1507 = vst [vmem:[%s2000_s22 + $0x68] sm:$0xff] %v1483_v40   ;;  %v1013_v48 = vadd.f32 %v1692_v45, %v852_v41  ;;  %v1593_v49 = vpop.f32.mrb[45].mxu0  ;;  %v1004_v51 = vpop.f32.mrb[45].mxu1 }
 0x153   : > { %v1040_v53 = vmax.f32 %v976_v19, 0.0  ;;  %v1594_v54 = vadd.f32 %v1593_v49, %v1592_v44  ;;  %v1005_v50 = vadd.f32 %v1004_v51, %v844_v46  ;;  %v1595_v57 = vpop.f32.mrb[46].mxu0  ;;  %v1693_v59 = vpop.f32.mrb[46].mxu1  ;;  %1506 = vst [vmem:[%s2000_s22 + $0x60] sm:$0xff] %v1478_v47  }
 0x154   : > { %v1016_v60 = vadd.f32 %v1693_v59, %v855_v52  ;;  %v1596_v61 = vpop.f32.mrb[47].mxu0  ;;  %v1007_v62 = vpop.f32.mrb[47].mxu1  ;;  %v1049_v3 = vmax.f32 %v1013_v48, 0.0 }
 0x155   : > { %v1468_v63 = vpack.c.bf16 %v1040_v53, %v1039_v42  ;;  %v820_v0 = vadd.f32 %v1594_v54, %v1990_v56  ;;  %v1597_v55 = vadd.f32 %v1596_v61, %v1595_v57  ;;  %v1008_v4 = vadd.f32 %v1007_v62, %v847_v38 }
 0x156   : > { %v1050_v1 = vmax.f32 %v1016_v60, 0.0  ;;  %v1047_v7 = vmax.f32 %v1005_v50, 0.0 }
 0x157   : > { %1504 = vst [vmem:[%s2000_s22 + $0x50] sm:$0xff] %v1468_v63   ;;  %v981_v5 = vadd.f32 %v2024_v58, %v820_v0  ;;  %v823_v6 = vadd.f32 %v1597_v55, %v1990_v56  ;;  %v1048_v10 = vmax.f32 %v1008_v4, 0.0 }
 0x158   : > { %v1493_v8 = vpack.c.bf16 %v1050_v1, %v1049_v3 }
 0x159   : > { %v984_v43 = vadd.f32 %v2026_v2, %v823_v6  ;;  %v1488_v11 = vpack.c.bf16 %v1048_v10, %v1047_v7  ;;  %v1041_v13 = vmax.f32 %v981_v5, 0.0 }
 0x15a   : > { %1509 = vst [vmem:[%s2000_s22 + $0x78] sm:$0xff] %v1493_v8  }
 0x15b   : > { %v1042_v12 = vmax.f32 %v984_v43, 0.0  ;;  %1508 = vst [vmem:[%s2000_s22 + $0x70] sm:$0xff] %v1488_v11  }
 0x15d   : > { %v1473_v15 = vpack.c.bf16 %v1042_v12, %v1041_v13 }
 0x15f   : > { %1505 = vst [vmem:[%s2000_s22 + $0x58] sm:$0xff] %v1473_v15  }
 0x160 PF: > { %s13_s12 = sadd.s32 1, %s1813_s12  }
 0x161   : > { %p10_p4 = scmp.ge.s32.totalorder %s13_s12, 4  }
 0x163   :  { %12 = sbr.rel (!%p10_p4) target bundleno = 1 (0x1), region = 62 }

// kernel: rho_betavae_forward.17
= control target key start
LH: loop header
LB: loop body
LE: loop exit
PB: predicated region body
PF: predicated region fallthrough
CT: control target
= control target key end

     0   :  { %s4880_s12 = smov 0   ;;  %s5933_s0 = inlined_call_operand.vmem [shape: bf16[2048,384], index: 0, kind: input, shape index: {}]   ;;  %s5934_s1 = inlined_call_operand.vmem [shape: bf16[384,128], index: 1, kind: input, shape index: {}]   ;;  %s5935_s2 = inlined_call_operand.vmem [shape: f32[1,128], index: 2, kind: input, shape index: {}]   ;;  %s5936_s3 = inlined_call_operand.vmem [shape: f32[2048,128], index: 3, kind: output, shape index: {}]  }
   0x1 LB: > { %s3571_s13 = sadd.s32 4294967295, %s4857_s12   ;;  %p3575_p0 = scmp.ge.s32.totalorder %s4857_s12, 1  ;;  %s4857_s12 = sphi %s4880_s12, %s13_s12  }
   0x2   : > { %p139_p1 = scmp.lt.s32.totalorder %s4857_s12, 3 }
   0x4   : > { %p140_p2 = pnand %p3575_p0, %p139_p1 }
   0x6   : > { %143 = sbr.rel (%p140_p2) target bundleno = 734 (0x2de), region = 32 }
   0xd   : > { %v4057_v0 = vld [vmem:[%s5934_s1] sm:$0xff]   ;;  %v4859_v1 = vmov 0   ;;  %s3576_s16 = sshll.u32 %s3571_s13, 7  ;;  %v4058_v2 = vld [vmem:[%s5934_s1 + $0x8] sm:$0xff]   ;;  %v4059_v3 = vld [vmem:[%s5934_s1 + $0x10] sm:$0xff]  }
   0xe   : > { %1657 = vmatprep.subr.bf16.mxu0 %v4859_v1  ;;  %4015 = vmatprep.subr.bf16.mxu1 %v4859_v1  ;;  %p165_p3 = scmp.lt.s32.totalorder %s3576_s16, 255  ;;  %v4060_v4 = vld [vmem:[%s5934_s1 + $0x18] sm:$0xff]   ;;  %v4061_v5 = vld [vmem:[%s5934_s1 + $0x20] sm:$0xff]   ;;  %v4062_v7 = vld [vmem:[%s5934_s1 + $0x28] sm:$0xff]  }
   0xf   : > { %1658 = vmatpush1.bf16.msra.mxu0 %v4057_v0  ;;  %4031 = vmatpush1.bf16.msra.mxu1 %v4057_v0  ;;  %v4063_v9 = vld [vmem:[%s5934_s1 + $0x30] sm:$0xff]   ;;  %v4064_v10 = vld [vmem:[%s5934_s1 + $0x38] sm:$0xff]   ;;  %v4065_v11 = vld [vmem:[%s5934_s1 + $0x40] sm:$0xff]  }
  0x10   : > { %1659 = vmatprep.subr.bf16.mxu0 %v4859_v1  ;;  %4016 = vmatprep.subr.bf16.mxu1 %v4859_v1  ;;  %s5980_s16 = smov (!%p165_p3, %s3576_s16), 255  ;;  %v4066_v12 = vld [vmem:[%s5934_s1 + $0x48] sm:$0xff]   ;;  %v4067_v13 = vld [vmem:[%s5934_s1 + $0x50] sm:$0xff]   ;;  %v4068_v14 = vld [vmem:[%s5934_s1 + $0x58] sm:$0xff]  }
  0x11   : > { %s4047_s23 = smul.u32 12, %s5980_s16  ;;  %v4069_v15 = vld [vmem:[%s5934_s1 + $0x60] sm:$0xff]   ;;  %v4070_v16 = vld [vmem:[%s5934_s1 + $0x68] sm:$0xff]   ;;  %v4071_v17 = vld [vmem:[%s5934_s1 + $0x70] sm:$0xff]   ;;  %s3579_s20 = sshll.u32 %s5980_s16, 3 }
  0x12   : > { %v4072_v18 = vld [vmem:[%s5934_s1 + $0x78] sm:$0xff]   ;;  %v4079_v19 = vld [vmem:[%s5934_s1 + $0x80] sm:$0xff]   ;;  %v4092_v24 = vld [vmem:[%s5934_s1 + $0x88] sm:$0xff]  }
  0x13   : > { %1660 = vmatpush1.bf16.msra.mxu0 %v4058_v2  ;;  %4032 = vmatpush1.bf16.msra.mxu1 %v4058_v2  ;;  %s4917_s28 = scalar_lea.vmem %s5933_s0, %s4047_s23  ;;  %v4105_v25 = vld [vmem:[%s5934_s1 + $0x90] sm:$0xff]   ;;  %v4118_v30 = vld [vmem:[%s5934_s1 + $0x98] sm:$0xff]   ;;  %v4131_v33 = vld [vmem:[%s5934_s1 + $0xa0] sm:$0xff]   ;;  %s5377_s23 = scalar_lea.vmem %s5936_s3, %s3579_s20 }
  0x14   : > { %1661 = vmatprep.subr.bf16.mxu0 %v4859_v1  ;;  %4017 = vmatprep.subr.bf16.mxu1 %v4859_v1  ;;  %v4075_v6 = vld [vmem:[%s4917_s28 + $0x4] ss:$12 sps:$4 sm:$0xff]   ;;  %v4073_v20 = vld [vmem:[%s4917_s28] ss:$12 sps:$4 sm:$0xff]   ;;  %v4080_v22 = vld [vmem:[%s4917_s28 + $0x1c] ss:$12 sps:$4 sm:$0xff]  }
  0x15   : > { %v4078_v8 = vld [vmem:[%s4917_s28 + $0x484] ss:$12 sps:$4 sm:$0xff]   ;;  %1689 = vmatprep.mubr.bf16.mxu0 %v4075_v6  ;;  %v4076_v21 = vld [vmem:[%s4917_s28 + $0x480] ss:$12 sps:$4 sm:$0xff]   ;;  %v4082_v23 = vld [vmem:[%s4917_s28 + $0x49c] ss:$12 sps:$4 sm:$0xff]  }
  0x16   : > { %2073 = vmatprep.mubr.bf16.mxu1 %v4078_v8  ;;  %v4084_v26 = vld [vmem:[%s4917_s28 + $0x18] ss:$12 sps:$4 sm:$0xff]   ;;  %v4086_v28 = vld [vmem:[%s4917_s28 + $0x34] ss:$12 sps:$4 sm:$0xff]   ;;  %v4090_v31 = vld [vmem:[%s4917_s28 + $0x30] ss:$12 sps:$4 sm:$0xff]  }
  0x17   : > { %1662 = vmatpush1.bf16.msra.mxu0 %v4059_v3  ;;  %4033 = vmatpush1.bf16.msra.mxu1 %v4059_v3  ;;  %v4085_v27 = vld [vmem:[%s4917_s28 + $0x498] ss:$12 sps:$4 sm:$0xff]   ;;  %v4088_v29 = vld [vmem:[%s4917_s28 + $0x4b4] ss:$12 sps:$4 sm:$0xff]   ;;  %v4091_v32 = vld [vmem:[%s4917_s28 + $0x4b0] ss:$12 sps:$4 sm:$0xff]  }
  0x18   : > { %1663 = vmatprep.subr.bf16.mxu0 %v4859_v1  ;;  %4018 = vmatprep.subr.bf16.mxu1 %v4859_v1  ;;  %v4093_v34 = vld [vmem:[%s4917_s28 + $0x4c] ss:$12 sps:$4 sm:$0xff]   ;;  %v4157_v37 = vld [vmem:[%s5934_s1 + $0xb0] sm:$0xff]   ;;  %v4106_v45 = vld [vmem:[%s4917_s28 + $0x7c] ss:$12 sps:$4 sm:$0xff]  }
  0x19   : > { %v4095_v35 = vld [vmem:[%s4917_s28 + $0x4cc] ss:$12 sps:$4 sm:$0xff]   ;;  %v4097_v38 = vld [vmem:[%s4917_s28 + $0x48] ss:$12 sps:$4 sm:$0xff]   ;;  %v4099_v40 = vld [vmem:[%s4917_s28 + $0x64] ss:$12 sps:$4 sm:$0xff]  }
  0x1a   : > { %v4144_v36 = vld [vmem:[%s5934_s1 + $0xa8] sm:$0xff]   ;;  %v4101_v41 = vld [vmem:[%s4917_s28 + $0x4e4] ss:$12 sps:$4 sm:$0xff]   ;;  %v4170_v42 = vld [vmem:[%s5934_s1 + $0xb8] sm:$0xff]  }
  0x1b   : > { %1664 = vmatpush1.bf16.msra.mxu0 %v4060_v4  ;;  %4034 = vmatpush1.bf16.msra.mxu1 %v4060_v4  ;;  %v4098_v39 = vld [vmem:[%s4917_s28 + $0x4c8] ss:$12 sps:$4 sm:$0xff]   ;;  %v4103_v43 = vld [vmem:[%s4917_s28 + $0x60] ss:$12 sps:$4 sm:$0xff]   ;;  %v4110_v47 = vld [vmem:[%s4917_s28 + $0x78] ss:$12 sps:$4 sm:$0xff]  }
  0x1c   : > { %1665 = vmatprep.subr.bf16.mxu0 %v4859_v1  ;;  %4019 = vmatprep.subr.bf16.mxu1 %v4859_v1  ;;  %v4104_v44 = vld [vmem:[%s4917_s28 + $0x4e0] ss:$12 sps:$4 sm:$0xff]   ;;  %v4108_v46 = vld [vmem:[%s4917_s28 + $0x4fc] ss:$12 sps:$4 sm:$0xff]   ;;  %v4111_v48 = vld [vmem:[%s4917_s28 + $0x4f8] ss:$12 sps:$4 sm:$0xff]  }
  0x1d   : > { %v4112_v49 = vld [vmem:[%s4917_s28 + $0x94] ss:$12 sps:$4 sm:$0xff]   ;;  %v4116_v51 = vld [vmem:[%s4917_s28 + $0x90] ss:$12 sps:$4 sm:$0xff]   ;;  %v4119_v53 = vld [vmem:[%s4917_s28 + $0xac] ss:$12 sps:$4 sm:$0xff]  }
  0x1e   : > { %v4114_v50 = vld [vmem:[%s4917_s28 + $0x514] ss:$12 sps:$4 sm:$0xff]   ;;  %v4117_v52 = vld [vmem:[%s4917_s28 + $0x510] ss:$12 sps:$4 sm:$0xff]   ;;  %v4121_v54 = vld [vmem:[%s4917_s28 + $0x52c] ss:$12 sps:$4 sm:$0xff]  }
  0x1f   : > { %1666 = vmatpush1.bf16.msra.mxu0 %v4061_v5  ;;  %4035 = vmatpush1.bf16.msra.mxu1 %v4061_v5  ;;  %v4123_v55 = vld [vmem:[%s4917_s28 + $0xa8] ss:$12 sps:$4 sm:$0xff]   ;;  %v4125_v57 = vld [vmem:[%s4917_s28 + $0xc4] ss:$12 sps:$4 sm:$0xff]   ;;  %v4129_v59 = vld [vmem:[%s4917_s28 + $0xc0] ss:$12 sps:$4 sm:$0xff]  }
  0x20   : > { %1667 = vmatprep.subr.bf16.mxu0 %v4859_v1  ;;  %4020 = vmatprep.subr.bf16.mxu1 %v4859_v1  ;;  %v4124_v56 = vld [vmem:[%s4917_s28 + $0x528] ss:$12 sps:$4 sm:$0xff]   ;;  %v4127_v58 = vld [vmem:[%s4917_s28 + $0x544] ss:$12 sps:$4 sm:$0xff]   ;;  %v4130_v60 = vld [vmem:[%s4917_s28 + $0x540] ss:$12 sps:$4 sm:$0xff]  }
  0x21   : > { %v4132_v61 = vld [vmem:[%s4917_s28 + $0xdc] ss:$12 sps:$4 sm:$0xff]   ;;  %v4136_v63 = vld [vmem:[%s4917_s28 + $0xd8] ss:$12 sps:$4 sm:$0xff]   ;;  %v4140_v2 = vld [vmem:[%s4917_s28 + $0x574] ss:$12 sps:$4 sm:$0xff]  }
  0x22   : > { %v4134_v62 = vld [vmem:[%s4917_s28 + $0x55c] ss:$12 sps:$4 sm:$0xff]   ;;  %v4137_v0 = vld [vmem:[%s4917_s28 + $0x558] ss:$12 sps:$4 sm:$0xff]  }
  0x23   : > { %1668 = vmatpush1.bf16.msra.mxu0 %v4062_v7  ;;  %4036 = vmatpush1.bf16.msra.mxu1 %v4062_v7  ;;  %v4142_v3 = vld [vmem:[%s4917_s28 + $0xf0] ss:$12 sps:$4 sm:$0xff]   ;;  %v4145_v5 = vld [vmem:[%s4917_s28 + $0x10c] ss:$12 sps:$4 sm:$0xff]   ;;  %v4149_v7 = vld [vmem:[%s4917_s28 + $0x108] ss:$12 sps:$4 sm:$0xff]  }
  0x24   : > { %1669 = vmatprep.subr.bf16.mxu0 %v4859_v1  ;;  %4021 = vmatprep.subr.bf16.mxu1 %v4859_v1  ;;  %v4143_v4 = vld [vmem:[%s4917_s28 + $0x570] ss:$12 sps:$4 sm:$0xff]   ;;  %v4147_v6 = vld [vmem:[%s4917_s28 + $0x58c] ss:$12 sps:$4 sm:$0xff]   ;;  %v4150_v8 = vld [vmem:[%s4917_s28 + $0x588] ss:$12 sps:$4 sm:$0xff]  }
  0x27   : > { %1670 = vmatpush1.bf16.msra.mxu0 %v4063_v9  ;;  %4037 = vmatpush1.bf16.msra.mxu1 %v4063_v9  ;;  %v4151_v9 = vld [vmem:[%s4917_s28 + $0x124] ss:$12 sps:$4 sm:$0xff]  }
  0x28   : > { %1671 = vmatprep.subr.bf16.mxu0 %v4859_v1  ;;  %4022 = vmatprep.subr.bf16.mxu1 %v4859_v1 }
  0x2b   : > { %1672 = vmatpush1.bf16.msra.mxu0 %v4064_v10  ;;  %4038 = vmatpush1.bf16.msra.mxu1 %v4064_v10  ;;  %v4153_v10 = vld [vmem:[%s4917_s28 + $0x5a4] ss:$12 sps:$4 sm:$0xff]  }
  0x2c   : > { %1673 = vmatprep.subr.bf16.mxu0 %v4859_v1  ;;  %4023 = vmatprep.subr.bf16.mxu1 %v4859_v1 }
  0x2f   : > { %1674 = vmatpush1.bf16.msra.mxu0 %v4065_v11  ;;  %4039 = vmatpush1.bf16.msra.mxu1 %v4065_v11  ;;  %v4155_v11 = vld [vmem:[%s4917_s28 + $0x120] ss:$12 sps:$4 sm:$0xff]  }
  0x30   : > { %1675 = vmatprep.subr.bf16.mxu0 %v4859_v1  ;;  %4024 = vmatprep.subr.bf16.mxu1 %v4859_v1 }
  0x33   : > { %1676 = vmatpush1.bf16.msra.mxu0 %v4066_v12  ;;  %4040 = vmatpush1.bf16.msra.mxu1 %v4066_v12  ;;  %v4156_v12 = vld [vmem:[%s4917_s28 + $0x5a0] ss:$12 sps:$4 sm:$0xff]  }
  0x34   : > { %1677 = vmatprep.subr.bf16.mxu0 %v4859_v1  ;;  %4025 = vmatprep.subr.bf16.mxu1 %v4859_v1 }
  0x37   : > { %1678 = vmatpush1.bf16.msra.mxu0 %v4067_v13  ;;  %4041 = vmatpush1.bf16.msra.mxu1 %v4067_v13  ;;  %v4158_v13 = vld [vmem:[%s4917_s28 + $0x13c] ss:$12 sps:$4 sm:$0xff]  }
  0x38   : > { %1679 = vmatprep.subr.bf16.mxu0 %v4859_v1  ;;  %4026 = vmatprep.subr.bf16.mxu1 %v4859_v1 }
  0x3b   : > { %1680 = vmatpush1.bf16.msra.mxu0 %v4068_v14  ;;  %4042 = vmatpush1.bf16.msra.mxu1 %v4068_v14  ;;  %v4160_v14 = vld [vmem:[%s4917_s28 + $0x5bc] ss:$12 sps:$4 sm:$0xff]  }
  0x3c   : > { %1681 = vmatprep.subr.bf16.mxu0 %v4859_v1  ;;  %4027 = vmatprep.subr.bf16.mxu1 %v4859_v1 }
  0x3f   : > { %1682 = vmatpush1.bf16.msra.mxu0 %v4069_v15  ;;  %4043 = vmatpush1.bf16.msra.mxu1 %v4069_v15  ;;  %v4162_v15 = vld [vmem:[%s4917_s28 + $0x138] ss:$12 sps:$4 sm:$0xff]  }
  0x40   : > { %1683 = vmatprep.subr.bf16.mxu0 %v4859_v1  ;;  %4028 = vmatprep.subr.bf16.mxu1 %v4859_v1 }
  0x43   : > { %1684 = vmatpush1.bf16.msra.mxu0 %v4070_v16  ;;  %4044 = vmatpush1.bf16.msra.mxu1 %v4070_v16  ;;  %v4163_v16 = vld [vmem:[%s4917_s28 + $0x5b8] ss:$12 sps:$4 sm:$0xff]  }
  0x44   : > { %1685 = vmatprep.subr.bf16.mxu0 %v4859_v1  ;;  %4029 = vmatprep.subr.bf16.mxu1 %v4859_v1 }
  0x47   : > { %1686 = vmatpush1.bf16.msra.mxu0 %v4071_v17  ;;  %4045 = vmatpush1.bf16.msra.mxu1 %v4071_v17  ;;  %v4164_v17 = vld [vmem:[%s4917_s28 + $0x154] ss:$12 sps:$4 sm:$0xff]  }
  0x48   : > { %1687 = vmatprep.subr.bf16.mxu0 %v4859_v1  ;;  %4030 = vmatprep.subr.bf16.mxu1 %v4859_v1  ;;  %v4138_v1 = vld [vmem:[%s4917_s28 + $0xf4] ss:$12 sps:$4 sm:$0xff]  }
  0x4b   : > { %1688 = vmatpush1.bf16.msra.mxu0 %v4072_v18  ;;  %4046 = vmatpush1.bf16.msra.mxu1 %v4072_v18  ;;  %v4166_v18 = vld [vmem:[%s4917_s28 + $0x5d4] ss:$12 sps:$4 sm:$0xff]  }
  0x4c   : > { %3871 = vmatprep.subr.bf16.mxu1 %v4079_v19 }
  0x4e   : > { %1690 = vmatmul.mubr.bf16.vlgmr.msra.gmra.mrb[0].mxu0 %v4073_v20  ;;  %2074 = vmatmul.mubr.bf16.vlgmr.msra.gmra.mrb[0].mxu1 %v4076_v21  ;;  %v4169_v20 = vld [vmem:[%s4917_s28 + $0x5d0] ss:$12 sps:$4 sm:$0xff]   ;;  %v4171_v21 = vld [vmem:[%s4917_s28 + $0x16c] ss:$12 sps:$4 sm:$0xff]  }
  0x4f   : > { %3872 = vmatpush3.bf16.msra.mxu1 %v4079_v19  ;;  %1697 = vmatprep.mubr.bf16.mxu0 %v4080_v22  ;;  %v4168_v19 = vld [vmem:[%s4917_s28 + $0x150] ss:$12 sps:$4 sm:$0xff]   ;;  %v4173_v22 = vld [vmem:[%s4917_s28 + $0x5ec] ss:$12 sps:$4 sm:$0xff]  }
  0x50   : > { %2081 = vmatprep.mubr.bf16.mxu1 %v4082_v23  ;;  %3873 = vmatprep.subr.bf16.mxu1 %v4092_v24  ;;  %v4175_v23 = vld [vmem:[%s4917_s28 + $0x168] ss:$12 sps:$4 sm:$0xff]  }
  0x53   : > { %3874 = vmatpush3.bf16.msra.mxu1 %v4092_v24  ;;  %v4176_v24 = vld [vmem:[%s4917_s28 + $0x5e8] ss:$12 sps:$4 sm:$0xff]  }
  0x54   : > { %3875 = vmatprep.subr.bf16.mxu1 %v4105_v25 }
  0x56   : > { %1698 = vmatmul.mubr.bf16.gmra.mrb[4].mxu0 %v4084_v26  ;;  %2082 = vmatmul.mubr.bf16.gmra.mrb[4].mxu1 %v4085_v27  ;;  %v4179_v26 = vld [vmem:[%s4917_s28 + $0x8] ss:$12 sps:$4 sm:$0xff]   ;;  %v4180_v27 = vld [vmem:[%s4917_s28 + $0x180] ss:$12 sps:$4 sm:$0xff]  }
  0x57   : > { %1705 = vmatprep.mubr.bf16.mxu0 %v4086_v28  ;;  %2089 = vmatprep.mubr.bf16.mxu1 %v4088_v29  ;;  %v4181_v28 = vld [vmem:[%s4917_s28 + $0x20] ss:$12 sps:$4 sm:$0xff]   ;;  %v4182_v29 = vld [vmem:[%s4917_s28 + $0x19c] ss:$12 sps:$4 sm:$0xff]  }
  0x58   : > { %3876 = vmatpush3.bf16.msra.mxu1 %v4105_v25  ;;  %v4177_v25 = vld [vmem:[%s4917_s28 + $0x184] ss:$12 sps:$4 sm:$0xff]  }
  0x59   : > { %3877 = vmatprep.subr.bf16.mxu1 %v4118_v30 }
  0x5c   : > { %3878 = vmatpush3.bf16.msra.mxu1 %v4118_v30  ;;  %v4184_v30 = vld [vmem:[%s4917_s28 + $0x38] ss:$12 sps:$4 sm:$0xff]  }
  0x5d   : > { %3879 = vmatprep.subr.bf16.mxu1 %v4131_v33 }
  0x5e   : > { %1706 = vmatmul.mubr.bf16.gmra.mrb[8].mxu0 %v4090_v31  ;;  %2090 = vmatmul.mubr.bf16.gmra.mrb[8].mxu1 %v4091_v32  ;;  %v4185_v31 = vld [vmem:[%s4917_s28 + $0x198] ss:$12 sps:$4 sm:$0xff]   ;;  %v4186_v32 = vld [vmem:[%s4917_s28 + $0x50] ss:$12 sps:$4 sm:$0xff]  }
  0x5f   : > { %1713 = vmatprep.mubr.bf16.mxu0 %v4093_v34  ;;  %2097 = vmatprep.mubr.bf16.mxu1 %v4095_v35  ;;  %v4189_v34 = vld [vmem:[%s4917_s28 + $0x68] ss:$12 sps:$4 sm:$0xff]   ;;  %v4190_v35 = vld [vmem:[%s4917_s28 + $0x1b0] ss:$12 sps:$4 sm:$0xff]  }
  0x60   : > { %3880 = vmatpush3.bf16.msra.mxu1 %v4131_v33  ;;  %v4187_v33 = vld [vmem:[%s4917_s28 + $0x1b4] ss:$12 sps:$4 sm:$0xff]  }
  0x61   : > { %3881 = vmatprep.subr.bf16.mxu1 %v4144_v36 }
  0x64   : > { %3882 = vmatpush3.bf16.msra.mxu1 %v4144_v36  ;;  %v4191_v36 = vld [vmem:[%s4917_s28 + $0x80] ss:$12 sps:$4 sm:$0xff]  }
  0x65   : > { %3883 = vmatprep.subr.bf16.mxu1 %v4157_v37 }
  0x66   : > { %1714 = vmatmul.mubr.bf16.gmra.mrb[12].mxu0 %v4097_v38  ;;  %2098 = vmatmul.mubr.bf16.gmra.mrb[12].mxu1 %v4098_v39  ;;  %v4194_v38 = vld [vmem:[%s4917_s28 + $0x98] ss:$12 sps:$4 sm:$0xff]   ;;  %v4195_v39 = vld [vmem:[%s4917_s28 + $0x1c8] ss:$12 sps:$4 sm:$0xff]  }
  0x67   : > { %1721 = vmatprep.mubr.bf16.mxu0 %v4099_v40  ;;  %2105 = vmatprep.mubr.bf16.mxu1 %v4101_v41  ;;  %v4196_v40 = vld [vmem:[%s4917_s28 + $0xb0] ss:$12 sps:$4 sm:$0xff]  }
  0x68   : > { %3884 = vmatpush3.bf16.msra.mxu1 %v4157_v37  ;;  %v4192_v37 = vld [vmem:[%s4917_s28 + $0x1cc] ss:$12 sps:$4 sm:$0xff]   ;;  %v4197_v41 = vld [vmem:[%s4917_s28 + $0x1e4] ss:$12 sps:$4 sm:$0xff]  }
  0x69   : > { %3885 = vmatprep.subr.bf16.mxu1 %v4170_v42 }
  0x6c   : > { %3886 = vmatpush3.bf16.msra.mxu1 %v4170_v42  ;;  %v4199_v42 = vld [vmem:[%s4917_s28 + $0xc8] ss:$12 sps:$4 sm:$0xff]  }
  0x6e   : > { %1722 = vmatmul.mubr.bf16.gmra.mrb[16].mxu0 %v4103_v43  ;;  %2106 = vmatmul.mubr.bf16.gmra.mrb[16].mxu1 %v4104_v44  ;;  %v4200_v43 = vld [vmem:[%s4917_s28 + $0x1e0] ss:$12 sps:$4 sm:$0xff]  }
  0x6f   : > { %1729 = vmatprep.mubr.bf16.mxu0 %v4106_v45  ;;  %2113 = vmatprep.mubr.bf16.mxu1 %v4108_v46  ;;  %v4201_v44 = vld [vmem:[%s4917_s28 + $0xe0] ss:$12 sps:$4 sm:$0xff]   ;;  %v4202_v45 = vld [vmem:[%s4917_s28 + $0x1fc] ss:$12 sps:$4 sm:$0xff]   ;;  %v4204_v46 = vld [vmem:[%s4917_s28 + $0xf8] ss:$12 sps:$4 sm:$0xff]  }
  0x76   : > { %1730 = vmatmul.mubr.bf16.gmra.mrb[20].mxu0 %v4110_v47  ;;  %2114 = vmatmul.mubr.bf16.gmra.mrb[20].mxu1 %v4111_v48  ;;  %v4205_v47 = vld [vmem:[%s4917_s28 + $0x1f8] ss:$12 sps:$4 sm:$0xff]   ;;  %v4206_v48 = vld [vmem:[%s4917_s28 + $0x110] ss:$12 sps:$4 sm:$0xff]  }
  0x77   : > { %1737 = vmatprep.mubr.bf16.mxu0 %v4112_v49  ;;  %2121 = vmatprep.mubr.bf16.mxu1 %v4114_v50  ;;  %v4207_v49 = vld [vmem:[%s4917_s28 + $0x214] ss:$12 sps:$4 sm:$0xff]  }
  0x78   : > { %v4209_v50 = vld [vmem:[%s4917_s28 + $0x128] ss:$12 sps:$4 sm:$0xff]  }
  0x7e   : > { %1738 = vmatmul.mubr.bf16.gmra.mrb[24].mxu0 %v4116_v51  ;;  %2122 = vmatmul.mubr.bf16.gmra.mrb[24].mxu1 %v4117_v52  ;;  %v4210_v51 = vld [vmem:[%s4917_s28 + $0x210] ss:$12 sps:$4 sm:$0xff]   ;;  %v4211_v52 = vld [vmem:[%s4917_s28 + $0x140] ss:$12 sps:$4 sm:$0xff]  }
  0x7f   : > { %1745 = vmatprep.mubr.bf16.mxu0 %v4119_v53  ;;  %2129 = vmatprep.mubr.bf16.mxu1 %v4121_v54  ;;  %v4212_v53 = vld [vmem:[%s4917_s28 + $0x22c] ss:$12 sps:$4 sm:$0xff]  }
  0x80   : > { %v4214_v54 = vld [vmem:[%s4917_s28 + $0x158] ss:$12 sps:$4 sm:$0xff]  }
  0x86   : > { %1746 = vmatmul.mubr.bf16.gmra.mrb[28].mxu0 %v4123_v55  ;;  %2130 = vmatmul.mubr.bf16.gmra.mrb[28].mxu1 %v4124_v56  ;;  %v4215_v55 = vld [vmem:[%s4917_s28 + $0x228] ss:$12 sps:$4 sm:$0xff]   ;;  %v4216_v56 = vld [vmem:[%s4917_s28 + $0x170] ss:$12 sps:$4 sm:$0xff]  }
  0x87   : > { %1753 = vmatprep.mubr.bf16.mxu0 %v4125_v57  ;;  %2137 = vmatprep.mubr.bf16.mxu1 %v4127_v58  ;;  %v4217_v57 = vld [vmem:[%s4917_s28 + $0x244] ss:$12 sps:$4 sm:$0xff]   ;;  %v4219_v58 = vld [vmem:[%s4917_s28 + $0x188] ss:$12 sps:$4 sm:$0xff]  }
  0x8e   : > { %1754 = vmatmul.mubr.bf16.gmra.mrb[32].mxu0 %v4129_v59  ;;  %2138 = vmatmul.mubr.bf16.gmra.mrb[32].mxu1 %v4130_v60  ;;  %v4220_v59 = vld [vmem:[%s4917_s28 + $0x240] ss:$12 sps:$4 sm:$0xff]  }
  0x8f   : > { %1761 = vmatprep.mubr.bf16.mxu0 %v4132_v61  ;;  %2145 = vmatprep.mubr.bf16.mxu1 %v4134_v62  ;;  %v4221_v60 = vld [vmem:[%s4917_s28 + $0x1a0] ss:$12 sps:$4 sm:$0xff]   ;;  %v4222_v61 = vld [vmem:[%s4917_s28 + $0x25c] ss:$12 sps:$4 sm:$0xff]   ;;  %v4224_v62 = vld [vmem:[%s4917_s28 + $0x1b8] ss:$12 sps:$4 sm:$0xff]  }
  0x96   : > { %1762 = vmatmul.mubr.bf16.gmra.mrb[36].mxu0 %v4136_v63  ;;  %2146 = vmatmul.mubr.bf16.gmra.mrb[36].mxu1 %v4137_v0  ;;  %v4225_v63 = vld [vmem:[%s4917_s28 + $0x258] ss:$12 sps:$4 sm:$0xff]   ;;  %v4226_v0 = vld [vmem:[%s4917_s28 + $0x1d0] ss:$12 sps:$4 sm:$0xff]  }
  0x97   : > { %1769 = vmatprep.mubr.bf16.mxu0 %v4138_v1  ;;  %2153 = vmatprep.mubr.bf16.mxu1 %v4140_v2  ;;  %v4227_v1 = vld [vmem:[%s4917_s28 + $0x274] ss:$12 sps:$4 sm:$0xff]  }
  0x98   : > { %v4229_v2 = vld [vmem:[%s4917_s28 + $0x1e8] ss:$12 sps:$4 sm:$0xff]  }
  0x9e   : > { %1770 = vmatmul.mubr.bf16.gmra.mrb[40].mxu0 %v4142_v3  ;;  %2154 = vmatmul.mubr.bf16.gmra.mrb[40].mxu1 %v4143_v4  ;;  %v4230_v3 = vld [vmem:[%s4917_s28 + $0x270] ss:$12 sps:$4 sm:$0xff]   ;;  %v4231_v4 = vld [vmem:[%s4917_s28 + $0x200] ss:$12 sps:$4 sm:$0xff]  }
  0x9f   : > { %1777 = vmatprep.mubr.bf16.mxu0 %v4145_v5  ;;  %2161 = vmatprep.mubr.bf16.mxu1 %v4147_v6  ;;  %v4232_v5 = vld [vmem:[%s4917_s28 + $0x28c] ss:$12 sps:$4 sm:$0xff]  }
  0xa0   : > { %v4234_v6 = vld [vmem:[%s4917_s28 + $0x218] ss:$12 sps:$4 sm:$0xff]  }
  0xa6   : > { %1778 = vmatmul.mubr.bf16.gmra.mrb[44].mxu0 %v4149_v7  ;;  %2162 = vmatmul.mubr.bf16.gmra.mrb[44].mxu1 %v4150_v8 }
  0xa7   : > { %1785 = vmatprep.mubr.bf16.mxu0 %v4151_v9  ;;  %2169 = vmatprep.mubr.bf16.mxu1 %v4153_v10 }
  0xae   : > { %1786 = vmatmul.mubr.bf16.gmra.mrb[48].mxu0 %v4155_v11  ;;  %2170 = vmatmul.mubr.bf16.gmra.mrb[48].mxu1 %v4156_v12  ;;  %v4235_v11 = vld [vmem:[%s4917_s28 + $0x288] ss:$12 sps:$4 sm:$0xff]   ;;  %v4236_v12 = vld [vmem:[%s4917_s28 + $0x230] ss:$12 sps:$4 sm:$0xff]  }
  0xaf   : > { %1793 = vmatprep.mubr.bf16.mxu0 %v4158_v13  ;;  %2177 = vmatprep.mubr.bf16.mxu1 %v4160_v14 }
  0xb6   : > { %1794 = vmatmul.mubr.bf16.gmra.mrb[52].mxu0 %v4162_v15  ;;  %2178 = vmatmul.mubr.bf16.gmra.mrb[52].mxu1 %v4163_v16  ;;  %v4237_v15 = vld [vmem:[%s4917_s28 + $0x2a4] ss:$12 sps:$4 sm:$0xff]   ;;  %v4239_v16 = vld [vmem:[%s4917_s28 + $0x248] ss:$12 sps:$4 sm:$0xff]  }
  0xb7   : > { %1801 = vmatprep.mubr.bf16.mxu0 %v4164_v17  ;;  %2185 = vmatprep.mubr.bf16.mxu1 %v4166_v18 }
  0xbe   : > { %1802 = vmatmul.mubr.bf16.gmra.mrb[56].mxu0 %v4168_v19  ;;  %2186 = vmatmul.mubr.bf16.gmra.mrb[56].mxu1 %v4169_v20 }
  0xbf   : > { %1809 = vmatprep.mubr.bf16.mxu0 %v4171_v21  ;;  %2193 = vmatprep.mubr.bf16.mxu1 %v4173_v22 }
  0xc6   : > { %1810 = vmatmul.mubr.bf16.gmra.mrb[60].mxu0 %v4175_v23  ;;  %2194 = vmatmul.mubr.bf16.gmra.mrb[60].mxu1 %v4176_v24  ;;  %v4240_v23 = vld [vmem:[%s4917_s28 + $0x2a0] ss:$12 sps:$4 sm:$0xff]  }
  0xc7   : > { %1817 = vmatprep.mubr.bf16.mxu0 %v4177_v25  ;;  %3887 = vmatprep.mubr.bf16.mxu1 %v4179_v26  ;;  %v4241_v24 = vld [vmem:[%s4917_s28 + $0x260] ss:$12 sps:$4 sm:$0xff]  }
  0xce   : > { %1818 = vmatmul.mubr.bf16.gmra.mrb[64].mxu0 %v4180_v27  ;;  %3888 = vmatmul.mubr.bf16.vlgmr.msra.gmra.mrb[64].mxu1 %v4181_v28  ;;  %v4242_v27 = vld [vmem:[%s4917_s28 + $0x2bc] ss:$12 sps:$4 sm:$0xff]   ;;  %v4244_v28 = vld [vmem:[%s4917_s28 + $0x278] ss:$12 sps:$4 sm:$0xff]  }
  0xcf   : > { %1825 = vmatprep.mubr.bf16.mxu0 %v4182_v29  ;;  %3891 = vmatprep.mubr.bf16.mxu1 %v4184_v30 }
  0xd6   : > { %1826 = vmatmul.mubr.bf16.gmra.mrb[68].mxu0 %v4185_v31  ;;  %3892 = vmatmul.mubr.bf16.gmra.mrb[68].mxu1 %v4186_v32 }
  0xd7   : > { %1833 = vmatprep.mubr.bf16.mxu0 %v4187_v33  ;;  %3895 = vmatprep.mubr.bf16.mxu1 %v4189_v34 }
  0xde   : > { %1834 = vmatmul.mubr.bf16.gmra.mrb[72].mxu0 %v4190_v35  ;;  %3896 = vmatmul.mubr.bf16.gmra.mrb[72].mxu1 %v4191_v36  ;;  %v4245_v35 = vld [vmem:[%s4917_s28 + $0x2b8] ss:$12 sps:$4 sm:$0xff]   ;;  %v4246_v36 = vld [vmem:[%s4917_s28 + $0x290] ss:$12 sps:$4 sm:$0xff]  }
  0xdf   : > { %1841 = vmatprep.mubr.bf16.mxu0 %v4192_v37  ;;  %3899 = vmatprep.mubr.bf16.mxu1 %v4194_v38 }
  0xe6   : > { %1842 = vmatmul.mubr.bf16.gmra.mrb[76].mxu0 %v4195_v39  ;;  %3900 = vmatmul.mubr.bf16.gmra.mrb[76].mxu1 %v4196_v40  ;;  %v4247_v39 = vld [vmem:[%s4917_s28 + $0x2d4] ss:$12 sps:$4 sm:$0xff]  }
  0xe7   : > { %1849 = vmatprep.mubr.bf16.mxu0 %v4197_v41  ;;  %3903 = vmatprep.mubr.bf16.mxu1 %v4199_v42  ;;  %v4249_v40 = vld [vmem:[%s4917_s28 + $0x2a8] ss:$12 sps:$4 sm:$0xff]  }
  0xee   : > { %1850 = vmatmul.mubr.bf16.gmra.mrb[80].mxu0 %v4200_v43  ;;  %3904 = vmatmul.mubr.bf16.gmra.mrb[80].mxu1 %v4201_v44 }
  0xef   : > { %1857 = vmatprep.mubr.bf16.mxu0 %v4202_v45  ;;  %3907 = vmatprep.mubr.bf16.mxu1 %v4204_v46 }
  0xf6   : > { %1858 = vmatmul.mubr.bf16.gmra.mrb[84].mxu0 %v4205_v47  ;;  %3908 = vmatmul.mubr.bf16.gmra.mrb[84].mxu1 %v4206_v48  ;;  %v4250_v47 = vld [vmem:[%s4917_s28 + $0x2d0] ss:$12 sps:$4 sm:$0xff]   ;;  %v4251_v48 = vld [vmem:[%s4917_s28 + $0x2c0] ss:$12 sps:$4 sm:$0xff]  }
  0xf7   : > { %1865 = vmatprep.mubr.bf16.mxu0 %v4207_v49  ;;  %3911 = vmatprep.mubr.bf16.mxu1 %v4209_v50 }
  0xfe   : > { %1866 = vmatmul.mubr.bf16.gmra.mrb[88].mxu0 %v4210_v51  ;;  %3912 = vmatmul.mubr.bf16.gmra.mrb[88].mxu1 %v4211_v52  ;;  %v4252_v51 = vld [vmem:[%s4917_s28 + $0x2ec] ss:$12 sps:$4 sm:$0xff]  }
  0xff   : > { %1873 = vmatprep.mubr.bf16.mxu0 %v4212_v53  ;;  %3915 = vmatprep.mubr.bf16.mxu1 %v4214_v54  ;;  %v4254_v52 = vld [vmem:[%s4917_s28 + $0x2d8] ss:$12 sps:$4 sm:$0xff]  }
 0x106   : > { %1874 = vmatmul.mubr.bf16.gmra.mrb[92].mxu0 %v4215_v55  ;;  %3916 = vmatmul.mubr.bf16.gmra.mrb[92].mxu1 %v4216_v56 }
 0x107   : > { %1881 = vmatprep.mubr.bf16.mxu0 %v4217_v57  ;;  %3919 = vmatprep.mubr.bf16.mxu1 %v4219_v58 }
 0x10e   : > { %1882 = vmatmul.mubr.bf16.gmra.mrb[96].mxu0 %v4220_v59  ;;  %3920 = vmatmul.mubr.bf16.gmra.mrb[96].mxu1 %v4221_v60  ;;  %v4255_v59 = vld [vmem:[%s4917_s28 + $0x2e8] ss:$12 sps:$4 sm:$0xff]   ;;  %v4256_v60 = vld [vmem:[%s4917_s28 + $0x2f0] ss:$12 sps:$4 sm:$0xff]  }
 0x10f   : > { %1889 = vmatprep.mubr.bf16.mxu0 %v4222_v61  ;;  %3923 = vmatprep.mubr.bf16.mxu1 %v4224_v62 }
 0x116   : > { %1890 = vmatmul.mubr.bf16.gmra.mrb[100].mxu0 %v4225_v63  ;;  %3924 = vmatmul.mubr.bf16.gmra.mrb[100].mxu1 %v4226_v0  ;;  %v4257_v63 = vld [vmem:[%s4917_s28 + $0x304] ss:$12 sps:$4 sm:$0xff]   ;;  %v4259_v0 = vld [vmem:[%s4917_s28 + $0x308] ss:$12 sps:$4 sm:$0xff]  }
 0x117   : > { %1897 = vmatprep.mubr.bf16.mxu0 %v4227_v1  ;;  %3927 = vmatprep.mubr.bf16.mxu1 %v4229_v2 }
 0x11e   : > { %1898 = vmatmul.mubr.bf16.gmra.mrb[104].mxu0 %v4230_v3  ;;  %3928 = vmatmul.mubr.bf16.gmra.mrb[104].mxu1 %v4231_v4 }
 0x11f   : > { %1905 = vmatprep.mubr.bf16.mxu0 %v4232_v5  ;;  %3931 = vmatprep.mubr.bf16.mxu1 %v4234_v6 }
 0x121   : > { %v5110_v7 = vpop.f32.mrb[0].mxu0  ;;  %v5112_v8 = vpop.f32.mrb[0].mxu1 }
 0x122   : > { %v1693_v9 = vpop.f32.mrb[1].mxu0  ;;  %v2077_v10 = vpop.f32.mrb[1].mxu1 }
 0x123   : > { %v5116_v13 = vpop.f32.mrb[2].mxu0  ;;  %v5118_v14 = vpop.f32.mrb[2].mxu1  ;;  %v4260_v9 = vld [vmem:[%s4917_s28 + $0x300] ss:$12 sps:$4 sm:$0xff]  }
 0x124   : > { %v1696_v17 = vpop.f32.mrb[3].mxu0  ;;  %v2080_v18 = vpop.f32.mrb[3].mxu1  ;;  %v4261_v10 = vld [vmem:[%s4917_s28 + $0x320] ss:$12 sps:$4 sm:$0xff]  }
 0x126   : > { %1906 = vmatmul.mubr.bf16.gmra.mrb[108].mxu0 %v4235_v11  ;;  %3932 = vmatmul.mubr.bf16.gmra.mrb[108].mxu1 %v4236_v12 }
 0x127   : > { %1913 = vmatprep.mubr.bf16.mxu0 %v4237_v15  ;;  %3935 = vmatprep.mubr.bf16.mxu1 %v4239_v16  ;;  %v4262_v15 = vld [vmem:[%s4917_s28 + $0x31c] ss:$12 sps:$4 sm:$0xff]   ;;  %v4264_v16 = vld [vmem:[%s4917_s28 + $0x338] ss:$12 sps:$4 sm:$0xff]  }
 0x129   : > { %v5122_v19 = vpop.f32.mrb[4].mxu0  ;;  %v5124_v20 = vpop.f32.mrb[4].mxu1 }
 0x12a   : > { %v1701_v21 = vpop.f32.mrb[5].mxu0  ;;  %v2085_v22 = vpop.f32.mrb[5].mxu1 }
 0x12b   : > { %v5128_v25 = vpop.f32.mrb[6].mxu0  ;;  %v5130_v26 = vpop.f32.mrb[6].mxu1 }
 0x12c   : > { %v1704_v29 = vpop.f32.mrb[7].mxu0  ;;  %v2088_v30 = vpop.f32.mrb[7].mxu1 }
 0x12e   : > { %1914 = vmatmul.mubr.bf16.gmra.mrb[112].mxu0 %v4240_v23  ;;  %3936 = vmatmul.mubr.bf16.gmra.mrb[112].mxu1 %v4241_v24 }
 0x12f   : > { %1921 = vmatprep.mubr.bf16.mxu0 %v4242_v27  ;;  %3939 = vmatprep.mubr.bf16.mxu1 %v4244_v28  ;;  %v4265_v27 = vld [vmem:[%s4917_s28 + $0x318] ss:$12 sps:$4 sm:$0xff]   ;;  %v4266_v28 = vld [vmem:[%s4917_s28 + $0x350] ss:$12 sps:$4 sm:$0xff]  }
 0x131   : > { %v5134_v31 = vpop.f32.mrb[8].mxu0  ;;  %v5136_v32 = vpop.f32.mrb[8].mxu1 }
 0x132   : > { %v1709_v33 = vpop.f32.mrb[9].mxu0  ;;  %v2093_v34 = vpop.f32.mrb[9].mxu1 }
 0x133   : > { %v5140_v37 = vpop.f32.mrb[10].mxu0  ;;  %v5142_v38 = vpop.f32.mrb[10].mxu1  ;;  %v4267_v33 = vld [vmem:[%s4917_s28 + $0x334] ss:$12 sps:$4 sm:$0xff]  }
 0x134   : > { %v1712_v41 = vpop.f32.mrb[11].mxu0  ;;  %v2096_v42 = vpop.f32.mrb[11].mxu1  ;;  %v4269_v34 = vld [vmem:[%s4917_s28 + $0x368] ss:$12 sps:$4 sm:$0xff]  }
 0x136   : > { %1922 = vmatmul.mubr.bf16.gmra.mrb[116].mxu0 %v4245_v35  ;;  %3940 = vmatmul.mubr.bf16.gmra.mrb[116].mxu1 %v4246_v36 }
 0x137   : > { %1929 = vmatprep.mubr.bf16.mxu0 %v4247_v39  ;;  %3943 = vmatprep.mubr.bf16.mxu1 %v4249_v40 }
 0x139   : > { %v5146_v43 = vpop.f32.mrb[12].mxu0  ;;  %v5148_v44 = vpop.f32.mrb[12].mxu1 }
 0x13a   : > { %v1717_v45 = vpop.f32.mrb[13].mxu0  ;;  %v2101_v46 = vpop.f32.mrb[13].mxu1 }
 0x13b   : > { %v5152_v49 = vpop.f32.mrb[14].mxu0  ;;  %v5154_v50 = vpop.f32.mrb[14].mxu1  ;;  %v4270_v45 = vld [vmem:[%s4917_s28 + $0x330] ss:$12 sps:$4 sm:$0xff]   ;;  %v4271_v46 = vld [vmem:[%s4917_s28 + $0x380] ss:$12 sps:$4 sm:$0xff]  }
 0x13c   : > { %v1720_v53 = vpop.f32.mrb[15].mxu0  ;;  %v2104_v54 = vpop.f32.mrb[15].mxu1 }
 0x13e   : > { %1930 = vmatmul.mubr.bf16.gmra.mrb[120].mxu0 %v4250_v47  ;;  %3944 = vmatmul.mubr.bf16.gmra.mrb[120].mxu1 %v4251_v48 }
 0x13f   : > { %1937 = vmatprep.mubr.bf16.mxu0 %v4252_v51  ;;  %3947 = vmatprep.mubr.bf16.mxu1 %v4254_v52  ;;  %v4272_v51 = vld [vmem:[%s4917_s28 + $0x34c] ss:$12 sps:$4 sm:$0xff]  }
 0x140   : > { %v4274_v52 = vld [vmem:[%s4917_s28 + $0x398] ss:$12 sps:$4 sm:$0xff]  }
 0x141   : > { %v5158_v55 = vpop.f32.mrb[16].mxu0  ;;  %v5160_v56 = vpop.f32.mrb[16].mxu1 }
 0x142   : > { %v1725_v57 = vpop.f32.mrb[17].mxu0  ;;  %v2109_v58 = vpop.f32.mrb[17].mxu1 }
 0x143   : > { %v5164_v61 = vpop.f32.mrb[18].mxu0  ;;  %v5166_v62 = vpop.f32.mrb[18].mxu1 }
 0x144   : > { %v1728_v1 = vpop.f32.mrb[19].mxu0  ;;  %v2112_v2 = vpop.f32.mrb[19].mxu1 }
 0x146   : > { %1938 = vmatmul.mubr.bf16.gmra.mrb[124].mxu0 %v4255_v59  ;;  %3948 = vmatmul.mubr.bf16.gmra.mrb[124].mxu1 %v4256_v60 }
 0x147   : > { %1945 = vmatprep.mubr.bf16.mxu0 %v4257_v63  ;;  %3951 = vmatprep.mubr.bf16.mxu1 %v4259_v0  ;;  %v4275_v63 = vld [vmem:[%s4917_s28 + $0x348] ss:$12 sps:$4 sm:$0xff]   ;;  %v4276_v0 = vld [vmem:[%s4917_s28 + $0x3b0] ss:$12 sps:$4 sm:$0xff]  }
 0x149   : > { %v5170_v3 = vpop.f32.mrb[20].mxu0  ;;  %v5172_v4 = vpop.f32.mrb[20].mxu1 }
 0x14a   : > { %v1733_v5 = vpop.f32.mrb[21].mxu0  ;;  %v2117_v6 = vpop.f32.mrb[21].mxu1 }
 0x14b   : > { %v5176_v11 = vpop.f32.mrb[22].mxu0  ;;  %v5178_v12 = vpop.f32.mrb[22].mxu1  ;;  %v4277_v5 = vld [vmem:[%s4917_s28 + $0x364] ss:$12 sps:$4 sm:$0xff]   ;;  %v4279_v6 = vld [vmem:[%s4917_s28 + $0x3c8] ss:$12 sps:$4 sm:$0xff]  }
 0x14c   : > { %5937 = vst [vmem:[#allocation2_spill] sm:$0xff] %v5178_v12  ;;  %v1736_v17 = vpop.f32.mrb[23].mxu0  ;;  %v2120_v18 = vpop.f32.mrb[23].mxu1 }
 0x14e   : > { %1946 = vmatmul.mubr.bf16.gmra.mrb[128].mxu0 %v4260_v9  ;;  %3952 = vmatmul.mubr.bf16.gmra.mrb[128].mxu1 %v4261_v10 }
 0x14f   : > { %1953 = vmatprep.mubr.bf16.mxu0 %v4262_v15  ;;  %3955 = vmatprep.mubr.bf16.mxu1 %v4264_v16 }
 0x151   : > { %v5182_v21 = vpop.f32.mrb[24].mxu0  ;;  %v5184_v22 = vpop.f32.mrb[24].mxu1 }
 0x152   : > { %5938 = vst [vmem:[#allocation3_spill] sm:$0xff] %v5184_v22  ;;  %v1741_v23 = vpop.f32.mrb[25].mxu0  ;;  %v2125_v24 = vpop.f32.mrb[25].mxu1 }
 0x153   : > { %v5188_v29 = vpop.f32.mrb[26].mxu0  ;;  %v5190_v30 = vpop.f32.mrb[26].mxu1  ;;  %v4280_v23 = vld [vmem:[%s4917_s28 + $0x360] ss:$12 sps:$4 sm:$0xff]  }
 0x154   : > { %5939 = vst [vmem:[#allocation4_spill] sm:$0xff] %v5190_v30  ;;  %v1744_v35 = vpop.f32.mrb[27].mxu0  ;;  %v2128_v36 = vpop.f32.mrb[27].mxu1  ;;  %v4281_v24 = vld [vmem:[%s4917_s28 + $0x3e0] ss:$12 sps:$4 sm:$0xff]  }
 0x156   : > { %1954 = vmatmul.mubr.bf16.gmra.mrb[132].mxu0 %v4265_v27  ;;  %3956 = vmatmul.mubr.bf16.gmra.mrb[132].mxu1 %v4266_v28 }
 0x157   : > { %1961 = vmatprep.mubr.bf16.mxu0 %v4267_v33  ;;  %3959 = vmatprep.mubr.bf16.mxu1 %v4269_v34  ;;  %v4282_v33 = vld [vmem:[%s4917_s28 + $0x37c] ss:$12 sps:$4 sm:$0xff]   ;;  %v4284_v34 = vld [vmem:[%s4917_s28 + $0x3f8] ss:$12 sps:$4 sm:$0xff]  }
 0x159   : > { %v5194_v39 = vpop.f32.mrb[28].mxu0  ;;  %v5196_v40 = vpop.f32.mrb[28].mxu1 }
 0x15a   : > { %5940 = vst [vmem:[#allocation5_spill] sm:$0xff] %v5196_v40  ;;  %v1749_v41 = vpop.f32.mrb[29].mxu0  ;;  %v2133_v42 = vpop.f32.mrb[29].mxu1 }
 0x15b   : > { %v5200_v47 = vpop.f32.mrb[30].mxu0  ;;  %v5202_v48 = vpop.f32.mrb[30].mxu1 }
 0x15c   : > { %5941 = vst [vmem:[#allocation6_spill] sm:$0xff] %v5202_v48  ;;  %v1752_v53 = vpop.f32.mrb[31].mxu0  ;;  %v2136_v54 = vpop.f32.mrb[31].mxu1 }
 0x15e   : > { %1962 = vmatmul.mubr.bf16.gmra.mrb[136].mxu0 %v4270_v45  ;;  %3960 = vmatmul.mubr.bf16.gmra.mrb[136].mxu1 %v4271_v46 }
 0x15f   : > { %1969 = vmatprep.mubr.bf16.mxu0 %v4272_v51  ;;  %3963 = vmatprep.mubr.bf16.mxu1 %v4274_v52  ;;  %v4285_v51 = vld [vmem:[%s4917_s28 + $0x378] ss:$12 sps:$4 sm:$0xff]   ;;  %v4286_v52 = vld [vmem:[%s4917_s28 + $0x410] ss:$12 sps:$4 sm:$0xff]  }
 0x161   : > { %v5206_v57 = vpop.f32.mrb[32].mxu0  ;;  %v5208_v58 = vpop.f32.mrb[32].mxu1 }
 0x162   : > { %5942 = vst [vmem:[#allocation7_spill] sm:$0xff] %v5208_v58  ;;  %v1757_v59 = vpop.f32.mrb[33].mxu0  ;;  %v2141_v60 = vpop.f32.mrb[33].mxu1 }
 0x163   : > { %v5212_v1 = vpop.f32.mrb[34].mxu0  ;;  %v5214_v2 = vpop.f32.mrb[34].mxu1  ;;  %v4287_v59 = vld [vmem:[%s4917_s28 + $0x394] ss:$12 sps:$4 sm:$0xff]  }
 0x164   : > { %5943 = vst [vmem:[#allocation8_spill] sm:$0xff] %v5214_v2  ;;  %v1760_v9 = vpop.f32.mrb[35].mxu0  ;;  %v2144_v10 = vpop.f32.mrb[35].mxu1  ;;  %v4289_v60 = vld [vmem:[%s4917_s28 + $0x428] ss:$12 sps:$4 sm:$0xff]  }
 0x165   : > { %v4317_v2 = vld [vmem:[%s4917_s28 + $0x424] ss:$12 sps:$4 sm:$0xff]  }
 0x166   : > { %1970 = vmatmul.mubr.bf16.gmra.mrb[140].mxu0 %v4275_v63  ;;  %3964 = vmatmul.mubr.bf16.gmra.mrb[140].mxu1 %v4276_v0 }
 0x167   : > { %1977 = vmatprep.mubr.bf16.mxu0 %v4277_v5  ;;  %3967 = vmatprep.mubr.bf16.mxu1 %v4279_v6 }
 0x169   : > { %v5218_v15 = vpop.f32.mrb[36].mxu0  ;;  %v5220_v16 = vpop.f32.mrb[36].mxu1 }
 0x16a   : > { %5944 = vst [vmem:[#allocation9_spill] sm:$0xff] %v5220_v16  ;;  %v1765_v17 = vpop.f32.mrb[37].mxu0  ;;  %v2149_v18 = vpop.f32.mrb[37].mxu1  ;;  %v4314_v16 = vld [vmem:[%s4917_s28 + $0x518] ss:$12 sps:$4 sm:$0xff]  }
 0x16b   : > { %v5224_v27 = vpop.f32.mrb[38].mxu0  ;;  %v5226_v28 = vpop.f32.mrb[38].mxu1  ;;  %v4290_v17 = vld [vmem:[%s4917_s28 + $0x390] ss:$12 sps:$4 sm:$0xff]   ;;  %v4291_v18 = vld [vmem:[%s4917_s28 + $0x440] ss:$12 sps:$4 sm:$0xff]  }
 0x16c   : > { %5945 = vst [vmem:[#allocation10_spill] sm:$0xff] %v5226_v28  ;;  %v1768_v35 = vpop.f32.mrb[39].mxu0  ;;  %v2152_v36 = vpop.f32.mrb[39].mxu1  ;;  %v4312_v28 = vld [vmem:[%s4917_s28 + $0x40c] ss:$12 sps:$4 sm:$0xff]  }
 0x16e   : > { %1978 = vmatmul.mubr.bf16.gmra.mrb[144].mxu0 %v4280_v23  ;;  %3968 = vmatmul.mubr.bf16.gmra.mrb[144].mxu1 %v4281_v24 }
 0x16f   : > { %1985 = vmatprep.mubr.bf16.mxu0 %v4282_v33  ;;  %3971 = vmatprep.mubr.bf16.mxu1 %v4284_v34  ;;  %v4292_v33 = vld [vmem:[%s4917_s28 + $0x3ac] ss:$12 sps:$4 sm:$0xff]  }
 0x170   : > { %v4294_v34 = vld [vmem:[%s4917_s28 + $0x458] ss:$12 sps:$4 sm:$0xff]  }
 0x171   : > { %v5230_v41 = vpop.f32.mrb[40].mxu0  ;;  %v5232_v42 = vpop.f32.mrb[40].mxu1 }
 0x172   : > { %5946 = vst [vmem:[#allocation11_spill] sm:$0xff] %v5232_v42  ;;  %v1773_v45 = vpop.f32.mrb[41].mxu0  ;;  %v2157_v46 = vpop.f32.mrb[41].mxu1  ;;  %v4311_v42 = vld [vmem:[%s4917_s28 + $0x500] ss:$12 sps:$4 sm:$0xff]  }
 0x173   : > { %v5236_v53 = vpop.f32.mrb[42].mxu0  ;;  %v5238_v54 = vpop.f32.mrb[42].mxu1 }
 0x174   : > { %5947 = vst [vmem:[#allocation12_spill] sm:$0xff] %v5238_v54  ;;  %v1776_v63 = vpop.f32.mrb[43].mxu0  ;;  %v2160_v0 = vpop.f32.mrb[43].mxu1 }
 0x176   : > { %1986 = vmatmul.mubr.bf16.gmra.mrb[148].mxu0 %v4285_v51  ;;  %3972 = vmatmul.mubr.bf16.gmra.mrb[148].mxu1 %v4286_v52 }
 0x177   : > { %1993 = vmatprep.mubr.bf16.mxu0 %v4287_v59  ;;  %3975 = vmatprep.mubr.bf16.mxu1 %v4289_v60  ;;  %v4295_v59 = vld [vmem:[%s4917_s28 + $0x3a8] ss:$12 sps:$4 sm:$0xff]   ;;  %v4296_v60 = vld [vmem:[%s4917_s28 + $0x470] ss:$12 sps:$4 sm:$0xff]  }
 0x179   : > { %v5242_v5 = vpop.f32.mrb[44].mxu0  ;;  %v5244_v6 = vpop.f32.mrb[44].mxu1 }
 0x17a   : > { %5948 = vst [vmem:[#allocation13_spill] sm:$0xff] %v5244_v6  ;;  %v1781_v9 = vpop.f32.mrb[45].mxu0  ;;  %v2165_v10 = vpop.f32.mrb[45].mxu1 }
 0x17b   : > { %v5248_v23 = vpop.f32.mrb[46].mxu0  ;;  %v5250_v24 = vpop.f32.mrb[46].mxu1  ;;  %v4297_v9 = vld [vmem:[%s4917_s28 + $0x3c4] ss:$12 sps:$4 sm:$0xff]   ;;  %v4299_v10 = vld [vmem:[%s4917_s28 + $0x488] ss:$12 sps:$4 sm:$0xff]  }
 0x17c   : > { %5949 = vst [vmem:[#allocation14_spill] sm:$0xff] %v5250_v24  ;;  %v1784_v35 = vpop.f32.mrb[47].mxu0  ;;  %v2168_v36 = vpop.f32.mrb[47].mxu1  ;;  %v4306_v24 = vld [vmem:[%s4917_s28 + $0x4d0] ss:$12 sps:$4 sm:$0xff]  }
 0x17e   : > { %1994 = vmatmul.mubr.bf16.gmra.mrb[152].mxu0 %v4290_v17  ;;  %3976 = vmatmul.mubr.bf16.gmra.mrb[152].mxu1 %v4291_v18 }
 0x17f   : > { %2001 = vmatprep.mubr.bf16.mxu0 %v4292_v33  ;;  %3979 = vmatprep.mubr.bf16.mxu1 %v4294_v34 }
 0x181   : > { %v5254_v45 = vpop.f32.mrb[48].mxu0  ;;  %v5256_v46 = vpop.f32.mrb[48].mxu1 }
 0x182   : > { %5950 = vst [vmem:[#allocation15_spill] sm:$0xff] %v5256_v46  ;;  %v1789_v51 = vpop.f32.mrb[49].mxu0  ;;  %v2173_v52 = vpop.f32.mrb[49].mxu1 }
 0x183   : > { %v5260_v63 = vpop.f32.mrb[50].mxu0  ;;  %v5262_v0 = vpop.f32.mrb[50].mxu1  ;;  %v4300_v51 = vld [vmem:[%s4917_s28 + $0x3c0] ss:$12 sps:$4 sm:$0xff]  }
 0x184   : > { %5951 = vst [vmem:[#allocation16_spill] sm:$0xff] %v5262_v0  ;;  %v1792_v17 = vpop.f32.mrb[51].mxu0  ;;  %v2176_v18 = vpop.f32.mrb[51].mxu1  ;;  %v4301_v52 = vld [vmem:[%s4917_s28 + $0x4a0] ss:$12 sps:$4 sm:$0xff]  }
 0x185   : > { %v4302_v17 = vld [vmem:[%s4917_s28 + $0x3dc] ss:$12 sps:$4 sm:$0xff]  }
 0x186   : > { %2002 = vmatmul.mubr.bf16.gmra.mrb[156].mxu0 %v4295_v59  ;;  %3980 = vmatmul.mubr.bf16.gmra.mrb[156].mxu1 %v4296_v60  ;;  %v4304_v59 = vld [vmem:[%s4917_s28 + $0x4b8] ss:$12 sps:$4 sm:$0xff]  }
 0x187   : > { %2009 = vmatprep.mubr.bf16.mxu0 %v4297_v9  ;;  %3983 = vmatprep.mubr.bf16.mxu1 %v4299_v10 }
 0x189   : > { %v5266_v33 = vpop.f32.mrb[52].mxu0  ;;  %v5268_v34 = vpop.f32.mrb[52].mxu1 }
 0x18a   : > { %5952 = vst [vmem:[#allocation17_spill] sm:$0xff] %v5268_v34  ;;  %v1797_v35 = vpop.f32.mrb[53].mxu0  ;;  %v2181_v36 = vpop.f32.mrb[53].mxu1  ;;  %v4305_v34 = vld [vmem:[%s4917_s28 + $0x3d8] ss:$12 sps:$4 sm:$0xff]  }
 0x18b   : > { %v5272_v0 = vpop.f32.mrb[54].mxu0  ;;  %v5274_v46 = vpop.f32.mrb[54].mxu1 }
 0x18c   : > { %5953 = vst [vmem:[#allocation18_spill] sm:$0xff] %v5274_v46  ;;  %v1800_v60 = vpop.f32.mrb[55].mxu0  ;;  %v2184_v9 = vpop.f32.mrb[55].mxu1 }
 0x18d   : > { %v4307_v60 = vld [vmem:[%s4917_s28 + $0x3f4] ss:$12 sps:$4 sm:$0xff]  }
 0x18e   : > { %2010 = vmatmul.mubr.bf16.gmra.mrb[160].mxu0 %v4300_v51  ;;  %3984 = vmatmul.mubr.bf16.gmra.mrb[160].mxu1 %v4301_v52  ;;  %v4309_v51 = vld [vmem:[%s4917_s28 + $0x4e8] ss:$12 sps:$4 sm:$0xff]  }
 0x18f   : > { %2017 = vmatprep.mubr.bf16.mxu0 %v4302_v17  ;;  %3987 = vmatprep.mubr.bf16.mxu1 %v4304_v59 }
 0x191   : > { %v5278_v10 = vpop.f32.mrb[56].mxu0  ;;  %v5280_v18 = vpop.f32.mrb[56].mxu1 }
 0x192   : > { %5954 = vst [vmem:[#allocation19_spill] sm:$0xff] %v5280_v18  ;;  %v1805_v35 = vpop.f32.mrb[57].mxu0  ;;  %v2189_v36 = vpop.f32.mrb[57].mxu1  ;;  %v4310_v18 = vld [vmem:[%s4917_s28 + $0x3f0] ss:$12 sps:$4 sm:$0xff]  }
 0x193   : > { %v5284_v46 = vpop.f32.mrb[58].mxu0  ;;  %v5286_v54 = vpop.f32.mrb[58].mxu1 }
 0x194   : > { %5955 = vst [vmem:[#allocation20_spill] sm:$0xff] %v5286_v54  ;;  %v1808_v52 = vpop.f32.mrb[59].mxu0  ;;  %v2192_v17 = vpop.f32.mrb[59].mxu1 }
 0x196   : > { %2018 = vmatmul.mubr.bf16.gmra.mrb[164].mxu0 %v4305_v34  ;;  %3988 = vmatmul.mubr.bf16.gmra.mrb[164].mxu1 %v4306_v24  ;;  %v5305_v34 = vld [vmem:[%s5935_s2] ss:$0 sm:$0xff] }
 0x197   : > { %2025 = vmatprep.mubr.bf16.mxu0 %v4307_v60  ;;  %3991 = vmatprep.mubr.bf16.mxu1 %v4309_v51  ;;  %v1700_v60 = vadd.f32 %v5305_v34, %v5122_v19  ;;  %v1692_v51 = vadd.f32 %v5305_v34, %v5110_v7  ;;  %v4319_v7 = vld [vmem:[%s4917_s28 + $0x548] ss:$12 sps:$4 sm:$0xff]  }
 0x199   : > { %v5290_v59 = vpop.f32.mrb[60].mxu0  ;;  %v5292_v9 = vpop.f32.mrb[60].mxu1 }
 0x19a   : > { %5956 = vst [vmem:[#allocation21_spill] sm:$0xff] %v5292_v9  ;;  %v1813_v35 = vpop.f32.mrb[61].mxu0  ;;  %v2197_v36 = vpop.f32.mrb[61].mxu1 }
 0x19b   : > { %v5296_v6 = vpop.f32.mrb[62].mxu0  ;;  %v5298_v54 = vpop.f32.mrb[62].mxu1  ;;  %v1703_v36 = vadd.f32 %v5305_v34, %v5128_v25 }
 0x19c   : > { %5957 = vst [vmem:[#allocation22_spill] sm:$0xff] %v5298_v54  ;;  %v1816_v52 = vpop.f32.mrb[63].mxu0  ;;  %v2200_v24 = vpop.f32.mrb[63].mxu1 }
 0x19e   : > { %2026 = vmatmul.mubr.bf16.gmra.mrb[168].mxu0 %v4310_v18  ;;  %3992 = vmatmul.mubr.bf16.gmra.mrb[168].mxu1 %v4311_v42  ;;  %v4315_v42 = vld [vmem:[%s4917_s28 + $0x408] ss:$12 sps:$4 sm:$0xff]  }
 0x19f   : > { %2033 = vmatprep.mubr.bf16.mxu0 %v4312_v28  ;;  %3995 = vmatprep.mubr.bf16.mxu1 %v4314_v16  ;;  %v4316_v28 = vld [vmem:[%s4917_s28 + $0x530] ss:$12 sps:$4 sm:$0xff]   ;;  %v1695_v16 = vadd.f32 %v5305_v34, %v5116_v13  ;;  %v1716_v13 = vadd.f32 %v5305_v34, %v5146_v43  ;;  %v4320_v43 = vld [vmem:[%s4917_s28 + $0x420] ss:$12 sps:$4 sm:$0xff]  }
 0x1a1   : > { %v5311_v17 = vpop.f32.mrb[64].mxu0  ;;  %v3889_v35 = vpop.f32.mrb[64].mxu1 }
 0x1a2   : > { %v2245_v52 = vadd.f32 %v3889_v35, %v1700_v60  ;;  %v1821_v24 = vpop.f32.mrb[65].mxu0  ;;  %v2236_v18 = vpop.f32.mrb[65].mxu1 }
 0x1a3   : > { %v2237_v54 = vadd.f32 %v2236_v18, %v1692_v51  ;;  %v5319_v9 = vpop.f32.mrb[66].mxu0  ;;  %v3890_v19 = vpop.f32.mrb[66].mxu1  ;;  %v1711_v18 = vadd.f32 %v5305_v34, %v5140_v37 }
 0x1a4   : > { %v2749_v58 = vsub.f32 0.0, %v2245_v52  ;;  %v2248_v48 = vadd.f32 %v3890_v19, %v1703_v36  ;;  %v1824_v40 = vpop.f32.mrb[67].mxu0  ;;  %v2239_v30 = vpop.f32.mrb[67].mxu1  ;;  %v4321_v52 = vld [vmem:[%s4917_s28 + $0x560] ss:$12 sps:$4 sm:$0xff]  }
 0x1a5   : > { %v2747_v22 = vsub.f32 0.0, %v2237_v54  ;;  %v2240_v25 = vadd.f32 %v2239_v30, %v1695_v16  ;;  %v1708_v40 = vadd.f32 %v5305_v34, %v5134_v31  ;;  %v4324_v16 = vld [vmem:[%s4917_s28 + $0x578] ss:$12 sps:$4 sm:$0xff]  }
 0x1a6   : > { %v2879_v60 = vmul.f32 1.442695, %v2749_v58  ;;  %v2750_v35 = vsub.f32 0.0, %v2248_v48  ;;  %2034 = vmatmul.mubr.bf16.gmra.mrb[172].mxu0 %v4315_v42  ;;  %3996 = vmatmul.mubr.bf16.gmra.mrb[172].mxu1 %v4316_v28  ;;  %v1719_v58 = vadd.f32 %v5305_v34, %v5152_v49  ;;  %v4322_v28 = vld [vmem:[%s4917_s28 + $0x43c] ss:$12 sps:$4 sm:$0xff]  }
 0x1a7   : > { %v2875_v24 = vmul.f32 1.442695, %v2747_v22  ;;  %v2748_v12 = vsub.f32 0.0, %v2240_v25  ;;  %2041 = vmatprep.mubr.bf16.mxu0 %v4317_v2  ;;  %3999 = vmatprep.mubr.bf16.mxu1 %v4319_v7 }
 0x1a8   : > { %4337 = vpow2.f32 %v2879_v60  ;;  %v2881_v51 = vmul.f32 1.442695, %v2750_v35 }
 0x1a9   : > { %4339 = vpow2.f32 %v2875_v24  ;;  %v2877_v30 = vmul.f32 1.442695, %v2748_v12  ;;  %v5327_v48 = vpop.f32.mrb[68].mxu0  ;;  %v3893_v22 = vpop.f32.mrb[68].mxu1 }
 0x1aa   : > { %4341 = vpow2.f32 %v2881_v51  ;;  %v2261_v2 = vadd.f32 %v3893_v22, %v1716_v13  ;;  %v1829_v54 = vpop.f32.mrb[69].mxu0  ;;  %v2252_v36 = vpop.f32.mrb[69].mxu1  ;;  %v1724_v22 = vadd.f32 %v5305_v34, %v5158_v55  ;;  %v1727_v55 = vadd.f32 %v5305_v34, %v5164_v61 }
 0x1ab   : > { %4343 = vpow2.f32 %v2877_v30  ;;  %v2253_v31 = vadd.f32 %v2252_v36, %v1708_v40  ;;  %v5335_v42 = vpop.f32.mrb[70].mxu0  ;;  %v3894_v12 = vpop.f32.mrb[70].mxu1  ;;  %v1732_v40 = vadd.f32 %v5305_v34, %v5170_v3  ;;  %v4325_v36 = vld [vmem:[%s4917_s28 + $0x438] ss:$12 sps:$4 sm:$0xff]  }
 0x1ac   : > { %v2753_v19 = vsub.f32 0.0, %v2261_v2  ;;  %v2264_v7 = vadd.f32 %v3894_v12, %v1719_v58  ;;  %v1832_v25 = vpop.f32.mrb[71].mxu0  ;;  %v2255_v49 = vpop.f32.mrb[71].mxu1  ;;  %v4326_v12 = vld [vmem:[%s4917_s28 + $0x590] ss:$12 sps:$4 sm:$0xff]  }
 0x1ad   : > { %v2751_v60 = vsub.f32 0.0, %v2253_v31  ;;  %v2256_v35 = vadd.f32 %v2255_v49, %v1711_v18 }
 0x1ae   : > { %v2887_v24 = vmul.f32 1.442695, %v2753_v19  ;;  %v2754_v13 = vsub.f32 0.0, %v2264_v7  ;;  %2042 = vmatmul.mubr.bf16.gmra.mrb[176].mxu0 %v4320_v43  ;;  %4000 = vmatmul.mubr.bf16.gmra.mrb[176].mxu1 %v4321_v52  ;;  %v1735_v52 = vadd.f32 %v5305_v34, %v5176_v11 }
 0x1af   : > { %v2883_v51 = vmul.f32 1.442695, %v2751_v60  ;;  %v2752_v37 = vsub.f32 0.0, %v2256_v35  ;;  %2049 = vmatprep.mubr.bf16.mxu0 %v4322_v28  ;;  %4003 = vmatprep.mubr.bf16.mxu1 %v4324_v16  ;;  %v4327_v28 = vld [vmem:[%s4917_s28 + $0x454] ss:$12 sps:$4 sm:$0xff]  }
 0x1b0   : > { %4345 = vpow2.f32 %v2887_v24  ;;  %v2889_v30 = vmul.f32 1.442695, %v2754_v13  ;;  %v4329_v60 = vld [vmem:[%s4917_s28 + $0x5a8] ss:$12 sps:$4 sm:$0xff]  }
 0x1b1   : > { %4347 = vpow2.f32 %v2883_v51  ;;  %v2885_v58 = vmul.f32 1.442695, %v2752_v37  ;;  %v5343_v2 = vpop.f32.mrb[72].mxu0  ;;  %v3897_v54 = vpop.f32.mrb[72].mxu1 }
 0x1b2   : > { %v4338_v43 = vpop.eup %4337  ;;  %4349 = vpow2.f32 %v2889_v30  ;;  %v2277_v18 = vadd.f32 %v3897_v54, %v1732_v40  ;;  %v1837_v3 = vpop.f32.mrb[73].mxu0 }
 0x1b3   : > { %v2268_v31 = vpop.f32.mrb[73].mxu1  ;;  %v4340_v16 = vpop.eup %4339  ;;  %v3133_v19 = vadd.f32 1.0, %v4338_v43  ;;  %4351 = vpow2.f32 %v2885_v58 }
 0x1b4   : > { %v2269_v7 = vadd.f32 %v2268_v31, %v1724_v22  ;;  %v5352_v25 = vpop.f32.mrb[74].mxu0  ;;  %v3898_v49 = vpop.f32.mrb[74].mxu1  ;;  %v3131_v24 = vadd.f32 1.0, %v4340_v16  ;;  %v2757_v11 = vsub.f32 0.0, %v2277_v18  ;;  %v1740_v16 = vadd.f32 %v5305_v34, %v5182_v21 }
 0x1b5   : > { %v4342_v35 = vpop.eup %4341  ;;  %v2280_v13 = vadd.f32 %v3898_v49, %v1735_v52  ;;  %v1840_v51 = vpop.f32.mrb[75].mxu0  ;;  %4353 = vrcp.f32 %v3133_v19  ;;  %v1748_v52 = vadd.f32 %v5305_v34, %v5194_v39  ;;  %v4330_v19 = vld [vmem:[%s4917_s28 + $0x450] ss:$12 sps:$4 sm:$0xff]   ;;  %v4331_v39 = vld [vmem:[%s4917_s28 + $0x5c0] ss:$12 sps:$4 sm:$0xff]  }
 0x1b6   : > { %v2271_v37 = vpop.f32.mrb[75].mxu1  ;;  %v4344_v40 = vpop.eup %4343  ;;  %v3134_v30 = vadd.f32 1.0, %v4342_v35  ;;  %v2755_v54 = vsub.f32 0.0, %v2269_v7  ;;  %4355 = vrcp.f32 %v3131_v24  ;;  %v2895_v58 = vmul.f32 1.442695, %v2757_v11  ;;  %2050 = vmatmul.mubr.bf16.gmra.mrb[180].mxu0 %v4325_v36  ;;  %4004 = vmatmul.mubr.bf16.gmra.mrb[180].mxu1 %v4326_v12 }
 0x1b7   : > { %v2272_v3 = vadd.f32 %v2271_v37, %v1727_v55  ;;  %v3132_v61 = vadd.f32 1.0, %v4344_v40  ;;  %v2758_v22 = vsub.f32 0.0, %v2280_v13  ;;  %2057 = vmatprep.mubr.bf16.mxu0 %v4327_v28  ;;  %4007 = vmatprep.mubr.bf16.mxu1 %v4329_v60  ;;  %v4332_v35 = vld [vmem:[%s4917_s28 + $0x46c] ss:$12 sps:$4 sm:$0xff]   ;;  %v1751_v11 = vadd.f32 %v5305_v34, %v5200_v47 }
 0x1b8   : > { %4357 = vrcp.f32 %v3134_v30  ;;  %v2891_v43 = vmul.f32 1.442695, %v2755_v54  ;;  %v4334_v40 = vld [vmem:[%s4917_s28 + $0x5d8] ss:$12 sps:$4 sm:$0xff]   ;;  %v1743_v54 = vadd.f32 %v5305_v34, %v5188_v29 }
 0x1b9   : > { %v2756_v31 = vsub.f32 0.0, %v2272_v3  ;;  %4359 = vrcp.f32 %v3132_v61  ;;  %v2897_v18 = vmul.f32 1.442695, %v2758_v22  ;;  %v5360_v55 = vpop.f32.mrb[76].mxu0  ;;  %v3901_v12 = vpop.f32.mrb[76].mxu1 }
 0x1ba   : > { %4361 = vpow2.f32 %v2895_v58  ;;  %v4346_v28 = vpop.eup %4345  ;;  %v2293_v7 = vadd.f32 %v3901_v12, %v1748_v52  ;;  %v1845_v49 = vpop.f32.mrb[77].mxu0 }
 0x1bb   : > { %v2893_v36 = vmul.f32 1.442695, %v2756_v31  ;;  %4363 = vpow2.f32 %v2891_v43  ;;  %v2284_v60 = vpop.f32.mrb[77].mxu1  ;;  %v4348_v24 = vpop.eup %4347  ;;  %v3137_v21 = vadd.f32 1.0, %v4346_v28  ;;  %v1764_v49 = vadd.f32 %v5305_v34, %v5218_v15 }
 0x1bc   : > { %4365 = vpow2.f32 %v2897_v18  ;;  %v2285_v13 = vadd.f32 %v2284_v60, %v1740_v16  ;;  %v5367_v51 = vpop.f32.mrb[78].mxu0  ;;  %v3902_v37 = vpop.f32.mrb[78].mxu1  ;;  %v3135_v3 = vadd.f32 1.0, %v4348_v24  ;;  %v2761_v61 = vsub.f32 0.0, %v2293_v7 }
 0x1bd   : > { %v4350_v30 = vpop.eup %4349  ;;  %4367 = vpow2.f32 %v2893_v36  ;;  %v1848_v58 = vpop.f32.mrb[79].mxu0  ;;  %v2296_v52 = vadd.f32 %v3902_v37, %v1751_v11 }
 0x1be   : > { %v2287_v22 = vpop.f32.mrb[79].mxu1  ;;  %v4352_v43 = vpop.eup %4351  ;;  %4369 = vrcp.f32 %v3137_v21  ;;  %v3138_v47 = vadd.f32 1.0, %v4350_v30  ;;  %v2759_v31 = vsub.f32 0.0, %v2285_v13  ;;  %v2903_v29 = vmul.f32 1.442695, %v2761_v61  ;;  %2058 = vmatmul.mubr.bf16.gmra.mrb[184].mxu0 %v4330_v19  ;;  %4008 = vmatmul.mubr.bf16.gmra.mrb[184].mxu1 %v4331_v39 }
 0x1bf   : > { %4371 = vrcp.f32 %v3135_v3  ;;  %v3136_v18 = vadd.f32 1.0, %v4352_v43  ;;  %v2288_v16 = vadd.f32 %v2287_v22, %v1743_v54  ;;  %v4354_v36 = vpop.eup %4353  ;;  %v2762_v28 = vsub.f32 0.0, %v2296_v52  ;;  %2065 = vmatprep.mubr.bf16.mxu0 %v4332_v35  ;;  %4011 = vmatprep.mubr.bf16.mxu1 %v4334_v40  ;;  %v4335_v21 = vld [vmem:[%s4917_s28 + $0x468] ss:$12 sps:$4 sm:$0xff]   ;;  %v4336_v54 = vld [vmem:[%s4917_s28 + $0x5f0] ss:$12 sps:$4 sm:$0xff]  }
 0x1c0   : > { %4373 = vrcp.f32 %v3138_v47  ;;  %v2899_v12 = vmul.f32 1.442695, %v2759_v31  ;;  %v4356_v7 = vpop.eup %4355  ;;  %3389 = vst [vmem:[%s5377_s23 + $0x10] sm:$0xff] %v4354_v36  ;;  %v1756_v19 = vadd.f32 %v5305_v34, %v5206_v57  ;;  %v1759_v57 = vadd.f32 %v5305_v34, %v5212_v1 }
 0x1c1   : > { %4375 = vrcp.f32 %v3136_v18  ;;  %v2760_v60 = vsub.f32 0.0, %v2288_v16  ;;  %3387 = vst [vmem:[%s5377_s23] sm:$0xff] %v4356_v7  ;;  %v2905_v39 = vmul.f32 1.442695, %v2762_v28  ;;  %v5385_v11 = vpop.f32.mrb[80].mxu0  ;;  %v3905_v35 = vpop.f32.mrb[80].mxu1  ;;  %v1767_v61 = vadd.f32 %v5305_v34, %v5224_v27 }
 0x1c2   : > { %v4358_v24 = vpop.eup %4357  ;;  %4377 = vpow2.f32 %v2903_v29  ;;  %v2309_v37 = vadd.f32 %v3905_v35, %v1764_v49  ;;  %v1853_v40 = vpop.f32.mrb[81].mxu0 }
 0x1c3   : > { %v4360_v13 = vpop.eup %4359  ;;  %3390 = vst [vmem:[%s5377_s23 + $0x18] sm:$0xff] %v4358_v24  ;;  %4379 = vpow2.f32 %v2899_v12  ;;  %v2901_v15 = vmul.f32 1.442695, %v2760_v60  ;;  %v2300_v30 = vpop.f32.mrb[81].mxu1  ;;  %v1772_v40 = vadd.f32 %v5305_v34, %v5230_v41 }
 0x1c4   : > { %v4362_v3 = vpop.eup %4361  ;;  %3388 = vst [vmem:[%s5377_s23 + $0x8] sm:$0xff] %v4360_v13  ;;  %4381 = vpow2.f32 %v2905_v39  ;;  %v2301_v58 = vadd.f32 %v2300_v30, %v1756_v19  ;;  %v5395_v22 = vpop.f32.mrb[82].mxu0  ;;  %v2765_v52 = vsub.f32 0.0, %v2309_v37  ;;  %v1780_v13 = vadd.f32 %v5305_v34, %v5242_v5 }
 0x1c5   : > { %v3906_v43 = vpop.f32.mrb[82].mxu1  ;;  %v4364_v47 = vpop.eup %4363  ;;  %v3141_v31 = vadd.f32 1.0, %v4362_v3  ;;  %4383 = vpow2.f32 %v2901_v15 }
 0x1c6   : > { %v1856_v18 = vpop.f32.mrb[83].mxu0  ;;  %v2303_v29 = vpop.f32.mrb[83].mxu1  ;;  %v3139_v36 = vadd.f32 1.0, %v4364_v47  ;;  %v2763_v12 = vsub.f32 0.0, %v2301_v58  ;;  %v2312_v1 = vadd.f32 %v3906_v43, %v1767_v61  ;;  %v2911_v49 = vmul.f32 1.442695, %v2765_v52  ;;  %2066 = vmatmul.mubr.bf16.gmra.mrb[188].mxu0 %v4335_v21  ;;  %4012 = vmatmul.mubr.bf16.gmra.mrb[188].mxu1 %v4336_v54 }
 0x1c7   : > { %v4366_v16 = vpop.eup %4365  ;;  %v2304_v28 = vadd.f32 %v2303_v29, %v1759_v57  ;;  %4385 = vrcp.f32 %v3141_v31  ;;  %v1783_v47 = vadd.f32 %v5305_v34, %v5248_v23  ;;  %v1775_v29 = vadd.f32 %v5305_v34, %v5236_v53 }
 0x1c8   : > { %v4368_v7 = vpop.eup %4367  ;;  %v3142_v27 = vadd.f32 1.0, %v4366_v16  ;;  %4387 = vrcp.f32 %v3139_v36  ;;  %v2907_v19 = vmul.f32 1.442695, %v2763_v12  ;;  %v2766_v39 = vsub.f32 0.0, %v2312_v1 }
 0x1c9   : > { %v4370_v60 = vpop.eup %4369  ;;  %v3140_v24 = vadd.f32 1.0, %v4368_v7  ;;  %v2764_v15 = vsub.f32 0.0, %v2304_v28  ;;  %v5403_v30 = vpop.f32.mrb[84].mxu0 }
 0x1ca   : > { %v4372_v35 = vpop.eup %4371  ;;  %3393 = vst [vmem:[%s5377_s23 + $0x30] sm:$0xff] %v4370_v60  ;;  %4389 = vrcp.f32 %v3142_v27  ;;  %v2913_v21 = vmul.f32 1.442695, %v2766_v39  ;;  %v3909_v54 = vpop.f32.mrb[84].mxu1 }
 0x1cb   : > { %v4374_v37 = vpop.eup %4373  ;;  %3391 = vst [vmem:[%s5377_s23 + $0x20] sm:$0xff] %v4372_v35  ;;  %4391 = vrcp.f32 %v3140_v24  ;;  %v2909_v57 = vmul.f32 1.442695, %v2764_v15  ;;  %v2325_v61 = vadd.f32 %v3909_v54, %v1780_v13  ;;  %v1861_v5 = vpop.f32.mrb[85].mxu0  ;;  %v1796_v15 = vadd.f32 %v5305_v34, %v5266_v33 }
 0x1cc   : > { %v4376_v3 = vpop.eup %4375  ;;  %3394 = vst [vmem:[%s5377_s23 + $0x38] sm:$0xff] %v4374_v37  ;;  %4393 = vpow2.f32 %v2911_v49  ;;  %v2316_v58 = vpop.f32.mrb[85].mxu1  ;;  %v1799_v5 = vadd.f32 %v5305_v34, %v5272_v0 }
 0x1cd   : > { %v4378_v43 = vpop.eup %4377  ;;  %3392 = vst [vmem:[%s5377_s23 + $0x28] sm:$0xff] %v4376_v3  ;;  %4395 = vpow2.f32 %v2907_v19  ;;  %v2317_v41 = vadd.f32 %v2316_v58, %v1772_v40  ;;  %v5409_v31 = vpop.f32.mrb[86].mxu0  ;;  %v2769_v36 = vsub.f32 0.0, %v2325_v61 }
 0x1ce   : > { %v3910_v52 = vpop.f32.mrb[86].mxu1  ;;  %v4380_v18 = vpop.eup %4379  ;;  %v3145_v16 = vadd.f32 1.0, %v4378_v43  ;;  %4397 = vpow2.f32 %v2913_v21  ;;  %v1788_v21 = vadd.f32 %v5305_v34, %v5254_v45  ;;  %v1791_v45 = vadd.f32 %v5305_v34, %v5260_v63 }
 0x1cf   : > { %v1864_v12 = vpop.f32.mrb[87].mxu0  ;;  %v2319_v1 = vpop.f32.mrb[87].mxu1  ;;  %v3143_v7 = vadd.f32 1.0, %v4380_v18  ;;  %4399 = vpow2.f32 %v2909_v57  ;;  %v2767_v27 = vsub.f32 0.0, %v2317_v41  ;;  %v2328_v23 = vadd.f32 %v3910_v52, %v1783_v47 }
 0x1d0   : > { %v4382_v28 = vpop.eup %4381  ;;  %4401 = vrcp.f32 %v3145_v16  ;;  %v2919_v24 = vmul.f32 1.442695, %v2769_v36  ;;  %v2320_v19 = vadd.f32 %v2319_v1, %v1775_v29 }
 0x1d1   : > { %v4384_v49 = vpop.eup %4383  ;;  %v3146_v60 = vadd.f32 1.0, %v4382_v28  ;;  %4403 = vrcp.f32 %v3143_v7  ;;  %v2915_v53 = vmul.f32 1.442695, %v2767_v27  ;;  %v2770_v35 = vsub.f32 0.0, %v2328_v23  ;;  %v5418_v3 = vpop.f32.mrb[88].mxu0 }
 0x1d2   : > { %v3144_v39 = vadd.f32 1.0, %v4384_v49  ;;  %v4386_v13 = vpop.eup %4385  ;;  %v2768_v37 = vsub.f32 0.0, %v2320_v19  ;;  %v3913_v57 = vpop.f32.mrb[88].mxu1 }
 0x1d3   : > { %4405 = vrcp.f32 %v3146_v60  ;;  %v4388_v40 = vpop.eup %4387  ;;  %3397 = vst [vmem:[%s5377_s23 + $0x50] sm:$0xff] %v4386_v13  ;;  %v2921_v54 = vmul.f32 1.442695, %v2770_v35  ;;  %v2341_v58 = vadd.f32 %v3913_v57, %v1796_v15  ;;  %v1869_v43 = vpop.f32.mrb[89].mxu0  ;;  %v1812_v13 = vadd.f32 %v5305_v34, %v5290_v59 }
 0x1d4   : > { %4407 = vrcp.f32 %v3144_v39  ;;  %v4390_v61 = vpop.eup %4389  ;;  %3395 = vst [vmem:[%s5377_s23 + $0x40] sm:$0xff] %v4388_v40  ;;  %v2917_v33 = vmul.f32 1.442695, %v2768_v37  ;;  %v2332_v47 = vpop.f32.mrb[89].mxu1 }
 0x1d5   : > { %4409 = vpow2.f32 %v2919_v24  ;;  %v4392_v41 = vpop.eup %4391  ;;  %3398 = vst [vmem:[%s5377_s23 + $0x58] sm:$0xff] %v4390_v61  ;;  %v2333_v52 = vadd.f32 %v2332_v47, %v1788_v21  ;;  %v5426_v18 = vpop.f32.mrb[90].mxu0  ;;  %v2773_v0 = vsub.f32 0.0, %v2341_v58  ;;  %v1804_v21 = vadd.f32 %v5305_v34, %v5278_v10 }
 0x1d6   : > { %4411 = vpow2.f32 %v2915_v53  ;;  %v3914_v29 = vpop.f32.mrb[90].mxu1  ;;  %v4394_v16 = vpop.eup %4393  ;;  %3396 = vst [vmem:[%s5377_s23 + $0x48] sm:$0xff] %v4392_v41  ;;  %v1807_v10 = vadd.f32 %v5305_v34, %v5284_v46 }
 0x1d7   : > { %4413 = vpow2.f32 %v2921_v54  ;;  %v2344_v36 = vadd.f32 %v3914_v29, %v1799_v5  ;;  %v1872_v12 = vpop.f32.mrb[91].mxu0  ;;  %v2335_v1 = vpop.f32.mrb[91].mxu1  ;;  %v3149_v7 = vadd.f32 1.0, %v4394_v16  ;;  %v2771_v27 = vsub.f32 0.0, %v2333_v52 }
 0x1d8   : > { %v4396_v28 = vpop.eup %4395  ;;  %4415 = vpow2.f32 %v2917_v33  ;;  %v2336_v23 = vadd.f32 %v2335_v1, %v1791_v45  ;;  %v2927_v39 = vmul.f32 1.442695, %v2773_v0  ;;  %v1815_v33 = vadd.f32 %v5305_v34, %v5296_v6 }
 0x1d9   : > { %v4398_v63 = vpop.eup %4397  ;;  %v3147_v49 = vadd.f32 1.0, %v4396_v28  ;;  %v2774_v60 = vsub.f32 0.0, %v2344_v36  ;;  %4417 = vrcp.f32 %v3149_v7  ;;  %v2923_v37 = vmul.f32 1.442695, %v2771_v27  ;;  %v5434_v57 = vpop.f32.mrb[92].mxu0 }
 0x1da   : > { %v4400_v24 = vpop.eup %4399  ;;  %v3150_v19 = vadd.f32 1.0, %v4398_v63  ;;  %v2772_v53 = vsub.f32 0.0, %v2336_v23  ;;  %v3917_v61 = vpop.f32.mrb[92].mxu1 }
 0x1db   : > { %v4402_v35 = vpop.eup %4401  ;;  %4419 = vrcp.f32 %v3147_v49  ;;  %v3148_v15 = vadd.f32 1.0, %v4400_v24  ;;  %v2929_v54 = vmul.f32 1.442695, %v2774_v60  ;;  %v2357_v58 = vadd.f32 %v3917_v61, %v1812_v13  ;;  %v1877_v43 = vpop.f32.mrb[93].mxu0 }
 0x1dc   : > { %v4404_v40 = vpop.eup %4403  ;;  %3401 = vst [vmem:[%s5377_s23 + $0x70] sm:$0xff] %v4402_v35  ;;  %4421 = vrcp.f32 %v3150_v19  ;;  %v2925_v59 = vmul.f32 1.442695, %v2772_v53  ;;  %v2348_v47 = vpop.f32.mrb[93].mxu1  ;;  %v1831_v61 = vadd.f32 %v5305_v34, %v5335_v42 }
 0x1dd   : > { %v4406_v5 = vpop.eup %4405  ;;  %3399 = vst [vmem:[%s5377_s23 + $0x60] sm:$0xff] %v4404_v40  ;;  %4423 = vrcp.f32 %v3148_v15  ;;  %v2349_v45 = vadd.f32 %v2348_v47, %v1804_v21  ;;  %v5442_v52 = vpop.f32.mrb[94].mxu0  ;;  %v2777_v6 = vsub.f32 0.0, %v2357_v58  ;;  %v1820_v15 = vadd.f32 %v5305_v34, %v5311_v17 }
 0x1de   : > { %v4408_v41 = vpop.eup %4407  ;;  %3402 = vst [vmem:[%s5377_s23 + $0x78] sm:$0xff] %v4406_v5  ;;  %4425 = vpow2.f32 %v2927_v39  ;;  %v3918_v29 = vpop.f32.mrb[94].mxu1  ;;  %v1828_v39 = vadd.f32 %v5305_v34, %v5327_v48  ;;  %v1823_v17 = vadd.f32 %v5305_v34, %v5319_v9 }
 0x1df   : > { %v4410_v16 = vpop.eup %4409  ;;  %3400 = vst [vmem:[%s5377_s23 + $0x68] sm:$0xff] %v4408_v41  ;;  %4427 = vpow2.f32 %v2923_v37  ;;  %v2360_v0 = vadd.f32 %v3918_v29, %v1815_v33  ;;  %v1880_v36 = vpop.f32.mrb[95].mxu0  ;;  %v2775_v7 = vsub.f32 0.0, %v2349_v45  ;;  %v2935_v24 = vmul.f32 1.442695, %v2777_v6 }
 0x1e0   : > { %v2351_v12 = vpop.f32.mrb[95].mxu1  ;;  %v4412_v1 = vpop.eup %4411  ;;  %v3153_v28 = vadd.f32 1.0, %v4410_v16  ;;  %4429 = vpow2.f32 %v2929_v54 }
 0x1e1   : > { %v2352_v27 = vadd.f32 %v2351_v12, %v1807_v10  ;;  %v4414_v23 = vpop.eup %4413  ;;  %v3151_v46 = vadd.f32 1.0, %v4412_v1  ;;  %4431 = vpow2.f32 %v2925_v59  ;;  %v2778_v63 = vsub.f32 0.0, %v2360_v0  ;;  %v5449_v40 = vpop.f32.mrb[96].mxu0 }
 0x1e2   : > { %v4416_v49 = vpop.eup %4415  ;;  %4433 = vrcp.f32 %v3153_v28  ;;  %v3154_v60 = vadd.f32 1.0, %v4414_v23  ;;  %v2931_v35 = vmul.f32 1.442695, %v2775_v7  ;;  %v3921_v21 = vpop.f32.mrb[96].mxu1 }
 0x1e3   : > { %v2776_v19 = vsub.f32 0.0, %v2352_v27  ;;  %4435 = vrcp.f32 %v3151_v46  ;;  %v3152_v53 = vadd.f32 1.0, %v4416_v49  ;;  %v4418_v13 = vpop.eup %4417  ;;  %v2937_v37 = vmul.f32 1.442695, %v2778_v63  ;;  %v1885_v33 = vpop.f32.mrb[97].mxu0 }
 0x1e4   : > { %4437 = vrcp.f32 %v3154_v60  ;;  %3405 = vst [vmem:[%s5377_s23 + $0x90] sm:$0xff] %v4418_v13  ;;  %v2373_v5 = vadd.f32 %v3921_v21, %v1828_v39  ;;  %v2364_v59 = vpop.f32.mrb[97].mxu1  ;;  %v5457_v47 = vpop.f32.mrb[98].mxu0  ;;  %v1844_v46 = vadd.f32 %v5305_v34, %v5360_v55 }
 0x1e5   : > { %v4420_v54 = vpop.eup %4419  ;;  %4439 = vrcp.f32 %v3152_v53  ;;  %v2933_v48 = vmul.f32 1.442695, %v2776_v19  ;;  %v2365_v43 = vadd.f32 %v2364_v59, %v1820_v15  ;;  %v3922_v41 = vpop.f32.mrb[98].mxu1  ;;  %v1847_v15 = vadd.f32 %v5305_v34, %v5367_v51 }
 0x1e6   : > { %v4422_v58 = vpop.eup %4421  ;;  %3403 = vst [vmem:[%s5377_s23 + $0x80] sm:$0xff] %v4420_v54  ;;  %4441 = vpow2.f32 %v2935_v24  ;;  %v2781_v42 = vsub.f32 0.0, %v2373_v5  ;;  %v2376_v45 = vadd.f32 %v3922_v41, %v1831_v61  ;;  %v1888_v29 = vpop.f32.mrb[99].mxu0  ;;  %v1836_v24 = vadd.f32 %v5305_v34, %v5343_v2 }
 0x1e7   : > { %v4424_v10 = vpop.eup %4423  ;;  %3406 = vst [vmem:[%s5377_s23 + $0x98] sm:$0xff] %v4422_v58  ;;  %4443 = vpow2.f32 %v2931_v35  ;;  %v2367_v16 = vpop.f32.mrb[99].mxu1  ;;  %v2779_v0 = vsub.f32 0.0, %v2365_v43  ;;  %v1839_v2 = vadd.f32 %v5305_v34, %v5352_v25 }
 0x1e8   : > { %v4426_v6 = vpop.eup %4425  ;;  %3404 = vst [vmem:[%s5377_s23 + $0x88] sm:$0xff] %v4424_v10  ;;  %4445 = vpow2.f32 %v2937_v37  ;;  %v2368_v36 = vadd.f32 %v2367_v16, %v1823_v17  ;;  %v2782_v1 = vsub.f32 0.0, %v2376_v45  ;;  %v2943_v49 = vmul.f32 1.442695, %v2781_v42 }
 0x1e9   : > { %v4428_v12 = vpop.eup %4427  ;;  %v3157_v9 = vadd.f32 1.0, %v4426_v6  ;;  %4447 = vpow2.f32 %v2933_v48  ;;  %v2939_v39 = vmul.f32 1.442695, %v2779_v0  ;;  %v5465_v53 = vpop.f32.mrb[100].mxu0 }
 0x1ea   : > { %v4430_v28 = vpop.eup %4429  ;;  %v3155_v7 = vadd.f32 1.0, %v4428_v12  ;;  %v2780_v27 = vsub.f32 0.0, %v2368_v36  ;;  %v3925_v35 = vpop.f32.mrb[100].mxu1  ;;  %v2945_v55 = vmul.f32 1.442695, %v2782_v1 }
 0x1eb   : > { %v4432_v23 = vpop.eup %4431  ;;  %4449 = vrcp.f32 %v3157_v9  ;;  %v3158_v63 = vadd.f32 1.0, %v4430_v28  ;;  %v2389_v37 = vadd.f32 %v3925_v35, %v1844_v46  ;;  %v1893_v21 = vpop.f32.mrb[101].mxu0  ;;  %v1860_v9 = vadd.f32 %v5305_v34, %v5403_v30 }
 0x1ec   : > { %v4434_v60 = vpop.eup %4433  ;;  %4451 = vrcp.f32 %v3155_v7  ;;  %v3156_v19 = vadd.f32 1.0, %v4432_v23  ;;  %v2380_v54 = vpop.f32.mrb[101].mxu1  ;;  %v2941_v48 = vmul.f32 1.442695, %v2780_v27  ;;  %v1852_v7 = vadd.f32 %v5305_v34, %v5385_v11 }
 0x1ed   : > { %v4436_v13 = vpop.eup %4435  ;;  %3409 = vst [vmem:[%s5377_s23 + $0xb0] sm:$0xff] %v4434_v60  ;;  %4453 = vrcp.f32 %v3158_v63  ;;  %v2381_v5 = vadd.f32 %v2380_v54, %v1836_v24  ;;  %v5473_v33 = vpop.f32.mrb[102].mxu0  ;;  %v2785_v58 = vsub.f32 0.0, %v2389_v37  ;;  %v1863_v60 = vadd.f32 %v5305_v34, %v5409_v31 }
 0x1ee   : > { %v4438_v61 = vpop.eup %4437  ;;  %3407 = vst [vmem:[%s5377_s23 + $0xa0] sm:$0xff] %v4436_v13  ;;  %4455 = vrcp.f32 %v3156_v19  ;;  %v3926_v59 = vpop.f32.mrb[102].mxu1  ;;  %v1855_v11 = vadd.f32 %v5305_v34, %v5395_v22 }
 0x1ef   : > { %v4440_v51 = vpop.eup %4439  ;;  %3410 = vst [vmem:[%s5377_s23 + $0xb8] sm:$0xff] %v4438_v61  ;;  %4457 = vpow2.f32 %v2943_v49  ;;  %v2392_v17 = vadd.f32 %v3926_v59, %v1847_v15  ;;  %v1896_v43 = vpop.f32.mrb[103].mxu0  ;;  %v2783_v42 = vsub.f32 0.0, %v2381_v5  ;;  %v2951_v28 = vmul.f32 1.442695, %v2785_v58 }
 0x1f0   : > { %v2383_v41 = vpop.f32.mrb[103].mxu1  ;;  %v4442_v10 = vpop.eup %4441  ;;  %3408 = vst [vmem:[%s5377_s23 + $0xa8] sm:$0xff] %v4440_v51  ;;  %4459 = vpow2.f32 %v2939_v39 }
 0x1f1   : > { %v2384_v45 = vadd.f32 %v2383_v41, %v1839_v2  ;;  %v4444_v25 = vpop.eup %4443  ;;  %v3161_v29 = vadd.f32 1.0, %v4442_v10  ;;  %4461 = vpow2.f32 %v2945_v55  ;;  %v2786_v16 = vsub.f32 0.0, %v2392_v17  ;;  %v5481_v46 = vpop.f32.mrb[104].mxu0 }
 0x1f2   : > { %v4446_v6 = vpop.eup %4445  ;;  %v3159_v0 = vadd.f32 1.0, %v4444_v25  ;;  %4463 = vpow2.f32 %v2941_v48  ;;  %v2947_v23 = vmul.f32 1.442695, %v2783_v42  ;;  %v3929_v63 = vpop.f32.mrb[104].mxu1  ;;  %v1868_v42 = vadd.f32 %v5305_v34, %v5418_v3 }
 0x1f3   : > { %v2784_v36 = vsub.f32 0.0, %v2384_v45  ;;  %v4448_v12 = vpop.eup %4447  ;;  %4465 = vrcp.f32 %v3161_v29  ;;  %v3162_v1 = vadd.f32 1.0, %v4446_v6  ;;  %v2953_v30 = vmul.f32 1.442695, %v2786_v16  ;;  %v1901_v19 = vpop.f32.mrb[105].mxu0 }
 0x1f4   : > { %4467 = vrcp.f32 %v3159_v0  ;;  %v3160_v27 = vadd.f32 1.0, %v4448_v12  ;;  %v2405_v24 = vadd.f32 %v3929_v63, %v1860_v9  ;;  %v2396_v39 = vpop.f32.mrb[105].mxu1  ;;  %v5488_v55 = vpop.f32.mrb[106].mxu0  ;;  %v1876_v45 = vadd.f32 %v5305_v34, %v5434_v57 }
 0x1f5   : > { %v4450_v49 = vpop.eup %4449  ;;  %4469 = vrcp.f32 %v3162_v1  ;;  %v2949_v13 = vmul.f32 1.442695, %v2784_v36  ;;  %v2397_v15 = vadd.f32 %v2396_v39, %v1852_v7  ;;  %v3930_v37 = vpop.f32.mrb[106].mxu1  ;;  %v1879_v16 = vadd.f32 %v5305_v34, %v5442_v52  ;;  %v5504_v34 = vld [vmem:[%s5935_s2] ss:$0 sm:$0xff] }
 0x1f6   : > { %v4452_v35 = vpop.eup %4451  ;;  %3413 = vst [vmem:[%s5377_s23 + $0xd0] sm:$0xff] %v4450_v49  ;;  %4471 = vrcp.f32 %v3160_v27  ;;  %v2789_v31 = vsub.f32 0.0, %v2405_v24  ;;  %v2408_v54 = vadd.f32 %v3930_v37, %v1863_v60  ;;  %v1904_v61 = vpop.f32.mrb[107].mxu0  ;;  %v1871_v52 = vadd.f32 %v5504_v34, %v5426_v18 }
 0x1f7   : > { %v4454_v21 = vpop.eup %4453  ;;  %3411 = vst [vmem:[%s5377_s23 + $0xc0] sm:$0xff] %v4452_v35  ;;  %4473 = vpow2.f32 %v2951_v28  ;;  %v2399_v2 = vpop.f32.mrb[107].mxu1  ;;  %v2787_v5 = vsub.f32 0.0, %v2397_v15 }
 0x1f8   : > { %v4456_v48 = vpop.eup %4455  ;;  %3414 = vst [vmem:[%s5377_s23 + $0xd8] sm:$0xff] %v4454_v21  ;;  %4475 = vpow2.f32 %v2947_v23  ;;  %v2400_v22 = vadd.f32 %v2399_v2, %v1855_v11  ;;  %v2959_v51 = vmul.f32 1.442695, %v2789_v31  ;;  %v2790_v58 = vsub.f32 0.0, %v2408_v54 }
 0x1f9   : > { %v4458_v59 = vpop.eup %4457  ;;  %3412 = vst [vmem:[%s5377_s23 + $0xc8] sm:$0xff] %v4456_v48  ;;  %4477 = vpow2.f32 %v2953_v30  ;;  %v2955_v0 = vmul.f32 1.442695, %v2787_v5  ;;  %v5499_v36 = vpop.f32.mrb[108].mxu0  ;;  %v1884_v31 = vadd.f32 %v5504_v34, %v5449_v40  ;;  %v1892_v48 = vadd.f32 %v5504_v34, %v5465_v53 }
 0x1fa   : > { %v4460_v17 = vpop.eup %4459  ;;  %v3165_v43 = vadd.f32 1.0, %v4458_v59  ;;  %4479 = vpow2.f32 %v2949_v13  ;;  %v2788_v41 = vsub.f32 0.0, %v2400_v22  ;;  %v3933_v12 = vpop.f32.mrb[108].mxu1  ;;  %v2961_v1 = vmul.f32 1.442695, %v2790_v58 }
 0x1fb   : > { %v4462_v10 = vpop.eup %4461  ;;  %v3163_v25 = vadd.f32 1.0, %v4460_v17  ;;  %4481 = vpow2.f32 %v2959_v51  ;;  %v2421_v28 = vadd.f32 %v3933_v12, %v1876_v45  ;;  %v1909_v57 = vpop.f32.mrb[109].mxu0  ;;  %v1887_v51 = vadd.f32 %v5504_v34, %v5457_v47 }
 0x1fc   : > { %v4464_v29 = vpop.eup %4463  ;;  %4483 = vrcp.f32 %v3165_v43  ;;  %v3166_v6 = vadd.f32 1.0, %v4462_v10  ;;  %v2412_v7 = vpop.f32.mrb[109].mxu1  ;;  %v2957_v23 = vmul.f32 1.442695, %v2788_v41  ;;  %v1895_v58 = vadd.f32 %v5504_v34, %v5473_v33 }
 0x1fd   : > { %v4466_v9 = vpop.eup %4465  ;;  %4485 = vrcp.f32 %v3163_v25  ;;  %v3164_v3 = vadd.f32 1.0, %v4464_v29  ;;  %v2413_v63 = vadd.f32 %v2412_v7, %v1868_v42  ;;  %v5509_v49 = vpop.f32.mrb[110].mxu0  ;;  %v2793_v24 = vsub.f32 0.0, %v2421_v28 }
 0x1fe   : > { %v4468_v27 = vpop.eup %4467  ;;  %3417 = vst [vmem:[%s5377_s23 + $0xf0] sm:$0xff] %v4466_v9  ;;  %4487 = vrcp.f32 %v3166_v6  ;;  %v3934_v60 = vpop.f32.mrb[110].mxu1 }
 0x1ff   : > { %v4470_v30 = vpop.eup %4469  ;;  %3415 = vst [vmem:[%s5377_s23 + $0xe0] sm:$0xff] %v4468_v27  ;;  %4489 = vrcp.f32 %v3164_v3  ;;  %v2424_v19 = vadd.f32 %v3934_v60, %v1879_v16  ;;  %v1912_v39 = vpop.f32.mrb[111].mxu0  ;;  %v2967_v15 = vmul.f32 1.442695, %v2793_v24  ;;  %v2791_v37 = vsub.f32 0.0, %v2413_v63 }
 0x200   : > { %v2415_v35 = vpop.f32.mrb[111].mxu1  ;;  %v4472_v11 = vpop.eup %4471  ;;  %3418 = vst [vmem:[%s5377_s23 + $0xf8] sm:$0xff] %v4470_v30  ;;  %4491 = vpow2.f32 %v2955_v0  ;;  %v1900_v30 = vadd.f32 %v5504_v34, %v5481_v46 }
 0x201   : > { %v2416_v13 = vadd.f32 %v2415_v35, %v1871_v52  ;;  %v4474_v18 = vpop.eup %4473  ;;  %3416 = vst [vmem:[%s5377_s23 + $0xe8] sm:$0xff] %v4472_v11  ;;  %4493 = vpow2.f32 %v2961_v1  ;;  %v2794_v61 = vsub.f32 0.0, %v2424_v19  ;;  %v5522_v40 = vpop.f32.mrb[112].mxu0  ;;  %v2963_v53 = vmul.f32 1.442695, %v2791_v37 }
 0x202   : > { %v4476_v21 = vpop.eup %4475  ;;  %v3169_v54 = vadd.f32 1.0, %v4474_v18  ;;  %4495 = vpow2.f32 %v2957_v23  ;;  %v3937_v43 = vpop.f32.mrb[112].mxu1  ;;  %v1908_v35 = vadd.f32 %v5504_v34, %v5499_v36  ;;  %v1903_v18 = vadd.f32 %v5504_v34, %v5488_v55 }
 0x203   : > { %v4478_v2 = vpop.eup %4477  ;;  %v3167_v5 = vadd.f32 1.0, %v4476_v21  ;;  %4497 = vpow2.f32 %v2967_v15  ;;  %v2792_v22 = vsub.f32 0.0, %v2416_v13  ;;  %v2437_v42 = vadd.f32 %v3937_v43, %v1892_v48  ;;  %v1917_v45 = vpop.f32.mrb[113].mxu0 }
 0x204   : > { %v4480_v59 = vpop.eup %4479  ;;  %4499 = vrcp.f32 %v3169_v54  ;;  %v3170_v17 = vadd.f32 1.0, %v4478_v2  ;;  %v2428_v25 = vpop.f32.mrb[113].mxu1  ;;  %v2969_v16 = vmul.f32 1.442695, %v2794_v61  ;;  %v1911_v37 = vadd.f32 %v5504_v34, %v5509_v49 }
 0x205   : > { %v4482_v41 = vpop.eup %4481  ;;  %4501 = vrcp.f32 %v3167_v5  ;;  %v3168_v10 = vadd.f32 1.0, %v4480_v59  ;;  %v2429_v6 = vadd.f32 %v2428_v25, %v1884_v31  ;;  %v5524_v33 = vpop.f32.mrb[114].mxu0  ;;  %v2965_v9 = vmul.f32 1.442695, %v2792_v22 }
 0x206   : > { %v4484_v29 = vpop.eup %4483  ;;  %4503 = vrcp.f32 %v3170_v17  ;;  %v3173_v47 = vadd.f32 1.0, %v4482_v41  ;;  %v3938_v0 = vpop.f32.mrb[114].mxu1  ;;  %v2797_v3 = vsub.f32 0.0, %v2437_v42 }
 0x207   : > { %v4486_v12 = vpop.eup %4485  ;;  %3421 = vst [vmem:[%s5377_s23 + $0x110] sm:$0xff] %v4484_v29  ;;  %4505 = vrcp.f32 %v3168_v10  ;;  %v2440_v1 = vadd.f32 %v3938_v0, %v1895_v58  ;;  %v1920_v28 = vpop.f32.mrb[115].mxu0  ;;  %v2795_v63 = vsub.f32 0.0, %v2429_v6 }
 0x208   : > { %v2431_v57 = vpop.f32.mrb[115].mxu1  ;;  %v4488_v7 = vpop.eup %4487  ;;  %3419 = vst [vmem:[%s5377_s23 + $0x100] sm:$0xff] %v4486_v12  ;;  %4507 = vrcp.f32 %v3173_v47  ;;  %v2975_v23 = vmul.f32 1.442695, %v2797_v3 }
 0x209   : > { %v2432_v27 = vadd.f32 %v2431_v57, %v1887_v51  ;;  %v4490_v52 = vpop.eup %4489  ;;  %3422 = vst [vmem:[%s5377_s23 + $0x118] sm:$0xff] %v4488_v7  ;;  %4509 = vpow2.f32 %v2963_v53  ;;  %v2798_v24 = vsub.f32 0.0, %v2440_v1  ;;  %v1923_v21 = vpop.f32.mrb[116].mxu0  ;;  %v2971_v61 = vmul.f32 1.442695, %v2795_v63 }
 0x20a   : > { %v4492_v60 = vpop.eup %4491  ;;  %3420 = vst [vmem:[%s5377_s23 + $0x108] sm:$0xff] %v4490_v52  ;;  %4511 = vpow2.f32 %v2969_v16  ;;  %v3941_v46 = vpop.f32.mrb[116].mxu1  ;;  %v1916_v57 = vadd.f32 %v5504_v34, %v5522_v40  ;;  %v1919_v7 = vadd.f32 %v5504_v34, %v5524_v33 }
 0x20b   : > { %v4494_v19 = vpop.eup %4493  ;;  %v3171_v39 = vadd.f32 1.0, %v4492_v60  ;;  %4513 = vpow2.f32 %v2965_v9  ;;  %v2796_v11 = vsub.f32 0.0, %v2432_v27  ;;  %v2453_v2 = vadd.f32 %v3941_v46, %v1908_v35  ;;  %v1925_v36 = vpop.f32.mrb[117].mxu0 }
 0x20c   : > { %v4496_v13 = vpop.eup %4495  ;;  %v3174_v15 = vadd.f32 1.0, %v4494_v19  ;;  %4515 = vpow2.f32 %v2975_v23  ;;  %v2444_v48 = vpop.f32.mrb[117].mxu1  ;;  %v2977_v55 = vmul.f32 1.442695, %v2798_v24  ;;  %v1924_v9 = vadd.f32 %v5504_v34, %v1923_v21 }
 0x20d   : > { %v4498_v31 = vpop.eup %4497  ;;  %4517 = vrcp.f32 %v3171_v39  ;;  %v3172_v54 = vadd.f32 1.0, %v4496_v13  ;;  %v2445_v59 = vadd.f32 %v2444_v48, %v1900_v30  ;;  %v1926_v51 = vpop.f32.mrb[118].mxu0  ;;  %v2973_v17 = vmul.f32 1.442695, %v2796_v11 }
 0x20e   : > { %v4500_v5 = vpop.eup %4499  ;;  %4519 = vrcp.f32 %v3174_v15  ;;  %v3177_v22 = vadd.f32 1.0, %v4498_v31  ;;  %v3942_v49 = vpop.f32.mrb[118].mxu1  ;;  %v2801_v43 = vsub.f32 0.0, %v2453_v2  ;;  %v1927_v60 = vadd.f32 %v5504_v34, %v1926_v51 }
 0x20f   : > { %v4502_v58 = vpop.eup %4501  ;;  %3425 = vst [vmem:[%s5377_s23 + $0x130] sm:$0xff] %v4500_v5  ;;  %4521 = vrcp.f32 %v3172_v54  ;;  %v2456_v41 = vadd.f32 %v3942_v49, %v1911_v37  ;;  %v1928_v10 = vpop.f32.mrb[119].mxu0  ;;  %v2799_v45 = vsub.f32 0.0, %v2445_v59 }
 0x210   : > { %v2447_v53 = vpop.f32.mrb[119].mxu1  ;;  %v4504_v42 = vpop.eup %4503  ;;  %3423 = vst [vmem:[%s5377_s23 + $0x120] sm:$0xff] %v4502_v58  ;;  %4523 = vrcp.f32 %v3177_v22  ;;  %v2983_v47 = vmul.f32 1.442695, %v2801_v43 }
 0x211   : > { %v2448_v25 = vadd.f32 %v2447_v53, %v1903_v18  ;;  %v4506_v29 = vpop.eup %4505  ;;  %3426 = vst [vmem:[%s5377_s23 + $0x138] sm:$0xff] %v4504_v42  ;;  %4525 = vpow2.f32 %v2971_v61  ;;  %v2979_v6 = vmul.f32 1.442695, %v2799_v45  ;;  %v2802_v0 = vsub.f32 0.0, %v2456_v41  ;;  %v1931_v27 = vpop.f32.mrb[120].mxu0 }
 0x212   : > { %v4508_v16 = vpop.eup %4507  ;;  %3424 = vst [vmem:[%s5377_s23 + $0x128] sm:$0xff] %v4506_v29  ;;  %4527 = vpow2.f32 %v2977_v55  ;;  %v3945_v52 = vpop.f32.mrb[120].mxu1  ;;  %v1932_v53 = vadd.f32 %v5504_v34, %v1931_v27 }
 0x213   : > { %v4510_v12 = vpop.eup %4509  ;;  %3429 = vst [vmem:[%s5377_s23 + $0x150] sm:$0xff] %v4508_v16  ;;  %4529 = vpow2.f32 %v2973_v17  ;;  %v2800_v3 = vsub.f32 0.0, %v2448_v25  ;;  %v2469_v30 = vadd.f32 %v3945_v52, %v1924_v9  ;;  %v1933_v24 = vpop.f32.mrb[121].mxu0  ;;  %v2985_v11 = vmul.f32 1.442695, %v2802_v0 }
 0x214   : > { %v4512_v1 = vpop.eup %4511  ;;  %v3175_v28 = vadd.f32 1.0, %v4510_v12  ;;  %4531 = vpow2.f32 %v2983_v47  ;;  %v2460_v19 = vpop.f32.mrb[121].mxu1 }
 0x215   : > { %v4514_v23 = vpop.eup %4513  ;;  %v3178_v63 = vadd.f32 1.0, %v4512_v1  ;;  %4533 = vpow2.f32 %v2979_v6  ;;  %v2461_v40 = vadd.f32 %v2460_v19, %v1916_v57  ;;  %v1934_v13 = vpop.f32.mrb[122].mxu0  ;;  %v2981_v37 = vmul.f32 1.442695, %v2800_v3 }
 0x216   : > { %v4516_v39 = vpop.eup %4515  ;;  %4535 = vrcp.f32 %v3175_v28  ;;  %v3176_v35 = vadd.f32 1.0, %v4514_v23  ;;  %v3946_v33 = vpop.f32.mrb[122].mxu1  ;;  %v2805_v21 = vsub.f32 0.0, %v2469_v30  ;;  %v1935_v16 = vadd.f32 %v5504_v34, %v1934_v13 }
 0x217   : > { %v4518_v18 = vpop.eup %4517  ;;  %4537 = vrcp.f32 %v3178_v63  ;;  %v3181_v15 = vadd.f32 1.0, %v4516_v39  ;;  %v1936_v46 = vpop.f32.mrb[123].mxu0  ;;  %v2803_v61 = vsub.f32 0.0, %v2461_v40  ;;  %v2472_v2 = vadd.f32 %v3946_v33, %v1927_v60 }
 0x218   : > { %v2463_v31 = vpop.f32.mrb[123].mxu1  ;;  %v4520_v54 = vpop.eup %4519  ;;  %3427 = vst [vmem:[%s5377_s23 + $0x140] sm:$0xff] %v4518_v18  ;;  %4539 = vrcp.f32 %v3176_v35  ;;  %v2991_v5 = vmul.f32 1.442695, %v2805_v21 }
 0x219   : > { %v2464_v36 = vadd.f32 %v2463_v31, %v1919_v7  ;;  %v4522_v48 = vpop.eup %4521  ;;  %3430 = vst [vmem:[%s5377_s23 + $0x158] sm:$0xff] %v4520_v54  ;;  %4541 = vrcp.f32 %v3181_v15  ;;  %v2987_v55 = vmul.f32 1.442695, %v2803_v61  ;;  %v2806_v59 = vsub.f32 0.0, %v2472_v2  ;;  %v1939_v43 = vpop.f32.mrb[124].mxu0 }
 0x21a   : > { %v4524_v22 = vpop.eup %4523  ;;  %3428 = vst [vmem:[%s5377_s23 + $0x148] sm:$0xff] %v4522_v48  ;;  %4543 = vpow2.f32 %v2985_v11  ;;  %v1940_v42 = vadd.f32 %v5504_v34, %v1939_v43  ;;  %v3949_v45 = vpop.f32.mrb[124].mxu1 }
 0x21b   : > { %v4526_v51 = vpop.eup %4525  ;;  %3433 = vst [vmem:[%s5377_s23 + $0x170] sm:$0xff] %v4524_v22  ;;  %4545 = vpow2.f32 %v2981_v37  ;;  %v2804_v17 = vsub.f32 0.0, %v2464_v36  ;;  %v1941_v25 = vpop.f32.mrb[125].mxu0  ;;  %v2993_v6 = vmul.f32 1.442695, %v2806_v59 }
 0x21c   : > { %v4528_v49 = vpop.eup %4527  ;;  %v3179_v58 = vadd.f32 1.0, %v4526_v51  ;;  %4547 = vpow2.f32 %v2991_v5  ;;  %v2476_v0 = vpop.f32.mrb[125].mxu1  ;;  %v2485_v1 = vadd.f32 %v3949_v45, %v1940_v42 }
 0x21d   : > { %v4530_v41 = vpop.eup %4529  ;;  %v3182_v10 = vadd.f32 1.0, %v4528_v49  ;;  %4549 = vpow2.f32 %v2987_v55  ;;  %v1942_v12 = vpop.f32.mrb[126].mxu0  ;;  %v2477_v28 = vadd.f32 %v2476_v0, %v1932_v53  ;;  %v2989_v23 = vmul.f32 1.442695, %v2804_v17 }
 0x21e   : > { %v4532_v29 = vpop.eup %4531  ;;  %4551 = vrcp.f32 %v3179_v58  ;;  %v3180_v47 = vadd.f32 1.0, %v4530_v41  ;;  %v3950_v57 = vpop.f32.mrb[126].mxu1  ;;  %v1943_v63 = vadd.f32 %v5504_v34, %v1942_v12  ;;  %v2809_v24 = vsub.f32 0.0, %v2485_v1 }
 0x21f   : > { %v4534_v9 = vpop.eup %4533  ;;  %4553 = vrcp.f32 %v3182_v10  ;;  %v3185_v3 = vadd.f32 1.0, %v4532_v29  ;;  %v1944_v7 = vpop.f32.mrb[127].mxu0  ;;  %v2807_v19 = vsub.f32 0.0, %v2477_v28 }
 0x220   : > { %v4536_v27 = vpop.eup %4535  ;;  %4555 = vrcp.f32 %v3180_v47  ;;  %v3183_v52 = vadd.f32 1.0, %v4534_v9  ;;  %v2479_v60 = vpop.f32.mrb[127].mxu1  ;;  %v2488_v11 = vadd.f32 %v3950_v57, %v1943_v63  ;;  %v2999_v13 = vmul.f32 1.442695, %v2809_v24 }
 0x221   : > { %v4538_v30 = vpop.eup %4537  ;;  %3431 = vst [vmem:[%s5377_s23 + $0x160] sm:$0xff] %v4536_v27  ;;  %4557 = vrcp.f32 %v3185_v3  ;;  %v2480_v39 = vadd.f32 %v2479_v60, %v1935_v16  ;;  %v2995_v33 = vmul.f32 1.442695, %v2807_v19  ;;  %v1947_v21 = vpop.f32.mrb[128].mxu0 }
 0x222   : > { %v4540_v35 = vpop.eup %4539  ;;  %3434 = vst [vmem:[%s5377_s23 + $0x178] sm:$0xff] %v4538_v30  ;;  %4559 = vrcp.f32 %v3183_v52  ;;  %v2810_v15 = vsub.f32 0.0, %v2488_v11  ;;  %v3953_v46 = vpop.f32.mrb[128].mxu1  ;;  %v1948_v61 = vadd.f32 %v5504_v34, %v1947_v21 }
 0x223   : > { %v4542_v40 = vpop.eup %4541  ;;  %3432 = vst [vmem:[%s5377_s23 + $0x168] sm:$0xff] %v4540_v35  ;;  %4561 = vpow2.f32 %v2993_v6  ;;  %v2808_v37 = vsub.f32 0.0, %v2480_v39  ;;  %v1949_v2 = vpop.f32.mrb[129].mxu0 }
 0x224   : > { %v4544_v18 = vpop.eup %4543  ;;  %3437 = vst [vmem:[%s5377_s23 + $0x190] sm:$0xff] %v4542_v40  ;;  %4563 = vpow2.f32 %v2989_v23  ;;  %v2492_v36 = vpop.f32.mrb[129].mxu1  ;;  %v3001_v22 = vmul.f32 1.442695, %v2810_v15 }
 0x225   : > { %v4546_v31 = vpop.eup %4545  ;;  %v3186_v54 = vadd.f32 1.0, %v4544_v18  ;;  %4565 = vpow2.f32 %v2999_v13  ;;  %v1950_v55 = vpop.f32.mrb[130].mxu0  ;;  %v2493_v58 = vadd.f32 %v2492_v36, %v1948_v61  ;;  %v2997_v42 = vmul.f32 1.442695, %v2808_v37 }
 0x226   : > { %v4548_v48 = vpop.eup %4547  ;;  %v3184_v5 = vadd.f32 1.0, %v4546_v31  ;;  %4567 = vpow2.f32 %v2995_v33  ;;  %v3954_v59 = vpop.f32.mrb[130].mxu1  ;;  %v1951_v17 = vadd.f32 %v5504_v34, %v1950_v55 }
 0x227   : > { %v4550_v51 = vpop.eup %4549  ;;  %4569 = vrcp.f32 %v3186_v54  ;;  %v3189_v49 = vadd.f32 1.0, %v4548_v48  ;;  %v1952_v43 = vpop.f32.mrb[131].mxu0  ;;  %v2811_v25 = vsub.f32 0.0, %v2493_v58 }
 0x228   : > { %v2495_v41 = vpop.f32.mrb[131].mxu1  ;;  %v4552_v10 = vpop.eup %4551  ;;  %4571 = vrcp.f32 %v3184_v5  ;;  %v3187_v53 = vadd.f32 1.0, %v4550_v51 }
 0x229   : > { %v4554_v45 = vpop.eup %4553  ;;  %3435 = vst [vmem:[%s5377_s23 + $0x180] sm:$0xff] %v4552_v10  ;;  %4573 = vrcp.f32 %v3189_v49  ;;  %v2496_v29 = vadd.f32 %v2495_v41, %v1951_v17  ;;  %v3003_v6 = vmul.f32 1.442695, %v2811_v25  ;;  %v1955_v9 = vpop.f32.mrb[132].mxu0 }
 0x22a   : > { %v4556_v47 = vpop.eup %4555  ;;  %3438 = vst [vmem:[%s5377_s23 + $0x198] sm:$0xff] %v4554_v45  ;;  %4575 = vrcp.f32 %v3187_v53  ;;  %v5567_v3 = vpop.f32.mrb[132].mxu1  ;;  %v1956_v57 = vadd.f32 %v5504_v34, %v1955_v9 }
 0x22b   : > { %v4558_v16 = vpop.eup %4557  ;;  %3436 = vst [vmem:[%s5377_s23 + $0x188] sm:$0xff] %v4556_v47  ;;  %4577 = vpow2.f32 %v3001_v22  ;;  %v2812_v0 = vsub.f32 0.0, %v2496_v29  ;;  %v1957_v7 = vpop.f32.mrb[133].mxu0 }
 0x22c   : > { %v4560_v12 = vpop.eup %4559  ;;  %3441 = vst [vmem:[%s5377_s23 + $0x1b0] sm:$0xff] %v4558_v16  ;;  %4579 = vpow2.f32 %v2997_v42  ;;  %v2508_v27 = vpop.f32.mrb[133].mxu1  ;;  %v2501_v19 = vadd.f32 %v3953_v46, %v1956_v57 }
 0x22d   : > { %v4562_v1 = vpop.eup %4561  ;;  %3439 = vst [vmem:[%s5377_s23 + $0x1a0] sm:$0xff] %v4560_v12  ;;  %4581 = vpow2.f32 %v3003_v6  ;;  %v3005_v28 = vmul.f32 1.442695, %v2812_v0  ;;  %v1958_v63 = vpop.f32.mrb[134].mxu0 }
 0x22e   : > { %v4564_v52 = vpop.eup %4563  ;;  %v3190_v23 = vadd.f32 1.0, %v4562_v1  ;;  %v5571_v60 = vpop.f32.mrb[134].mxu1  ;;  %v1959_v39 = vadd.f32 %v5504_v34, %v1958_v63  ;;  %v2813_v15 = vsub.f32 0.0, %v2501_v19 }
 0x22f   : > { %v4566_v30 = vpop.eup %4565  ;;  %v3188_v24 = vadd.f32 1.0, %v4564_v52  ;;  %4583 = vpow2.f32 %v3005_v28  ;;  %v1960_v35 = vpop.f32.mrb[135].mxu0 }
 0x230   : > { %v2511_v11 = vpop.f32.mrb[135].mxu1  ;;  %v4568_v40 = vpop.eup %4567  ;;  %4585 = vrcp.f32 %v3190_v23  ;;  %v3193_v13 = vadd.f32 1.0, %v4566_v30  ;;  %v2504_v37 = vadd.f32 %v3954_v59, %v1959_v39  ;;  %v3007_v46 = vmul.f32 1.442695, %v2813_v15 }
 0x231   : > { %v4570_v33 = vpop.eup %4569  ;;  %4587 = vrcp.f32 %v3188_v24  ;;  %v3191_v18 = vadd.f32 1.0, %v4568_v40  ;;  %v1963_v2 = vpop.f32.mrb[136].mxu0 }
 0x232   : > { %v4572_v21 = vpop.eup %4571  ;;  %3442 = vst [vmem:[%s5377_s23 + $0x1b8] sm:$0xff] %v4570_v33  ;;  %4589 = vrcp.f32 %v3193_v13  ;;  %v2814_v54 = vsub.f32 0.0, %v2504_v37  ;;  %v5577_v36 = vpop.f32.mrb[136].mxu1  ;;  %v1964_v22 = vadd.f32 %v5504_v34, %v1963_v2 }
 0x233   : > { %v4574_v31 = vpop.eup %4573  ;;  %3440 = vst [vmem:[%s5377_s23 + $0x1a8] sm:$0xff] %v4572_v21  ;;  %4591 = vrcp.f32 %v3191_v18  ;;  %v1965_v55 = vpop.f32.mrb[137].mxu0 }
 0x234   : > { %v4576_v61 = vpop.eup %4575  ;;  %3445 = vst [vmem:[%s5377_s23 + $0x1d0] sm:$0xff] %v4574_v31  ;;  %4593 = vpow2.f32 %v3007_v46  ;;  %v3009_v5 = vmul.f32 1.442695, %v2814_v54  ;;  %v5581_v59 = vpop.f32.mrb[137].mxu1  ;;  %v2509_v10 = vadd.f32 %v2508_v27, %v1964_v22 }
 0x235   : > { %v4578_v48 = vpop.eup %4577  ;;  %3443 = vst [vmem:[%s5377_s23 + $0x1c0] sm:$0xff] %v4576_v61  ;;  %v1966_v58 = vpop.f32.mrb[138].mxu0 }
 0x236   : > { %v4580_v51 = vpop.eup %4579  ;;  %v3194_v49 = vadd.f32 1.0, %v4578_v48  ;;  %v5583_v17 = vpop.f32.mrb[138].mxu1  ;;  %4595 = vpow2.f32 %v3009_v5  ;;  %v1967_v53 = vadd.f32 %v5504_v34, %v1966_v58  ;;  %v2815_v47 = vsub.f32 0.0, %v2509_v10 }
 0x237   : > { %v4582_v43 = vpop.eup %4581  ;;  %v3192_v41 = vadd.f32 1.0, %v4580_v51  ;;  %v1968_v42 = vpop.f32.mrb[139].mxu0 }
 0x238   : > { %v5586_v45 = vpop.f32.mrb[139].mxu1  ;;  %4597 = vrcp.f32 %v3194_v49  ;;  %v3195_v25 = vadd.f32 1.0, %v4582_v43  ;;  %v2512_v16 = vadd.f32 %v2511_v11, %v1967_v53  ;;  %v3011_v9 = vmul.f32 1.442695, %v2815_v47 }
 0x239   : > { %v4584_v29 = vpop.eup %4583  ;;  %4599 = vrcp.f32 %v3192_v41  ;;  %v1971_v57 = vpop.f32.mrb[140].mxu0 }
 0x23a   : > { %v4586_v6 = vpop.eup %4585  ;;  %4601 = vrcp.f32 %v3195_v25  ;;  %v3196_v0 = vadd.f32 1.0, %v4584_v29  ;;  %v2816_v1 = vsub.f32 0.0, %v2512_v16  ;;  %v5590_v7 = vpop.f32.mrb[140].mxu1  ;;  %v1972_v23 = vadd.f32 %v5504_v34, %v1971_v57 }
 0x23b   : > { %v4588_v12 = vpop.eup %4587  ;;  %3446 = vst [vmem:[%s5377_s23 + $0x1d8] sm:$0xff] %v4586_v6  ;;  %v1973_v63 = vpop.f32.mrb[141].mxu0 }
 0x23c   : > { %v4590_v28 = vpop.eup %4589  ;;  %3444 = vst [vmem:[%s5377_s23 + $0x1c8] sm:$0xff] %v4588_v12  ;;  %4603 = vrcp.f32 %v3196_v0  ;;  %v3013_v52 = vmul.f32 1.442695, %v2816_v1  ;;  %v5594_v30 = vpop.f32.mrb[141].mxu1  ;;  %v2517_v35 = vadd.f32 %v5567_v3, %v1972_v23 }
 0x23d   : > { %v4592_v27 = vpop.eup %4591  ;;  %3449 = vst [vmem:[%s5377_s23 + $0x1f0] sm:$0xff] %v4590_v28  ;;  %4605 = vpow2.f32 %v3011_v9  ;;  %v1974_v24 = vpop.f32.mrb[142].mxu0 }
 0x23e   : > { %3447 = vst [vmem:[%s5377_s23 + $0x1e0] sm:$0xff] %v4592_v27  ;;  %v5597_v19 = vpop.f32.mrb[142].mxu1  ;;  %v4594_v39 = vpop.eup %4593  ;;  %4607 = vpow2.f32 %v3013_v52  ;;  %v1975_v11 = vadd.f32 %v5504_v34, %v1974_v24  ;;  %v2817_v15 = vsub.f32 0.0, %v2517_v35 }
 0x23f   : > { %v1976_v40 = vpop.f32.mrb[143].mxu0  ;;  %v5601_v13 = vpop.f32.mrb[143].mxu1  ;;  %v3197_v33 = vadd.f32 1.0, %v4594_v39 }
 0x240   : > { %v4596_v18 = vpop.eup %4595  ;;  %v2520_v37 = vadd.f32 %v5571_v60, %v1975_v11  ;;  %v3015_v54 = vmul.f32 1.442695, %v2817_v15 }
 0x241   : > { %4609 = vrcp.f32 %v3197_v33  ;;  %v3198_v31 = vadd.f32 1.0, %v4596_v18  ;;  %v1979_v2 = vpop.f32.mrb[144].mxu0  ;;  %v5606_v48 = vpop.f32.mrb[144].mxu1 }
 0x242   : > { %v4598_v21 = vpop.eup %4597  ;;  %v2818_v61 = vsub.f32 0.0, %v2520_v37  ;;  %v1980_v22 = vadd.f32 %v5504_v34, %v1979_v2  ;;  %v1981_v60 = vpop.f32.mrb[145].mxu0 }
 0x243   : > { %v4600_v46 = vpop.eup %4599  ;;  %3450 = vst [vmem:[%s5377_s23 + $0x1f8] sm:$0xff] %v4598_v21  ;;  %4611 = vrcp.f32 %v3198_v31  ;;  %v5610_v55 = vpop.f32.mrb[145].mxu1 }
 0x244   : > { %v4602_v3 = vpop.eup %4601  ;;  %3448 = vst [vmem:[%s5377_s23 + $0x1e8] sm:$0xff] %v4600_v46  ;;  %4613 = vpow2.f32 %v3015_v54  ;;  %v3017_v5 = vmul.f32 1.442695, %v2818_v61  ;;  %v1982_v49 = vpop.f32.mrb[146].mxu0  ;;  %v2525_v41 = vadd.f32 %v5581_v59, %v1980_v22 }
 0x245   : > { %3451 = vst [vmem:[%s5377_s23 + $0x200] sm:$0xff] %v4602_v3  ;;  %v5612_v58 = vpop.f32.mrb[146].mxu1  ;;  %v1983_v10 = vadd.f32 %v5504_v34, %v1982_v49  ;;  %v1984_v53 = vpop.f32.mrb[147].mxu0 }
 0x246   : > { %v4604_v51 = vpop.eup %4603  ;;  %4615 = vpow2.f32 %v3017_v5  ;;  %v5617_v42 = vpop.f32.mrb[147].mxu1  ;;  %v2819_v47 = vsub.f32 0.0, %v2525_v41 }
 0x247   : > { %v4606_v43 = vpop.eup %4605  ;;  %3452 = vst [vmem:[%s5377_s23 + $0x208] sm:$0xff] %v4604_v51  ;;  %v2528_v16 = vadd.f32 %v5586_v45, %v1983_v10 }
 0x248   : > { %v3199_v25 = vadd.f32 1.0, %v4606_v43  ;;  %v4608_v29 = vpop.eup %4607  ;;  %v3019_v0 = vmul.f32 1.442695, %v2819_v47 }
 0x249   : > { %v3200_v6 = vadd.f32 1.0, %v4608_v29  ;;  %v2820_v12 = vsub.f32 0.0, %v2528_v16  ;;  %v1987_v1 = vpop.f32.mrb[148].mxu0  ;;  %v5620_v59 = vpop.f32.mrb[148].mxu1 }
 0x24a   : > { %4617 = vrcp.f32 %v3199_v25  ;;  %v1988_v57 = vadd.f32 %v5504_v34, %v1987_v1  ;;  %v1989_v27 = vpop.f32.mrb[149].mxu0  ;;  %v5624_v52 = vpop.f32.mrb[149].mxu1 }
 0x24b   : > { %v4610_v9 = vpop.eup %4609  ;;  %4619 = vrcp.f32 %v3200_v6  ;;  %v3021_v28 = vmul.f32 1.442695, %v2820_v12  ;;  %v1990_v45 = vpop.f32.mrb[150].mxu0 }
 0x24c   : > { %3453 = vst [vmem:[%s5377_s23 + $0x210] sm:$0xff] %v4610_v9  ;;  %4621 = vpow2.f32 %v3019_v0  ;;  %v5626_v63 = vpop.f32.mrb[150].mxu1  ;;  %v2533_v39 = vadd.f32 %v5577_v36, %v1988_v57  ;;  %v1991_v35 = vadd.f32 %v5504_v34, %v1990_v45  ;;  %v1992_v11 = vpop.f32.mrb[151].mxu0 }
 0x24d   : > { %v4612_v23 = vpop.eup %4611  ;;  %4623 = vpow2.f32 %v3021_v28  ;;  %v5631_v40 = vpop.f32.mrb[151].mxu1 }
 0x24e   : > { %v4614_v24 = vpop.eup %4613  ;;  %3454 = vst [vmem:[%s5377_s23 + $0x218] sm:$0xff] %v4612_v23  ;;  %v2821_v15 = vsub.f32 0.0, %v2533_v39  ;;  %v2536_v37 = vadd.f32 %v5583_v17, %v1991_v35 }
 0x24f   : > { %v3201_v33 = vadd.f32 1.0, %v4614_v24 }
 0x250   : > { %v4616_v18 = vpop.eup %4615  ;;  %v3023_v31 = vmul.f32 1.442695, %v2821_v15  ;;  %v2822_v46 = vsub.f32 0.0, %v2536_v37 }
 0x251   : > { %4625 = vrcp.f32 %v3201_v33  ;;  %v3202_v21 = vadd.f32 1.0, %v4616_v18  ;;  %v1995_v61 = vpop.f32.mrb[152].mxu0  ;;  %v5634_v36 = vpop.f32.mrb[152].mxu1 }
 0x252   : > { %v3025_v3 = vmul.f32 1.442695, %v2822_v46  ;;  %v1996_v2 = vadd.f32 %v5504_v34, %v1995_v61  ;;  %v1997_v5 = vpop.f32.mrb[153].mxu0  ;;  %v5638_v22 = vpop.f32.mrb[153].mxu1 }
 0x253   : > { %4627 = vrcp.f32 %v3202_v21  ;;  %v1998_v17 = vpop.f32.mrb[154].mxu0  ;;  %v5640_v51 = vpop.f32.mrb[154].mxu1 }
 0x254   : > { %v4618_v54 = vpop.eup %4617  ;;  %4629 = vpow2.f32 %v3023_v31  ;;  %v2541_v43 = vadd.f32 %v5594_v30, %v1996_v2  ;;  %v1999_v41 = vadd.f32 %v5504_v34, %v1998_v17  ;;  %v2000_v10 = vpop.f32.mrb[155].mxu0 }
 0x255   : > { %3455 = vst [vmem:[%s5377_s23 + $0x220] sm:$0xff] %v4618_v54  ;;  %v4620_v60 = vpop.eup %4619  ;;  %4631 = vpow2.f32 %v3025_v3  ;;  %v5645_v53 = vpop.f32.mrb[155].mxu1  ;;  %v2084_v54 = vadd.f32 %v5504_v34, %v5124_v20  ;;  %v2079_v20 = vadd.f32 %v5504_v34, %v5118_v14 }
 0x256   : > { %v4622_v49 = vpop.eup %4621  ;;  %3456 = vst [vmem:[%s5377_s23 + $0x228] sm:$0xff] %v4620_v60  ;;  %v2823_v47 = vsub.f32 0.0, %v2541_v43  ;;  %v2544_v16 = vadd.f32 %v5601_v13, %v1999_v41 }
 0x257   : > { %v3203_v25 = vadd.f32 1.0, %v4622_v49  ;;  %v4624_v29 = vpop.eup %4623 }
 0x258   : > { %v3204_v6 = vadd.f32 1.0, %v4624_v29  ;;  %v3027_v0 = vmul.f32 1.442695, %v2823_v47  ;;  %v2824_v12 = vsub.f32 0.0, %v2544_v16 }
 0x259   : > { %4633 = vrcp.f32 %v3203_v25  ;;  %v2003_v1 = vpop.f32.mrb[156].mxu0  ;;  %v5648_v30 = vpop.f32.mrb[156].mxu1  ;;  %v2087_v25 = vadd.f32 %v5504_v34, %v5130_v26  ;;  %v5678_v26 = vld [vmem:[%s5935_s2] ss:$0 sm:$0xff] }
 0x25a   : > { %4635 = vrcp.f32 %v3204_v6  ;;  %v3029_v28 = vmul.f32 1.442695, %v2824_v12  ;;  %v2004_v57 = vadd.f32 %v5504_v34, %v2003_v1  ;;  %v2005_v27 = vpop.f32.mrb[157].mxu0  ;;  %v5652_v23 = vpop.f32.mrb[157].mxu1 }
 0x25b   : > { %v4626_v9 = vpop.eup %4625  ;;  %4637 = vpow2.f32 %v3027_v0  ;;  %v2006_v13 = vpop.f32.mrb[158].mxu0 }
 0x25c   : > { %3457 = vst [vmem:[%s5377_s23 + $0x230] sm:$0xff] %v4626_v9  ;;  %v5654_v24 = vpop.f32.mrb[158].mxu1  ;;  %4639 = vpow2.f32 %v3029_v28  ;;  %v2549_v35 = vadd.f32 %v5590_v7, %v2004_v57  ;;  %v2007_v11 = vadd.f32 %v5504_v34, %v2006_v13  ;;  %v2008_v33 = vpop.f32.mrb[159].mxu0  ;;  %v2076_v7 = vadd.f32 %v5504_v34, %v5112_v8 }
 0x25d   : > { %v4628_v45 = vpop.eup %4627  ;;  %v5659_v18 = vpop.f32.mrb[159].mxu1  ;;  %v2092_v13 = vadd.f32 %v5678_v26, %v5136_v32  ;;  %v2103_v32 = vadd.f32 %v5678_v26, %v5154_v50 }
 0x25e   : > { %v4630_v39 = vpop.eup %4629  ;;  %3458 = vst [vmem:[%s5377_s23 + $0x238] sm:$0xff] %v4628_v45  ;;  %v2825_v21 = vsub.f32 0.0, %v2549_v35  ;;  %v2552_v31 = vadd.f32 %v5597_v19, %v2007_v11 }
 0x25f   : > { %v3205_v15 = vadd.f32 1.0, %v4630_v39  ;;  %v4632_v37 = vpop.eup %4631 }
 0x260   : > { %v3206_v46 = vadd.f32 1.0, %v4632_v37  ;;  %v3031_v61 = vmul.f32 1.442695, %v2825_v21  ;;  %v2826_v3 = vsub.f32 0.0, %v2552_v31 }
 0x261   : > { %4641 = vrcp.f32 %v3205_v15  ;;  %v2011_v5 = vpop.f32.mrb[160].mxu0  ;;  %v3985_v60 = vpop.f32.mrb[160].mxu1 }
 0x262   : > { %4643 = vrcp.f32 %v3206_v46  ;;  %v3033_v17 = vmul.f32 1.442695, %v2826_v3  ;;  %v2012_v19 = vadd.f32 %v5504_v34, %v2011_v5  ;;  %v2629_v49 = vadd.f32 %v3985_v60, %v2084_v54  ;;  %v2013_v43 = vpop.f32.mrb[161].mxu0  ;;  %v2620_v41 = vpop.f32.mrb[161].mxu1 }
 0x263   : > { %v4634_v2 = vpop.eup %4633  ;;  %4645 = vpow2.f32 %v3031_v61  ;;  %v2621_v8 = vadd.f32 %v2620_v41, %v2076_v7  ;;  %v2014_v29 = vpop.f32.mrb[162].mxu0  ;;  %v2100_v46 = vadd.f32 %v5678_v26, %v5148_v44  ;;  %v2095_v44 = vadd.f32 %v5678_v26, %v5142_v38 }
 0x264   : > { %3459 = vst [vmem:[%s5377_s23 + $0x240] sm:$0xff] %v4634_v2  ;;  %v4636_v10 = vpop.eup %4635  ;;  %v3986_v47 = vpop.f32.mrb[162].mxu1  ;;  %4647 = vpow2.f32 %v3033_v17  ;;  %v2557_v6 = vadd.f32 %v5610_v55, %v2012_v19  ;;  %v2845_v0 = vsub.f32 0.0, %v2629_v49  ;;  %v2015_v12 = vadd.f32 %v5504_v34, %v2014_v29 }
 0x265   : > { %v4638_v16 = vpop.eup %4637  ;;  %3460 = vst [vmem:[%s5377_s23 + $0x248] sm:$0xff] %v4636_v10  ;;  %v2016_v9 = vpop.f32.mrb[163].mxu0  ;;  %v2843_v57 = vsub.f32 0.0, %v2621_v8  ;;  %v2632_v27 = vadd.f32 %v3986_v47, %v2087_v25 }
 0x266   : > { %v2623_v1 = vpop.f32.mrb[163].mxu1  ;;  %v3207_v28 = vadd.f32 1.0, %v4638_v16  ;;  %v4640_v45 = vpop.eup %4639  ;;  %v2827_v39 = vsub.f32 0.0, %v2557_v6  ;;  %v3071_v55 = vmul.f32 1.442695, %v2845_v0  ;;  %v2560_v35 = vadd.f32 %v5617_v42, %v2015_v12 }
 0x267   : > { %v2624_v14 = vadd.f32 %v2623_v1, %v2079_v20  ;;  %v3208_v34 = vadd.f32 1.0, %v4640_v45  ;;  %v3067_v11 = vmul.f32 1.442695, %v2843_v57  ;;  %v2846_v33 = vsub.f32 0.0, %v2632_v27 }
 0x268   : > { %4649 = vrcp.f32 %v3207_v28  ;;  %v3035_v15 = vmul.f32 1.442695, %v2827_v39  ;;  %v2828_v37 = vsub.f32 0.0, %v2560_v35  ;;  %v2108_v0 = vadd.f32 %v5678_v26, %v5160_v56  ;;  %v5958_v56 = vld [vmem:[#allocation2_spill] sm:$0xff] }
 0x269   : > { %4651 = vpow2.f32 %v3071_v55  ;;  %v2844_v21 = vsub.f32 0.0, %v2624_v14  ;;  %v3073_v54 = vmul.f32 1.442695, %v2846_v33  ;;  %v2019_v61 = vpop.f32.mrb[164].mxu0  ;;  %v3989_v42 = vpop.f32.mrb[164].mxu1  ;;  %v2116_v39 = vadd.f32 %v5678_v26, %v5172_v4 }
 0x26a   : > { %4653 = vrcp.f32 %v3208_v34  ;;  %v3037_v3 = vmul.f32 1.442695, %v2828_v37  ;;  %v2020_v7 = vadd.f32 %v5678_v26, %v2019_v61  ;;  %v2021_v5 = vpop.f32.mrb[165].mxu0  ;;  %v2636_v60 = vpop.f32.mrb[165].mxu1  ;;  %v2645_v19 = vadd.f32 %v3989_v42, %v2100_v46 }
 0x26b   : > { %v4642_v31 = vpop.eup %4641  ;;  %4655 = vpow2.f32 %v3035_v15  ;;  %v3069_v2 = vmul.f32 1.442695, %v2844_v21  ;;  %v2637_v50 = vadd.f32 %v2636_v60, %v2092_v13  ;;  %v2022_v49 = vpop.f32.mrb[166].mxu0  ;;  %v2119_v55 = vadd.f32 %v5678_v26, %v5958_v56 }
 0x26c   : > { %3461 = vst [vmem:[%s5377_s23 + $0x250] sm:$0xff] %v4642_v31  ;;  %v4644_v17 = vpop.eup %4643  ;;  %4657 = vpow2.f32 %v3067_v11  ;;  %v3990_v43 = vpop.f32.mrb[166].mxu1  ;;  %v2565_v10 = vadd.f32 %v5606_v48, %v2020_v7  ;;  %v2023_v20 = vadd.f32 %v5678_v26, %v2022_v49  ;;  %v2849_v16 = vsub.f32 0.0, %v2645_v19  ;;  %v5960_v19 = vld [vmem:[#allocation4_spill] sm:$0xff]  ;;  %v5961_v49 = vld [vmem:[#allocation5_spill] sm:$0xff] }
 0x26d   : > { %v4646_v41 = vpop.eup %4645  ;;  %3462 = vst [vmem:[%s5377_s23 + $0x258] sm:$0xff] %v4644_v17  ;;  %4659 = vpow2.f32 %v3037_v3  ;;  %v5694_v25 = vadd.f32 %v3990_v43, %v2103_v32  ;;  %v2024_v8 = vpop.f32.mrb[167].mxu0  ;;  %v2847_v38 = vsub.f32 0.0, %v2637_v50  ;;  %v2111_v48 = vadd.f32 %v5678_v26, %v5166_v62  ;;  %v5959_v3 = vld [vmem:[#allocation3_spill] sm:$0xff] }
 0x26e   : > { %v2639_v29 = vpop.f32.mrb[167].mxu1  ;;  %v3209_v47 = vadd.f32 1.0, %v4646_v41  ;;  %4661 = vpow2.f32 %v3073_v54  ;;  %v4648_v6 = vpop.eup %4647  ;;  %v2829_v12 = vsub.f32 0.0, %v2565_v10  ;;  %v2568_v9 = vadd.f32 %v5612_v58, %v2023_v20 }
 0x26f   : > { %4663 = vpow2.f32 %v3069_v2  ;;  %v3210_v1 = vadd.f32 1.0, %v4648_v6  ;;  %v3079_v28 = vmul.f32 1.442695, %v2849_v16  ;;  %v3075_v27 = vmul.f32 1.442695, %v2847_v38 }
 0x270   : > { %4665 = vrcp.f32 %v3209_v47  ;;  %v3039_v57 = vmul.f32 1.442695, %v2829_v12  ;;  %v2830_v14 = vsub.f32 0.0, %v2568_v9  ;;  %v2640_v45 = vadd.f32 %v2639_v29, %v2095_v44 }
 0x271   : > { %4667 = vrcp.f32 %v3210_v1  ;;  %v2850_v58 = vsub.f32 0.0, %v5694_v25  ;;  %v2027_v35 = vpop.f32.mrb[168].mxu0  ;;  %v3993_v62 = vpop.f32.mrb[168].mxu1  ;;  %v2124_v2 = vadd.f32 %v5678_v26, %v5959_v3  ;;  %v5719_v50 = vadd.f32 %v5678_v26, %v5960_v19 }
 0x272   : > { %v4650_v13 = vpop.eup %4649  ;;  %4669 = vpow2.f32 %v3039_v57  ;;  %v3041_v11 = vmul.f32 1.442695, %v2830_v14  ;;  %v2848_v33 = vsub.f32 0.0, %v2640_v45  ;;  %v2028_v15 = vadd.f32 %v5678_v26, %v2027_v35  ;;  %v2029_v37 = vpop.f32.mrb[169].mxu0  ;;  %v5962_v35 = vld [vmem:[#allocation6_spill] sm:$0xff] }
 0x273   : > { %v4652_v34 = vpop.eup %4651  ;;  %3463 = vst [vmem:[%s5377_s23 + $0x260] sm:$0xff] %v4650_v13  ;;  %v2652_v21 = vpop.f32.mrb[169].mxu1  ;;  %4671 = vpow2.f32 %v3079_v28  ;;  %v5708_v46 = vadd.f32 %v3993_v62, %v2116_v39  ;;  %v2132_v43 = vadd.f32 %v5678_v26, %v5961_v49  ;;  %v3081_v47 = vmul.f32 1.442695, %v2850_v58  ;;  %v5964_v37 = vld [vmem:[#allocation8_spill] sm:$0xff] }
 0x274   : > { %v4654_v31 = vpop.eup %4653  ;;  %v3229_v4 = vadd.f32 1.0, %v4652_v34  ;;  %v5710_v32 = vadd.f32 %v2652_v21, %v2108_v0  ;;  %v2030_v54 = vpop.f32.mrb[170].mxu0  ;;  %4673 = vpow2.f32 %v3075_v27  ;;  %v2573_v7 = vadd.f32 %v5624_v52, %v2028_v15  ;;  %v5963_v34 = vld [vmem:[#allocation7_spill] sm:$0xff] }
 0x275   : > { %v3994_v61 = vpop.f32.mrb[170].mxu1  ;;  %v4656_v42 = vpop.eup %4655  ;;  %3464 = vst [vmem:[%s5377_s23 + $0x268] sm:$0xff] %v4654_v31  ;;  %v2031_v5 = vadd.f32 %v5678_v26, %v2030_v54  ;;  %v3077_v16 = vmul.f32 1.442695, %v2848_v33  ;;  %v2853_v0 = vsub.f32 0.0, %v5708_v46  ;;  %v2135_v62 = vadd.f32 %v5678_v26, %v5962_v35 }
 0x276   : > { %v2032_v60 = vpop.f32.mrb[171].mxu0  ;;  %v2655_v17 = vpop.f32.mrb[171].mxu1  ;;  %v3211_v41 = vadd.f32 1.0, %v4656_v42  ;;  %4675 = vrcp.f32 %v3229_v4  ;;  %v2831_v25 = vsub.f32 0.0, %v2573_v7  ;;  %v2851_v12 = vsub.f32 0.0, %v5710_v32 }
 0x277   : > { %v4658_v44 = vpop.eup %4657  ;;  %4677 = vpow2.f32 %v3041_v11  ;;  %v5724_v52 = vadd.f32 %v5631_v40, %v2031_v5  ;;  %v2664_v28 = vadd.f32 %v3994_v61, %v2119_v55  ;;  %v5728_v57 = vadd.f32 %v2655_v17, %v2111_v48 }
 0x278   : > { %v4660_v10 = vpop.eup %4659  ;;  %v3227_v20 = vadd.f32 1.0, %v4658_v44  ;;  %4679 = vrcp.f32 %v3211_v41  ;;  %v3043_v14 = vmul.f32 1.442695, %v2831_v25  ;;  %v2140_v48 = vadd.f32 %v5678_v26, %v5963_v34  ;;  %v5965_v25 = vld [vmem:[#allocation9_spill] sm:$0xff] }
 0x279   : > { %v4662_v8 = vpop.eup %4661  ;;  %v3212_v29 = vadd.f32 1.0, %v4660_v10  ;;  %v2035_v40 = vpop.f32.mrb[172].mxu0  ;;  %v5742_v21 = vadd.f32 %v5678_v26, %v5964_v37  ;;  %v3087_v42 = vmul.f32 1.442695, %v2853_v0  ;;  %v2832_v3 = vsub.f32 0.0, %v5724_v52 }
 0x27a   : > { %v4664_v38 = vpop.eup %4663  ;;  %4681 = vrcp.f32 %v3227_v20  ;;  %v3230_v6 = vadd.f32 1.0, %v4662_v8  ;;  %v3997_v27 = vpop.f32.mrb[172].mxu1  ;;  %v2036_v45 = vadd.f32 %v5678_v26, %v2035_v40  ;;  %v3083_v5 = vmul.f32 1.442695, %v2851_v12 }
 0x27b   : > { %v4666_v9 = vpop.eup %4665  ;;  %4683 = vrcp.f32 %v3212_v29  ;;  %v3228_v1 = vadd.f32 1.0, %v4664_v38  ;;  %v5732_v13 = vadd.f32 %v3997_v27, %v2132_v43  ;;  %v2037_v39 = vpop.f32.mrb[173].mxu0  ;;  %v2854_v60 = vsub.f32 0.0, %v2664_v28 }
 0x27c   : > { %3465 = vst [vmem:[%s5377_s23 + $0x270] sm:$0xff] %v4666_v9  ;;  %4685 = vrcp.f32 %v3230_v6  ;;  %v2668_v56 = vpop.f32.mrb[173].mxu1  ;;  %v4668_v58 = vpop.eup %4667  ;;  %v2581_v31 = vadd.f32 %v5620_v59, %v2036_v45  ;;  %v2852_v59 = vsub.f32 0.0, %v5728_v57  ;;  %v2148_v52 = vadd.f32 %v5678_v26, %v5965_v25  ;;  %v5966_v45 = vld [vmem:[#allocation10_spill] sm:$0xff] }
 0x27d   : > { %4687 = vrcp.f32 %v3228_v1  ;;  %v5738_v55 = vadd.f32 %v2668_v56, %v2124_v2  ;;  %v2038_v11 = vpop.f32.mrb[174].mxu0  ;;  %v3998_v33 = vpop.f32.mrb[174].mxu1  ;;  %3466 = vst [vmem:[%s5377_s23 + $0x278] sm:$0xff] %v4668_v58  ;;  %v3045_v29 = vmul.f32 1.442695, %v2832_v3  ;;  %v2857_v6 = vsub.f32 0.0, %v5732_v13 }
 0x27e   : > { %v4670_v15 = vpop.eup %4669  ;;  %4689 = vpow2.f32 %v3081_v47  ;;  %v2039_v4 = vadd.f32 %v5678_v26, %v2038_v11  ;;  %v2040_v46 = vpop.f32.mrb[175].mxu0  ;;  %v2833_v43 = vsub.f32 0.0, %v2581_v31  ;;  %v5753_v41 = vadd.f32 %v3998_v33, %v2135_v62  ;;  %v5967_v31 = vld [vmem:[#allocation13_spill] sm:$0xff] }
 0x27f   : > { %v2671_v32 = vpop.f32.mrb[175].mxu1  ;;  %v4672_v54 = vpop.eup %4671  ;;  %v3213_v61 = vadd.f32 1.0, %v4670_v15  ;;  %4691 = vpow2.f32 %v3077_v16  ;;  %v3089_v38 = vmul.f32 1.442695, %v2854_v60  ;;  %v3085_v1 = vmul.f32 1.442695, %v2852_v59 }
 0x280   : > { %v4674_v2 = vpop.eup %4673  ;;  %v3233_v7 = vadd.f32 1.0, %v4672_v54  ;;  %4693 = vpow2.f32 %v3043_v14  ;;  %v5750_v19 = vadd.f32 %v5626_v63, %v2039_v4  ;;  %v5756_v10 = vadd.f32 %v2671_v32, %v5719_v50 }
 0x281   : > { %v4676_v17 = vpop.eup %4675  ;;  %4695 = vrcp.f32 %v3213_v61  ;;  %v3231_v44 = vadd.f32 1.0, %v4674_v2  ;;  %v2043_v47 = vpop.f32.mrb[176].mxu0  ;;  %v2151_v13 = vadd.f32 %v5678_v26, %v5966_v45  ;;  %v3047_v39 = vmul.f32 1.442695, %v2833_v43  ;;  %v5968_v2 = vld [vmem:[#allocation11_spill] sm:$0xff] }
 0x282   : > { %v4678_v49 = vpop.eup %4677  ;;  %3485 = vst [vmem:[%s5377_s23 + $0x310] sm:$0xff] %v4676_v17  ;;  %4697 = vrcp.f32 %v3233_v7  ;;  %v4001_v63 = vpop.f32.mrb[176].mxu1  ;;  %v2044_v50 = vadd.f32 %v5678_v26, %v2043_v47  ;;  %v2855_v34 = vsub.f32 0.0, %v5738_v55  ;;  %v2834_v33 = vsub.f32 0.0, %v5750_v19 }
 0x283   : > { %v4680_v20 = vpop.eup %4679  ;;  %4699 = vrcp.f32 %v3231_v44  ;;  %v3214_v8 = vadd.f32 1.0, %v4678_v49  ;;  %v2045_v0 = vpop.f32.mrb[177].mxu0  ;;  %v5764_v28 = vadd.f32 %v4001_v63, %v2148_v52  ;;  %v2164_v4 = vadd.f32 %v5678_v26, %v5967_v31  ;;  %v5970_v52 = vld [vmem:[#allocation14_spill] sm:$0xff] }
 0x284   : > { %v4682_v16 = vpop.eup %4681  ;;  %3467 = vst [vmem:[%s5377_s23 + $0x280] sm:$0xff] %v4680_v20  ;;  %4701 = vpow2.f32 %v3087_v42  ;;  %v2684_v12 = vpop.f32.mrb[177].mxu1  ;;  %v5772_v56 = vadd.f32 %v5638_v22, %v2044_v50  ;;  %v3095_v55 = vmul.f32 1.442695, %v2857_v6  ;;  %v2858_v61 = vsub.f32 0.0, %v5753_v41  ;;  %v5969_v20 = vld [vmem:[#allocation12_spill] sm:$0xff] }
 0x285   : > { %v4684_v9 = vpop.eup %4683  ;;  %3483 = vst [vmem:[%s5377_s23 + $0x300] sm:$0xff] %v4682_v16  ;;  %4703 = vrcp.f32 %v3214_v8  ;;  %v5766_v57 = vadd.f32 %v2684_v12, %v2140_v48  ;;  %v2046_v40 = vpop.f32.mrb[178].mxu0  ;;  %v3049_v59 = vmul.f32 1.442695, %v2834_v33  ;;  %v2159_v25 = vadd.f32 %v5678_v26, %v5969_v20 }
 0x286   : > { %v4002_v27 = vpop.f32.mrb[178].mxu1  ;;  %v4686_v14 = vpop.eup %4685  ;;  %3468 = vst [vmem:[%s5377_s23 + $0x288] sm:$0xff] %v4684_v9  ;;  %4705 = vpow2.f32 %v3083_v5  ;;  %v2047_v48 = vadd.f32 %v5678_v26, %v2046_v40  ;;  %v3091_v5 = vmul.f32 1.442695, %v2855_v34  ;;  %v2167_v8 = vadd.f32 %v5678_v26, %v5970_v52 }
 0x287   : > { %v2048_v58 = vpop.f32.mrb[179].mxu0  ;;  %v2687_v35 = vpop.f32.mrb[179].mxu1  ;;  %3486 = vst [vmem:[%s5377_s23 + $0x318] sm:$0xff] %v4686_v14  ;;  %4707 = vpow2.f32 %v3045_v29  ;;  %v5779_v15 = vadd.f32 %v4002_v27, %v2151_v13  ;;  %v3097_v50 = vmul.f32 1.442695, %v2858_v61  ;;  %v2856_v27 = vsub.f32 0.0, %v5756_v10 }
 0x288   : > { %v4688_v62 = vpop.eup %4687  ;;  %4709 = vpow2.f32 %v3089_v38  ;;  %v5782_v37 = vadd.f32 %v2687_v35, %v5742_v21  ;;  %v5788_v42 = vadd.f32 %v5645_v53, %v2047_v48  ;;  %v2156_v21 = vadd.f32 %v5678_v26, %v5968_v2  ;;  %v5971_v38 = vld [vmem:[#allocation15_spill] sm:$0xff]  ;;  %v5972_v13 = vld [vmem:[#allocation16_spill] sm:$0xff] }
 0x289   : > { %v4690_v11 = vpop.eup %4689  ;;  %3484 = vst [vmem:[%s5377_s23 + $0x308] sm:$0xff] %v4688_v62  ;;  %4711 = vpow2.f32 %v3085_v1  ;;  %v2051_v60 = vpop.f32.mrb[180].mxu0  ;;  %v2172_v6 = vadd.f32 %v5678_v26, %v5971_v38  ;;  %v2861_v58 = vsub.f32 0.0, %v5764_v28  ;;  %v2835_v34 = vsub.f32 0.0, %v5772_v56  ;;  %v5975_v38 = vld [vmem:[#allocation19_spill] sm:$0xff] }
 0x28a   : > { %v4692_v22 = vpop.eup %4691  ;;  %v3234_v46 = vadd.f32 1.0, %v4690_v11  ;;  %4713 = vpow2.f32 %v3047_v39  ;;  %v4005_v17 = vpop.f32.mrb[180].mxu1  ;;  %v2052_v19 = vadd.f32 %v5678_v26, %v2051_v60  ;;  %v5813_v39 = vadd.f32 %v5678_v26, %v5972_v13  ;;  %v5973_v11 = vld [vmem:[#allocation17_spill] sm:$0xff] }
 0x28b   : > { %v4694_v32 = vpop.eup %4693  ;;  %v3232_v54 = vadd.f32 1.0, %v4692_v22  ;;  %v5794_v49 = vadd.f32 %v4005_v17, %v2164_v4  ;;  %v2053_v53 = vpop.f32.mrb[181].mxu0  ;;  %v2180_v33 = vadd.f32 %v5678_v26, %v5973_v11  ;;  %v5974_v22 = vld [vmem:[#allocation18_spill] sm:$0xff]  ;;  %v3051_v17 = vmul.f32 1.442695, %v2835_v34 }
 0x28c   : > { %v4696_v3 = vpop.eup %4695  ;;  %4715 = vrcp.f32 %v3234_v46  ;;  %v3215_v7 = vadd.f32 1.0, %v4694_v32  ;;  %v2700_v43 = vpop.f32.mrb[181].mxu1  ;;  %v5807_v0 = vadd.f32 %v5634_v36, %v2052_v19  ;;  %v2183_v31 = vadd.f32 %v5678_v26, %v5974_v22 }
 0x28d   : > { %v4698_v44 = vpop.eup %4697  ;;  %3469 = vst [vmem:[%s5377_s23 + $0x290] sm:$0xff] %v4696_v3  ;;  %4717 = vrcp.f32 %v3232_v54  ;;  %v5801_v29 = vadd.f32 %v2700_v43, %v2156_v21  ;;  %v2054_v47 = vpop.f32.mrb[182].mxu0  ;;  %v3103_v3 = vmul.f32 1.442695, %v2861_v58  ;;  %v2860_v58 = vsub.f32 0.0, %v5782_v37 }
 0x28e   : > { %v4700_v41 = vpop.eup %4699  ;;  %3489 = vst [vmem:[%s5377_s23 + $0x330] sm:$0xff] %v4698_v44  ;;  %4719 = vrcp.f32 %v3215_v7  ;;  %v4006_v63 = vpop.f32.mrb[182].mxu1  ;;  %v2055_v14 = vadd.f32 %v5678_v26, %v2054_v47  ;;  %v2859_v44 = vsub.f32 0.0, %v5766_v57  ;;  %v2836_v57 = vsub.f32 0.0, %v5788_v42 }
 0x28f   : > { %v4702_v16 = vpop.eup %4701  ;;  %3487 = vst [vmem:[%s5377_s23 + $0x320] sm:$0xff] %v4700_v41  ;;  %4721 = vpow2.f32 %v3095_v55  ;;  %v2056_v12 = vpop.f32.mrb[183].mxu0  ;;  %v5817_v36 = vadd.f32 %v4006_v63, %v2167_v8  ;;  %v3093_v55 = vmul.f32 1.442695, %v2856_v27  ;;  %v2862_v42 = vsub.f32 0.0, %v5779_v15 }
 0x290   : > { %v2703_v9 = vpop.f32.mrb[183].mxu1  ;;  %v4704_v1 = vpop.eup %4703  ;;  %v3237_v40 = vadd.f32 1.0, %v4702_v16  ;;  %4723 = vpow2.f32 %v3091_v5  ;;  %v5821_v10 = vadd.f32 %v5640_v51, %v2055_v14  ;;  %v3099_v13 = vmul.f32 1.442695, %v2859_v44  ;;  %v5978_v44 = vld [vmem:[#allocation20_spill] sm:$0xff] }
 0x291   : > { %v4706_v45 = vpop.eup %4705  ;;  %3470 = vst [vmem:[%s5377_s23 + $0x298] sm:$0xff] %v4704_v1  ;;  %4725 = vpow2.f32 %v3049_v59  ;;  %v5827_v32 = vadd.f32 %v2703_v9, %v2159_v25  ;;  %v2059_v54 = vpop.f32.mrb[184].mxu0  ;;  %v3053_v34 = vmul.f32 1.442695, %v2836_v57  ;;  %v2866_v57 = vsub.f32 0.0, %v5817_v36 }
 0x292   : > { %v4708_v35 = vpop.eup %4707  ;;  %4727 = vrcp.f32 %v3237_v40  ;;  %v3235_v62 = vadd.f32 1.0, %v4706_v45  ;;  %v4009_v56 = vpop.f32.mrb[184].mxu1  ;;  %v2060_v2 = vadd.f32 %v5678_v26, %v2059_v54 }
 0x293   : > { %v4710_v48 = vpop.eup %4709  ;;  %v3216_v4 = vadd.f32 1.0, %v4708_v35  ;;  %4729 = vpow2.f32 %v3097_v50  ;;  %v2061_v21 = vpop.f32.mrb[185].mxu0  ;;  %v5835_v41 = vadd.f32 %v4009_v56, %v2180_v33  ;;  %v5976_v50 = vld [vmem:[#allocation21_spill] sm:$0xff]  ;;  %v3113_v36 = vmul.f32 1.442695, %v2866_v57 }
 0x294   : > { %v4712_v28 = vpop.eup %4711  ;;  %4731 = vrcp.f32 %v3235_v62  ;;  %v3238_v46 = vadd.f32 1.0, %v4710_v48  ;;  %v2716_v7 = vpop.f32.mrb[185].mxu1  ;;  %v5833_v43 = vadd.f32 %v5652_v23, %v2060_v2  ;;  %v2188_v23 = vadd.f32 %v5678_v26, %v5975_v38 }
 0x295   : > { %v4714_v51 = vpop.eup %4713  ;;  %4733 = vrcp.f32 %v3216_v4  ;;  %v3236_v61 = vadd.f32 1.0, %v4712_v28  ;;  %v2062_v59 = vpop.f32.mrb[186].mxu0  ;;  %v5837_v20 = vadd.f32 %v2716_v7, %v2172_v6  ;;  %v2196_v12 = vadd.f32 %v5678_v26, %v5976_v50  ;;  %v5977_v6 = vld [vmem:[#allocation22_spill] sm:$0xff] }
 0x296   : > { %v4716_v5 = vpop.eup %4715  ;;  %4735 = vrcp.f32 %v3238_v46  ;;  %v3217_v60 = vadd.f32 1.0, %v4714_v51  ;;  %v4010_v19 = vpop.f32.mrb[186].mxu1  ;;  %v2063_v47 = vadd.f32 %v5678_v26, %v2062_v59  ;;  %v2199_v9 = vadd.f32 %v5678_v26, %v5977_v6 }
 0x297   : > { %v4718_v53 = vpop.eup %4717  ;;  %3490 = vst [vmem:[%s5377_s23 + $0x338] sm:$0xff] %v4716_v5  ;;  %4737 = vrcp.f32 %v3236_v61  ;;  %v2064_v25 = vpop.f32.mrb[187].mxu0  ;;  %v5842_v63 = vadd.f32 %v4010_v19, %v2183_v31  ;;  %v2837_v48 = vsub.f32 0.0, %v5807_v0  ;;  %v3105_v0 = vmul.f32 1.442695, %v2862_v42 }
 0x298   : > { %v2719_v52 = vpop.f32.mrb[187].mxu1  ;;  %v4720_v8 = vpop.eup %4719  ;;  %3488 = vst [vmem:[%s5377_s23 + $0x328] sm:$0xff] %v4718_v53  ;;  %4739 = vrcp.f32 %v3217_v60  ;;  %v5853_v27 = vadd.f32 %v5659_v18, %v2063_v47  ;;  %v2865_v18 = vsub.f32 0.0, %v5794_v49  ;;  %v3101_v49 = vmul.f32 1.442695, %v2860_v58 }
 0x299   : > { %v4722_v16 = vpop.eup %4721  ;;  %3471 = vst [vmem:[%s5377_s23 + $0x2a0] sm:$0xff] %v4720_v8  ;;  %4741 = vpow2.f32 %v3093_v55  ;;  %v2067_v11 = vpop.f32.mrb[188].mxu0  ;;  %v5860_v15 = vadd.f32 %v2719_v52, %v5813_v39  ;;  %v3055_v7 = vmul.f32 1.442695, %v2837_v48  ;;  %v2191_v59 = vadd.f32 %v5678_v26, %v5978_v44 }
 0x29a   : > { %v4724_v1 = vpop.eup %4723  ;;  %v3241_v40 = vadd.f32 1.0, %v4722_v16  ;;  %4743 = vpow2.f32 %v3051_v17  ;;  %v4013_v33 = vpop.f32.mrb[188].mxu1  ;;  %v2068_v31 = vadd.f32 %v5678_v26, %v2067_v11  ;;  %v2863_v19 = vsub.f32 0.0, %v5801_v29 }
 0x29b   : > { %v4726_v14 = vpop.eup %4725  ;;  %v3239_v45 = vadd.f32 1.0, %v4724_v1  ;;  %4745 = vpow2.f32 %v3103_v3  ;;  %v2069_v37 = vpop.f32.mrb[189].mxu0  ;;  %v5863_v55 = vadd.f32 %v4013_v33, %v2196_v12  ;;  %v2838_v25 = vsub.f32 0.0, %v5821_v10 }
 0x29c   : > { %v4728_v35 = vpop.eup %4727  ;;  %4747 = vrcp.f32 %v3241_v40  ;;  %v3218_v62 = vadd.f32 1.0, %v4726_v14  ;;  %v2732_v4 = vpop.f32.mrb[189].mxu1  ;;  %v5867_v39 = vadd.f32 %v5648_v30, %v2068_v31  ;;  %v3111_v30 = vmul.f32 1.442695, %v2865_v18 }
 0x29d   : > { %v4730_v22 = vpop.eup %4729  ;;  %3493 = vst [vmem:[%s5377_s23 + $0x350] sm:$0xff] %v4728_v35  ;;  %4749 = vrcp.f32 %v3239_v45  ;;  %v2070_v54 = vpop.f32.mrb[190].mxu0  ;;  %v5869_v61 = vadd.f32 %v2732_v4, %v2188_v23  ;;  %v3107_v10 = vmul.f32 1.442695, %v2863_v19  ;;  %v3057_v12 = vmul.f32 1.442695, %v2838_v25 }
 0x29e   : > { %v4732_v28 = vpop.eup %4731  ;;  %4751 = vrcp.f32 %v3218_v62  ;;  %v3242_v46 = vadd.f32 1.0, %v4730_v22  ;;  %v4014_v56 = vpop.f32.mrb[190].mxu1  ;;  %v2071_v5 = vadd.f32 %v5678_v26, %v2070_v54  ;;  %v2839_v45 = vsub.f32 0.0, %v5833_v43 }
 0x29f   : > { %v4734_v51 = vpop.eup %4733  ;;  %3491 = vst [vmem:[%s5377_s23 + $0x340] sm:$0xff] %v4732_v28  ;;  %4753 = vpow2.f32 %v3099_v13  ;;  %v2072_v3 = vpop.f32.mrb[191].mxu0  ;;  %v5873_v60 = vadd.f32 %v4014_v56, %v2199_v9  ;;  %v2869_v35 = vsub.f32 0.0, %v5835_v41  ;;  %v2867_v48 = vsub.f32 0.0, %v5837_v20 }
 0x2a0   : > { %v2735_v2 = vpop.f32.mrb[191].mxu1  ;;  %v4736_v21 = vpop.eup %4735  ;;  %3472 = vst [vmem:[%s5377_s23 + $0x2a8] sm:$0xff] %v4734_v51  ;;  %4755 = vrcp.f32 %v3242_v46  ;;  %v5882_v52 = vadd.f32 %v5654_v24, %v2071_v5  ;;  %v2864_v24 = vsub.f32 0.0, %v5827_v32  ;;  %v3059_v43 = vmul.f32 1.442695, %v2839_v45 }
 0x2a1   : > { %v4738_v17 = vpop.eup %4737  ;;  %3494 = vst [vmem:[%s5377_s23 + $0x358] sm:$0xff] %v4736_v21  ;;  %4757 = vpow2.f32 %v3053_v34  ;;  %v5886_v26 = vadd.f32 %v2735_v2, %v2191_v59  ;;  %v3119_v4 = vmul.f32 1.442695, %v2869_v35  ;;  %v3115_v28 = vmul.f32 1.442695, %v2867_v48 }
 0x2a2   : > { %v4740_v53 = vpop.eup %4739  ;;  %3492 = vst [vmem:[%s5377_s23 + $0x348] sm:$0xff] %v4738_v17  ;;  %4759 = vpow2.f32 %v3105_v0  ;;  %v3109_v40 = vmul.f32 1.442695, %v2864_v24  ;;  %v2840_v46 = vsub.f32 0.0, %v5853_v27  ;;  %v2870_v54 = vsub.f32 0.0, %v5842_v63 }
 0x2a3   : > { %v4742_v8 = vpop.eup %4741  ;;  %3473 = vst [vmem:[%s5377_s23 + $0x2b0] sm:$0xff] %v4740_v53  ;;  %4761 = vpow2.f32 %v3101_v49  ;;  %v2868_v49 = vsub.f32 0.0, %v5860_v15  ;;  %v2841_v27 = vsub.f32 0.0, %v5867_v39  ;;  %v2873_v17 = vsub.f32 0.0, %v5863_v55 }
 0x2a4   : > { %v4744_v47 = vpop.eup %4743  ;;  %v3240_v16 = vadd.f32 1.0, %v4742_v8  ;;  %4763 = vpow2.f32 %v3055_v7  ;;  %v3061_v21 = vmul.f32 1.442695, %v2840_v46  ;;  %v3121_v63 = vmul.f32 1.442695, %v2870_v54 }
 0x2a5   : > { %v4746_v29 = vpop.eup %4745  ;;  %v3219_v38 = vadd.f32 1.0, %v4744_v47  ;;  %4765 = vpow2.f32 %v3111_v30  ;;  %v2871_v15 = vsub.f32 0.0, %v5869_v61  ;;  %v3117_v19 = vmul.f32 1.442695, %v2868_v49 }
 0x2a6   : > { %v4748_v23 = vpop.eup %4747  ;;  %4767 = vrcp.f32 %v3240_v16  ;;  %v3245_v50 = vadd.f32 1.0, %v4746_v29  ;;  %v3063_v39 = vmul.f32 1.442695, %v2841_v27  ;;  %v3127_v55 = vmul.f32 1.442695, %v2873_v17 }
 0x2a7   : > { %v4750_v6 = vpop.eup %4749  ;;  %3497 = vst [vmem:[%s5377_s23 + $0x370] sm:$0xff] %v4748_v23  ;;  %4769 = vrcp.f32 %v3219_v38  ;;  %v3123_v57 = vmul.f32 1.442695, %v2871_v15  ;;  %v2842_v61 = vsub.f32 0.0, %v5882_v52  ;;  %v2874_v16 = vsub.f32 0.0, %v5873_v60 }
 0x2a8   : > { %v4752_v9 = vpop.eup %4751  ;;  %3495 = vst [vmem:[%s5377_s23 + $0x360] sm:$0xff] %v4750_v6  ;;  %4771 = vrcp.f32 %v3245_v50  ;;  %v2872_v38 = vsub.f32 0.0, %v5886_v26 }
 0x2a9   : > { %v4754_v1 = vpop.eup %4753  ;;  %3474 = vst [vmem:[%s5377_s23 + $0x2b8] sm:$0xff] %v4752_v9  ;;  %4773 = vpow2.f32 %v3107_v10  ;;  %v3065_v52 = vmul.f32 1.442695, %v2842_v61  ;;  %v3129_v60 = vmul.f32 1.442695, %v2874_v16 }
 0x2aa   : > { %v4756_v42 = vpop.eup %4755  ;;  %v3243_v14 = vadd.f32 1.0, %v4754_v1  ;;  %4775 = vpow2.f32 %v3057_v12  ;;  %v3125_v9 = vmul.f32 1.442695, %v2872_v38 }
 0x2ab   : > { %v4758_v32 = vpop.eup %4757  ;;  %3498 = vst [vmem:[%s5377_s23 + $0x378] sm:$0xff] %v4756_v42  ;;  %4777 = vpow2.f32 %v3113_v36 }
 0x2ac   : > { %v4760_v13 = vpop.eup %4759  ;;  %4779 = vrcp.f32 %v3243_v14  ;;  %v3220_v58 = vadd.f32 1.0, %v4758_v32 }
 0x2ad   : > { %v4762_v62 = vpop.eup %4761  ;;  %v3246_v34 = vadd.f32 1.0, %v4760_v13  ;;  %4781 = vpow2.f32 %v3109_v40 }
 0x2ae   : > { %v4764_v11 = vpop.eup %4763  ;;  %4783 = vrcp.f32 %v3220_v58  ;;  %v3244_v33 = vadd.f32 1.0, %v4762_v62 }
 0x2af   : > { %v4766_v22 = vpop.eup %4765  ;;  %4785 = vrcp.f32 %v3246_v34  ;;  %v3221_v18 = vadd.f32 1.0, %v4764_v11 }
 0x2b0   : > { %v4768_v31 = vpop.eup %4767  ;;  %4787 = vrcp.f32 %v3244_v33  ;;  %v3249_v37 = vadd.f32 1.0, %v4766_v22 }
 0x2b1   : > { %v4770_v41 = vpop.eup %4769  ;;  %3496 = vst [vmem:[%s5377_s23 + $0x368] sm:$0xff] %v4768_v31  ;;  %4789 = vrcp.f32 %v3221_v18 }
 0x2b2   : > { %v4772_v20 = vpop.eup %4771  ;;  %3475 = vst [vmem:[%s5377_s23 + $0x2c0] sm:$0xff] %v4770_v41  ;;  %4791 = vrcp.f32 %v3249_v37 }
 0x2b3   : > { %v4774_v0 = vpop.eup %4773  ;;  %3501 = vst [vmem:[%s5377_s23 + $0x390] sm:$0xff] %v4772_v20  ;;  %4793 = vpow2.f32 %v3059_v43 }
 0x2b4   : > { %v4776_v56 = vpop.eup %4775  ;;  %v3247_v51 = vadd.f32 1.0, %v4774_v0  ;;  %4795 = vpow2.f32 %v3119_v4 }
 0x2b5   : > { %v4778_v3 = vpop.eup %4777  ;;  %v3222_v2 = vadd.f32 1.0, %v4776_v56  ;;  %4797 = vpow2.f32 %v3115_v28 }
 0x2b6   : > { %v4780_v7 = vpop.eup %4779  ;;  %4799 = vrcp.f32 %v3247_v51  ;;  %v3250_v5 = vadd.f32 1.0, %v4778_v3 }
 0x2b7   : > { %v4782_v44 = vpop.eup %4781  ;;  %3499 = vst [vmem:[%s5377_s23 + $0x380] sm:$0xff] %v4780_v7  ;;  %4801 = vrcp.f32 %v3222_v2 }
 0x2b8   : > { %v4784_v59 = vpop.eup %4783  ;;  %4803 = vrcp.f32 %v3250_v5  ;;  %v3248_v30 = vadd.f32 1.0, %v4782_v44 }
 0x2b9   : > { %v4786_v53 = vpop.eup %4785  ;;  %3476 = vst [vmem:[%s5377_s23 + $0x2c8] sm:$0xff] %v4784_v59  ;;  %4805 = vpow2.f32 %v3061_v21 }
 0x2ba   : > { %v4788_v25 = vpop.eup %4787  ;;  %3502 = vst [vmem:[%s5377_s23 + $0x398] sm:$0xff] %v4786_v53  ;;  %4807 = vrcp.f32 %v3248_v30 }
 0x2bb   : > { %v4790_v8 = vpop.eup %4789  ;;  %3500 = vst [vmem:[%s5377_s23 + $0x388] sm:$0xff] %v4788_v25  ;;  %4809 = vpow2.f32 %v3121_v63 }
 0x2bc   : > { %v4792_v47 = vpop.eup %4791  ;;  %3477 = vst [vmem:[%s5377_s23 + $0x2d0] sm:$0xff] %v4790_v8  ;;  %4811 = vpow2.f32 %v3117_v19 }
 0x2bd   : > { %v4794_v29 = vpop.eup %4793  ;;  %3505 = vst [vmem:[%s5377_s23 + $0x3b0] sm:$0xff] %v4792_v47  ;;  %4813 = vpow2.f32 %v3063_v39 }
 0x2be   : > { %v4796_v10 = vpop.eup %4795  ;;  %v3223_v24 = vadd.f32 1.0, %v4794_v29  ;;  %4815 = vpow2.f32 %v3127_v55 }
 0x2bf   : > { %v4798_v23 = vpop.eup %4797  ;;  %v3253_v50 = vadd.f32 1.0, %v4796_v10  ;;  %4817 = vpow2.f32 %v3123_v57 }
 0x2c0   : > { %v4800_v12 = vpop.eup %4799  ;;  %4819 = vrcp.f32 %v3223_v24  ;;  %v3251_v6 = vadd.f32 1.0, %v4798_v23 }
 0x2c1   : > { %v4802_v36 = vpop.eup %4801  ;;  %3503 = vst [vmem:[%s5377_s23 + $0x3a0] sm:$0xff] %v4800_v12  ;;  %4821 = vrcp.f32 %v3253_v50 }
 0x2c2   : > { %v4804_v1 = vpop.eup %4803  ;;  %3478 = vst [vmem:[%s5377_s23 + $0x2d8] sm:$0xff] %v4802_v36  ;;  %4823 = vrcp.f32 %v3251_v6 }
 0x2c3   : > { %v4806_v26 = vpop.eup %4805  ;;  %3506 = vst [vmem:[%s5377_s23 + $0x3b8] sm:$0xff] %v4804_v1  ;;  %4825 = vpow2.f32 %v3065_v52 }
 0x2c4   : > { %v4808_v40 = vpop.eup %4807  ;;  %v3224_v42 = vadd.f32 1.0, %v4806_v26  ;;  %4827 = vpow2.f32 %v3129_v60 }
 0x2c5   : > { %v4810_v14 = vpop.eup %4809  ;;  %3504 = vst [vmem:[%s5377_s23 + $0x3a8] sm:$0xff] %v4808_v40  ;;  %4829 = vpow2.f32 %v3125_v9 }
 0x2c6   : > { %v4812_v32 = vpop.eup %4811  ;;  %4831 = vrcp.f32 %v3224_v42  ;;  %v3254_v45 = vadd.f32 1.0, %v4810_v14 }
 0x2c7   : > { %v4814_v13 = vpop.eup %4813  ;;  %v3252_v58 = vadd.f32 1.0, %v4812_v32 }
 0x2c8   : > { %v4816_v35 = vpop.eup %4815  ;;  %4833 = vrcp.f32 %v3254_v45  ;;  %v3225_v62 = vadd.f32 1.0, %v4814_v13 }
 0x2c9   : > { %v4818_v34 = vpop.eup %4817  ;;  %4835 = vrcp.f32 %v3252_v58  ;;  %v3257_v48 = vadd.f32 1.0, %v4816_v35 }
 0x2ca   : > { %v4820_v11 = vpop.eup %4819  ;;  %4837 = vrcp.f32 %v3225_v62  ;;  %v3255_v33 = vadd.f32 1.0, %v4818_v34 }
 0x2cb   : > { %v4822_v22 = vpop.eup %4821  ;;  %3479 = vst [vmem:[%s5377_s23 + $0x2e0] sm:$0xff] %v4820_v11  ;;  %4839 = vrcp.f32 %v3257_v48 }
 0x2cc   : > { %v4824_v18 = vpop.eup %4823  ;;  %3509 = vst [vmem:[%s5377_s23 + $0x3d0] sm:$0xff] %v4822_v22  ;;  %4841 = vrcp.f32 %v3255_v33 }
 0x2cd   : > { %v4826_v43 = vpop.eup %4825  ;;  %3507 = vst [vmem:[%s5377_s23 + $0x3c0] sm:$0xff] %v4824_v18 }
 0x2ce   : > { %v4828_v31 = vpop.eup %4827  ;;  %v3226_v37 = vadd.f32 1.0, %v4826_v43 }
 0x2cf   : > { %v4830_v4 = vpop.eup %4829  ;;  %v3258_v41 = vadd.f32 1.0, %v4828_v31 }
 0x2d0   : > { %v4832_v28 = vpop.eup %4831  ;;  %4843 = vrcp.f32 %v3226_v37  ;;  %v3256_v46 = vadd.f32 1.0, %v4830_v4 }
 0x2d1   : > { %3480 = vst [vmem:[%s5377_s23 + $0x2e8] sm:$0xff] %v4832_v28  ;;  %4845 = vrcp.f32 %v3258_v41 }
 0x2d2   : > { %v4834_v20 = vpop.eup %4833  ;;  %4847 = vrcp.f32 %v3256_v46 }
 0x2d3   : > { %v4836_v0 = vpop.eup %4835  ;;  %3510 = vst [vmem:[%s5377_s23 + $0x3d8] sm:$0xff] %v4834_v20 }
 0x2d4   : > { %v4838_v54 = vpop.eup %4837  ;;  %3508 = vst [vmem:[%s5377_s23 + $0x3c8] sm:$0xff] %v4836_v0 }
 0x2d5   : > { %v4840_v56 = vpop.eup %4839  ;;  %3481 = vst [vmem:[%s5377_s23 + $0x2f0] sm:$0xff] %v4838_v54 }
 0x2d6   : > { %v4842_v51 = vpop.eup %4841  ;;  %3513 = vst [vmem:[%s5377_s23 + $0x3f0] sm:$0xff] %v4840_v56 }
 0x2d7   : > { %3511 = vst [vmem:[%s5377_s23 + $0x3e0] sm:$0xff] %v4842_v51 }
 0x2da   : > { %v4844_v49 = vpop.eup %4843 }
 0x2db   : > { %v4846_v3 = vpop.eup %4845  ;;  %3482 = vst [vmem:[%s5377_s23 + $0x2f8] sm:$0xff] %v4844_v49 }
 0x2dc   : > { %v4848_v2 = vpop.eup %4847  ;;  %3514 = vst [vmem:[%s5377_s23 + $0x3f8] sm:$0xff] %v4846_v3 }
 0x2dd   : > { %3512 = vst [vmem:[%s5377_s23 + $0x3e8] sm:$0xff] %v4848_v2 }
 0x2de PF: > { %s13_s12 = sadd.s32 1, %s4857_s12  }
 0x2df   : > { %p10_p4 = scmp.ge.s32.totalorder %s13_s12, 4  }
 0x2e1   :  { %12 = sbr.rel (!%p10_p4) target bundleno = 1 (0x1), region = 62 }

</bundles_post_ra>
